<compile_context>
chip_gen: v7x
topology: tpu7x:2x2x1
jax: 0.10.0
libtpu: 0.0.40
codegen_flags: <defaults>
</compile_context>

<pallas_src>
import functools
import math

import jax
import jax.numpy as jnp
from jax.experimental import pallas as pl
from jax.experimental.pallas import tpu as pltpu

NUM_CLASSES = 91                   # len(COCO_INSTANCE_CATEGORY_NAMES)
NUM_BOXES = 10                     # num_boxes_per_image
N_CLS = NUM_BOXES * NUM_CLASSES    # 910
N_REG = NUM_BOXES * 4              # 40
HIDDEN = 1024
N_OUT_PAD = 1024                   # per-head output width, padded lane-dense


def _head_config():
    """Generation-specific tiling (selected from VMEM capacity)."""
    vmem_bytes = 64 * 1024 * 1024                     # conservative default
    try:
        vmem_bytes = int(pltpu.get_tpu_info().vmem_capacity_bytes)
    except Exception:
        pass
    if vmem_bytes >= 96 * 1024 * 1024:
        # v5e / v6e: single TensorCore, 128 MiB VMEM -> both heads in one grid
        # block (half the k-steps, x streamed once), big contiguous K tiles.
        return dict(heads_per_block=2, tk=7168, vmem_limit=96 * 1024 * 1024)
    # v7x: 64 MiB VMEM, 2 TensorCores -> one head per TC ("parallel" axis),
    # modest tiles, <= 48 MiB scoped VMEM.
    return dict(heads_per_block=1, tk=3584, vmem_limit=48 * 1024 * 1024)


# ----------------------------------------------------------------------------
# Fused head kernel:  y[h] = relu((x @ q1[h]) * s1[h] + b1[h]) @ w2[h] + b2[h]
# Grid: (num_heads // heads_per_block, K // tk); k is the streamed reduction.
# ----------------------------------------------------------------------------
def _fused_head_kernel(x_ref, w1_ref, s1_ref, b1_ref, w2_ref, b2_ref,
                       o_ref, acc_ref, *, heads_per_block):
    k = pl.program_id(1)

    @pl.when(k == 0)
    def _():
        acc_ref[...] = jnp.zeros_like(acc_ref)

    x = x_ref[...]                                    # (B, tk) bf16, pre-pooled
    for h in range(heads_per_block):
        # int8 values are exactly representable in bf16; the per-column
        # dequant scale is applied once in the epilogue.
        w = w1_ref[h].astype(jnp.bfloat16)
        acc_ref[h] += jnp.dot(x, w, preferred_element_type=jnp.float32)

    @pl.when(k == pl.num_programs(1) - 1)
    def _():
        for h in range(heads_per_block):
            hid = acc_ref[h] * s1_ref[h] + b1_ref[h]  # dequant scale + bias
            hid = jnp.maximum(hid, 0.0)               # ReLU; Dropout(0.3)=id (eval)
            y = jnp.dot(hid.astype(jnp.bfloat16), w2_ref[h],
                        preferred_element_type=jnp.float32) + b2_ref[h]
            o_ref[h] = y


def fused_head(x, w1q, s1, b1, w2, b2, *, heads_per_block, tk, vmem_limit):
    B, K = x.shape
    NH, Kw, Hd = w1q.shape
    hb = heads_per_block
    assert Kw == K and K % tk == 0 and Hd == HIDDEN
    assert NH % hb == 0 and w2.shape == (NH, HIDDEN, N_OUT_PAD)
    kernel = functools.partial(_fused_head_kernel, heads_per_block=hb)
    return pl.pallas_call(
        kernel,
        out_shape=jax.ShapeDtypeStruct((NH, B, N_OUT_PAD), jnp.float32),
        grid_spec=pltpu.PrefetchScalarGridSpec(
            num_scalar_prefetch=0,
            grid=(NH // hb, K // tk),
            in_specs=[
                pl.BlockSpec((B, tk), lambda n, k: (0, k)),                     # pooled x (bf16)
                pl.BlockSpec((hb, tk, HIDDEN), lambda n, k: (n, k, 0)),         # fc1 weights (int8)
                pl.BlockSpec((hb, 1, HIDDEN), lambda n, k: (n, 0, 0)),          # per-column scales
                pl.BlockSpec((hb, 1, HIDDEN), lambda n, k: (n, 0, 0)),          # b1
                pl.BlockSpec((hb, HIDDEN, N_OUT_PAD), lambda n, k: (n, 0, 0)),  # fc2 weights (resident)
                pl.BlockSpec((hb, 1, N_OUT_PAD), lambda n, k: (n, 0, 0)),       # b2
            ],
            out_specs=pl.BlockSpec((hb, B, N_OUT_PAD), lambda n, k: (n, 0, 0)),
            scratch_shapes=[pltpu.VMEM((hb, B, N_OUT_PAD), jnp.float32)],
        ),
        compiler_params=pltpu.CompilerParams(
            dimension_semantics=("parallel", "arbitrary"),
            vmem_limit_bytes=vmem_limit),
    )(x, w1q, s1, b1, w2, b2)


# ----------------------------------------------------------------------------
# Parameter init (PyTorch-Linear-style uniform) + quantized kernel packing
# ----------------------------------------------------------------------------
def init_params(key, feat_channels=2048, hidden=HIDDEN):
    K = feat_channels * 7 * 7
    keys = jax.random.split(key, 8)

    def lin_init(kw, kb, fan_in, fan_out):
        bound = 1.0 / math.sqrt(fan_in)
        w = jax.random.uniform(kw, (fan_in, fan_out), jnp.float32, -bound, bound)
        b = jax.random.uniform(kb, (1, fan_out), jnp.float32, -bound, bound)
        return w, b

    params = {}
    params["cls_w1"], params["cls_b1"] = lin_init(keys[0], keys[1], K, hidden)
    params["cls_w2"], params["cls_b2"] = lin_init(keys[2], keys[3], hidden, N_CLS)
    params["reg_w1"], params["reg_b1"] = lin_init(keys[4], keys[5], K, hidden)
    params["reg_w2"], params["reg_b2"] = lin_init(keys[6], keys[7], hidden, N_REG)
    return params


def pack_params(params):
    """Head-major packing: int8 fc1 (+ per-column f32 scales), bf16 fc2."""
    def quant_cols(w):  # symmetric, per output column
        amax = jnp.max(jnp.abs(w), axis=0, keepdims=True)
        scale = jnp.maximum(amax, 1e-12) / 127.0
        q = jnp.clip(jnp.round(w / scale), -127.0, 127.0).astype(jnp.int8)
        return q, scale.astype(jnp.float32)

    q_cls, s_cls = quant_cols(params["cls_w1"])
    q_reg, s_reg = quant_cols(params["reg_w1"])
    w1q = jnp.stack([q_cls, q_reg], axis=0)                      # [2, K, 1024] int8
    s1 = jnp.stack([s_cls, s_reg], axis=0)                       # [2, 1, 1024] f32
    b1 = jnp.stack([params["cls_b1"], params["reg_b1"]], axis=0) # [2, 1, 1024] f32

    # fc2 per head, zero-padded to 1024 output columns (pad stays exactly 0).
    w2 = jnp.zeros((2, HIDDEN, N_OUT_PAD), jnp.float32)
    w2 = w2.at[0, :, :N_CLS].set(params["cls_w2"])
    w2 = w2.at[1, :, :N_REG].set(params["reg_w2"])
    b2 = jnp.zeros((2, 1, N_OUT_PAD), jnp.float32)
    b2 = b2.at[0, 0, :N_CLS].set(params["cls_b2"][0])
    b2 = b2.at[1, 0, :N_REG].set(params["reg_b2"][0])
    return {"w1q": w1q, "s1": s1, "b1": b1,
            "w2": w2.astype(jnp.bfloat16), "b2": b2}


# ----------------------------------------------------------------------------
# Forward pass (Pallas) and pure-JAX references
# ----------------------------------------------------------------------------
def model_forward(kparams, features, *, heads_per_block, tk, vmem_limit):
    B, C, H, W = features.shape
    assert H == 14 and W == 14, "feature map must be 14x14 (exact 2x2 pool)"
    # AdaptiveAvgPool2d((7,7)) on 14x14 == exact 2x2 average pool; it touches
    # <4 MB so it stays a tiny XLA op outside the HBM-bound kernel.  The
    # flatten order matches PyTorch's NCHW Flatten (c*49 + i*7 + j).
    pooled = features.reshape(B, C, 7, 2, 7, 2).mean(axis=(3, 5))   # [B,C,7,7]
    x = pooled.reshape(B, C * 49).astype(jnp.bfloat16)              # [B, K]
    y = fused_head(x, kparams["w1q"], kparams["s1"], kparams["b1"],
                   kparams["w2"], kparams["b2"],
                   heads_per_block=heads_per_block, tk=tk,
                   vmem_limit=vmem_limit)                           # [2, B, 1024]
    class_logits = y[0, :, :N_CLS].reshape(B, NUM_BOXES, NUM_CLASSES)
    bbox = y[1, :, :N_REG].reshape(B, NUM_BOXES, 4)
    return class_logits, bbox


def reference_forward(params, features):
    B, C, H, W = features.shape
    pooled = features.reshape(B, C, 7, 2, 7, 2).mean(axis=(3, 5))   # [B,C,7,7]
    flat = pooled.reshape(B, C * 49)

    def lin(x, w, b, relu=False):
        y = jnp.dot(x, w, precision=jax.lax.Precision.HIGHEST) + b
        return jnp.maximum(y, 0.0) if relu else y

    cls = lin(lin(flat, params["cls_w1"], params["cls_b1"], True),
              params["cls_w2"], params["cls_b2"])
    reg = lin(lin(flat, params["reg_w1"], params["reg_b1"], True),
              params["reg_w2"], params["reg_b2"])
    return cls.reshape(B, NUM_BOXES, NUM_CLASSES), reg.reshape(B, NUM_BOXES, 4)


if __name__ == "__main__":
    key = jax.random.PRNGKey(0)
    k_feat, k_params = jax.random.split(key)

    # Backbone feature map (output of truncated ResNet50): [B, 2048, 14, 14].
    B, C, Hf, Wf = 2, 2048, 14, 14
    features = jax.random.normal(k_feat, (B, C, Hf, Wf), jnp.float32)
    params = init_params(k_params, feat_channels=C, hidden=HIDDEN)
    kparams = pack_params(params)

    cfg = _head_config()
    fwd = jax.jit(functools.partial(model_forward, **cfg))
    class_logits, bbox_regressions = fwd(kparams, features)
    class_logits = jax.block_until_ready(class_logits)
    bbox_regressions = jax.block_until_ready(bbox_regressions)

    assert class_logits.shape == (B, NUM_BOXES, NUM_CLASSES)
    assert bbox_regressions.shape == (B, NUM_BOXES, 4)

    # Tight check: kernel vs the same math (dequantized int8 fc1) in f32.
    dq = dict(params)
    dq["cls_w1"] = kparams["w1q"][0].astype(jnp.float32) * kparams["s1"][0]
    dq["reg_w1"] = kparams["w1q"][1].astype(jnp.float32) * kparams["s1"][1]
    dq_cls, dq_bbox = reference_forward(dq, features)
    assert jnp.allclose(class_logits, dq_cls, atol=5e-3, rtol=5e-3)
    assert jnp.allclose(bbox_regressions, dq_bbox, atol=5e-3, rtol=5e-3)

    # Loose check: kernel vs original full-f32 module semantics
    # (int8 + bf16 quantization error budget).
    ref_cls, ref_bbox = reference_forward(params, features)
    assert jnp.allclose(class_logits, ref_cls, atol=1e-2, rtol=1e-2)
    assert jnp.allclose(bbox_regressions, ref_bbox, atol=1e-2, rtol=1e-2)

    print("KERNEL_OK")
</pallas_src>

<mosaic_0001>
module attributes {stable_mosaic.version = 11 : i64} {
  func.func @_fused_head_kernel(%arg0: i32, %arg1: i32, %arg2: memref<2x3584xbf16, #tpu.memory_space<vmem>>, %arg3: memref<1x3584x1024xi8, #tpu.memory_space<vmem>>, %arg4: memref<1x1x1024xf32, #tpu.memory_space<vmem>>, %arg5: memref<1x1x1024xf32, #tpu.memory_space<vmem>>, %arg6: memref<1x1024x1024xbf16, #tpu.memory_space<vmem>>, %arg7: memref<1x1x1024xf32, #tpu.memory_space<vmem>>, %arg8: memref<1x2x1024xf32, #tpu.memory_space<vmem>>, %arg9: memref<1x2x1024xf32, #tpu.memory_space<vmem>>) attributes {dimension_semantics = [#tpu.dimension_semantics<parallel>, #tpu.dimension_semantics<arbitrary>], iteration_bounds = array<i64: 2, 28>, scalar_prefetch = 0 : i64, scratch_operands = 1 : i64, tpu.core_type = #tpu.core_type<tc>, window_params = [{transform_indices = @transform_0, window_bounds = array<i64: 2, 3584>}, {transform_indices = @transform_1, window_bounds = array<i64: 1, 3584, 1024>}, {transform_indices = @transform_2, window_bounds = array<i64: 1, 1, 1024>}, {transform_indices = @transform_3, window_bounds = array<i64: 1, 1, 1024>}, {transform_indices = @transform_4, window_bounds = array<i64: 1, 1024, 1024>}, {transform_indices = @transform_5, window_bounds = array<i64: 1, 1, 1024>}, {transform_indices = @transform_6, window_bounds = array<i64: 1, 2, 1024>}]} {
    %c0_i32 = arith.constant 0 : i32
    %0 = arith.cmpi eq, %arg1, %c0_i32 : i32
    %1 = arith.extui %0 : i1 to i32
    %c0_i32_0 = arith.constant 0 : i32
    %2 = arith.cmpi ne, %1, %c0_i32_0 : i32
    scf.if %2 {
      %cst_12 = arith.constant 0.000000e+00 : f32
      %17 = vector.broadcast %cst_12 : f32 to vector<1x2x1024xf32>
      %c0_13 = arith.constant 0 : index
      %c0_14 = arith.constant 0 : index
      %c0_15 = arith.constant 0 : index
      %18 = vector.load %arg9[%c0_13, %c0_14, %c0_15] : memref<1x2x1024xf32, #tpu.memory_space<vmem>>, vector<1x2x1024xf32>
      tpu.vector_store %arg9[%c0_13, %c0_14, %c0_15], %17 {strides = array<i32>} : memref<1x2x1024xf32, #tpu.memory_space<vmem>>, vector<1x2x1024xf32>,
    } else {
    }
    %c0 = arith.constant 0 : index
    %c0_1 = arith.constant 0 : index
    %3 = vector.load %arg2[%c0, %c0_1] : memref<2x3584xbf16, #tpu.memory_space<vmem>>, vector<2x3584xbf16>
    %c0_2 = arith.constant 0 : index
    %c0_3 = arith.constant 0 : index
    %c0_4 = arith.constant 0 : index
    %4 = vector.load %arg3[%c0_2, %c0_3, %c0_4] : memref<1x3584x1024xi8, #tpu.memory_space<vmem>>, vector<1x3584x1024xi8>
    %5 = vector.shape_cast %4 : vector<1x3584x1024xi8> to vector<3584x1024xi8>
    %6 = arith.sitofp %5 : vector<3584x1024xi8> to vector<3584x1024xbf16>
    %c0_5 = arith.constant 0 : index
    %c0_6 = arith.constant 0 : index
    %c0_7 = arith.constant 0 : index
    %7 = vector.load %arg9[%c0_5, %c0_6, %c0_7] : memref<1x2x1024xf32, #tpu.memory_space<vmem>>, vector<1x2x1024xf32>
    %8 = vector.shape_cast %7 : vector<1x2x1024xf32> to vector<2x1024xf32>
    %cst = arith.constant dense<0.000000e+00> : vector<2x1024xf32>
    %9 = tpu.matmul %3, %6, %cst {dimension_numbers = #tpu.dot_dimension_numbers<[1], [0], [0], [1], [0, 0, 1, 1], [], []>} : vector<2x3584xbf16>, vector<3584x1024xbf16>, vector<2x1024xf32> -> vector<2x1024xf32>
    %10 = arith.addf %8, %9 : vector<2x1024xf32>
    %c0_8 = arith.constant 0 : index
    %c0_9 = arith.constant 0 : index
    %c0_10 = arith.constant 0 : index
    %11 = vector.load %arg9[%c0_8, %c0_9, %c0_10] : memref<1x2x1024xf32, #tpu.memory_space<vmem>>, vector<1x2x1024xf32>
    %12 = vector.shape_cast %11 : vector<1x2x1024xf32> to vector<2x1024xf32>
    %13 = vector.shape_cast %10 : vector<2x1024xf32> to vector<1x2x1024xf32>
    tpu.vector_store %arg9[%c0_8, %c0_9, %c0_10], %13 {strides = array<i32>} : memref<1x2x1024xf32, #tpu.memory_space<vmem>>, vector<1x2x1024xf32>,
    %c27_i32 = arith.constant 27 : i32
    %14 = arith.cmpi eq, %arg1, %c27_i32 : i32
    %15 = arith.extui %14 : i1 to i32
    %c0_i32_11 = arith.constant 0 : i32
    %16 = arith.cmpi ne, %15, %c0_i32_11 : i32
    scf.if %16 {
      %c0_12 = arith.constant 0 : index
      %c0_13 = arith.constant 0 : index
      %c0_14 = arith.constant 0 : index
      %17 = vector.load %arg9[%c0_12, %c0_13, %c0_14] : memref<1x2x1024xf32, #tpu.memory_space<vmem>>, vector<1x2x1024xf32>
      %18 = vector.shape_cast %17 : vector<1x2x1024xf32> to vector<2x1024xf32>
      %c0_15 = arith.constant 0 : index
      %c0_16 = arith.constant 0 : index
      %c0_17 = arith.constant 0 : index
      %19 = vector.load %arg4[%c0_15, %c0_16, %c0_17] : memref<1x1x1024xf32, #tpu.memory_space<vmem>>, vector<1x1x1024xf32>
      %20 = vector.shape_cast %19 : vector<1x1x1024xf32> to vector<1x1024xf32>
      %21 = vector.broadcast %20 : vector<1x1024xf32> to vector<2x1024xf32>
      %22 = arith.mulf %18, %21 : vector<2x1024xf32>
      %c0_18 = arith.constant 0 : index
      %c0_19 = arith.constant 0 : index
      %c0_20 = arith.constant 0 : index
      %23 = vector.load %arg5[%c0_18, %c0_19, %c0_20] : memref<1x1x1024xf32, #tpu.memory_space<vmem>>, vector<1x1x1024xf32>
      %24 = vector.shape_cast %23 : vector<1x1x1024xf32> to vector<1x1024xf32>
      %25 = vector.broadcast %24 : vector<1x1024xf32> to vector<2x1024xf32>
      %26 = arith.addf %22, %25 : vector<2x1024xf32>
      %cst_21 = arith.constant 0.000000e+00 : f32
      %27 = vector.broadcast %cst_21 : f32 to vector<2x1024xf32>
      %28 = arith.maximumf %26, %27 : vector<2x1024xf32>
      %29 = arith.truncf %28 : vector<2x1024xf32> to vector<2x1024xbf16>
      %c0_22 = arith.constant 0 : index
      %c0_23 = arith.constant 0 : index
      %c0_24 = arith.constant 0 : index
      %30 = vector.load %arg6[%c0_22, %c0_23, %c0_24] : memref<1x1024x1024xbf16, #tpu.memory_space<vmem>>, vector<1x1024x1024xbf16>
      %31 = vector.shape_cast %30 : vector<1x1024x1024xbf16> to vector<1024x1024xbf16>
      %cst_25 = arith.constant dense<0.000000e+00> : vector<2x1024xf32>
      %32 = tpu.matmul %29, %31, %cst_25 {dimension_numbers = #tpu.dot_dimension_numbers<[1], [0], [0], [1], [0, 0, 1, 1], [], []>} : vector<2x1024xbf16>, vector<1024x1024xbf16>, vector<2x1024xf32> -> vector<2x1024xf32>
      %c0_26 = arith.constant 0 : index
      %c0_27 = arith.constant 0 : index
      %c0_28 = arith.constant 0 : index
      %33 = vector.load %arg7[%c0_26, %c0_27, %c0_28] : memref<1x1x1024xf32, #tpu.memory_space<vmem>>, vector<1x1x1024xf32>
      %34 = vector.shape_cast %33 : vector<1x1x1024xf32> to vector<1x1024xf32>
      %35 = vector.broadcast %34 : vector<1x1024xf32> to vector<2x1024xf32>
      %36 = arith.addf %32, %35 : vector<2x1024xf32>
      %c0_29 = arith.constant 0 : index
      %c0_30 = arith.constant 0 : index
      %c0_31 = arith.constant 0 : index
      %37 = vector.load %arg8[%c0_29, %c0_30, %c0_31] : memref<1x2x1024xf32, #tpu.memory_space<vmem>>, vector<1x2x1024xf32>
      %38 = vector.shape_cast %37 : vector<1x2x1024xf32> to vector<2x1024xf32>
      %39 = vector.shape_cast %36 : vector<2x1024xf32> to vector<1x2x1024xf32>
      tpu.vector_store %arg8[%c0_29, %c0_30, %c0_31], %39 {strides = array<i32>} : memref<1x2x1024xf32, #tpu.memory_space<vmem>>, vector<1x2x1024xf32>,
    } else {
    }
    return
  }
  func.func @transform_0(%arg0: i32, %arg1: i32) -> (i32, i32) {
    %c0_i32 = arith.constant 0 : i32
    %c0_i32_0 = arith.constant 0 : i32
    return %c0_i32, %arg1 : i32, i32
  }
  func.func @transform_1(%arg0: i32, %arg1: i32) -> (i32, i32, i32) {
    %c0_i32 = arith.constant 0 : i32
    %c0_i32_0 = arith.constant 0 : i32
    return %arg0, %arg1, %c0_i32 : i32, i32, i32
  }
  func.func @transform_2(%arg0: i32, %arg1: i32) -> (i32, i32, i32) {
    %c0_i32 = arith.constant 0 : i32
    %c0_i32_0 = arith.constant 0 : i32
    %c0_i32_1 = arith.constant 0 : i32
    return %arg0, %c0_i32, %c0_i32_0 : i32, i32, i32
  }
  func.func @transform_3(%arg0: i32, %arg1: i32) -> (i32, i32, i32) {
    %c0_i32 = arith.constant 0 : i32
    %c0_i32_0 = arith.constant 0 : i32
    %c0_i32_1 = arith.constant 0 : i32
    return %arg0, %c0_i32, %c0_i32_0 : i32, i32, i32
  }
  func.func @transform_4(%arg0: i32, %arg1: i32) -> (i32, i32, i32) {
    %c0_i32 = arith.constant 0 : i32
    %c0_i32_0 = arith.constant 0 : i32
    %c0_i32_1 = arith.constant 0 : i32
    return %arg0, %c0_i32, %c0_i32_0 : i32, i32, i32
  }
  func.func @transform_5(%arg0: i32, %arg1: i32) -> (i32, i32, i32) {
    %c0_i32 = arith.constant 0 : i32
    %c0_i32_0 = arith.constant 0 : i32
    %c0_i32_1 = arith.constant 0 : i32
    return %arg0, %c0_i32, %c0_i32_0 : i32, i32, i32
  }
  func.func @transform_6(%arg0: i32, %arg1: i32) -> (i32, i32, i32) {
    %c0_i32 = arith.constant 0 : i32
    %c0_i32_0 = arith.constant 0 : i32
    %c0_i32_1 = arith.constant 0 : i32
    return %arg0, %c0_i32, %c0_i32_0 : i32, i32, i32
  }
}

</mosaic_0001>

<bundles_post_ra>
// kernel: squeeze.2
= control target key start
LH: loop header
LB: loop body
LE: loop exit
PB: predicated region body
PF: predicated region fallthrough
CT: control target
= control target key end

     0   :  { %vm61_vm0 = vcmask 416768   ;;  %vm89_vm1 = vcmask 580608   ;;  %vm75_vm2 = vcmask 441344   ;;  %vm103_vm3 = vcmask 719872   ;;  %s193_s22 = smov 57   ;;  %s194_s23 = smov 74   ;;  %s290_s0 = inlined_call_operand.vmem [shape: f32[1,2,910], index: 0, kind: input, shape index: {}]   ;;  %s291_s1 = inlined_call_operand.vmem [shape: f32[2,10,91], index: 1, kind: output, shape index: {}]  }
   0x1   :  { %v160_v0 = vld [vmem:[%s290_s0 + $0xe] sm:$0x3]  ;;  %v161_v1 = vld [vmem:[%s290_s0 + $0xc] sm:$0x3]  ;;  %v163_v2 = vld [vmem:[%s290_s0 + $0x8] sm:$0x3] }
   0x2   :  { %8 = vst [vmem:[#allocation0 + $0x38] sm:$0x3] %v160_v0  ;;  %13 = vst [vmem:[#allocation0 + $0x30] sm:$0x3] %v161_v1  ;;  %v164_v3 = vld [vmem:[%s290_s0 + $0x6] sm:$0x3] }
   0x3   :  { %23 = vst [vmem:[#allocation0 + $0x20] sm:$0x3] %v163_v2  ;;  %28 = vst [vmem:[#allocation0 + $0x18] sm:$0x3] %v164_v3  ;;  %v165_v4 = vld [vmem:[%s290_s0 + $0x4] sm:$0x3] }
   0x4   :  { %v166_v5 = vld [vmem:[%s290_s0 + $0x2] sm:$0x3]  ;;  %33 = vst [vmem:[#allocation0 + $0x10] sm:$0x3] %v165_v4  ;;  %v162_v6 = vld [vmem:[%s290_s0 + $0xa] sm:$0x3] }
   0x5   :  { %37 = vst [vmem:[#allocation0 + $0x8] sm:$0x3] %v166_v5  ;;  %v38_v7 = vld [vmem:[%s290_s0] sm:$0x3]  ;;  %18 = vst [vmem:[#allocation0 + $0x28] sm:$0x3] %v162_v6 }
   0x6   :  { %39 = vst [vmem:[#allocation0] sm:$0x3] %v38_v7  ;;  %s192_s0 = smov 77   ;;  %vm41_vm4 = vcmask 744448   ;;  %vm130_vm5 = vcmask 883712   ;;  %s195_s26 = smov 40  }
   0x7   :  { %vm144_vm6 = vcmask 1022976   ;;  %s196_s27 = smov 37   ;;  %s197_s28 = smov 20   ;;  %vm65_vm7 = vcmask 629760   ;;  %vm68_vm8 = vcmask 745064   ;;  %vm93_vm9 = vcmask 465920  }
   0x8   :  { %s198_s29 = smov 3   ;;  %s199_s30 = smov 111   ;;  %vm96_vm10 = vcmask 744904   ;;  %vm79_vm11 = vcmask 605184   ;;  %vm82_vm12 = vcmask 745040   ;;  %vm107_vm13 = vcmask 326656  }
   0x9   :  { %v58_v8 = vld [vmem:[#allocation0 + $0x30] sm:$0x3]   ;;  %v60_v9 = vld [vmem:[#allocation0 + $0x38] sm:$0x3]   ;;  %s200_s2 = smov 94   ;;  %vm110_vm14 = vcmask 744768  }
   0xa   :  { %v62_v10 = vsel %vm61_vm0, %v60_v9, %v58_v8  ;;  %v86_v11 = vld [vmem:[#allocation0 + $0x18] sm:$0x3]   ;;  %v88_v12 = vld [vmem:[#allocation0 + $0x20] sm:$0x3]   ;;  %v102_v13 = vld [vmem:[#allocation0 + $0x30] sm:$0x3]  }
   0xb   :  { %63 = vrot.lane.b32.xlu0 %v62_v10, %s192_s0  ;;  %v90_v14 = vsel %vm89_vm1, %v88_v12, %v86_v11  ;;  %v74_v16 = vld [vmem:[#allocation0 + $0x10] sm:$0x3]   ;;  %v129_v23 = vld [vmem:[#allocation0 + $0x18] sm:$0x3]   ;;  %v141_v27 = vld [vmem:[#allocation0 + $0x20] sm:$0x3]  }
   0xc   :  { %v72_v15 = vld [vmem:[#allocation0 + $0x8] sm:$0x3]   ;;  %91 = vrot.lane.b32.xlu1 %v90_v14, %s193_s22  ;;  %v127_v22 = vld [vmem:[#allocation0 + $0x10] sm:$0x3]   ;;  %v51_v31 = vld [vmem:[#allocation0 + $0x20] sm:$0x3]  }
   0xd   :  { %v76_v17 = vsel %vm75_vm2, %v74_v16, %v72_v15  ;;  %v100_v18 = vld [vmem:[#allocation0 + $0x28] sm:$0x3]   ;;  %v113_v20 = vld [vmem:[#allocation0] sm:$0x3]   ;;  %v131_v26 = vsel %vm130_vm5, %v129_v23, %v127_v22  ;;  %v44_v30 = vld [vmem:[#allocation0 + $0x10] sm:$0x3]  }
   0xe   :  { %v104_v19 = vsel %vm103_vm3, %v102_v13, %v100_v18  ;;  %v115_v21 = vld [vmem:[#allocation0 + $0x8] sm:$0x3]   ;;  %v40_v24 = vld [vmem:[#allocation0] sm:$0x3]   ;;  %vm120_vm15 = vcmask 302080   ;;  %vm123_vm0 = vcmask 744744  }
   0xf   :  { %77 = vrot.lane.b32.xlu0 %v76_v17, %s194_s23  ;;  %42 = vst.msk [vmem:[%s291_s1] ss:$16 sm:$0x3] %vm41_vm4, %v40_v24   ;;  %v117_v25 = vsel %vm41_vm4, %v115_v21, %v113_v20  ;;  %v143_v28 = vld [vmem:[#allocation0 + $0x28] sm:$0x3]   ;;  %vm134_vm1 = vcmask 162816  }
  0x10   :  { %105 = vrot.lane.b32.xlu1 %v104_v19, %s195_s26  ;;  %v145_v29 = vsel %vm144_vm6, %v143_v28, %v141_v27  ;;  %vm137_vm2 = vcmask 744608   ;;  %vm148_vm3 = vcmask 23552   ;;  %vm151_vm5 = vcmask 744472  }
  0x13   :  { %118 = vrot.lane.b32.xlu0 %v117_v25, %s196_s27 }
  0x14   :  { %132 = vrot.lane.b32.xlu1 %v131_v26, %s197_s28 }
  0x17   :  { %146 = vrot.lane.b32.xlu0 %v145_v29, %s198_s29 }
  0x18   :  { %45 = vrot.lane.b32.xlu1 %v44_v30, %s199_s30 }
  0x1b   :  { %52 = vrot.lane.b32.xlu0 %v51_v31, %s200_s2 }
  0x7d   :  { %v64_v32 = vpop.permute.xlu0 %63  }
  0x7e   :  { %169 = vst.msk [vmem:[%s291_s1 + $0x9] ss:$16 sm:$0x3] %vm65_vm7, %v64_v32   ;;  %v92_v33 = vpop.permute.xlu1 %91  }
  0x7f   :  { %170 = vst.msk [vmem:[%s291_s1 + $0x9] ss:$16 sm:$0x3] %vm68_vm8, %v64_v32  }
  0x80   :  { %173 = vst.msk [vmem:[%s291_s1 + $0x5] ss:$16 sm:$0x3] %vm93_vm9, %v92_v33  }
  0x81   :  { %174 = vst.msk [vmem:[%s291_s1 + $0x5] ss:$16 sm:$0x3] %vm96_vm10, %v92_v33   ;;  %v78_v34 = vpop.permute.xlu0 %77  }
  0x82   :  { %171 = vst.msk [vmem:[%s291_s1 + $0x2] ss:$16 sm:$0x3] %vm79_vm11, %v78_v34   ;;  %v106_v35 = vpop.permute.xlu1 %105  }
  0x83   :  { %172 = vst.msk [vmem:[%s291_s1 + $0x2] ss:$16 sm:$0x3] %vm82_vm12, %v78_v34  }
  0x84   :  { %175 = vst.msk [vmem:[%s291_s1 + $0x8] ss:$16 sm:$0x3] %vm107_vm13, %v106_v35  }
  0x85   :  { %176 = vst.msk [vmem:[%s291_s1 + $0x8] ss:$16 sm:$0x3] %vm110_vm14, %v106_v35   ;;  %v119_v36 = vpop.permute.xlu0 %118  }
  0x86   :  { %177 = vst.msk [vmem:[%s291_s1 + $0x1] ss:$16 sm:$0x3] %vm120_vm15, %v119_v36   ;;  %v133_v37 = vpop.permute.xlu1 %132  }
  0x87   :  { %178 = vst.msk [vmem:[%s291_s1 + $0x1] ss:$16 sm:$0x3] %vm123_vm0, %v119_v36  }
  0x88   :  { %179 = vst.msk [vmem:[%s291_s1 + $0x4] ss:$16 sm:$0x3] %vm134_vm1, %v133_v37  }
  0x89   :  { %180 = vst.msk [vmem:[%s291_s1 + $0x4] ss:$16 sm:$0x3] %vm137_vm2, %v133_v37   ;;  %v147_v38 = vpop.permute.xlu0 %146  }
  0x8a   :  { %181 = vst.msk [vmem:[%s291_s1 + $0x7] ss:$16 sm:$0x3] %vm148_vm3, %v147_v38   ;;  %v46_v39 = vpop.permute.xlu1 %45  }
  0x8b   :  { %182 = vst.msk [vmem:[%s291_s1 + $0x7] ss:$16 sm:$0x3] %vm151_vm5, %v147_v38  }
  0x8c   :  { %167 = vst.msk [vmem:[%s291_s1 + $0x3] ss:$16 sm:$0x3] %vm41_vm4, %v46_v39  }
  0x8d   :  { %v53_v40 = vpop.permute.xlu0 %52  }
  0x8e   :  { %168 = vst.msk [vmem:[%s291_s1 + $0x6] ss:$16 sm:$0x3] %vm41_vm4, %v53_v40  }

// kernel: squeeze.3
= control target key start
LH: loop header
LB: loop body
LE: loop exit
PB: predicated region body
PF: predicated region fallthrough
CT: control target
= control target key end

     0   :  { %s82_s8 = smov 116   ;;  %vm7_vm0 = vcmask 31744   ;;  %s83_s11 = smov 120   ;;  %s143_s0 = inlined_call_operand.vmem [shape: f32[1,2,40], index: 0, kind: input, shape index: {}]   ;;  %s144_s1 = inlined_call_operand.vmem [shape: f32[2,10,4], index: 1, kind: output, shape index: {}]  }
   0x1   :  { %v4_v0 = vld [vmem:[%s143_s0] sm:$0x3]  ;;  %s81_s0 = smov 124   ;;  %s84_s12 = smov 112  }
   0x2   :  { %5 = vst [vmem:[#allocation0] sm:$0x3] %v4_v0  ;;  %s85_s13 = smov 108   ;;  %s86_s14 = smov 104  }
   0x3   :  { %s87_s15 = smov 100   ;;  %s88_s16 = smov 96  }
   0x4   :  { %s89_s17 = smov 92  }
   0x9   :  { %v9_v1 = vld [vmem:[#allocation0] sm:$0x3]  }
   0xa   :  { %v21_v2 = vld [vmem:[#allocation0] sm:$0x3]   ;;  %10 = vrot.lane.b32.xlu0 %v9_v1, %s81_s0 }
   0xb   :  { %22 = vrot.lane.b32.xlu1 %v21_v2, %s82_s8  ;;  %v15_v3 = vld [vmem:[#allocation0] sm:$0x3]  }
   0xc   :  { %v27_v4 = vld [vmem:[#allocation0] sm:$0x3]  }
   0xd   :  { %v6_v5 = vld [vmem:[#allocation0] sm:$0x3]  }
   0xe   :  { %8 = vst.msk [vmem:[%s144_s1] ss:$16 sm:$0x3] %vm7_vm0, %v6_v5   ;;  %16 = vrot.lane.b32.xlu0 %v15_v3, %s83_s11  ;;  %v33_v6 = vld [vmem:[#allocation0] sm:$0x3]  }
   0xf   :  { %28 = vrot.lane.b32.xlu1 %v27_v4, %s84_s12  ;;  %v39_v7 = vld [vmem:[#allocation0] sm:$0x3]  }
  0x10   :  { %v45_v8 = vld [vmem:[#allocation0] sm:$0x3]  }
  0x11   :  { %v51_v9 = vld [vmem:[#allocation0] sm:$0x3]  }
  0x12   :  { %34 = vrot.lane.b32.xlu0 %v33_v6, %s85_s13  ;;  %v57_v10 = vld [vmem:[#allocation0] sm:$0x3]  }
  0x13   :  { %40 = vrot.lane.b32.xlu1 %v39_v7, %s86_s14 }
  0x16   :  { %46 = vrot.lane.b32.xlu0 %v45_v8, %s87_s15 }
  0x17   :  { %52 = vrot.lane.b32.xlu1 %v51_v9, %s88_s16 }
  0x1a   :  { %58 = vrot.lane.b32.xlu0 %v57_v10, %s89_s17 }
  0x7c   :  { %v11_v11 = vpop.permute.xlu0 %10  }
  0x7d   :  { %v23_v12 = vpop.permute.xlu1 %22   ;;  %63 = vst.msk [vmem:[%s144_s1 + $0x1] ss:$16 sm:$0x3] %vm7_vm0, %v11_v11  }
  0x7e   :  { %65 = vst.msk [vmem:[%s144_s1 + $0x3] ss:$16 sm:$0x3] %vm7_vm0, %v23_v12  }
  0x80   :  { %v17_v13 = vpop.permute.xlu0 %16  }
  0x81   :  { %v29_v14 = vpop.permute.xlu1 %28   ;;  %64 = vst.msk [vmem:[%s144_s1 + $0x2] ss:$16 sm:$0x3] %vm7_vm0, %v17_v13  }
  0x82   :  { %66 = vst.msk [vmem:[%s144_s1 + $0x4] ss:$16 sm:$0x3] %vm7_vm0, %v29_v14  }
  0x84   :  { %v35_v15 = vpop.permute.xlu0 %34  }
  0x85   :  { %v41_v16 = vpop.permute.xlu1 %40   ;;  %67 = vst.msk [vmem:[%s144_s1 + $0x5] ss:$16 sm:$0x3] %vm7_vm0, %v35_v15  }
  0x86   :  { %68 = vst.msk [vmem:[%s144_s1 + $0x6] ss:$16 sm:$0x3] %vm7_vm0, %v41_v16  }
  0x88   :  { %v47_v17 = vpop.permute.xlu0 %46  }
  0x89   :  { %v53_v18 = vpop.permute.xlu1 %52   ;;  %69 = vst.msk [vmem:[%s144_s1 + $0x7] ss:$16 sm:$0x3] %vm7_vm0, %v47_v17  }
  0x8a   :  { %70 = vst.msk [vmem:[%s144_s1 + $0x8] ss:$16 sm:$0x3] %vm7_vm0, %v53_v18  }
  0x8c   :  { %v59_v19 = vpop.permute.xlu0 %58  }
  0x8d   :  { %71 = vst.msk [vmem:[%s144_s1 + $0x9] ss:$16 sm:$0x3] %vm7_vm0, %v59_v19  }

// kernel: model_forward.1
= control target key start
LH: loop header
LB: loop body
LE: loop exit
PB: predicated region body
PF: predicated region fallthrough
CT: control target
= control target key end

     0   :  { %s12864_s0 = inlined_call_operand.vmem [shape: bf16[2,100352], index: 0, kind: input, shape index: {}]   ;;  %s12865_s1 = inlined_call_operand.hbm [shape: s8[2,100352,1024], index: 1, kind: input, shape index: {}]   ;;  %s12866_s2 = inlined_call_operand.vmem [shape: f32[2,1,1024], index: 2, kind: input, shape index: {}]   ;;  %s12867_s3 = inlined_call_operand.vmem [shape: f32[2,1,1024], index: 3, kind: input, shape index: {}]   ;;  %s12868_s4 = inlined_call_operand.vmem [shape: bf16[2,1024,1024], index: 4, kind: input, shape index: {}]   ;;  %s12869_s5 = inlined_call_operand.vmem [shape: f32[2,1,1024], index: 5, kind: input, shape index: {}]   ;;  %s12870_s6 = inlined_call_operand.vmem [shape: f32[2,2,1024], index: 6, kind: output, shape index: {}]  }
   0x1   :  { %12875 = sst [smem:[#allocation10_spill]] %s12864_s0 }
   0x2   :  { %12876 = sst [smem:[#allocation11_spill]] %s12865_s1 }
   0x3   :  { %11 = vsyncpa [#allocation4], 0 }
   0x4   :  { %13 = vsyncpa [#allocation4 + $0x1], 0  ;;  %s10804_s21 = smov 0   ;;  %s10806_s22 = smov 0  }
   0x5   :  { %s10808_s23 = smov 0   ;;  %s10810_s24 = smov 0  }
   0x6   :  { %s10812_s25 = smov 0   ;;  %s10814_s26 = smov 0  }
   0x7   :  { %s10816_s27 = smov 0   ;;  %s10818_s28 = smov 0  }
   0x8 LB: > { %12877 = sst [smem:[#allocation6_spill]] %s10753_s26  ;;  %s9785_s29 = sadd.s32 4294967295, %s10761_s28   ;;  %s10761_s28 = sphi %s10818_s28, %s19_s28   ;;  %s10757_s27 = sphi %s10816_s27, %s12889_s27   ;;  %s10753_s26 = sphi %s10814_s26, %s12888_s26   ;;  %s10749_s25 = sphi %s10812_s25, %s12887_s25   ;;  %s10745_s24 = sphi %s10810_s24, %s12886_s24   ;;  %s10741_s23 = sphi %s10808_s23, %s12892_s23   ;;  %s10737_s22 = sphi %s10806_s22, %s12891_s22   ;;  %s10733_s21 = sphi %s10804_s21, %s12890_s21  }
   0x9   : > { %12878 = sst [smem:[#allocation7_spill]] %s10757_s27  ;;  %s28_s30 = sadd.s32 1, %s10753_s26 }
   0xa   : > { %p29_p0 = scmp.ge.s32.totalorder %s28_s30, 28  ;;  %s31_s7 = sadd.s32 1, %s10757_s27 }
   0xb   : > { %s66_s8 = sadd.s32 1, %s10741_s23  ;;  %p73_p1 = scmp.ne.s32.totalorder %s10741_s23, %s10737_s22 }
   0xc   : > { %s12894_s30 = smov (%p29_p0, %s28_s30), 0  ;;  %s12896_s7 = smov (!%p29_p0, %s31_s7), %s10757_s27 }
   0xd   : > { %12879 = sst [smem:[#allocation8_spill]] %s12894_s30  ;;  %s62_s9 = ssub.s32 %s10753_s26, %s12894_s30 }
   0xe   : > { %p74_p2 = scmp.eq.s32.totalorder %s10761_s28, 0  ;;  %p33_p3 = scmp.ge.s32.totalorder %s12896_s7, 2 }
   0xf   : > { %p79_p4 = scmp.ne.s32.totalorder %s10737_s22, %s10733_s21  ;;  %p80_p6 = scmp.eq.s32.totalorder %s9785_s29, 0 }
  0x10   : > { %p75_p5 = por %p74_p2, %p73_p1  ;;  %s12898_s7 = smov (%p33_p3, %s12896_s7), 0 }
  0x11   : > { %12880 = sst [smem:[#allocation9_spill]] %s12898_s7  ;;  %p10857_p7 = por %p80_p6, %p79_p4 }
  0x12   : > { %s61_s11 = ssub.s32 %s10757_s27, %s12898_s7  ;;  %p10592_p8 = scmp.lt.s32.totalorder %s10761_s28, 56 }
  0x13   : > { %s63_s12 = sor.u32 %s62_s9, %s61_s11  ;;  %s241_s13 = sand.u32 1, %s10741_s23  }
  0x14   : > { %p64_p9 = scmp.eq.s32.totalorder %s63_s12, 0  ;;  %s10583_s14 = smul.u32 7168, %s241_s13 }
  0x15   : > { %p10865_p10 = pnand %p10592_p8, %p75_p5  ;;  %s10316_s17 = smul.u32 896, %s10753_s26 }
  0x16   : > { %s10870_s16 = scalar_select %p64_p9, %s10741_s23, %s66_s8  }
  0x17   : > { %s10584_s18 = smul.u32 25088, %s10757_s27  ;;  %s245_s19 = scalar_lea.vmem [#allocation3], %s10583_s14 }
  0x18   : > { %s255_s20 = sshll.u32 %s245_s19, 4  ;;  %s12883_s1 = sld [smem:[#allocation11_spill]]  ;;  %s10874_s20 = int_to_ptr.vmem [resolvable:$true] %s255_s20 }
  0x19   : > { %s252_s21 = sadd.s32 %s10584_s18, %s10316_s17  ;;  %s10882_s8 = scalar_lea.sflag [#allocation4], %s241_s13 }
  0x1a   : > { %s9790_s29 = sshll.u32 %s252_s21, 7  ;;  %p10667_p13 = pneg %p10865_p10 }
  0x1e   : > { %s10879_s12 = scalar_lea.hbm %s12883_s1, %s9790_s29  ;;  %s10670_s18 = scalar_lea.hbm %s12883_s1, 6422528 }
  0x1f   : > { %s10665_s7 = scalar_lea.hbm %s10879_s12, 114688  ;;  %p10671_p2 = scmp.lt.u32.totalorder %s10879_s12, %s12883_s1 }
  0x20   : > { %p10666_p12 = scmp.ne.s32.totalorder %s10879_s12, %s10665_s7  ;;  %p10672_p3 = scmp.lt.u32.totalorder %s10670_s18, %s10665_s7 }
  0x21   : > { %p10674_p5 = scmp.lt.u32.totalorder %s10665_s7, %s10879_s12 }
  0x22   : > { %p10668_p0 = pnand %p10667_p13, %p10666_p12  ;;  %p10673_p4 = por %p10672_p3, %p10671_p2 }
  0x24   : > { %p10669_p1 = pneg %p10668_p0  ;;  %p10675_p6 = por %p10674_p5, %p10673_p4 }
  0x26   : > { %p10676_p8 = pnand %p10675_p6, %p10669_p1 }
  0x28   : > { %10679 = shalt.err (!%p10676_p8)
}
  0x29   : > { %s10680_s13 = scalar_lea.vmem %s10874_s20, 114688  ;;  %s10763_s29 = smov [#allocation3]  }
  0x2a   : > { %p10681_p9 = scmp.ne.s32.totalorder %s10874_s20, %s10680_s13  ;;  %s10685_s9 = sshll.u32 %s10763_s29, 4  ;;  %s10686_s9 = int_to_ptr.vmem [resolvable:$false] %s10685_s9 }
  0x2b   : > { %s10687_s11 = scalar_lea.vmem %s10686_s9, 229376  ;;  %p10688_p11 = scmp.lt.s32.totalorder %s10874_s20, %s10686_s9 }
  0x2c   : > { %p10683_p12 = pnand %p10681_p9, %p10667_p13  ;;  %p10689_p2 = scmp.lt.s32.totalorder %s10687_s11, %s10680_s13 }
  0x2e   : > { %p10684_p0 = pneg %p10683_p12  ;;  %p10690_p3 = por %p10689_p2, %p10688_p11 }
  0x30   : > { %p10691_p4 = pnand %p10690_p3, %p10684_p0 }
  0x32   : > { %10694 = shalt.err (!%p10691_p4)
}
  0x33   : > { %s10764_s7 = smov 1024   ;;  %s10765_s14 = smov 64  }
  0x34   : > { %10591 = dma.hbm_to_vmem [thread:$0]  (!%p10865_p10), %s10879_s12, 114688, %s10874_s20, %s10882_s8, %s10764_s7, %s10764_s7, %s10765_s14  }
  0x35   : > { %p292_p13 = scmp.lt.s32.totalorder %s10761_s28, 57  ;;  %p12884_p1 = scmp.ge.s32.totalorder %s10761_s28, 1 }
  0x37   : > { %p293_p5 = pnand %p12884_p1, %p292_p13 }
  0x38   : > { %s298_s17 = sand.u32 (!%p293_p5), 1, %s10737_s22  }
  0x39   : > { %296 = sbr.rel (%p293_p5) target bundleno = 2805 (0xaf5), region = 44  ;;  %s299_s19 = scalar_lea.sflag (!%p293_p5), [#allocation4], %s298_s17 }
  0x3a   : > { %s10585_s18 = smul.u32 (!%p293_p5), 7168, %s298_s17 }
  0x3c   : > { %s10914_s21 = scalar_lea.vmem (!%p293_p5), [#allocation3], %s10585_s18 }
  0x40   : > { %10728 = dma.done.wait (%p10857_p7), %s299_s19, 114688  }
  0x41   : > { %10730 = vsyncadd (%p10857_p7), %s299_s19, 4294852608  ;;  %s352_s15 = smul.u32 28, %s10745_s24  ;;  %p358_p10 = scmp.lt.s32.totalorder %s10749_s25, 1 }
  0x42   : > { %s12885_s0 = sld [smem:[#allocation10_spill]]  ;;  %p9799_p7 = scmp.ne.s32.totalorder %s10745_s24, 0 }
  0x43   : > { %p353_p11 = scmp.lt.s32.totalorder %s352_s15, 783  ;;  %s12900_s25 = smov (!%p358_p10, %s10749_s25), 1  ;;  %v10766_v0 = vmov (!%p9799_p7), 0.0  }
  0x44   : > { %s10923_s20 = sshll.u32 %s12900_s25, 3  ;;  %s10317_s12 = sshll.u32 %s12900_s25, 12  ;;  %384 = vst [vmem:[#allocation2] sm:$0xff] (!%p9799_p7), %v10766_v0  ;;  %385 = vst [vmem:[#allocation2 + $0x8] sm:$0xff] (!%p9799_p7), %v10766_v0 }
  0x45   : > { %s12902_s15 = smov (!%p353_p11, %s352_s15), 783  ;;  %s361_s11 = scalar_lea.vmem %s12866_s2, %s10923_s20 }
  0x46   : > { %s365_s17 = scalar_lea.vmem %s12867_s3, %s10923_s20  ;;  %s10941_s1 = scalar_lea.vmem %s12868_s4, %s10317_s12 }
  0x47   : > { %s374_s26 = scalar_lea.vmem %s12869_s5, %s10923_s20  ;;  %s10318_s8 = sshll.u32 %s12900_s25, 4 }
  0x48   : > { %s10928_s29 = scalar_lea.vmem %s12885_s0, %s12902_s15  ;;  %s10950_s0 = scalar_lea.vmem %s12870_s6, %s10318_s8 }
  0x49   : > { %383 = sbr.rel (%p9799_p7) target bundleno = 80 (0x50), region = 52 }
  0x50 PF: > { %v391_v1 = vld [vmem:[%s10914_s21 + $0x8] sm:$0xff]  ;;  %v393_v2 = vld [vmem:[%s10914_s21 + $0x18] sm:$0xff]  ;;  %v390_v3 = vld [vmem:[%s10914_s21] sm:$0xff]  ;;  %v3088_v31 = vlaneseq  ;;  %v10767_v36 = vmov 1966171168   ;;  %p9801_p6 = scmp.ne.s32.totalorder %s10745_s24, 27 }
  0x51   : > { %v1287_v4 = vunpack.c.l.s8.bf16 %v391_v1  ;;  %v1295_v5 = vunpack.c.h.s8.bf16 %v391_v1  ;;  %v1289_v6 = vunpack.c.l.s8.bf16 %v393_v2  ;;  %v1297_v7 = vunpack.c.h.s8.bf16 %v393_v2  ;;  %v392_v8 = vld [vmem:[%s10914_s21 + $0x10] sm:$0xff]  ;;  %v399_v11 = vld [vmem:[%s10914_s21 + $0x48] sm:$0xff]  ;;  %v401_v12 = vld [vmem:[%s10914_s21 + $0x58] sm:$0xff] }
  0x52   : > { %v1286_v9 = vunpack.c.l.s8.bf16 %v390_v3  ;;  %v1288_v10 = vunpack.c.l.s8.bf16 %v392_v8  ;;  %v1294_v13 = vunpack.c.h.s8.bf16 %v390_v3  ;;  %v1296_v14 = vunpack.c.h.s8.bf16 %v392_v8  ;;  %v398_v17 = vld [vmem:[%s10914_s21 + $0x40] sm:$0xff]  ;;  %v400_v18 = vld [vmem:[%s10914_s21 + $0x50] sm:$0xff]  ;;  %v407_v23 = vld [vmem:[%s10914_s21 + $0x88] sm:$0xff] }
  0x53   : > { %3283 = vmatprep.subr.bf16.mxu0 %v1287_v4  ;;  %3857 = vmatprep.subr.bf16.mxu1 %v1289_v6  ;;  %v1303_v15 = vunpack.c.l.s8.bf16 %v399_v11  ;;  %v1305_v16 = vunpack.c.l.s8.bf16 %v401_v12  ;;  %v1302_v19 = vunpack.c.l.s8.bf16 %v398_v17  ;;  %v1304_v20 = vunpack.c.l.s8.bf16 %v400_v18  ;;  %v409_v24 = vld [vmem:[%s10914_s21 + $0x98] sm:$0xff]  ;;  %v406_v29 = vld [vmem:[%s10914_s21 + $0x80] sm:$0xff]  ;;  %v408_v30 = vld [vmem:[%s10914_s21 + $0x90] sm:$0xff] }
  0x54   : > { %3284 = vmatpush1.bf16.msra.mxu0 %v1286_v9  ;;  %3858 = vmatpush1.bf16.msra.mxu1 %v1288_v10  ;;  %v1311_v21 = vunpack.c.h.s8.bf16 %v399_v11  ;;  %v1313_v22 = vunpack.c.h.s8.bf16 %v401_v12  ;;  %v1310_v25 = vunpack.c.h.s8.bf16 %v398_v17  ;;  %v1312_v26 = vunpack.c.h.s8.bf16 %v400_v18  ;;  %v415_v39 = vld [vmem:[%s10914_s21 + $0xc8] sm:$0xff]  ;;  %v417_v40 = vld [vmem:[%s10914_s21 + $0xd8] sm:$0xff]  ;;  %v10970_v44 = vld [vmem:[%s10928_s29] sm:$0xff] }
  0x55   : > { %3285 = vmatprep.subr.bf16.mxu0 %v1295_v5  ;;  %3859 = vmatprep.subr.bf16.mxu1 %v1297_v7  ;;  %v1319_v27 = vunpack.c.l.s8.bf16 %v407_v23  ;;  %v1321_v28 = vunpack.c.l.s8.bf16 %v409_v24  ;;  %v1318_v32 = vunpack.c.l.s8.bf16 %v406_v29  ;;  %v1320_v33 = vunpack.c.l.s8.bf16 %v408_v30  ;;  %v414_v47 = vld [vmem:[%s10914_s21 + $0xc0] sm:$0xff]  ;;  %v416_v48 = vld [vmem:[%s10914_s21 + $0xd0] sm:$0xff]  ;;  %v423_v56 = vld [vmem:[%s10914_s21 + $0x108] sm:$0xff] }
  0x56   : > { %v1327_v34 = vunpack.c.h.s8.bf16 %v407_v23  ;;  %v1329_v35 = vunpack.c.h.s8.bf16 %v409_v24  ;;  %v3086_v37 = vunpack.c.l.s4 %v10767_v36  ;;  %v10965_v38 = vshrl.u32 %v3088_v31, 7  ;;  %v425_v57 = vld [vmem:[%s10914_s21 + $0x118] sm:$0xff]  ;;  %v422_v63 = vld [vmem:[%s10914_s21 + $0x100] sm:$0xff]  ;;  %v424_v0 = vld [vmem:[%s10914_s21 + $0x110] sm:$0xff] }
  0x57   : > { %v1326_v42 = vunpack.c.h.s8.bf16 %v406_v29  ;;  %v1328_v43 = vunpack.c.h.s8.bf16 %v408_v30  ;;  %v1335_v45 = vunpack.c.l.s8.bf16 %v415_v39  ;;  %v1337_v46 = vunpack.c.l.s8.bf16 %v417_v40  ;;  %v431_v5 = vld [vmem:[%s10914_s21 + $0x148] sm:$0xff]  ;;  %v433_v6 = vld [vmem:[%s10914_s21 + $0x158] sm:$0xff]  ;;  %v430_v11 = vld [vmem:[%s10914_s21 + $0x140] sm:$0xff] }
  0x58   : > { %3286 = vmatpush1.bf16.msra.mxu0 %v1294_v13  ;;  %3860 = vmatpush1.bf16.msra.mxu1 %v1296_v14  ;;  %v3087_v41 = vunpack.c.0.s8 %v3086_v37  ;;  %v1334_v51 = vunpack.c.l.s8.bf16 %v414_v47  ;;  %v1336_v52 = vunpack.c.l.s8.bf16 %v416_v48  ;;  %v1343_v53 = vunpack.c.h.s8.bf16 %v415_v39  ;;  %v432_v12 = vld [vmem:[%s10914_s21 + $0x150] sm:$0xff]  ;;  %v439_v17 = vld [vmem:[%s10914_s21 + $0x188] sm:$0xff]  ;;  %v441_v18 = vld [vmem:[%s10914_s21 + $0x198] sm:$0xff] }
  0x59   : > { %3287 = vmatprep.subr.bf16.mxu0 %v1303_v15  ;;  %3861 = vmatprep.subr.bf16.mxu1 %v1305_v16  ;;  %v1345_v54 = vunpack.c.h.s8.bf16 %v417_v40  ;;  %v1342_v59 = vunpack.c.h.s8.bf16 %v414_v47  ;;  %v1344_v60 = vunpack.c.h.s8.bf16 %v416_v48  ;;  %v1351_v61 = vunpack.c.l.s8.bf16 %v423_v56  ;;  %v438_v23 = vld [vmem:[%s10914_s21 + $0x180] sm:$0xff]  ;;  %v440_v24 = vld [vmem:[%s10914_s21 + $0x190] sm:$0xff]  ;;  %v447_v29 = vld [vmem:[%s10914_s21 + $0x1c8] sm:$0xff] }
  0x5a   : > { %v10975_v49 = vsub.s32 %v3087_v41, %v10965_v38  ;;  %v1353_v62 = vunpack.c.l.s8.bf16 %v425_v57  ;;  %v1350_v1 = vunpack.c.l.s8.bf16 %v422_v63  ;;  %v1352_v2 = vunpack.c.l.s8.bf16 %v424_v0  ;;  %v449_v30 = vld [vmem:[%s10914_s21 + $0x1d8] sm:$0xff]  ;;  %v448_v36 = vld [vmem:[%s10914_s21 + $0x1d0] sm:$0xff] }
  0x5b   : > { %v1359_v3 = vunpack.c.h.s8.bf16 %v423_v56  ;;  %v1361_v4 = vunpack.c.h.s8.bf16 %v425_v57  ;;  %v1358_v7 = vunpack.c.h.s8.bf16 %v422_v63  ;;  %v1360_v8 = vunpack.c.h.s8.bf16 %v424_v0 }
  0x5c   : > { %3288 = vmatpush1.bf16.msra.mxu0 %v1302_v19  ;;  %3862 = vmatpush1.bf16.msra.mxu1 %v1304_v20  ;;  %v10979_v50 = vrot.slane %v10970_v44, %v10975_v49  ;;  %v1367_v9 = vunpack.c.l.s8.bf16 %v431_v5  ;;  %v1369_v10 = vunpack.c.l.s8.bf16 %v433_v6  ;;  %v1366_v13 = vunpack.c.l.s8.bf16 %v430_v11 }
  0x5d   : > { %3289 = vmatprep.subr.bf16.mxu0 %v1311_v21  ;;  %3863 = vmatprep.subr.bf16.mxu1 %v1313_v22  ;;  %v1368_v14 = vunpack.c.l.s8.bf16 %v432_v12  ;;  %v1375_v15 = vunpack.c.h.s8.bf16 %v431_v5  ;;  %v1377_v16 = vunpack.c.h.s8.bf16 %v433_v6  ;;  %v1374_v19 = vunpack.c.h.s8.bf16 %v430_v11 }
  0x5e   : > { %v3099_v55 = vcombine.high %v10979_v50, %v10979_v50  ;;  %v1376_v20 = vunpack.c.h.s8.bf16 %v432_v12  ;;  %v1383_v21 = vunpack.c.l.s8.bf16 %v439_v17  ;;  %v1385_v22 = vunpack.c.l.s8.bf16 %v441_v18 }
  0x5f   : > { %v1390_v31 = vunpack.c.h.s8.bf16 %v438_v23  ;;  %v1400_v39 = vunpack.c.l.s8.bf16 %v448_v36  ;;  %v1407_v40 = vunpack.c.h.s8.bf16 %v447_v29  ;;  %v1409_v41 = vunpack.c.h.s8.bf16 %v449_v30 }
  0x60   : > { %3290 = vmatpush1.bf16.msra.mxu0 %v1310_v25  ;;  %3864 = vmatpush1.bf16.msra.mxu1 %v1312_v26  ;;  %v10986_v58 = vrot.slane %v3099_v55, %v10975_v49  ;;  %v1382_v25 = vunpack.c.l.s8.bf16 %v438_v23  ;;  %v1384_v26 = vunpack.c.l.s8.bf16 %v440_v24 }
  0x61   : > { %3291 = vmatprep.subr.bf16.mxu0 %v1319_v27  ;;  %3865 = vmatprep.subr.bf16.mxu1 %v1321_v28  ;;  %v1391_v27 = vunpack.c.h.s8.bf16 %v439_v17  ;;  %v1393_v28 = vunpack.c.h.s8.bf16 %v441_v18 }
  0x62   : > { %3315 = vmatprep.mubr.bf16.mxu0 %v10986_v58  ;;  %3889 = vmatprep.mubr.bf16.mxu1 %v10986_v58 }
  0x64   : > { %3292 = vmatpush1.bf16.msra.mxu0 %v1318_v32  ;;  %3866 = vmatpush1.bf16.msra.mxu1 %v1320_v33  ;;  %v1392_v32 = vunpack.c.h.s8.bf16 %v440_v24  ;;  %v1399_v33 = vunpack.c.l.s8.bf16 %v447_v29 }
  0x65   : > { %3293 = vmatprep.subr.bf16.mxu0 %v1327_v34  ;;  %3867 = vmatprep.subr.bf16.mxu1 %v1329_v35  ;;  %v1401_v34 = vunpack.c.l.s8.bf16 %v449_v30  ;;  %v446_v35 = vld [vmem:[%s10914_s21 + $0x1c0] sm:$0xff] }
  0x66   : > { %v1398_v37 = vunpack.c.l.s8.bf16 %v446_v35 }
  0x68   : > { %3294 = vmatpush1.bf16.msra.mxu0 %v1326_v42  ;;  %3868 = vmatpush1.bf16.msra.mxu1 %v1328_v43  ;;  %v455_v42 = vld [vmem:[%s10914_s21 + $0x208] sm:$0xff]  ;;  %v457_v43 = vld [vmem:[%s10914_s21 + $0x218] sm:$0xff] }
  0x69   : > { %3295 = vmatprep.subr.bf16.mxu0 %v1335_v45  ;;  %3869 = vmatprep.subr.bf16.mxu1 %v1337_v46  ;;  %v1406_v45 = vunpack.c.h.s8.bf16 %v446_v35  ;;  %v1408_v46 = vunpack.c.h.s8.bf16 %v448_v36  ;;  %v1415_v47 = vunpack.c.l.s8.bf16 %v455_v42  ;;  %v1417_v48 = vunpack.c.l.s8.bf16 %v457_v43 }
  0x6a   : > { %v1423_v56 = vunpack.c.h.s8.bf16 %v455_v42  ;;  %v1425_v57 = vunpack.c.h.s8.bf16 %v457_v43 }
  0x6c   : > { %3296 = vmatpush1.bf16.msra.mxu0 %v1334_v51  ;;  %3870 = vmatpush1.bf16.msra.mxu1 %v1336_v52  ;;  %v454_v51 = vld [vmem:[%s10914_s21 + $0x200] sm:$0xff]  ;;  %v456_v52 = vld [vmem:[%s10914_s21 + $0x210] sm:$0xff] }
  0x6d   : > { %3297 = vmatprep.subr.bf16.mxu0 %v1343_v53  ;;  %3871 = vmatprep.subr.bf16.mxu1 %v1345_v54  ;;  %v11010_v53 = vrot.slane %v10979_v50, %v10975_v49  ;;  %v1414_v54 = vunpack.c.l.s8.bf16 %v454_v51  ;;  %v1416_v55 = vunpack.c.l.s8.bf16 %v456_v52  ;;  %v1422_v50 = vunpack.c.h.s8.bf16 %v454_v51 }
  0x70   : > { %3298 = vmatpush1.bf16.msra.mxu0 %v1342_v59  ;;  %3872 = vmatpush1.bf16.msra.mxu1 %v1344_v60  ;;  %v463_v59 = vld [vmem:[%s10914_s21 + $0x248] sm:$0xff]  ;;  %v465_v60 = vld [vmem:[%s10914_s21 + $0x258] sm:$0xff] }
  0x71   : > { %3299 = vmatprep.subr.bf16.mxu0 %v1351_v61  ;;  %3873 = vmatprep.subr.bf16.mxu1 %v1353_v62  ;;  %v11016_v61 = vcombine.high %v10986_v58, %v10986_v58  ;;  %v1424_v62 = vunpack.c.h.s8.bf16 %v456_v52  ;;  %v1431_v63 = vunpack.c.l.s8.bf16 %v463_v59  ;;  %v1433_v0 = vunpack.c.l.s8.bf16 %v465_v60 }
  0x72   : > { %v1439_v5 = vunpack.c.h.s8.bf16 %v463_v59  ;;  %v1441_v6 = vunpack.c.h.s8.bf16 %v465_v60 }
  0x74   : > { %3300 = vmatpush1.bf16.msra.mxu0 %v1350_v1  ;;  %3874 = vmatpush1.bf16.msra.mxu1 %v1352_v2  ;;  %v462_v1 = vld [vmem:[%s10914_s21 + $0x240] sm:$0xff]  ;;  %v464_v2 = vld [vmem:[%s10914_s21 + $0x250] sm:$0xff] }
  0x75   : > { %3301 = vmatprep.subr.bf16.mxu0 %v1359_v3  ;;  %3875 = vmatprep.subr.bf16.mxu1 %v1361_v4  ;;  %v1430_v3 = vunpack.c.l.s8.bf16 %v462_v1  ;;  %v1432_v4 = vunpack.c.l.s8.bf16 %v464_v2 }
  0x78   : > { %3302 = vmatpush1.bf16.msra.mxu0 %v1358_v7  ;;  %3876 = vmatpush1.bf16.msra.mxu1 %v1360_v8  ;;  %v471_v7 = vld [vmem:[%s10914_s21 + $0x288] sm:$0xff]  ;;  %v473_v8 = vld [vmem:[%s10914_s21 + $0x298] sm:$0xff] }
  0x79   : > { %3303 = vmatprep.subr.bf16.mxu0 %v1367_v9  ;;  %3877 = vmatprep.subr.bf16.mxu1 %v1369_v10  ;;  %v1438_v9 = vunpack.c.h.s8.bf16 %v462_v1  ;;  %v1440_v10 = vunpack.c.h.s8.bf16 %v464_v2  ;;  %v1447_v11 = vunpack.c.l.s8.bf16 %v471_v7  ;;  %v1449_v12 = vunpack.c.l.s8.bf16 %v473_v8 }
  0x7a   : > { %v1455_v17 = vunpack.c.h.s8.bf16 %v471_v7  ;;  %v1457_v18 = vunpack.c.h.s8.bf16 %v473_v8 }
  0x7c   : > { %3304 = vmatpush1.bf16.msra.mxu0 %v1366_v13  ;;  %3878 = vmatpush1.bf16.msra.mxu1 %v1368_v14  ;;  %v470_v13 = vld [vmem:[%s10914_s21 + $0x280] sm:$0xff]  ;;  %v472_v14 = vld [vmem:[%s10914_s21 + $0x290] sm:$0xff] }
  0x7d   : > { %3305 = vmatprep.subr.bf16.mxu0 %v1375_v15  ;;  %3879 = vmatprep.subr.bf16.mxu1 %v1377_v16  ;;  %v1446_v15 = vunpack.c.l.s8.bf16 %v470_v13  ;;  %v1448_v16 = vunpack.c.l.s8.bf16 %v472_v14 }
  0x80   : > { %3306 = vmatpush1.bf16.msra.mxu0 %v1374_v19  ;;  %3880 = vmatpush1.bf16.msra.mxu1 %v1376_v20  ;;  %v479_v19 = vld [vmem:[%s10914_s21 + $0x2c8] sm:$0xff]  ;;  %v481_v20 = vld [vmem:[%s10914_s21 + $0x2d8] sm:$0xff] }
  0x81   : > { %3307 = vmatprep.subr.bf16.mxu0 %v1383_v21  ;;  %3881 = vmatprep.subr.bf16.mxu1 %v1385_v22  ;;  %v1454_v21 = vunpack.c.h.s8.bf16 %v470_v13  ;;  %v1456_v22 = vunpack.c.h.s8.bf16 %v472_v14  ;;  %v1463_v23 = vunpack.c.l.s8.bf16 %v479_v19  ;;  %v1465_v24 = vunpack.c.l.s8.bf16 %v481_v20 }
  0x82   : > { %v1471_v29 = vunpack.c.h.s8.bf16 %v479_v19  ;;  %v1473_v30 = vunpack.c.h.s8.bf16 %v481_v20 }
  0x84   : > { %3308 = vmatpush1.bf16.msra.mxu0 %v1382_v25  ;;  %3882 = vmatpush1.bf16.msra.mxu1 %v1384_v26  ;;  %v478_v25 = vld [vmem:[%s10914_s21 + $0x2c0] sm:$0xff]  ;;  %v480_v26 = vld [vmem:[%s10914_s21 + $0x2d0] sm:$0xff] }
  0x85   : > { %3309 = vmatprep.subr.bf16.mxu0 %v1391_v27  ;;  %3883 = vmatprep.subr.bf16.mxu1 %v1393_v28  ;;  %v1462_v27 = vunpack.c.l.s8.bf16 %v478_v25  ;;  %v1464_v28 = vunpack.c.l.s8.bf16 %v480_v26 }
  0x88   : > { %3310 = vmatpush1.bf16.msra.mxu0 %v1390_v31  ;;  %3884 = vmatpush1.bf16.msra.mxu1 %v1392_v32  ;;  %v487_v31 = vld [vmem:[%s10914_s21 + $0x308] sm:$0xff]  ;;  %v489_v32 = vld [vmem:[%s10914_s21 + $0x318] sm:$0xff] }
  0x89   : > { %3311 = vmatprep.subr.bf16.mxu0 %v1399_v33  ;;  %3885 = vmatprep.subr.bf16.mxu1 %v1401_v34  ;;  %v1470_v33 = vunpack.c.h.s8.bf16 %v478_v25  ;;  %v1472_v34 = vunpack.c.h.s8.bf16 %v480_v26  ;;  %v1479_v35 = vunpack.c.l.s8.bf16 %v487_v31  ;;  %v1481_v36 = vunpack.c.l.s8.bf16 %v489_v32 }
  0x8a   : > { %v1487_v42 = vunpack.c.h.s8.bf16 %v487_v31  ;;  %v1489_v43 = vunpack.c.h.s8.bf16 %v489_v32  ;;  %v11061_v31 = vcombine.high %v11010_v53, %v11010_v53 }
  0x8c   : > { %3312 = vmatpush1.bf16.msra.mxu0 %v1398_v37  ;;  %3886 = vmatpush1.bf16.msra.mxu1 %v1400_v39  ;;  %v486_v37 = vld [vmem:[%s10914_s21 + $0x300] sm:$0xff]  ;;  %v488_v39 = vld [vmem:[%s10914_s21 + $0x310] sm:$0xff] }
  0x8d   : > { %3313 = vmatprep.subr.bf16.mxu0 %v1407_v40  ;;  %3887 = vmatprep.subr.bf16.mxu1 %v1409_v41  ;;  %v1478_v40 = vunpack.c.l.s8.bf16 %v486_v37  ;;  %v1480_v41 = vunpack.c.l.s8.bf16 %v488_v39 }
  0x90   : > { %3314 = vmatpush1.bf16.msra.mxu0 %v1406_v45  ;;  %3888 = vmatpush1.bf16.msra.mxu1 %v1408_v46  ;;  %v495_v45 = vld [vmem:[%s10914_s21 + $0x348] sm:$0xff]  ;;  %v497_v46 = vld [vmem:[%s10914_s21 + $0x358] sm:$0xff] }
  0x91   : > { %3324 = vmatprep.subr.bf16.mxu0 %v1415_v47  ;;  %3898 = vmatprep.subr.bf16.mxu1 %v1417_v48  ;;  %v1486_v47 = vunpack.c.h.s8.bf16 %v486_v37  ;;  %v1488_v48 = vunpack.c.h.s8.bf16 %v488_v39  ;;  %v1495_v51 = vunpack.c.l.s8.bf16 %v495_v45  ;;  %v1497_v52 = vunpack.c.l.s8.bf16 %v497_v46  ;;  %v529_v37 = vld [vmem:[%s10914_s21 + $0x458] sm:$0xff] }
  0x92   : > { %v1503_v59 = vunpack.c.h.s8.bf16 %v495_v45  ;;  %v1505_v60 = vunpack.c.h.s8.bf16 %v497_v46  ;;  %v526_v45 = vld [vmem:[%s10914_s21 + $0x440] sm:$0xff]  ;;  %v528_v46 = vld [vmem:[%s10914_s21 + $0x450] sm:$0xff] }
  0x93   : > { %3316 = vmatmul.mubr.bf16.vlgmr.msra.gmra.mrb[0].mxu0 %v11010_v53  ;;  %3890 = vmatmul.mubr.bf16.vlgmr.msra.gmra.mrb[0].mxu1 %v11010_v53 }
  0x94   : > { %3325 = vmatpush1.bf16.msra.mxu0 %v1414_v54  ;;  %3899 = vmatpush1.bf16.msra.mxu1 %v1416_v55  ;;  %v494_v54 = vld [vmem:[%s10914_s21 + $0x340] sm:$0xff]  ;;  %v496_v55 = vld [vmem:[%s10914_s21 + $0x350] sm:$0xff] }
  0x95   : > { %3326 = vmatprep.subr.bf16.mxu0 %v1423_v56  ;;  %3900 = vmatprep.subr.bf16.mxu1 %v1425_v57  ;;  %v1494_v56 = vunpack.c.l.s8.bf16 %v494_v54  ;;  %v1496_v57 = vunpack.c.l.s8.bf16 %v496_v55 }
  0x96   : > { %3356 = vmatprep.mubr.bf16.mxu0 %v11016_v61  ;;  %3930 = vmatprep.mubr.bf16.mxu1 %v11016_v61 }
  0x98   : > { %3327 = vmatpush1.bf16.msra.mxu0 %v1422_v50  ;;  %3901 = vmatpush1.bf16.msra.mxu1 %v1424_v62  ;;  %v503_v50 = vld [vmem:[%s10914_s21 + $0x388] sm:$0xff]  ;;  %v505_v62 = vld [vmem:[%s10914_s21 + $0x398] sm:$0xff] }
  0x99   : > { %3328 = vmatprep.subr.bf16.mxu0 %v1431_v63  ;;  %3902 = vmatprep.subr.bf16.mxu1 %v1433_v0  ;;  %v1502_v63 = vunpack.c.h.s8.bf16 %v494_v54  ;;  %v1504_v0 = vunpack.c.h.s8.bf16 %v496_v55  ;;  %v1511_v1 = vunpack.c.l.s8.bf16 %v503_v50  ;;  %v1513_v2 = vunpack.c.l.s8.bf16 %v505_v62  ;;  %v535_v54 = vld [vmem:[%s10914_s21 + $0x488] sm:$0xff]  ;;  %v537_v55 = vld [vmem:[%s10914_s21 + $0x498] sm:$0xff] }
  0x9a   : > { %v1519_v7 = vunpack.c.h.s8.bf16 %v503_v50  ;;  %v1521_v8 = vunpack.c.h.s8.bf16 %v505_v62  ;;  %v534_v50 = vld [vmem:[%s10914_s21 + $0x480] sm:$0xff]  ;;  %v536_v62 = vld [vmem:[%s10914_s21 + $0x490] sm:$0xff] }
  0x9c   : > { %3329 = vmatpush1.bf16.msra.mxu0 %v1430_v3  ;;  %3903 = vmatpush1.bf16.msra.mxu1 %v1432_v4  ;;  %v502_v3 = vld [vmem:[%s10914_s21 + $0x380] sm:$0xff]  ;;  %v504_v4 = vld [vmem:[%s10914_s21 + $0x390] sm:$0xff] }
  0x9d   : > { %3330 = vmatprep.subr.bf16.mxu0 %v1439_v5  ;;  %3904 = vmatprep.subr.bf16.mxu1 %v1441_v6  ;;  %v1510_v5 = vunpack.c.l.s8.bf16 %v502_v3  ;;  %v1512_v6 = vunpack.c.l.s8.bf16 %v504_v4 }
  0xa0   : > { %3331 = vmatpush1.bf16.msra.mxu0 %v1438_v9  ;;  %3905 = vmatpush1.bf16.msra.mxu1 %v1440_v10  ;;  %v511_v9 = vld [vmem:[%s10914_s21 + $0x3c8] sm:$0xff]  ;;  %v513_v10 = vld [vmem:[%s10914_s21 + $0x3d8] sm:$0xff] }
  0xa1   : > { %3332 = vmatprep.subr.bf16.mxu0 %v1447_v11  ;;  %3906 = vmatprep.subr.bf16.mxu1 %v1449_v12  ;;  %v1518_v11 = vunpack.c.h.s8.bf16 %v502_v3  ;;  %v1520_v12 = vunpack.c.h.s8.bf16 %v504_v4  ;;  %v1527_v13 = vunpack.c.l.s8.bf16 %v511_v9  ;;  %v1529_v14 = vunpack.c.l.s8.bf16 %v513_v10  ;;  %v543_v3 = vld [vmem:[%s10914_s21 + $0x4c8] sm:$0xff]  ;;  %v545_v4 = vld [vmem:[%s10914_s21 + $0x4d8] sm:$0xff] }
  0xa2   : > { %v1535_v20 = vunpack.c.h.s8.bf16 %v511_v9  ;;  %v542_v9 = vld [vmem:[%s10914_s21 + $0x4c0] sm:$0xff] }
  0xa4   : > { %3333 = vmatpush1.bf16.msra.mxu0 %v1446_v15  ;;  %3907 = vmatpush1.bf16.msra.mxu1 %v1448_v16  ;;  %v510_v15 = vld [vmem:[%s10914_s21 + $0x3c0] sm:$0xff]  ;;  %v512_v16 = vld [vmem:[%s10914_s21 + $0x3d0] sm:$0xff] }
  0xa5   : > { %3334 = vmatprep.subr.bf16.mxu0 %v1455_v17  ;;  %3908 = vmatprep.subr.bf16.mxu1 %v1457_v18  ;;  %v3084_v17 = vcombine.high %v10970_v44, %v10970_v44  ;;  %v1526_v18 = vunpack.c.l.s8.bf16 %v510_v15  ;;  %v1528_v19 = vunpack.c.l.s8.bf16 %v512_v16  ;;  %v1534_v25 = vunpack.c.h.s8.bf16 %v510_v15  ;;  %v551_v15 = vld [vmem:[%s10914_s21 + $0x508] sm:$0xff] }
  0xa6   : > { %v1536_v26 = vunpack.c.h.s8.bf16 %v512_v16  ;;  %v553_v16 = vld [vmem:[%s10914_s21 + $0x518] sm:$0xff] }
  0xa8   : > { %3335 = vmatpush1.bf16.msra.mxu0 %v1454_v21  ;;  %3909 = vmatpush1.bf16.msra.mxu1 %v1456_v22  ;;  %v1537_v21 = vunpack.c.h.s8.bf16 %v513_v10  ;;  %v519_v22 = vld [vmem:[%s10914_s21 + $0x408] sm:$0xff]  ;;  %v544_v10 = vld [vmem:[%s10914_s21 + $0x4d0] sm:$0xff] }
  0xa9   : > { %3336 = vmatprep.subr.bf16.mxu0 %v1463_v23  ;;  %3910 = vmatprep.subr.bf16.mxu1 %v1465_v24  ;;  %v521_v23 = vld [vmem:[%s10914_s21 + $0x418] sm:$0xff]  ;;  %v11053_v24 = vrot.slane %v3084_v17, %v10975_v49  ;;  %v1543_v44 = vunpack.c.l.s8.bf16 %v519_v22  ;;  %v1598_v17 = vunpack.c.h.s8.bf16 %v542_v9 }
  0xac   : > { %3337 = vmatpush1.bf16.msra.mxu0 %v1462_v27  ;;  %3911 = vmatpush1.bf16.msra.mxu1 %v1464_v28  ;;  %v1545_v27 = vunpack.c.l.s8.bf16 %v521_v23  ;;  %v518_v28 = vld [vmem:[%s10914_s21 + $0x400] sm:$0xff] }
  0xad   : > { %3338 = vmatprep.subr.bf16.mxu0 %v1471_v29  ;;  %3912 = vmatprep.subr.bf16.mxu1 %v1473_v30  ;;  %v520_v29 = vld [vmem:[%s10914_s21 + $0x410] sm:$0xff]  ;;  %v3100_v30 = vcombine.high %v11053_v24, %v11053_v24  ;;  %v1542_v32 = vunpack.c.l.s8.bf16 %v518_v28 }
  0xaf   : > { %v11066_v39 = vrot.slane %v3100_v30, %v10975_v49 }
  0xb0   : > { %3339 = vmatpush1.bf16.msra.mxu0 %v1470_v33  ;;  %3913 = vmatpush1.bf16.msra.mxu1 %v1472_v34  ;;  %v1544_v33 = vunpack.c.l.s8.bf16 %v520_v29  ;;  %v1551_v34 = vunpack.c.h.s8.bf16 %v519_v22  ;;  %v552_v22 = vld [vmem:[%s10914_s21 + $0x510] sm:$0xff] }
  0xb1   : > { %3340 = vmatprep.subr.bf16.mxu0 %v1479_v35  ;;  %3914 = vmatprep.subr.bf16.mxu1 %v1481_v36  ;;  %v1553_v35 = vunpack.c.h.s8.bf16 %v521_v23  ;;  %v527_v36 = vld [vmem:[%s10914_s21 + $0x448] sm:$0xff]  ;;  %v1616_v30 = vunpack.c.h.s8.bf16 %v552_v22 }
  0xb4   : > { %3341 = vmatpush1.bf16.msra.mxu0 %v1478_v40  ;;  %3915 = vmatpush1.bf16.msra.mxu1 %v1480_v41  ;;  %v1550_v40 = vunpack.c.h.s8.bf16 %v518_v28  ;;  %v1552_v41 = vunpack.c.h.s8.bf16 %v520_v29  ;;  %v561_v28 = vld [vmem:[%s10914_s21 + $0x558] sm:$0xff] }
  0xb5   : > { %3342 = vmatprep.subr.bf16.mxu0 %v1487_v42  ;;  %3916 = vmatprep.subr.bf16.mxu1 %v1489_v43  ;;  %v1559_v42 = vunpack.c.l.s8.bf16 %v527_v36  ;;  %v1561_v43 = vunpack.c.l.s8.bf16 %v529_v37 }
  0xb8   : > { %3343 = vmatpush1.bf16.msra.mxu0 %v1486_v47  ;;  %3917 = vmatpush1.bf16.msra.mxu1 %v1488_v48  ;;  %v1558_v47 = vunpack.c.l.s8.bf16 %v526_v45  ;;  %v1560_v48 = vunpack.c.l.s8.bf16 %v528_v46 }
  0xb9   : > { %3344 = vmatprep.subr.bf16.mxu0 %v1495_v51  ;;  %3918 = vmatprep.subr.bf16.mxu1 %v1497_v52  ;;  %v1567_v51 = vunpack.c.h.s8.bf16 %v527_v36  ;;  %v1569_v52 = vunpack.c.h.s8.bf16 %v529_v37 }
  0xbc   : > { %3345 = vmatpush1.bf16.msra.mxu0 %v1494_v56  ;;  %3919 = vmatpush1.bf16.msra.mxu1 %v1496_v57  ;;  %v1566_v56 = vunpack.c.h.s8.bf16 %v526_v45  ;;  %v1568_v57 = vunpack.c.h.s8.bf16 %v528_v46 }
  0xbd   : > { %3346 = vmatprep.subr.bf16.mxu0 %v1503_v59  ;;  %3920 = vmatprep.subr.bf16.mxu1 %v1505_v60  ;;  %v1575_v59 = vunpack.c.l.s8.bf16 %v535_v54  ;;  %v1577_v60 = vunpack.c.l.s8.bf16 %v537_v55 }
  0xc0   : > { %3347 = vmatpush1.bf16.msra.mxu0 %v1502_v63  ;;  %3921 = vmatpush1.bf16.msra.mxu1 %v1504_v0  ;;  %v1574_v63 = vunpack.c.l.s8.bf16 %v534_v50  ;;  %v1576_v0 = vunpack.c.l.s8.bf16 %v536_v62 }
  0xc1   : > { %3348 = vmatprep.subr.bf16.mxu0 %v1511_v1  ;;  %3922 = vmatprep.subr.bf16.mxu1 %v1513_v2  ;;  %v1583_v1 = vunpack.c.h.s8.bf16 %v535_v54  ;;  %v1585_v2 = vunpack.c.h.s8.bf16 %v537_v55 }
  0xc4   : > { %3349 = vmatpush1.bf16.msra.mxu0 %v1510_v5  ;;  %3923 = vmatpush1.bf16.msra.mxu1 %v1512_v6  ;;  %v1582_v5 = vunpack.c.h.s8.bf16 %v534_v50  ;;  %v1584_v6 = vunpack.c.h.s8.bf16 %v536_v62 }
  0xc5   : > { %3350 = vmatprep.subr.bf16.mxu0 %v1519_v7  ;;  %3924 = vmatprep.subr.bf16.mxu1 %v1521_v8  ;;  %v1591_v7 = vunpack.c.l.s8.bf16 %v543_v3  ;;  %v1593_v8 = vunpack.c.l.s8.bf16 %v545_v4 }
  0xc8   : > { %3351 = vmatpush1.bf16.msra.mxu0 %v1518_v11  ;;  %3925 = vmatpush1.bf16.msra.mxu1 %v1520_v12  ;;  %v1590_v11 = vunpack.c.l.s8.bf16 %v542_v9  ;;  %v1592_v12 = vunpack.c.l.s8.bf16 %v544_v10 }
  0xc9   : > { %3352 = vmatprep.subr.bf16.mxu0 %v1527_v13  ;;  %3926 = vmatprep.subr.bf16.mxu1 %v1529_v14  ;;  %v1599_v13 = vunpack.c.h.s8.bf16 %v543_v3  ;;  %v1601_v14 = vunpack.c.h.s8.bf16 %v545_v4 }
  0xcc   : > { %3353 = vmatpush1.bf16.msra.mxu0 %v1526_v18  ;;  %3927 = vmatpush1.bf16.msra.mxu1 %v1528_v19  ;;  %v1600_v18 = vunpack.c.h.s8.bf16 %v544_v10  ;;  %v1607_v19 = vunpack.c.l.s8.bf16 %v551_v15 }
  0xcd   : > { %3354 = vmatprep.subr.bf16.mxu0 %v1535_v20  ;;  %3928 = vmatprep.subr.bf16.mxu1 %v1537_v21  ;;  %v1609_v20 = vunpack.c.l.s8.bf16 %v553_v16  ;;  %v550_v21 = vld [vmem:[%s10914_s21 + $0x500] sm:$0xff] }
  0xce   : > { %v1606_v23 = vunpack.c.l.s8.bf16 %v550_v21  ;;  %v1614_v29 = vunpack.c.h.s8.bf16 %v550_v21  ;;  %v593_v21 = vld [vmem:[%s10914_s21 + $0x658] sm:$0xff] }
  0xd0   : > { %3355 = vmatpush1.bf16.msra.mxu0 %v1534_v25  ;;  %3929 = vmatpush1.bf16.msra.mxu1 %v1536_v26  ;;  %v1608_v25 = vunpack.c.l.s8.bf16 %v552_v22  ;;  %v1615_v26 = vunpack.c.h.s8.bf16 %v551_v15  ;;  %v11104_v15 = vrot.slane %v11053_v24, %v10975_v49  ;;  %v11110_v22 = vcombine.high %v11066_v39, %v11066_v39 }
  0xd1   : > { %3365 = vmatprep.subr.bf16.mxu0 %v1543_v44  ;;  %3939 = vmatprep.subr.bf16.mxu1 %v1545_v27  ;;  %v1617_v44 = vunpack.c.h.s8.bf16 %v553_v16  ;;  %v559_v27 = vld [vmem:[%s10914_s21 + $0x548] sm:$0xff] }
  0xd3   : > { %3357 = vmatmul.mubr.bf16.vlgmr.msra.gmra.mrb[0].mxu0 %v11061_v31  ;;  %3931 = vmatmul.mubr.bf16.vlgmr.msra.gmra.mrb[0].mxu1 %v11061_v31 }
  0xd4   : > { %3366 = vmatpush1.bf16.msra.mxu0 %v1542_v32  ;;  %3940 = vmatpush1.bf16.msra.mxu1 %v1544_v33  ;;  %v1623_v32 = vunpack.c.l.s8.bf16 %v559_v27  ;;  %v1625_v33 = vunpack.c.l.s8.bf16 %v561_v28 }
  0xd5   : > { %3367 = vmatprep.subr.bf16.mxu0 %v1551_v34  ;;  %3941 = vmatprep.subr.bf16.mxu1 %v1553_v35  ;;  %v558_v34 = vld [vmem:[%s10914_s21 + $0x540] sm:$0xff]  ;;  %v560_v35 = vld [vmem:[%s10914_s21 + $0x550] sm:$0xff] }
  0xd6   : > { %3397 = vmatprep.mubr.bf16.mxu0 %v11066_v39  ;;  %3971 = vmatprep.mubr.bf16.mxu1 %v11066_v39  ;;  %v1622_v36 = vunpack.c.l.s8.bf16 %v558_v34  ;;  %v1624_v37 = vunpack.c.l.s8.bf16 %v560_v35  ;;  %v1630_v45 = vunpack.c.h.s8.bf16 %v558_v34  ;;  %v1632_v46 = vunpack.c.h.s8.bf16 %v560_v35  ;;  %v601_v34 = vld [vmem:[%s10914_s21 + $0x698] sm:$0xff] }
  0xd8   : > { %3368 = vmatpush1.bf16.msra.mxu0 %v1550_v40  ;;  %3942 = vmatpush1.bf16.msra.mxu1 %v1552_v41  ;;  %v1631_v40 = vunpack.c.h.s8.bf16 %v559_v27  ;;  %v1633_v41 = vunpack.c.h.s8.bf16 %v561_v28  ;;  %v592_v27 = vld [vmem:[%s10914_s21 + $0x650] sm:$0xff] }
  0xd9   : > { %3369 = vmatprep.subr.bf16.mxu0 %v1559_v42  ;;  %3943 = vmatprep.subr.bf16.mxu1 %v1561_v43  ;;  %v567_v42 = vld [vmem:[%s10914_s21 + $0x588] sm:$0xff]  ;;  %v569_v43 = vld [vmem:[%s10914_s21 + $0x598] sm:$0xff] }
  0xdc   : > { %3370 = vmatpush1.bf16.msra.mxu0 %v1558_v47  ;;  %3944 = vmatpush1.bf16.msra.mxu1 %v1560_v48  ;;  %v1639_v47 = vunpack.c.l.s8.bf16 %v567_v42  ;;  %v1641_v48 = vunpack.c.l.s8.bf16 %v569_v43 }
  0xdd   : > { %3371 = vmatprep.subr.bf16.mxu0 %v1567_v51  ;;  %3945 = vmatprep.subr.bf16.mxu1 %v1569_v52  ;;  %v566_v51 = vld [vmem:[%s10914_s21 + $0x580] sm:$0xff]  ;;  %v568_v52 = vld [vmem:[%s10914_s21 + $0x590] sm:$0xff] }
  0xde   : > { %v1638_v54 = vunpack.c.l.s8.bf16 %v566_v51  ;;  %v1640_v55 = vunpack.c.l.s8.bf16 %v568_v52  ;;  %v1646_v50 = vunpack.c.h.s8.bf16 %v566_v51  ;;  %v1648_v62 = vunpack.c.h.s8.bf16 %v568_v52  ;;  %v609_v51 = vld [vmem:[%s10914_s21 + $0x6d8] sm:$0xff] }
  0xe0   : > { %3372 = vmatpush1.bf16.msra.mxu0 %v1566_v56  ;;  %3946 = vmatpush1.bf16.msra.mxu1 %v1568_v57  ;;  %v1647_v56 = vunpack.c.h.s8.bf16 %v567_v42  ;;  %v1649_v57 = vunpack.c.h.s8.bf16 %v569_v43  ;;  %v600_v42 = vld [vmem:[%s10914_s21 + $0x690] sm:$0xff] }
  0xe1   : > { %3373 = vmatprep.subr.bf16.mxu0 %v1575_v59  ;;  %3947 = vmatprep.subr.bf16.mxu1 %v1577_v60  ;;  %v575_v59 = vld [vmem:[%s10914_s21 + $0x5c8] sm:$0xff]  ;;  %v577_v60 = vld [vmem:[%s10914_s21 + $0x5d8] sm:$0xff] }
  0xe4   : > { %3374 = vmatpush1.bf16.msra.mxu0 %v1574_v63  ;;  %3948 = vmatpush1.bf16.msra.mxu1 %v1576_v0  ;;  %v1655_v63 = vunpack.c.l.s8.bf16 %v575_v59  ;;  %v1657_v0 = vunpack.c.l.s8.bf16 %v577_v60 }
  0xe5   : > { %3375 = vmatprep.subr.bf16.mxu0 %v1583_v1  ;;  %3949 = vmatprep.subr.bf16.mxu1 %v1585_v2  ;;  %v574_v1 = vld [vmem:[%s10914_s21 + $0x5c0] sm:$0xff]  ;;  %v576_v2 = vld [vmem:[%s10914_s21 + $0x5d0] sm:$0xff] }
  0xe6   : > { %v1654_v3 = vunpack.c.l.s8.bf16 %v574_v1  ;;  %v1656_v4 = vunpack.c.l.s8.bf16 %v576_v2  ;;  %v1662_v9 = vunpack.c.h.s8.bf16 %v574_v1  ;;  %v1664_v10 = vunpack.c.h.s8.bf16 %v576_v2  ;;  %v617_v1 = vld [vmem:[%s10914_s21 + $0x718] sm:$0xff] }
  0xe8   : > { %3376 = vmatpush1.bf16.msra.mxu0 %v1582_v5  ;;  %3950 = vmatpush1.bf16.msra.mxu1 %v1584_v6  ;;  %v1663_v5 = vunpack.c.h.s8.bf16 %v575_v59  ;;  %v1665_v6 = vunpack.c.h.s8.bf16 %v577_v60  ;;  %v608_v59 = vld [vmem:[%s10914_s21 + $0x6d0] sm:$0xff] }
  0xe9   : > { %3377 = vmatprep.subr.bf16.mxu0 %v1591_v7  ;;  %3951 = vmatprep.subr.bf16.mxu1 %v1593_v8  ;;  %v583_v7 = vld [vmem:[%s10914_s21 + $0x608] sm:$0xff]  ;;  %v585_v8 = vld [vmem:[%s10914_s21 + $0x618] sm:$0xff] }
  0xec   : > { %3378 = vmatpush1.bf16.msra.mxu0 %v1590_v11  ;;  %3952 = vmatpush1.bf16.msra.mxu1 %v1592_v12  ;;  %v1671_v11 = vunpack.c.l.s8.bf16 %v583_v7  ;;  %v1673_v12 = vunpack.c.l.s8.bf16 %v585_v8 }
  0xed   : > { %3379 = vmatprep.subr.bf16.mxu0 %v1599_v13  ;;  %3953 = vmatprep.subr.bf16.mxu1 %v1601_v14  ;;  %v582_v13 = vld [vmem:[%s10914_s21 + $0x600] sm:$0xff]  ;;  %v584_v14 = vld [vmem:[%s10914_s21 + $0x610] sm:$0xff] }
  0xee   : > { %v1670_v16 = vunpack.c.l.s8.bf16 %v582_v13  ;;  %v1678_v24 = vunpack.c.h.s8.bf16 %v582_v13  ;;  %v625_v13 = vld [vmem:[%s10914_s21 + $0x758] sm:$0xff] }
  0xf0   : > { %3380 = vmatpush1.bf16.msra.mxu0 %v1598_v17  ;;  %3954 = vmatpush1.bf16.msra.mxu1 %v1600_v18  ;;  %v1672_v17 = vunpack.c.l.s8.bf16 %v584_v14  ;;  %v1679_v18 = vunpack.c.h.s8.bf16 %v583_v7  ;;  %v616_v7 = vld [vmem:[%s10914_s21 + $0x710] sm:$0xff] }
  0xf1   : > { %3381 = vmatprep.subr.bf16.mxu0 %v1607_v19  ;;  %3955 = vmatprep.subr.bf16.mxu1 %v1609_v20  ;;  %v1681_v19 = vunpack.c.h.s8.bf16 %v585_v8  ;;  %v591_v20 = vld [vmem:[%s10914_s21 + $0x648] sm:$0xff] }
  0xf4   : > { %3382 = vmatpush1.bf16.msra.mxu0 %v1606_v23  ;;  %3956 = vmatpush1.bf16.msra.mxu1 %v1608_v25  ;;  %v1680_v23 = vunpack.c.h.s8.bf16 %v584_v14  ;;  %v1687_v25 = vunpack.c.l.s8.bf16 %v591_v20 }
  0xf5   : > { %3383 = vmatprep.subr.bf16.mxu0 %v1615_v26  ;;  %3957 = vmatprep.subr.bf16.mxu1 %v1617_v44  ;;  %v1689_v26 = vunpack.c.l.s8.bf16 %v593_v21  ;;  %v590_v44 = vld [vmem:[%s10914_s21 + $0x640] sm:$0xff] }
  0xf6   : > { %v1686_v28 = vunpack.c.l.s8.bf16 %v590_v44  ;;  %v1694_v35 = vunpack.c.h.s8.bf16 %v590_v44  ;;  %v633_v44 = vld [vmem:[%s10914_s21 + $0x798] sm:$0xff] }
  0xf8   : > { %3384 = vmatpush1.bf16.msra.mxu0 %v1614_v29  ;;  %3958 = vmatpush1.bf16.msra.mxu1 %v1616_v30  ;;  %v1688_v29 = vunpack.c.l.s8.bf16 %v592_v27  ;;  %v1695_v30 = vunpack.c.h.s8.bf16 %v591_v20  ;;  %v624_v20 = vld [vmem:[%s10914_s21 + $0x750] sm:$0xff] }
  0xf9   : > { %3385 = vmatprep.subr.bf16.mxu0 %v1623_v32  ;;  %3959 = vmatprep.subr.bf16.mxu1 %v1625_v33  ;;  %v1697_v32 = vunpack.c.h.s8.bf16 %v593_v21  ;;  %v599_v33 = vld [vmem:[%s10914_s21 + $0x688] sm:$0xff] }
  0xfc   : > { %3386 = vmatpush1.bf16.msra.mxu0 %v1622_v36  ;;  %3960 = vmatpush1.bf16.msra.mxu1 %v1624_v37  ;;  %v1696_v36 = vunpack.c.h.s8.bf16 %v592_v27  ;;  %v1703_v37 = vunpack.c.l.s8.bf16 %v599_v33 }
  0xfd   : > { %3387 = vmatprep.subr.bf16.mxu0 %v1631_v40  ;;  %3961 = vmatprep.subr.bf16.mxu1 %v1633_v41  ;;  %v1705_v40 = vunpack.c.l.s8.bf16 %v601_v34  ;;  %v598_v41 = vld [vmem:[%s10914_s21 + $0x680] sm:$0xff] }
  0xfe   : > { %v1702_v43 = vunpack.c.l.s8.bf16 %v598_v41  ;;  %v1710_v52 = vunpack.c.h.s8.bf16 %v598_v41  ;;  %v641_v41 = vld [vmem:[%s10914_s21 + $0x7d8] sm:$0xff] }
 0x100   : > { %3388 = vmatpush1.bf16.msra.mxu0 %v1630_v45  ;;  %3962 = vmatpush1.bf16.msra.mxu1 %v1632_v46  ;;  %v1704_v45 = vunpack.c.l.s8.bf16 %v600_v42  ;;  %v1711_v46 = vunpack.c.h.s8.bf16 %v599_v33  ;;  %v632_v33 = vld [vmem:[%s10914_s21 + $0x790] sm:$0xff] }
 0x101   : > { %3389 = vmatprep.subr.bf16.mxu0 %v1639_v47  ;;  %3963 = vmatprep.subr.bf16.mxu1 %v1641_v48  ;;  %v1713_v47 = vunpack.c.h.s8.bf16 %v601_v34  ;;  %v607_v48 = vld [vmem:[%s10914_s21 + $0x6c8] sm:$0xff] }
 0x104   : > { %3390 = vmatpush1.bf16.msra.mxu0 %v1638_v54  ;;  %3964 = vmatpush1.bf16.msra.mxu1 %v1640_v55  ;;  %v1712_v54 = vunpack.c.h.s8.bf16 %v600_v42  ;;  %v1719_v55 = vunpack.c.l.s8.bf16 %v607_v48 }
 0x105   : > { %3391 = vmatprep.subr.bf16.mxu0 %v1647_v56  ;;  %3965 = vmatprep.subr.bf16.mxu1 %v1649_v57  ;;  %v1721_v56 = vunpack.c.l.s8.bf16 %v609_v51  ;;  %v606_v57 = vld [vmem:[%s10914_s21 + $0x6c0] sm:$0xff] }
 0x106   : > { %v1718_v60 = vunpack.c.l.s8.bf16 %v606_v57  ;;  %v1726_v2 = vunpack.c.h.s8.bf16 %v606_v57  ;;  %v647_v57 = vld [vmem:[%s10914_s21 + $0x808] sm:$0xff] }
 0x108   : > { %3392 = vmatpush1.bf16.msra.mxu0 %v1646_v50  ;;  %3966 = vmatpush1.bf16.msra.mxu1 %v1648_v62  ;;  %v1720_v50 = vunpack.c.l.s8.bf16 %v608_v59  ;;  %v1727_v62 = vunpack.c.h.s8.bf16 %v607_v48  ;;  %v640_v48 = vld [vmem:[%s10914_s21 + $0x7d0] sm:$0xff] }
 0x109   : > { %3393 = vmatprep.subr.bf16.mxu0 %v1655_v63  ;;  %3967 = vmatprep.subr.bf16.mxu1 %v1657_v0  ;;  %v1729_v63 = vunpack.c.h.s8.bf16 %v609_v51  ;;  %v615_v0 = vld [vmem:[%s10914_s21 + $0x708] sm:$0xff]  ;;  %v11143_v51 = vld [vmem:[%s10928_s29 + $0x8] sm:$0xff] }
 0x10c   : > { %3394 = vmatpush1.bf16.msra.mxu0 %v1654_v3  ;;  %3968 = vmatpush1.bf16.msra.mxu1 %v1656_v4  ;;  %v1728_v3 = vunpack.c.h.s8.bf16 %v608_v59  ;;  %v1735_v4 = vunpack.c.l.s8.bf16 %v615_v0  ;;  %v649_v59 = vld [vmem:[%s10914_s21 + $0x818] sm:$0xff] }
 0x10d   : > { %3395 = vmatprep.subr.bf16.mxu0 %v1663_v5  ;;  %3969 = vmatprep.subr.bf16.mxu1 %v1665_v6  ;;  %v1737_v5 = vunpack.c.l.s8.bf16 %v617_v1  ;;  %v614_v6 = vld [vmem:[%s10914_s21 + $0x700] sm:$0xff] }
 0x10e   : > { %v1734_v8 = vunpack.c.l.s8.bf16 %v614_v6  ;;  %v1742_v14 = vunpack.c.h.s8.bf16 %v614_v6 }
 0x110   : > { %3396 = vmatpush1.bf16.msra.mxu0 %v1662_v9  ;;  %3970 = vmatpush1.bf16.msra.mxu1 %v1664_v10  ;;  %v1736_v9 = vunpack.c.l.s8.bf16 %v616_v7  ;;  %v1743_v10 = vunpack.c.h.s8.bf16 %v615_v0  ;;  %v1801_v0 = vunpack.c.l.s8.bf16 %v649_v59 }
 0x111   : > { %3406 = vmatprep.subr.bf16.mxu0 %v1671_v11  ;;  %3980 = vmatprep.subr.bf16.mxu1 %v1673_v12  ;;  %v1745_v11 = vunpack.c.h.s8.bf16 %v617_v1  ;;  %v623_v12 = vld [vmem:[%s10914_s21 + $0x748] sm:$0xff]  ;;  %v646_v1 = vld [vmem:[%s10914_s21 + $0x800] sm:$0xff] }
 0x113   : > { %3398 = vmatmul.mubr.bf16.vlgmr.msra.gmra.mrb[0].mxu0 %v11104_v15  ;;  %3972 = vmatmul.mubr.bf16.vlgmr.msra.gmra.mrb[0].mxu1 %v11104_v15 }
 0x114   : > { %3407 = vmatpush1.bf16.msra.mxu0 %v1670_v16  ;;  %3981 = vmatpush1.bf16.msra.mxu1 %v1672_v17  ;;  %v1744_v16 = vunpack.c.h.s8.bf16 %v616_v7  ;;  %v1751_v17 = vunpack.c.l.s8.bf16 %v623_v12  ;;  %v1807_v7 = vunpack.c.h.s8.bf16 %v647_v57 }
 0x115   : > { %3408 = vmatprep.subr.bf16.mxu0 %v1679_v18  ;;  %3982 = vmatprep.subr.bf16.mxu1 %v1681_v19  ;;  %v1753_v18 = vunpack.c.l.s8.bf16 %v625_v13  ;;  %v622_v19 = vld [vmem:[%s10914_s21 + $0x740] sm:$0xff] }
 0x116   : > { %3438 = vmatprep.mubr.bf16.mxu0 %v11110_v22  ;;  %4012 = vmatprep.mubr.bf16.mxu1 %v11110_v22  ;;  %v1750_v21 = vunpack.c.l.s8.bf16 %v622_v19  ;;  %v1758_v27 = vunpack.c.h.s8.bf16 %v622_v19 }
 0x118   : > { %3409 = vmatpush1.bf16.msra.mxu0 %v1678_v24  ;;  %3983 = vmatpush1.bf16.msra.mxu1 %v1680_v23  ;;  %v1752_v24 = vunpack.c.l.s8.bf16 %v624_v20  ;;  %v1759_v23 = vunpack.c.h.s8.bf16 %v623_v12  ;;  %v1806_v12 = vunpack.c.h.s8.bf16 %v646_v1 }
 0x119   : > { %3410 = vmatprep.subr.bf16.mxu0 %v1687_v25  ;;  %3984 = vmatprep.subr.bf16.mxu1 %v1689_v26  ;;  %v1761_v25 = vunpack.c.h.s8.bf16 %v625_v13  ;;  %v631_v26 = vld [vmem:[%s10914_s21 + $0x788] sm:$0xff] }
 0x11c   : > { %3411 = vmatpush1.bf16.msra.mxu0 %v1686_v28  ;;  %3985 = vmatpush1.bf16.msra.mxu1 %v1688_v29  ;;  %v1760_v28 = vunpack.c.h.s8.bf16 %v624_v20  ;;  %v1767_v29 = vunpack.c.l.s8.bf16 %v631_v26 }
 0x11d   : > { %3412 = vmatprep.subr.bf16.mxu0 %v1695_v30  ;;  %3986 = vmatprep.subr.bf16.mxu1 %v1697_v32  ;;  %v1769_v30 = vunpack.c.l.s8.bf16 %v633_v44  ;;  %v630_v32 = vld [vmem:[%s10914_s21 + $0x780] sm:$0xff] }
 0x11e   : > { %v1766_v34 = vunpack.c.l.s8.bf16 %v630_v32  ;;  %v1774_v42 = vunpack.c.h.s8.bf16 %v630_v32 }
 0x120   : > { %3413 = vmatpush1.bf16.msra.mxu0 %v1694_v35  ;;  %3987 = vmatpush1.bf16.msra.mxu1 %v1696_v36  ;;  %v1768_v35 = vunpack.c.l.s8.bf16 %v632_v33  ;;  %v1775_v36 = vunpack.c.h.s8.bf16 %v631_v26 }
 0x121   : > { %3414 = vmatprep.subr.bf16.mxu0 %v1703_v37  ;;  %3988 = vmatprep.subr.bf16.mxu1 %v1705_v40  ;;  %v1777_v37 = vunpack.c.h.s8.bf16 %v633_v44  ;;  %v639_v40 = vld [vmem:[%s10914_s21 + $0x7c8] sm:$0xff] }
 0x124   : > { %3415 = vmatpush1.bf16.msra.mxu0 %v1702_v43  ;;  %3989 = vmatpush1.bf16.msra.mxu1 %v1704_v45  ;;  %v1776_v43 = vunpack.c.h.s8.bf16 %v632_v33  ;;  %v1783_v45 = vunpack.c.l.s8.bf16 %v639_v40 }
 0x125   : > { %3416 = vmatprep.subr.bf16.mxu0 %v1711_v46  ;;  %3990 = vmatprep.subr.bf16.mxu1 %v1713_v47  ;;  %v1785_v46 = vunpack.c.l.s8.bf16 %v641_v41  ;;  %v638_v47 = vld [vmem:[%s10914_s21 + $0x7c0] sm:$0xff] }
 0x128   : > { %3417 = vmatpush1.bf16.msra.mxu0 %v1710_v52  ;;  %3991 = vmatpush1.bf16.msra.mxu1 %v1712_v54  ;;  %v1782_v52 = vunpack.c.l.s8.bf16 %v638_v47  ;;  %v1784_v54 = vunpack.c.l.s8.bf16 %v640_v48 }
 0x129   : > { %3418 = vmatprep.subr.bf16.mxu0 %v1719_v55  ;;  %3992 = vmatprep.subr.bf16.mxu1 %v1721_v56  ;;  %v1791_v55 = vunpack.c.h.s8.bf16 %v639_v40  ;;  %v1793_v56 = vunpack.c.h.s8.bf16 %v641_v41 }
 0x12c   : > { %3419 = vmatpush1.bf16.msra.mxu0 %v1718_v60  ;;  %3993 = vmatpush1.bf16.msra.mxu1 %v1720_v50  ;;  %v11149_v60 = vrot.slane %v11143_v51, %v10975_v49  ;;  %v1790_v50 = vunpack.c.h.s8.bf16 %v638_v47 }
 0x12d   : > { %3420 = vmatprep.subr.bf16.mxu0 %v1727_v62  ;;  %3994 = vmatprep.subr.bf16.mxu1 %v1729_v63  ;;  %v1792_v62 = vunpack.c.h.s8.bf16 %v640_v48  ;;  %v1799_v63 = vunpack.c.l.s8.bf16 %v647_v57 }
 0x130   : > { %3421 = vmatpush1.bf16.msra.mxu0 %v1726_v2  ;;  %3995 = vmatpush1.bf16.msra.mxu1 %v1728_v3  ;;  %v648_v2 = vld [vmem:[%s10914_s21 + $0x810] sm:$0xff]  ;;  %v3148_v3 = vcombine.high %v11149_v60, %v11149_v60 }
 0x131   : > { %3422 = vmatprep.subr.bf16.mxu0 %v1735_v4  ;;  %3996 = vmatprep.subr.bf16.mxu1 %v1737_v5  ;;  %v11157_v4 = vcombine.high %v11104_v15, %v11104_v15  ;;  %v1798_v5 = vunpack.c.l.s8.bf16 %v646_v1  ;;  %v1800_v6 = vunpack.c.l.s8.bf16 %v648_v2  ;;  %v1808_v13 = vunpack.c.h.s8.bf16 %v648_v2 }
 0x134   : > { %3423 = vmatpush1.bf16.msra.mxu0 %v1734_v8  ;;  %3997 = vmatpush1.bf16.msra.mxu1 %v1736_v9  ;;  %v1809_v8 = vunpack.c.h.s8.bf16 %v649_v59  ;;  %v655_v9 = vld [vmem:[%s10914_s21 + $0x848] sm:$0xff] }
 0x135   : > { %3424 = vmatprep.subr.bf16.mxu0 %v1743_v10  ;;  %3998 = vmatprep.subr.bf16.mxu1 %v1745_v11  ;;  %v657_v10 = vld [vmem:[%s10914_s21 + $0x858] sm:$0xff]  ;;  %v11162_v11 = vrot.slane %v3148_v3, %v10975_v49 }
 0x138   : > { %3425 = vmatpush1.bf16.msra.mxu0 %v1742_v14  ;;  %3999 = vmatpush1.bf16.msra.mxu1 %v1744_v16  ;;  %v1815_v14 = vunpack.c.l.s8.bf16 %v655_v9  ;;  %v1817_v16 = vunpack.c.l.s8.bf16 %v657_v10 }
 0x139   : > { %3426 = vmatprep.subr.bf16.mxu0 %v1751_v17  ;;  %4000 = vmatprep.subr.bf16.mxu1 %v1753_v18  ;;  %v654_v17 = vld [vmem:[%s10914_s21 + $0x840] sm:$0xff]  ;;  %v656_v18 = vld [vmem:[%s10914_s21 + $0x850] sm:$0xff] }
 0x13a   : > { %v1814_v19 = vunpack.c.l.s8.bf16 %v654_v17  ;;  %v1816_v20 = vunpack.c.l.s8.bf16 %v656_v18  ;;  %v1822_v26 = vunpack.c.h.s8.bf16 %v654_v17  ;;  %v1824_v44 = vunpack.c.h.s8.bf16 %v656_v18 }
 0x13c   : > { %3427 = vmatpush1.bf16.msra.mxu0 %v1750_v21  ;;  %4001 = vmatpush1.bf16.msra.mxu1 %v1752_v24  ;;  %v1823_v21 = vunpack.c.h.s8.bf16 %v655_v9  ;;  %v1825_v24 = vunpack.c.h.s8.bf16 %v657_v10 }
 0x13d   : > { %3428 = vmatprep.subr.bf16.mxu0 %v1759_v23  ;;  %4002 = vmatprep.subr.bf16.mxu1 %v1761_v25  ;;  %v663_v23 = vld [vmem:[%s10914_s21 + $0x888] sm:$0xff]  ;;  %v665_v25 = vld [vmem:[%s10914_s21 + $0x898] sm:$0xff] }
 0x140   : > { %3429 = vmatpush1.bf16.msra.mxu0 %v1758_v27  ;;  %4003 = vmatpush1.bf16.msra.mxu1 %v1760_v28  ;;  %v1831_v27 = vunpack.c.l.s8.bf16 %v663_v23  ;;  %v1833_v28 = vunpack.c.l.s8.bf16 %v665_v25 }
 0x141   : > { %3430 = vmatprep.subr.bf16.mxu0 %v1767_v29  ;;  %4004 = vmatprep.subr.bf16.mxu1 %v1769_v30  ;;  %v662_v29 = vld [vmem:[%s10914_s21 + $0x880] sm:$0xff]  ;;  %v664_v30 = vld [vmem:[%s10914_s21 + $0x890] sm:$0xff] }
 0x142   : > { %v1830_v32 = vunpack.c.l.s8.bf16 %v662_v29  ;;  %v1832_v33 = vunpack.c.l.s8.bf16 %v664_v30  ;;  %v1838_v40 = vunpack.c.h.s8.bf16 %v662_v29  ;;  %v1840_v41 = vunpack.c.h.s8.bf16 %v664_v30 }
 0x144   : > { %3431 = vmatpush1.bf16.msra.mxu0 %v1766_v34  ;;  %4005 = vmatpush1.bf16.msra.mxu1 %v1768_v35  ;;  %v1839_v34 = vunpack.c.h.s8.bf16 %v663_v23  ;;  %v1841_v35 = vunpack.c.h.s8.bf16 %v665_v25 }
 0x145   : > { %3432 = vmatprep.subr.bf16.mxu0 %v1775_v36  ;;  %4006 = vmatprep.subr.bf16.mxu1 %v1777_v37  ;;  %v671_v36 = vld [vmem:[%s10914_s21 + $0x8c8] sm:$0xff]  ;;  %v673_v37 = vld [vmem:[%s10914_s21 + $0x8d8] sm:$0xff] }
 0x148   : > { %3433 = vmatpush1.bf16.msra.mxu0 %v1774_v42  ;;  %4007 = vmatpush1.bf16.msra.mxu1 %v1776_v43  ;;  %v1847_v42 = vunpack.c.l.s8.bf16 %v671_v36  ;;  %v1849_v43 = vunpack.c.l.s8.bf16 %v673_v37 }
 0x149   : > { %3434 = vmatprep.subr.bf16.mxu0 %v1783_v45  ;;  %4008 = vmatprep.subr.bf16.mxu1 %v1785_v46  ;;  %v670_v45 = vld [vmem:[%s10914_s21 + $0x8c0] sm:$0xff]  ;;  %v672_v46 = vld [vmem:[%s10914_s21 + $0x8d0] sm:$0xff] }
 0x14a   : > { %v1846_v47 = vunpack.c.l.s8.bf16 %v670_v45  ;;  %v1848_v48 = vunpack.c.l.s8.bf16 %v672_v46  ;;  %v1854_v57 = vunpack.c.h.s8.bf16 %v670_v45  ;;  %v1856_v59 = vunpack.c.h.s8.bf16 %v672_v46 }
 0x14c   : > { %3435 = vmatpush1.bf16.msra.mxu0 %v1782_v52  ;;  %4009 = vmatpush1.bf16.msra.mxu1 %v1784_v54  ;;  %v1855_v52 = vunpack.c.h.s8.bf16 %v671_v36  ;;  %v1857_v54 = vunpack.c.h.s8.bf16 %v673_v37 }
 0x14d   : > { %3436 = vmatprep.subr.bf16.mxu0 %v1791_v55  ;;  %4010 = vmatprep.subr.bf16.mxu1 %v1793_v56  ;;  %v679_v55 = vld [vmem:[%s10914_s21 + $0x908] sm:$0xff]  ;;  %v681_v56 = vld [vmem:[%s10914_s21 + $0x918] sm:$0xff] }
 0x14e   : > { %v1871_v3 = vunpack.c.h.s8.bf16 %v679_v55 }
 0x150   : > { %3437 = vmatpush1.bf16.msra.mxu0 %v1790_v50  ;;  %4011 = vmatpush1.bf16.msra.mxu1 %v1792_v62  ;;  %v1863_v50 = vunpack.c.l.s8.bf16 %v679_v55  ;;  %v1865_v62 = vunpack.c.l.s8.bf16 %v681_v56 }
 0x151   : > { %3447 = vmatprep.subr.bf16.mxu0 %v1799_v63  ;;  %4021 = vmatprep.subr.bf16.mxu1 %v1801_v0  ;;  %v678_v63 = vld [vmem:[%s10914_s21 + $0x900] sm:$0xff]  ;;  %v680_v0 = vld [vmem:[%s10914_s21 + $0x910] sm:$0xff] }
 0x152   : > { %v1862_v1 = vunpack.c.l.s8.bf16 %v678_v63  ;;  %v1864_v2 = vunpack.c.l.s8.bf16 %v680_v0  ;;  %v1872_v9 = vunpack.c.h.s8.bf16 %v680_v0 }
 0x153   : > { %3439 = vmatmul.mubr.bf16.vlgmr.msra.gmra.mrb[0].mxu0 %v11157_v4  ;;  %4013 = vmatmul.mubr.bf16.vlgmr.msra.gmra.mrb[0].mxu1 %v11157_v4 }
 0x154   : > { %3448 = vmatpush1.bf16.msra.mxu0 %v1798_v5  ;;  %4022 = vmatpush1.bf16.msra.mxu1 %v1800_v6  ;;  %v1873_v5 = vunpack.c.h.s8.bf16 %v681_v56  ;;  %v687_v6 = vld [vmem:[%s10914_s21 + $0x948] sm:$0xff] }
 0x155   : > { %3449 = vmatprep.subr.bf16.mxu0 %v1807_v7  ;;  %4023 = vmatprep.subr.bf16.mxu1 %v1809_v8  ;;  %v689_v7 = vld [vmem:[%s10914_s21 + $0x958] sm:$0xff]  ;;  %v1870_v8 = vunpack.c.h.s8.bf16 %v678_v63  ;;  %v1879_v10 = vunpack.c.l.s8.bf16 %v687_v6  ;;  %v1887_v18 = vunpack.c.h.s8.bf16 %v687_v6  ;;  %v11206_v6 = vcombine.high %v11162_v11, %v11162_v11 }
 0x156   : > { %3479 = vmatprep.mubr.bf16.mxu0 %v11162_v11  ;;  %4053 = vmatprep.mubr.bf16.mxu1 %v11162_v11 }
 0x158   : > { %3450 = vmatpush1.bf16.msra.mxu0 %v1806_v12  ;;  %4024 = vmatpush1.bf16.msra.mxu1 %v1808_v13  ;;  %v1881_v12 = vunpack.c.l.s8.bf16 %v689_v7  ;;  %v686_v13 = vld [vmem:[%s10914_s21 + $0x940] sm:$0xff] }
 0x159   : > { %3451 = vmatprep.subr.bf16.mxu0 %v1815_v14  ;;  %4025 = vmatprep.subr.bf16.mxu1 %v1817_v16  ;;  %v688_v14 = vld [vmem:[%s10914_s21 + $0x950] sm:$0xff]  ;;  %v1878_v16 = vunpack.c.l.s8.bf16 %v686_v13 }
 0x15a   : > { %v1880_v17 = vunpack.c.l.s8.bf16 %v688_v14  ;;  %v1888_v23 = vunpack.c.h.s8.bf16 %v688_v14 }
 0x15c   : > { %3452 = vmatpush1.bf16.msra.mxu0 %v1814_v19  ;;  %4026 = vmatpush1.bf16.msra.mxu1 %v1816_v20  ;;  %v1889_v19 = vunpack.c.h.s8.bf16 %v689_v7  ;;  %v695_v20 = vld [vmem:[%s10914_s21 + $0x988] sm:$0xff] }
 0x15d   : > { %3453 = vmatprep.subr.bf16.mxu0 %v1823_v21  ;;  %4027 = vmatprep.subr.bf16.mxu1 %v1825_v24  ;;  %v697_v21 = vld [vmem:[%s10914_s21 + $0x998] sm:$0xff]  ;;  %v1886_v24 = vunpack.c.h.s8.bf16 %v686_v13  ;;  %v1895_v25 = vunpack.c.l.s8.bf16 %v695_v20  ;;  %v1903_v30 = vunpack.c.h.s8.bf16 %v695_v20 }
 0x160   : > { %3454 = vmatpush1.bf16.msra.mxu0 %v1822_v26  ;;  %4028 = vmatpush1.bf16.msra.mxu1 %v1824_v44  ;;  %v1897_v26 = vunpack.c.l.s8.bf16 %v697_v21  ;;  %v694_v44 = vld [vmem:[%s10914_s21 + $0x980] sm:$0xff] }
 0x161   : > { %3455 = vmatprep.subr.bf16.mxu0 %v1831_v27  ;;  %4029 = vmatprep.subr.bf16.mxu1 %v1833_v28  ;;  %v696_v27 = vld [vmem:[%s10914_s21 + $0x990] sm:$0xff]  ;;  %v1894_v28 = vunpack.c.l.s8.bf16 %v694_v44 }
 0x162   : > { %v1896_v29 = vunpack.c.l.s8.bf16 %v696_v27  ;;  %v1904_v36 = vunpack.c.h.s8.bf16 %v696_v27 }
 0x164   : > { %3456 = vmatpush1.bf16.msra.mxu0 %v1830_v32  ;;  %4030 = vmatpush1.bf16.msra.mxu1 %v1832_v33  ;;  %v1905_v32 = vunpack.c.h.s8.bf16 %v697_v21  ;;  %v703_v33 = vld [vmem:[%s10914_s21 + $0x9c8] sm:$0xff] }
 0x165   : > { %3457 = vmatprep.subr.bf16.mxu0 %v1839_v34  ;;  %4031 = vmatprep.subr.bf16.mxu1 %v1841_v35  ;;  %v705_v34 = vld [vmem:[%s10914_s21 + $0x9d8] sm:$0xff]  ;;  %v1902_v35 = vunpack.c.h.s8.bf16 %v694_v44  ;;  %v1911_v37 = vunpack.c.l.s8.bf16 %v703_v33  ;;  %v1919_v46 = vunpack.c.h.s8.bf16 %v703_v33 }
 0x168   : > { %3458 = vmatpush1.bf16.msra.mxu0 %v1838_v40  ;;  %4032 = vmatpush1.bf16.msra.mxu1 %v1840_v41  ;;  %v1913_v40 = vunpack.c.l.s8.bf16 %v705_v34  ;;  %v702_v41 = vld [vmem:[%s10914_s21 + $0x9c0] sm:$0xff] }
 0x169   : > { %3459 = vmatprep.subr.bf16.mxu0 %v1847_v42  ;;  %4033 = vmatprep.subr.bf16.mxu1 %v1849_v43  ;;  %v704_v42 = vld [vmem:[%s10914_s21 + $0x9d0] sm:$0xff]  ;;  %v1910_v43 = vunpack.c.l.s8.bf16 %v702_v41 }
 0x16a   : > { %v1912_v45 = vunpack.c.l.s8.bf16 %v704_v42  ;;  %v1920_v55 = vunpack.c.h.s8.bf16 %v704_v42 }
 0x16c   : > { %3460 = vmatpush1.bf16.msra.mxu0 %v1846_v47  ;;  %4034 = vmatpush1.bf16.msra.mxu1 %v1848_v48  ;;  %v1921_v47 = vunpack.c.h.s8.bf16 %v705_v34  ;;  %v711_v48 = vld [vmem:[%s10914_s21 + $0xa08] sm:$0xff] }
 0x16d   : > { %3461 = vmatprep.subr.bf16.mxu0 %v1855_v52  ;;  %4035 = vmatprep.subr.bf16.mxu1 %v1857_v54  ;;  %v713_v52 = vld [vmem:[%s10914_s21 + $0xa18] sm:$0xff]  ;;  %v1918_v54 = vunpack.c.h.s8.bf16 %v702_v41  ;;  %v1927_v56 = vunpack.c.l.s8.bf16 %v711_v48 }
 0x170   : > { %3462 = vmatpush1.bf16.msra.mxu0 %v1854_v57  ;;  %4036 = vmatpush1.bf16.msra.mxu1 %v1856_v59  ;;  %v1929_v57 = vunpack.c.l.s8.bf16 %v713_v52  ;;  %v710_v59 = vld [vmem:[%s10914_s21 + $0xa00] sm:$0xff] }
 0x171   : > { %3463 = vmatprep.subr.bf16.mxu0 %v1863_v50  ;;  %4037 = vmatprep.subr.bf16.mxu1 %v1865_v62  ;;  %v712_v50 = vld [vmem:[%s10914_s21 + $0xa10] sm:$0xff]  ;;  %v11200_v62 = vrot.slane %v11149_v60, %v10975_v49  ;;  %v1926_v63 = vunpack.c.l.s8.bf16 %v710_v59  ;;  %v1934_v60 = vunpack.c.h.s8.bf16 %v710_v59 }
 0x172   : > { %v1928_v0 = vunpack.c.l.s8.bf16 %v712_v50  ;;  %v1936_v7 = vunpack.c.h.s8.bf16 %v712_v50 }
 0x174   : > { %3464 = vmatpush1.bf16.msra.mxu0 %v1862_v1  ;;  %4038 = vmatpush1.bf16.msra.mxu1 %v1864_v2  ;;  %v1935_v1 = vunpack.c.h.s8.bf16 %v711_v48  ;;  %v1937_v2 = vunpack.c.h.s8.bf16 %v713_v52 }
 0x175   : > { %3465 = vmatprep.subr.bf16.mxu0 %v1871_v3  ;;  %4039 = vmatprep.subr.bf16.mxu1 %v1873_v5  ;;  %v719_v3 = vld [vmem:[%s10914_s21 + $0xa48] sm:$0xff]  ;;  %v721_v5 = vld [vmem:[%s10914_s21 + $0xa58] sm:$0xff] }
 0x178   : > { %3466 = vmatpush1.bf16.msra.mxu0 %v1870_v8  ;;  %4040 = vmatpush1.bf16.msra.mxu1 %v1872_v9  ;;  %v1943_v8 = vunpack.c.l.s8.bf16 %v719_v3  ;;  %v1945_v9 = vunpack.c.l.s8.bf16 %v721_v5 }
 0x179   : > { %3467 = vmatprep.subr.bf16.mxu0 %v1879_v10  ;;  %4041 = vmatprep.subr.bf16.mxu1 %v1881_v12  ;;  %v718_v10 = vld [vmem:[%s10914_s21 + $0xa40] sm:$0xff]  ;;  %v720_v12 = vld [vmem:[%s10914_s21 + $0xa50] sm:$0xff] }
 0x17a   : > { %v1942_v13 = vunpack.c.l.s8.bf16 %v718_v10  ;;  %v1944_v14 = vunpack.c.l.s8.bf16 %v720_v12  ;;  %v1950_v20 = vunpack.c.h.s8.bf16 %v718_v10  ;;  %v1952_v21 = vunpack.c.h.s8.bf16 %v720_v12 }
 0x17c   : > { %3468 = vmatpush1.bf16.msra.mxu0 %v1878_v16  ;;  %4042 = vmatpush1.bf16.msra.mxu1 %v1880_v17  ;;  %v1951_v16 = vunpack.c.h.s8.bf16 %v719_v3  ;;  %v1953_v17 = vunpack.c.h.s8.bf16 %v721_v5 }
 0x17d   : > { %3469 = vmatprep.subr.bf16.mxu0 %v1887_v18  ;;  %4043 = vmatprep.subr.bf16.mxu1 %v1889_v19  ;;  %v727_v18 = vld [vmem:[%s10914_s21 + $0xa88] sm:$0xff]  ;;  %v729_v19 = vld [vmem:[%s10914_s21 + $0xa98] sm:$0xff] }
 0x180   : > { %3470 = vmatpush1.bf16.msra.mxu0 %v1886_v24  ;;  %4044 = vmatpush1.bf16.msra.mxu1 %v1888_v23  ;;  %v1959_v24 = vunpack.c.l.s8.bf16 %v727_v18  ;;  %v1961_v23 = vunpack.c.l.s8.bf16 %v729_v19 }
 0x181   : > { %3471 = vmatprep.subr.bf16.mxu0 %v1895_v25  ;;  %4045 = vmatprep.subr.bf16.mxu1 %v1897_v26  ;;  %v726_v25 = vld [vmem:[%s10914_s21 + $0xa80] sm:$0xff]  ;;  %v728_v26 = vld [vmem:[%s10914_s21 + $0xa90] sm:$0xff] }
 0x182   : > { %v1958_v44 = vunpack.c.l.s8.bf16 %v726_v25  ;;  %v1960_v27 = vunpack.c.l.s8.bf16 %v728_v26  ;;  %v1966_v33 = vunpack.c.h.s8.bf16 %v726_v25  ;;  %v1968_v34 = vunpack.c.h.s8.bf16 %v728_v26 }
 0x184   : > { %3472 = vmatpush1.bf16.msra.mxu0 %v1894_v28  ;;  %4046 = vmatpush1.bf16.msra.mxu1 %v1896_v29  ;;  %v1967_v28 = vunpack.c.h.s8.bf16 %v727_v18  ;;  %v1969_v29 = vunpack.c.h.s8.bf16 %v729_v19 }
 0x185   : > { %3473 = vmatprep.subr.bf16.mxu0 %v1903_v30  ;;  %4047 = vmatprep.subr.bf16.mxu1 %v1905_v32  ;;  %v735_v30 = vld [vmem:[%s10914_s21 + $0xac8] sm:$0xff]  ;;  %v737_v32 = vld [vmem:[%s10914_s21 + $0xad8] sm:$0xff] }
 0x188   : > { %3474 = vmatpush1.bf16.msra.mxu0 %v1902_v35  ;;  %4048 = vmatpush1.bf16.msra.mxu1 %v1904_v36  ;;  %v1975_v35 = vunpack.c.l.s8.bf16 %v735_v30  ;;  %v1977_v36 = vunpack.c.l.s8.bf16 %v737_v32 }
 0x189   : > { %3475 = vmatprep.subr.bf16.mxu0 %v1911_v37  ;;  %4049 = vmatprep.subr.bf16.mxu1 %v1913_v40  ;;  %v734_v37 = vld [vmem:[%s10914_s21 + $0xac0] sm:$0xff]  ;;  %v736_v40 = vld [vmem:[%s10914_s21 + $0xad0] sm:$0xff] }
 0x18a   : > { %v1974_v41 = vunpack.c.l.s8.bf16 %v734_v37  ;;  %v1976_v42 = vunpack.c.l.s8.bf16 %v736_v40  ;;  %v1982_v48 = vunpack.c.h.s8.bf16 %v734_v37  ;;  %v1984_v52 = vunpack.c.h.s8.bf16 %v736_v40 }
 0x18b   : > { %v3133_v37 = vcombine.high %v11143_v51, %v11143_v51 }
 0x18c   : > { %3476 = vmatpush1.bf16.msra.mxu0 %v1910_v43  ;;  %4050 = vmatpush1.bf16.msra.mxu1 %v1912_v45  ;;  %v1983_v43 = vunpack.c.h.s8.bf16 %v735_v30  ;;  %v1985_v45 = vunpack.c.h.s8.bf16 %v737_v32 }
 0x18d   : > { %3477 = vmatprep.subr.bf16.mxu0 %v1919_v46  ;;  %4051 = vmatprep.subr.bf16.mxu1 %v1921_v47  ;;  %v743_v46 = vld [vmem:[%s10914_s21 + $0xb08] sm:$0xff]  ;;  %v745_v47 = vld [vmem:[%s10914_s21 + $0xb18] sm:$0xff] }
 0x190   : > { %3478 = vmatpush1.bf16.msra.mxu0 %v1918_v54  ;;  %4052 = vmatpush1.bf16.msra.mxu1 %v1920_v55  ;;  %v1991_v54 = vunpack.c.l.s8.bf16 %v743_v46  ;;  %v1993_v55 = vunpack.c.l.s8.bf16 %v745_v47 }
 0x191   : > { %3488 = vmatprep.subr.bf16.mxu0 %v1927_v56  ;;  %4062 = vmatprep.subr.bf16.mxu1 %v1929_v57  ;;  %v742_v56 = vld [vmem:[%s10914_s21 + $0xb00] sm:$0xff]  ;;  %v744_v57 = vld [vmem:[%s10914_s21 + $0xb10] sm:$0xff] }
 0x192   : > { %v1990_v59 = vunpack.c.l.s8.bf16 %v742_v56  ;;  %v1992_v50 = vunpack.c.l.s8.bf16 %v744_v57  ;;  %v1998_v3 = vunpack.c.h.s8.bf16 %v742_v56  ;;  %v2000_v5 = vunpack.c.h.s8.bf16 %v744_v57  ;;  %v776_v56 = vld [vmem:[%s10914_s21 + $0xc10] sm:$0xff] }
 0x193   : > { %3480 = vmatmul.mubr.bf16.vlgmr.msra.gmra.mrb[0].mxu0 %v11200_v62  ;;  %4054 = vmatmul.mubr.bf16.vlgmr.msra.gmra.mrb[0].mxu1 %v11200_v62 }
 0x194   : > { %3489 = vmatpush1.bf16.msra.mxu0 %v1926_v63  ;;  %4063 = vmatpush1.bf16.msra.mxu1 %v1928_v0  ;;  %v1999_v63 = vunpack.c.h.s8.bf16 %v743_v46  ;;  %v2001_v0 = vunpack.c.h.s8.bf16 %v745_v47  ;;  %v777_v46 = vld [vmem:[%s10914_s21 + $0xc18] sm:$0xff]  ;;  %v11243_v47 = vrot.slane %v3133_v37, %v10975_v49  ;;  %v798_v37 = vld [vmem:[%s10914_s21 + $0xcc0] sm:$0xff] }
 0x195   : > { %3490 = vmatprep.subr.bf16.mxu0 %v1935_v1  ;;  %4064 = vmatprep.subr.bf16.mxu1 %v1937_v2  ;;  %v751_v1 = vld [vmem:[%s10914_s21 + $0xb48] sm:$0xff]  ;;  %v753_v2 = vld [vmem:[%s10914_s21 + $0xb58] sm:$0xff] }
 0x196   : > { %3520 = vmatprep.mubr.bf16.mxu0 %v11206_v6  ;;  %4094 = vmatprep.mubr.bf16.mxu1 %v11206_v6  ;;  %v3149_v57 = vcombine.high %v11243_v47, %v11243_v47 }
 0x198   : > { %3491 = vmatpush1.bf16.msra.mxu0 %v1934_v60  ;;  %4065 = vmatpush1.bf16.msra.mxu1 %v1936_v7  ;;  %v2007_v60 = vunpack.c.l.s8.bf16 %v751_v1  ;;  %v2009_v7 = vunpack.c.l.s8.bf16 %v753_v2 }
 0x199   : > { %3492 = vmatprep.subr.bf16.mxu0 %v1943_v8  ;;  %4066 = vmatprep.subr.bf16.mxu1 %v1945_v9  ;;  %v750_v8 = vld [vmem:[%s10914_s21 + $0xb40] sm:$0xff]  ;;  %v752_v9 = vld [vmem:[%s10914_s21 + $0xb50] sm:$0xff] }
 0x19a   : > { %v2006_v10 = vunpack.c.l.s8.bf16 %v750_v8  ;;  %v2008_v12 = vunpack.c.l.s8.bf16 %v752_v9  ;;  %v2014_v18 = vunpack.c.h.s8.bf16 %v750_v8  ;;  %v2016_v19 = vunpack.c.h.s8.bf16 %v752_v9 }
 0x19c   : > { %3493 = vmatpush1.bf16.msra.mxu0 %v1942_v13  ;;  %4067 = vmatpush1.bf16.msra.mxu1 %v1944_v14  ;;  %v2015_v13 = vunpack.c.h.s8.bf16 %v751_v1  ;;  %v2017_v14 = vunpack.c.h.s8.bf16 %v753_v2  ;;  %v2065_v1 = vunpack.c.h.s8.bf16 %v777_v46  ;;  %v783_v2 = vld [vmem:[%s10914_s21 + $0xc48] sm:$0xff] }
 0x19d   : > { %3494 = vmatprep.subr.bf16.mxu0 %v1951_v16  ;;  %4068 = vmatprep.subr.bf16.mxu1 %v1953_v17  ;;  %v759_v16 = vld [vmem:[%s10914_s21 + $0xb88] sm:$0xff]  ;;  %v761_v17 = vld [vmem:[%s10914_s21 + $0xb98] sm:$0xff]  ;;  %v2071_v8 = vunpack.c.l.s8.bf16 %v783_v2 }
 0x1a0   : > { %3495 = vmatpush1.bf16.msra.mxu0 %v1950_v20  ;;  %4069 = vmatpush1.bf16.msra.mxu1 %v1952_v21  ;;  %v2023_v20 = vunpack.c.l.s8.bf16 %v759_v16  ;;  %v2025_v21 = vunpack.c.l.s8.bf16 %v761_v17 }
 0x1a1   : > { %3496 = vmatprep.subr.bf16.mxu0 %v1959_v24  ;;  %4070 = vmatprep.subr.bf16.mxu1 %v1961_v23  ;;  %v758_v24 = vld [vmem:[%s10914_s21 + $0xb80] sm:$0xff]  ;;  %v760_v23 = vld [vmem:[%s10914_s21 + $0xb90] sm:$0xff] }
 0x1a2   : > { %v2022_v25 = vunpack.c.l.s8.bf16 %v758_v24  ;;  %v2024_v26 = vunpack.c.l.s8.bf16 %v760_v23  ;;  %v2030_v30 = vunpack.c.h.s8.bf16 %v758_v24  ;;  %v2032_v32 = vunpack.c.h.s8.bf16 %v760_v23 }
 0x1a4   : > { %3497 = vmatpush1.bf16.msra.mxu0 %v1958_v44  ;;  %4071 = vmatpush1.bf16.msra.mxu1 %v1960_v27  ;;  %v2031_v44 = vunpack.c.h.s8.bf16 %v759_v16  ;;  %v2033_v27 = vunpack.c.h.s8.bf16 %v761_v17  ;;  %v2079_v16 = vunpack.c.h.s8.bf16 %v783_v2  ;;  %v815_v2 = vld [vmem:[%s10914_s21 + $0xd48] sm:$0xff] }
 0x1a5   : > { %3498 = vmatprep.subr.bf16.mxu0 %v1967_v28  ;;  %4072 = vmatprep.subr.bf16.mxu1 %v1969_v29  ;;  %v767_v28 = vld [vmem:[%s10914_s21 + $0xbc8] sm:$0xff]  ;;  %v769_v29 = vld [vmem:[%s10914_s21 + $0xbd8] sm:$0xff] }
 0x1a8   : > { %3499 = vmatpush1.bf16.msra.mxu0 %v1966_v33  ;;  %4073 = vmatpush1.bf16.msra.mxu1 %v1968_v34  ;;  %v2039_v33 = vunpack.c.l.s8.bf16 %v767_v28  ;;  %v2041_v34 = vunpack.c.l.s8.bf16 %v769_v29 }
 0x1a9   : > { %3500 = vmatprep.subr.bf16.mxu0 %v1975_v35  ;;  %4074 = vmatprep.subr.bf16.mxu1 %v1977_v36  ;;  %v766_v35 = vld [vmem:[%s10914_s21 + $0xbc0] sm:$0xff]  ;;  %v768_v36 = vld [vmem:[%s10914_s21 + $0xbd0] sm:$0xff] }
 0x1aa   : > { %v2038_v40 = vunpack.c.l.s8.bf16 %v766_v35 }
 0x1ac   : > { %3501 = vmatpush1.bf16.msra.mxu0 %v1974_v41  ;;  %4075 = vmatpush1.bf16.msra.mxu1 %v1976_v42  ;;  %v2040_v41 = vunpack.c.l.s8.bf16 %v768_v36  ;;  %v2047_v42 = vunpack.c.h.s8.bf16 %v767_v28 }
 0x1ad   : > { %3502 = vmatprep.subr.bf16.mxu0 %v1983_v43  ;;  %4076 = vmatprep.subr.bf16.mxu1 %v1985_v45  ;;  %v2049_v43 = vunpack.c.h.s8.bf16 %v769_v29  ;;  %v775_v45 = vld [vmem:[%s10914_s21 + $0xc08] sm:$0xff] }
 0x1ae   : > { %v2055_v51 = vunpack.c.l.s8.bf16 %v775_v45 }
 0x1b0   : > { %3503 = vmatpush1.bf16.msra.mxu0 %v1982_v48  ;;  %4077 = vmatpush1.bf16.msra.mxu1 %v1984_v52  ;;  %v2046_v48 = vunpack.c.h.s8.bf16 %v766_v35  ;;  %v2048_v52 = vunpack.c.h.s8.bf16 %v768_v36 }
 0x1b1   : > { %3504 = vmatprep.subr.bf16.mxu0 %v1991_v54  ;;  %4078 = vmatprep.subr.bf16.mxu1 %v1993_v55  ;;  %v2057_v54 = vunpack.c.l.s8.bf16 %v777_v46  ;;  %v774_v55 = vld [vmem:[%s10914_s21 + $0xc00] sm:$0xff]  ;;  %v807_v46 = vld [vmem:[%s10914_s21 + $0xd08] sm:$0xff] }
 0x1b4   : > { %3505 = vmatpush1.bf16.msra.mxu0 %v1990_v59  ;;  %4079 = vmatpush1.bf16.msra.mxu1 %v1992_v50  ;;  %v11251_v59 = vcombine.high %v11200_v62, %v11200_v62  ;;  %v2054_v50 = vunpack.c.l.s8.bf16 %v774_v55 }
 0x1b5   : > { %3506 = vmatprep.subr.bf16.mxu0 %v1999_v63  ;;  %4080 = vmatprep.subr.bf16.mxu1 %v2001_v0  ;;  %v2056_v63 = vunpack.c.l.s8.bf16 %v776_v56  ;;  %v2063_v0 = vunpack.c.h.s8.bf16 %v775_v45 }
 0x1b8   : > { %3507 = vmatpush1.bf16.msra.mxu0 %v1998_v3  ;;  %4081 = vmatpush1.bf16.msra.mxu1 %v2000_v5  ;;  %v785_v3 = vld [vmem:[%s10914_s21 + $0xc58] sm:$0xff]  ;;  %v11256_v5 = vrot.slane %v3149_v57, %v10975_v49  ;;  %v808_v57 = vld [vmem:[%s10914_s21 + $0xd10] sm:$0xff] }
 0x1b9   : > { %3508 = vmatprep.subr.bf16.mxu0 %v2007_v60  ;;  %4082 = vmatprep.subr.bf16.mxu1 %v2009_v7  ;;  %v2062_v60 = vunpack.c.h.s8.bf16 %v774_v55  ;;  %v2064_v7 = vunpack.c.h.s8.bf16 %v776_v56  ;;  %v2073_v9 = vunpack.c.l.s8.bf16 %v785_v3  ;;  %v2081_v17 = vunpack.c.h.s8.bf16 %v785_v3  ;;  %v806_v56 = vld [vmem:[%s10914_s21 + $0xd00] sm:$0xff]  ;;  %v817_v3 = vld [vmem:[%s10914_s21 + $0xd58] sm:$0xff] }
 0x1bc   : > { %3509 = vmatpush1.bf16.msra.mxu0 %v2006_v10  ;;  %4083 = vmatpush1.bf16.msra.mxu1 %v2008_v12  ;;  %v782_v10 = vld [vmem:[%s10914_s21 + $0xc40] sm:$0xff]  ;;  %v784_v12 = vld [vmem:[%s10914_s21 + $0xc50] sm:$0xff] }
 0x1bd   : > { %3510 = vmatprep.subr.bf16.mxu0 %v2015_v13  ;;  %4084 = vmatprep.subr.bf16.mxu1 %v2017_v14  ;;  %v2070_v13 = vunpack.c.l.s8.bf16 %v782_v10  ;;  %v2072_v14 = vunpack.c.l.s8.bf16 %v784_v12 }
 0x1c0   : > { %3511 = vmatpush1.bf16.msra.mxu0 %v2014_v18  ;;  %4085 = vmatpush1.bf16.msra.mxu1 %v2016_v19  ;;  %v791_v18 = vld [vmem:[%s10914_s21 + $0xc88] sm:$0xff]  ;;  %v793_v19 = vld [vmem:[%s10914_s21 + $0xc98] sm:$0xff] }
 0x1c1   : > { %3512 = vmatprep.subr.bf16.mxu0 %v2023_v20  ;;  %4086 = vmatprep.subr.bf16.mxu1 %v2025_v21  ;;  %v2078_v20 = vunpack.c.h.s8.bf16 %v782_v10  ;;  %v2080_v21 = vunpack.c.h.s8.bf16 %v784_v12  ;;  %v2087_v24 = vunpack.c.l.s8.bf16 %v791_v18  ;;  %v2089_v23 = vunpack.c.l.s8.bf16 %v793_v19  ;;  %v814_v10 = vld [vmem:[%s10914_s21 + $0xd40] sm:$0xff]  ;;  %v816_v12 = vld [vmem:[%s10914_s21 + $0xd50] sm:$0xff] }
 0x1c2   : > { %v2095_v28 = vunpack.c.h.s8.bf16 %v791_v18  ;;  %v2097_v29 = vunpack.c.h.s8.bf16 %v793_v19  ;;  %v823_v18 = vld [vmem:[%s10914_s21 + $0xd88] sm:$0xff]  ;;  %v825_v19 = vld [vmem:[%s10914_s21 + $0xd98] sm:$0xff] }
 0x1c4   : > { %3513 = vmatpush1.bf16.msra.mxu0 %v2022_v25  ;;  %4087 = vmatpush1.bf16.msra.mxu1 %v2024_v26  ;;  %v790_v25 = vld [vmem:[%s10914_s21 + $0xc80] sm:$0xff]  ;;  %v792_v26 = vld [vmem:[%s10914_s21 + $0xc90] sm:$0xff] }
 0x1c5   : > { %3514 = vmatprep.subr.bf16.mxu0 %v2031_v44  ;;  %4088 = vmatprep.subr.bf16.mxu1 %v2033_v27  ;;  %v2086_v44 = vunpack.c.l.s8.bf16 %v790_v25  ;;  %v2088_v27 = vunpack.c.l.s8.bf16 %v792_v26 }
 0x1c8   : > { %3515 = vmatpush1.bf16.msra.mxu0 %v2030_v30  ;;  %4089 = vmatpush1.bf16.msra.mxu1 %v2032_v32  ;;  %v799_v30 = vld [vmem:[%s10914_s21 + $0xcc8] sm:$0xff]  ;;  %v801_v32 = vld [vmem:[%s10914_s21 + $0xcd8] sm:$0xff] }
 0x1c9   : > { %3516 = vmatprep.subr.bf16.mxu0 %v2039_v33  ;;  %4090 = vmatprep.subr.bf16.mxu1 %v2041_v34  ;;  %v2094_v33 = vunpack.c.h.s8.bf16 %v790_v25  ;;  %v2096_v34 = vunpack.c.h.s8.bf16 %v792_v26  ;;  %v2103_v35 = vunpack.c.l.s8.bf16 %v799_v30  ;;  %v2105_v36 = vunpack.c.l.s8.bf16 %v801_v32  ;;  %v822_v25 = vld [vmem:[%s10914_s21 + $0xd80] sm:$0xff]  ;;  %v824_v26 = vld [vmem:[%s10914_s21 + $0xd90] sm:$0xff] }
 0x1ca   : > { %v2113_v45 = vunpack.c.h.s8.bf16 %v801_v32  ;;  %v833_v32 = vld [vmem:[%s10914_s21 + $0xdd8] sm:$0xff] }
 0x1cc   : > { %3517 = vmatpush1.bf16.msra.mxu0 %v2038_v40  ;;  %4091 = vmatpush1.bf16.msra.mxu1 %v2040_v41  ;;  %v800_v40 = vld [vmem:[%s10914_s21 + $0xcd0] sm:$0xff]  ;;  %v2102_v41 = vunpack.c.l.s8.bf16 %v798_v37 }
 0x1cd   : > { %3518 = vmatprep.subr.bf16.mxu0 %v2047_v42  ;;  %4092 = vmatprep.subr.bf16.mxu1 %v2049_v43  ;;  %v2104_v42 = vunpack.c.l.s8.bf16 %v800_v40  ;;  %v2111_v43 = vunpack.c.h.s8.bf16 %v799_v30  ;;  %v831_v30 = vld [vmem:[%s10914_s21 + $0xdc8] sm:$0xff] }
 0x1d0   : > { %3519 = vmatpush1.bf16.msra.mxu0 %v2046_v48  ;;  %4093 = vmatpush1.bf16.msra.mxu1 %v2048_v52  ;;  %v809_v48 = vld [vmem:[%s10914_s21 + $0xd18] sm:$0xff]  ;;  %v2110_v52 = vunpack.c.h.s8.bf16 %v798_v37  ;;  %v830_v37 = vld [vmem:[%s10914_s21 + $0xdc0] sm:$0xff] }
 0x1d1   : > { %3529 = vmatprep.subr.bf16.mxu0 %v2055_v51  ;;  %4103 = vmatprep.subr.bf16.mxu1 %v2057_v54  ;;  %v2112_v51 = vunpack.c.h.s8.bf16 %v800_v40  ;;  %v2119_v54 = vunpack.c.l.s8.bf16 %v807_v46  ;;  %v2121_v55 = vunpack.c.l.s8.bf16 %v809_v48  ;;  %v832_v40 = vld [vmem:[%s10914_s21 + $0xdd0] sm:$0xff] }
 0x1d3   : > { %3521 = vmatmul.mubr.bf16.vlgmr.msra.gmra.mrb[0].mxu0 %v11251_v59  ;;  %4095 = vmatmul.mubr.bf16.vlgmr.msra.gmra.mrb[0].mxu1 %v11251_v59 }
 0x1d4   : > { %3530 = vmatpush1.bf16.msra.mxu0 %v2054_v50  ;;  %4104 = vmatpush1.bf16.msra.mxu1 %v2056_v63  ;;  %v2118_v50 = vunpack.c.l.s8.bf16 %v806_v56  ;;  %v2120_v63 = vunpack.c.l.s8.bf16 %v808_v57 }
 0x1d5   : > { %3531 = vmatprep.subr.bf16.mxu0 %v2063_v0  ;;  %4105 = vmatprep.subr.bf16.mxu1 %v2065_v1  ;;  %v2127_v0 = vunpack.c.h.s8.bf16 %v807_v46  ;;  %v2129_v1 = vunpack.c.h.s8.bf16 %v809_v48  ;;  %v839_v46 = vld [vmem:[%s10914_s21 + $0xe08] sm:$0xff]  ;;  %v841_v48 = vld [vmem:[%s10914_s21 + $0xe18] sm:$0xff] }
 0x1d6   : > { %3561 = vmatprep.mubr.bf16.mxu0 %v11256_v5  ;;  %4135 = vmatprep.mubr.bf16.mxu1 %v11256_v5 }
 0x1d8   : > { %3532 = vmatpush1.bf16.msra.mxu0 %v2062_v60  ;;  %4106 = vmatpush1.bf16.msra.mxu1 %v2064_v7  ;;  %v2126_v60 = vunpack.c.h.s8.bf16 %v806_v56  ;;  %v2128_v7 = vunpack.c.h.s8.bf16 %v808_v57  ;;  %v838_v56 = vld [vmem:[%s10914_s21 + $0xe00] sm:$0xff]  ;;  %v840_v57 = vld [vmem:[%s10914_s21 + $0xe10] sm:$0xff] }
 0x1d9   : > { %3533 = vmatprep.subr.bf16.mxu0 %v2071_v8  ;;  %4107 = vmatprep.subr.bf16.mxu1 %v2073_v9  ;;  %v2135_v8 = vunpack.c.l.s8.bf16 %v815_v2  ;;  %v2137_v9 = vunpack.c.l.s8.bf16 %v817_v3 }
 0x1dc   : > { %3534 = vmatpush1.bf16.msra.mxu0 %v2070_v13  ;;  %4108 = vmatpush1.bf16.msra.mxu1 %v2072_v14  ;;  %v2134_v13 = vunpack.c.l.s8.bf16 %v814_v10  ;;  %v2136_v14 = vunpack.c.l.s8.bf16 %v816_v12 }
 0x1dd   : > { %3535 = vmatprep.subr.bf16.mxu0 %v2079_v16  ;;  %4109 = vmatprep.subr.bf16.mxu1 %v2081_v17  ;;  %v2143_v16 = vunpack.c.h.s8.bf16 %v815_v2  ;;  %v2145_v17 = vunpack.c.h.s8.bf16 %v817_v3  ;;  %v2193_v2 = vunpack.c.h.s8.bf16 %v841_v48  ;;  %v847_v3 = vld [vmem:[%s10914_s21 + $0xe48] sm:$0xff] }
 0x1e0   : > { %3536 = vmatpush1.bf16.msra.mxu0 %v2078_v20  ;;  %4110 = vmatpush1.bf16.msra.mxu1 %v2080_v21  ;;  %v2142_v20 = vunpack.c.h.s8.bf16 %v814_v10  ;;  %v2144_v21 = vunpack.c.h.s8.bf16 %v816_v12  ;;  %v846_v12 = vld [vmem:[%s10914_s21 + $0xe40] sm:$0xff] }
 0x1e1   : > { %3537 = vmatprep.subr.bf16.mxu0 %v2087_v24  ;;  %4111 = vmatprep.subr.bf16.mxu1 %v2089_v23  ;;  %v2151_v24 = vunpack.c.l.s8.bf16 %v823_v18  ;;  %v2153_v23 = vunpack.c.l.s8.bf16 %v825_v19 }
 0x1e4   : > { %3538 = vmatpush1.bf16.msra.mxu0 %v2086_v44  ;;  %4112 = vmatpush1.bf16.msra.mxu1 %v2088_v27  ;;  %v2150_v44 = vunpack.c.l.s8.bf16 %v822_v25  ;;  %v2152_v27 = vunpack.c.l.s8.bf16 %v824_v26 }
 0x1e5   : > { %3539 = vmatprep.subr.bf16.mxu0 %v2095_v28  ;;  %4113 = vmatprep.subr.bf16.mxu1 %v2097_v29  ;;  %v2159_v28 = vunpack.c.h.s8.bf16 %v823_v18  ;;  %v2161_v29 = vunpack.c.h.s8.bf16 %v825_v19  ;;  %v855_v19 = vld [vmem:[%s10914_s21 + $0xe88] sm:$0xff] }
 0x1e8   : > { %3540 = vmatpush1.bf16.msra.mxu0 %v2094_v33  ;;  %4114 = vmatpush1.bf16.msra.mxu1 %v2096_v34  ;;  %v2158_v33 = vunpack.c.h.s8.bf16 %v822_v25  ;;  %v2160_v34 = vunpack.c.h.s8.bf16 %v824_v26  ;;  %v854_v26 = vld [vmem:[%s10914_s21 + $0xe80] sm:$0xff] }
 0x1e9   : > { %3541 = vmatprep.subr.bf16.mxu0 %v2103_v35  ;;  %4115 = vmatprep.subr.bf16.mxu1 %v2105_v36  ;;  %v2167_v35 = vunpack.c.l.s8.bf16 %v831_v30  ;;  %v2169_v36 = vunpack.c.l.s8.bf16 %v833_v32 }
 0x1ec   : > { %3542 = vmatpush1.bf16.msra.mxu0 %v2102_v41  ;;  %4116 = vmatpush1.bf16.msra.mxu1 %v2104_v42  ;;  %v2166_v41 = vunpack.c.l.s8.bf16 %v830_v37  ;;  %v2168_v42 = vunpack.c.l.s8.bf16 %v832_v40 }
 0x1ed   : > { %3543 = vmatprep.subr.bf16.mxu0 %v2111_v43  ;;  %4117 = vmatprep.subr.bf16.mxu1 %v2113_v45  ;;  %v2175_v43 = vunpack.c.h.s8.bf16 %v831_v30  ;;  %v2177_v45 = vunpack.c.h.s8.bf16 %v833_v32  ;;  %v863_v32 = vld [vmem:[%s10914_s21 + $0xec8] sm:$0xff] }
 0x1f0   : > { %3544 = vmatpush1.bf16.msra.mxu0 %v2110_v52  ;;  %4118 = vmatpush1.bf16.msra.mxu1 %v2112_v51  ;;  %v2174_v52 = vunpack.c.h.s8.bf16 %v830_v37  ;;  %v2176_v51 = vunpack.c.h.s8.bf16 %v832_v40  ;;  %v862_v40 = vld [vmem:[%s10914_s21 + $0xec0] sm:$0xff] }
 0x1f1   : > { %3545 = vmatprep.subr.bf16.mxu0 %v2119_v54  ;;  %4119 = vmatprep.subr.bf16.mxu1 %v2121_v55  ;;  %v2183_v54 = vunpack.c.l.s8.bf16 %v839_v46  ;;  %v2185_v55 = vunpack.c.l.s8.bf16 %v841_v48  ;;  %v871_v48 = vld [vmem:[%s10914_s21 + $0xf08] sm:$0xff] }
 0x1f4   : > { %3546 = vmatpush1.bf16.msra.mxu0 %v2118_v50  ;;  %4120 = vmatpush1.bf16.msra.mxu1 %v2120_v63  ;;  %v11294_v50 = vrot.slane %v11243_v47, %v10975_v49  ;;  %v2182_v63 = vunpack.c.l.s8.bf16 %v838_v56  ;;  %v2190_v47 = vunpack.c.h.s8.bf16 %v838_v56 }
 0x1f5   : > { %3547 = vmatprep.subr.bf16.mxu0 %v2127_v0  ;;  %4121 = vmatprep.subr.bf16.mxu1 %v2129_v1  ;;  %v2184_v0 = vunpack.c.l.s8.bf16 %v840_v57  ;;  %v2191_v1 = vunpack.c.h.s8.bf16 %v839_v46 }
 0x1f8   : > { %3548 = vmatpush1.bf16.msra.mxu0 %v2126_v60  ;;  %4122 = vmatpush1.bf16.msra.mxu1 %v2128_v7  ;;  %v849_v60 = vld [vmem:[%s10914_s21 + $0xe58] sm:$0xff]  ;;  %v11300_v7 = vcombine.high %v11256_v5, %v11256_v5 }
 0x1f9   : > { %3549 = vmatprep.subr.bf16.mxu0 %v2135_v8  ;;  %4123 = vmatprep.subr.bf16.mxu1 %v2137_v9  ;;  %v2192_v8 = vunpack.c.h.s8.bf16 %v840_v57  ;;  %v2199_v9 = vunpack.c.l.s8.bf16 %v847_v3  ;;  %v2201_v10 = vunpack.c.l.s8.bf16 %v849_v60  ;;  %v2209_v18 = vunpack.c.h.s8.bf16 %v849_v60  ;;  %v870_v57 = vld [vmem:[%s10914_s21 + $0xf00] sm:$0xff]  ;;  %v879_v60 = vld [vmem:[%s10914_s21 + $0xf48] sm:$0xff] }
 0x1fc   : > { %3550 = vmatpush1.bf16.msra.mxu0 %v2134_v13  ;;  %4124 = vmatpush1.bf16.msra.mxu1 %v2136_v14  ;;  %v848_v13 = vld [vmem:[%s10914_s21 + $0xe50] sm:$0xff]  ;;  %v2198_v14 = vunpack.c.l.s8.bf16 %v846_v12 }
 0x1fd   : > { %3551 = vmatprep.subr.bf16.mxu0 %v2143_v16  ;;  %4125 = vmatprep.subr.bf16.mxu1 %v2145_v17  ;;  %v2200_v16 = vunpack.c.l.s8.bf16 %v848_v13  ;;  %v2207_v17 = vunpack.c.h.s8.bf16 %v847_v3 }
 0x200   : > { %3552 = vmatpush1.bf16.msra.mxu0 %v2142_v20  ;;  %4126 = vmatpush1.bf16.msra.mxu1 %v2144_v21  ;;  %v857_v20 = vld [vmem:[%s10914_s21 + $0xe98] sm:$0xff]  ;;  %v2206_v21 = vunpack.c.h.s8.bf16 %v846_v12 }
 0x201   : > { %3553 = vmatprep.subr.bf16.mxu0 %v2151_v24  ;;  %4127 = vmatprep.subr.bf16.mxu1 %v2153_v23  ;;  %v2208_v24 = vunpack.c.h.s8.bf16 %v848_v13  ;;  %v2215_v23 = vunpack.c.l.s8.bf16 %v855_v19  ;;  %v2217_v25 = vunpack.c.l.s8.bf16 %v857_v20  ;;  %v2225_v30 = vunpack.c.h.s8.bf16 %v857_v20  ;;  %v878_v13 = vld [vmem:[%s10914_s21 + $0xf40] sm:$0xff]  ;;  %v887_v20 = vld [vmem:[%s10914_s21 + $0xf88] sm:$0xff] }
 0x204   : > { %3554 = vmatpush1.bf16.msra.mxu0 %v2150_v44  ;;  %4128 = vmatpush1.bf16.msra.mxu1 %v2152_v27  ;;  %v856_v44 = vld [vmem:[%s10914_s21 + $0xe90] sm:$0xff]  ;;  %v2214_v27 = vunpack.c.l.s8.bf16 %v854_v26 }
 0x205   : > { %3555 = vmatprep.subr.bf16.mxu0 %v2159_v28  ;;  %4129 = vmatprep.subr.bf16.mxu1 %v2161_v29  ;;  %v2216_v28 = vunpack.c.l.s8.bf16 %v856_v44  ;;  %v2223_v29 = vunpack.c.h.s8.bf16 %v855_v19 }
 0x208   : > { %3556 = vmatpush1.bf16.msra.mxu0 %v2158_v33  ;;  %4130 = vmatpush1.bf16.msra.mxu1 %v2160_v34  ;;  %v865_v33 = vld [vmem:[%s10914_s21 + $0xed8] sm:$0xff]  ;;  %v2222_v34 = vunpack.c.h.s8.bf16 %v854_v26 }
 0x209   : > { %3557 = vmatprep.subr.bf16.mxu0 %v2167_v35  ;;  %4131 = vmatprep.subr.bf16.mxu1 %v2169_v36  ;;  %v2224_v35 = vunpack.c.h.s8.bf16 %v856_v44  ;;  %v2231_v36 = vunpack.c.l.s8.bf16 %v863_v32  ;;  %v2233_v37 = vunpack.c.l.s8.bf16 %v865_v33  ;;  %v2241_v46 = vunpack.c.h.s8.bf16 %v865_v33  ;;  %v886_v44 = vld [vmem:[%s10914_s21 + $0xf80] sm:$0xff]  ;;  %v895_v33 = vld [vmem:[%s10914_s21 + $0xfc8] sm:$0xff] }
 0x20c   : > { %3558 = vmatpush1.bf16.msra.mxu0 %v2166_v41  ;;  %4132 = vmatpush1.bf16.msra.mxu1 %v2168_v42  ;;  %v864_v41 = vld [vmem:[%s10914_s21 + $0xed0] sm:$0xff]  ;;  %v2230_v42 = vunpack.c.l.s8.bf16 %v862_v40 }
 0x20d   : > { %3559 = vmatprep.subr.bf16.mxu0 %v2175_v43  ;;  %4133 = vmatprep.subr.bf16.mxu1 %v2177_v45  ;;  %v2232_v43 = vunpack.c.l.s8.bf16 %v864_v41  ;;  %v2239_v45 = vunpack.c.h.s8.bf16 %v863_v32 }
 0x210   : > { %3560 = vmatpush1.bf16.msra.mxu0 %v2174_v52  ;;  %4134 = vmatpush1.bf16.msra.mxu1 %v2176_v51  ;;  %v873_v52 = vld [vmem:[%s10914_s21 + $0xf18] sm:$0xff]  ;;  %v2238_v51 = vunpack.c.h.s8.bf16 %v862_v40 }
 0x211   : > { %3570 = vmatprep.subr.bf16.mxu0 %v2183_v54  ;;  %4144 = vmatprep.subr.bf16.mxu1 %v2185_v55  ;;  %v2240_v54 = vunpack.c.h.s8.bf16 %v864_v41  ;;  %v2247_v55 = vunpack.c.l.s8.bf16 %v871_v48  ;;  %v2249_v56 = vunpack.c.l.s8.bf16 %v873_v52  ;;  %v2257_v3 = vunpack.c.h.s8.bf16 %v873_v52  ;;  %v894_v41 = vld [vmem:[%s10914_s21 + $0xfc0] sm:$0xff] }
 0x213   : > { %3562 = vmatmul.mubr.bf16.vlgmr.msra.gmra.mrb[0].mxu0 %v11294_v50  ;;  %4136 = vmatmul.mubr.bf16.vlgmr.msra.gmra.mrb[0].mxu1 %v11294_v50 }
 0x214   : > { %3571 = vmatpush1.bf16.msra.mxu0 %v2182_v63  ;;  %4145 = vmatpush1.bf16.msra.mxu1 %v2184_v0  ;;  %v872_v63 = vld [vmem:[%s10914_s21 + $0xf10] sm:$0xff]  ;;  %v2246_v0 = vunpack.c.l.s8.bf16 %v870_v57 }
 0x215   : > { %3572 = vmatprep.subr.bf16.mxu0 %v2191_v1  ;;  %4146 = vmatprep.subr.bf16.mxu1 %v2193_v2  ;;  %v2248_v1 = vunpack.c.l.s8.bf16 %v872_v63  ;;  %v2255_v2 = vunpack.c.h.s8.bf16 %v871_v48  ;;  %v2303_v48 = vunpack.c.h.s8.bf16 %v895_v33 }
 0x216   : > { %3602 = vmatprep.mubr.bf16.mxu0 %v11300_v7  ;;  %4176 = vmatprep.mubr.bf16.mxu1 %v11300_v7 }
 0x218   : > { %3573 = vmatpush1.bf16.msra.mxu0 %v2190_v47  ;;  %4147 = vmatpush1.bf16.msra.mxu1 %v2192_v8  ;;  %v881_v47 = vld [vmem:[%s10914_s21 + $0xf58] sm:$0xff]  ;;  %v2254_v8 = vunpack.c.h.s8.bf16 %v870_v57 }
 0x219   : > { %3574 = vmatprep.subr.bf16.mxu0 %v2199_v9  ;;  %4148 = vmatprep.subr.bf16.mxu1 %v2201_v10  ;;  %v2256_v9 = vunpack.c.h.s8.bf16 %v872_v63  ;;  %v2263_v10 = vunpack.c.l.s8.bf16 %v879_v60  ;;  %v2265_v12 = vunpack.c.l.s8.bf16 %v881_v47  ;;  %v2273_v19 = vunpack.c.h.s8.bf16 %v881_v47 }
 0x21c   : > { %3575 = vmatpush1.bf16.msra.mxu0 %v2198_v14  ;;  %4149 = vmatpush1.bf16.msra.mxu1 %v2200_v16  ;;  %v880_v14 = vld [vmem:[%s10914_s21 + $0xf50] sm:$0xff]  ;;  %v2262_v16 = vunpack.c.l.s8.bf16 %v878_v13 }
 0x21d   : > { %3576 = vmatprep.subr.bf16.mxu0 %v2207_v17  ;;  %4150 = vmatprep.subr.bf16.mxu1 %v2209_v18  ;;  %v2264_v17 = vunpack.c.l.s8.bf16 %v880_v14  ;;  %v2271_v18 = vunpack.c.h.s8.bf16 %v879_v60  ;;  %v11347_v60 = vcombine.high %v11294_v50, %v11294_v50 }
 0x220   : > { %3577 = vmatpush1.bf16.msra.mxu0 %v2206_v21  ;;  %4151 = vmatpush1.bf16.msra.mxu1 %v2208_v24  ;;  %v889_v21 = vld [vmem:[%s10914_s21 + $0xf98] sm:$0xff]  ;;  %v2270_v24 = vunpack.c.h.s8.bf16 %v878_v13 }
 0x221   : > { %3578 = vmatprep.subr.bf16.mxu0 %v2215_v23  ;;  %4152 = vmatprep.subr.bf16.mxu1 %v2217_v25  ;;  %v2272_v23 = vunpack.c.h.s8.bf16 %v880_v14  ;;  %v2279_v25 = vunpack.c.l.s8.bf16 %v887_v20  ;;  %v2281_v26 = vunpack.c.l.s8.bf16 %v889_v21  ;;  %v2289_v32 = vunpack.c.h.s8.bf16 %v889_v21  ;;  %v913_v13 = vld [vmem:[%s10914_s21 + $0x1058] sm:$0xff]  ;;  %v912_v21 = vld [vmem:[%s10914_s21 + $0x1050] sm:$0xff] }
 0x224   : > { %3579 = vmatpush1.bf16.msra.mxu0 %v2214_v27  ;;  %4153 = vmatpush1.bf16.msra.mxu1 %v2216_v28  ;;  %v888_v27 = vld [vmem:[%s10914_s21 + $0xf90] sm:$0xff]  ;;  %v2278_v28 = vunpack.c.l.s8.bf16 %v886_v44 }
 0x225   : > { %3580 = vmatprep.subr.bf16.mxu0 %v2223_v29  ;;  %4154 = vmatprep.subr.bf16.mxu1 %v2225_v30  ;;  %v2280_v29 = vunpack.c.l.s8.bf16 %v888_v27  ;;  %v2287_v30 = vunpack.c.h.s8.bf16 %v887_v20  ;;  %v910_v20 = vld [vmem:[%s10914_s21 + $0x1040] sm:$0xff] }
 0x228   : > { %3581 = vmatpush1.bf16.msra.mxu0 %v2222_v34  ;;  %4155 = vmatpush1.bf16.msra.mxu1 %v2224_v35  ;;  %v897_v34 = vld [vmem:[%s10914_s21 + $0xfd8] sm:$0xff]  ;;  %v2286_v35 = vunpack.c.h.s8.bf16 %v886_v44  ;;  %v919_v44 = vld [vmem:[%s10914_s21 + $0x1088] sm:$0xff] }
 0x229   : > { %3582 = vmatprep.subr.bf16.mxu0 %v2231_v36  ;;  %4156 = vmatprep.subr.bf16.mxu1 %v2233_v37  ;;  %v2288_v36 = vunpack.c.h.s8.bf16 %v888_v27  ;;  %v2295_v37 = vunpack.c.l.s8.bf16 %v895_v33  ;;  %v2297_v40 = vunpack.c.l.s8.bf16 %v897_v34  ;;  %v2305_v52 = vunpack.c.h.s8.bf16 %v897_v34  ;;  %v921_v27 = vld [vmem:[%s10914_s21 + $0x1098] sm:$0xff]  ;;  %v918_v33 = vld [vmem:[%s10914_s21 + $0x1080] sm:$0xff]  ;;  %v920_v34 = vld [vmem:[%s10914_s21 + $0x1090] sm:$0xff] }
 0x22c   : > { %3583 = vmatpush1.bf16.msra.mxu0 %v2230_v42  ;;  %4157 = vmatpush1.bf16.msra.mxu1 %v2232_v43  ;;  %v896_v42 = vld [vmem:[%s10914_s21 + $0xfd0] sm:$0xff]  ;;  %v11333_v43 = vld [vmem:[%s10928_s29 + $0x10] sm:$0xff] }
 0x22d   : > { %3584 = vmatprep.subr.bf16.mxu0 %v2239_v45  ;;  %4158 = vmatprep.subr.bf16.mxu1 %v2241_v46  ;;  %v2294_v45 = vunpack.c.l.s8.bf16 %v894_v41  ;;  %v2296_v46 = vunpack.c.l.s8.bf16 %v896_v42  ;;  %v2304_v57 = vunpack.c.h.s8.bf16 %v896_v42  ;;  %v929_v42 = vld [vmem:[%s10914_s21 + $0x10d8] sm:$0xff] }
 0x230   : > { %3585 = vmatpush1.bf16.msra.mxu0 %v2238_v51  ;;  %4159 = vmatpush1.bf16.msra.mxu1 %v2240_v54  ;;  %v903_v51 = vld [vmem:[%s10914_s21 + $0x1008] sm:$0xff]  ;;  %v905_v54 = vld [vmem:[%s10914_s21 + $0x1018] sm:$0xff] }
 0x231   : > { %3586 = vmatprep.subr.bf16.mxu0 %v2247_v55  ;;  %4160 = vmatprep.subr.bf16.mxu1 %v2249_v56  ;;  %v11339_v55 = vrot.slane %v11333_v43, %v10975_v49  ;;  %v2302_v56 = vunpack.c.h.s8.bf16 %v894_v41  ;;  %v2311_v63 = vunpack.c.l.s8.bf16 %v903_v51  ;;  %v927_v41 = vld [vmem:[%s10914_s21 + $0x10c8] sm:$0xff] }
 0x234   : > { %3587 = vmatpush1.bf16.msra.mxu0 %v2246_v0  ;;  %4161 = vmatpush1.bf16.msra.mxu1 %v2248_v1  ;;  %v2313_v0 = vunpack.c.l.s8.bf16 %v905_v54  ;;  %v902_v1 = vld [vmem:[%s10914_s21 + $0x1000] sm:$0xff] }
 0x235   : > { %3588 = vmatprep.subr.bf16.mxu0 %v2255_v2  ;;  %4162 = vmatprep.subr.bf16.mxu1 %v2257_v3  ;;  %v904_v2 = vld [vmem:[%s10914_s21 + $0x1010] sm:$0xff]  ;;  %v3197_v3 = vcombine.high %v11339_v55, %v11339_v55  ;;  %v2310_v47 = vunpack.c.l.s8.bf16 %v902_v1 }
 0x237   : > { %v11352_v14 = vrot.slane %v3197_v3, %v10975_v49 }
 0x238   : > { %3589 = vmatpush1.bf16.msra.mxu0 %v2254_v8  ;;  %4163 = vmatpush1.bf16.msra.mxu1 %v2256_v9  ;;  %v2312_v8 = vunpack.c.l.s8.bf16 %v904_v2  ;;  %v2319_v9 = vunpack.c.h.s8.bf16 %v903_v51  ;;  %v926_v51 = vld [vmem:[%s10914_s21 + $0x10c0] sm:$0xff] }
 0x239   : > { %3590 = vmatprep.subr.bf16.mxu0 %v2263_v10  ;;  %4164 = vmatprep.subr.bf16.mxu1 %v2265_v12  ;;  %v2321_v10 = vunpack.c.h.s8.bf16 %v905_v54  ;;  %v911_v12 = vld [vmem:[%s10914_s21 + $0x1048] sm:$0xff]  ;;  %v928_v54 = vld [vmem:[%s10914_s21 + $0x10d0] sm:$0xff]  ;;  %v2366_v3 = vunpack.c.h.s8.bf16 %v926_v51 }
 0x23c   : > { %3591 = vmatpush1.bf16.msra.mxu0 %v2262_v16  ;;  %4165 = vmatpush1.bf16.msra.mxu1 %v2264_v17  ;;  %v2318_v16 = vunpack.c.h.s8.bf16 %v902_v1  ;;  %v2320_v17 = vunpack.c.h.s8.bf16 %v904_v2  ;;  %v935_v1 = vld [vmem:[%s10914_s21 + $0x1108] sm:$0xff]  ;;  %v937_v2 = vld [vmem:[%s10914_s21 + $0x1118] sm:$0xff] }
 0x23d   : > { %3592 = vmatprep.subr.bf16.mxu0 %v2271_v18  ;;  %4166 = vmatprep.subr.bf16.mxu1 %v2273_v19  ;;  %v2327_v18 = vunpack.c.l.s8.bf16 %v911_v12  ;;  %v2329_v19 = vunpack.c.l.s8.bf16 %v913_v13 }
 0x240   : > { %3593 = vmatpush1.bf16.msra.mxu0 %v2270_v24  ;;  %4167 = vmatpush1.bf16.msra.mxu1 %v2272_v23  ;;  %v2326_v24 = vunpack.c.l.s8.bf16 %v910_v20  ;;  %v2328_v23 = vunpack.c.l.s8.bf16 %v912_v21 }
 0x241   : > { %3594 = vmatprep.subr.bf16.mxu0 %v2279_v25  ;;  %4168 = vmatprep.subr.bf16.mxu1 %v2281_v26  ;;  %v2335_v25 = vunpack.c.h.s8.bf16 %v911_v12  ;;  %v2337_v26 = vunpack.c.h.s8.bf16 %v913_v13  ;;  %v936_v12 = vld [vmem:[%s10914_s21 + $0x1110] sm:$0xff] }
 0x244   : > { %3595 = vmatpush1.bf16.msra.mxu0 %v2278_v28  ;;  %4169 = vmatpush1.bf16.msra.mxu1 %v2280_v29  ;;  %v2334_v28 = vunpack.c.h.s8.bf16 %v910_v20  ;;  %v2336_v29 = vunpack.c.h.s8.bf16 %v912_v21  ;;  %v945_v20 = vld [vmem:[%s10914_s21 + $0x1158] sm:$0xff] }
 0x245   : > { %3596 = vmatprep.subr.bf16.mxu0 %v2287_v30  ;;  %4170 = vmatprep.subr.bf16.mxu1 %v2289_v32  ;;  %v2343_v30 = vunpack.c.l.s8.bf16 %v919_v44  ;;  %v2345_v32 = vunpack.c.l.s8.bf16 %v921_v27 }
 0x248   : > { %3597 = vmatpush1.bf16.msra.mxu0 %v2286_v35  ;;  %4171 = vmatpush1.bf16.msra.mxu1 %v2288_v36  ;;  %v2342_v35 = vunpack.c.l.s8.bf16 %v918_v33  ;;  %v2344_v36 = vunpack.c.l.s8.bf16 %v920_v34 }
 0x249   : > { %3598 = vmatprep.subr.bf16.mxu0 %v2295_v37  ;;  %4172 = vmatprep.subr.bf16.mxu1 %v2297_v40  ;;  %v2351_v37 = vunpack.c.h.s8.bf16 %v919_v44  ;;  %v2353_v40 = vunpack.c.h.s8.bf16 %v921_v27  ;;  %v944_v44 = vld [vmem:[%s10914_s21 + $0x1150] sm:$0xff] }
 0x24c   : > { %3599 = vmatpush1.bf16.msra.mxu0 %v2294_v45  ;;  %4173 = vmatpush1.bf16.msra.mxu1 %v2296_v46  ;;  %v2350_v45 = vunpack.c.h.s8.bf16 %v918_v33  ;;  %v2352_v46 = vunpack.c.h.s8.bf16 %v920_v34  ;;  %v953_v33 = vld [vmem:[%s10914_s21 + $0x1198] sm:$0xff] }
 0x24d   : > { %3600 = vmatprep.subr.bf16.mxu0 %v2303_v48  ;;  %4174 = vmatprep.subr.bf16.mxu1 %v2305_v52  ;;  %v2359_v48 = vunpack.c.l.s8.bf16 %v927_v41  ;;  %v2361_v52 = vunpack.c.l.s8.bf16 %v929_v42 }
 0x250   : > { %3601 = vmatpush1.bf16.msra.mxu0 %v2302_v56  ;;  %4175 = vmatpush1.bf16.msra.mxu1 %v2304_v57  ;;  %v2358_v56 = vunpack.c.l.s8.bf16 %v926_v51  ;;  %v2360_v57 = vunpack.c.l.s8.bf16 %v928_v54  ;;  %v961_v51 = vld [vmem:[%s10914_s21 + $0x11d8] sm:$0xff] }
 0x251   : > { %3611 = vmatprep.subr.bf16.mxu0 %v2311_v63  ;;  %4185 = vmatprep.subr.bf16.mxu1 %v2313_v0  ;;  %v2367_v63 = vunpack.c.h.s8.bf16 %v927_v41  ;;  %v2369_v0 = vunpack.c.h.s8.bf16 %v929_v42  ;;  %v952_v41 = vld [vmem:[%s10914_s21 + $0x1190] sm:$0xff] }
 0x253   : > { %3603 = vmatmul.mubr.bf16.vlgmr.msra.gmra.mrb[0].mxu0 %v11347_v60  ;;  %4177 = vmatmul.mubr.bf16.vlgmr.msra.gmra.mrb[0].mxu1 %v11347_v60 }
 0x254   : > { %3612 = vmatpush1.bf16.msra.mxu0 %v2310_v47  ;;  %4186 = vmatpush1.bf16.msra.mxu1 %v2312_v8  ;;  %v2368_v47 = vunpack.c.h.s8.bf16 %v928_v54  ;;  %v2375_v8 = vunpack.c.l.s8.bf16 %v935_v1 }
 0x255   : > { %3613 = vmatprep.subr.bf16.mxu0 %v2319_v9  ;;  %4187 = vmatprep.subr.bf16.mxu1 %v2321_v10  ;;  %v2377_v9 = vunpack.c.l.s8.bf16 %v937_v2  ;;  %v934_v10 = vld [vmem:[%s10914_s21 + $0x1100] sm:$0xff] }
 0x256   : > { %3643 = vmatprep.mubr.bf16.mxu0 %v11352_v14  ;;  %4217 = vmatprep.mubr.bf16.mxu1 %v11352_v14  ;;  %v2374_v13 = vunpack.c.l.s8.bf16 %v934_v10  ;;  %v2382_v21 = vunpack.c.h.s8.bf16 %v934_v10  ;;  %v969_v10 = vld [vmem:[%s10914_s21 + $0x1218] sm:$0xff] }
 0x258   : > { %3614 = vmatpush1.bf16.msra.mxu0 %v2318_v16  ;;  %4188 = vmatpush1.bf16.msra.mxu1 %v2320_v17  ;;  %v2376_v16 = vunpack.c.l.s8.bf16 %v936_v12  ;;  %v2383_v17 = vunpack.c.h.s8.bf16 %v935_v1  ;;  %v960_v1 = vld [vmem:[%s10914_s21 + $0x11d0] sm:$0xff] }
 0x259   : > { %3615 = vmatprep.subr.bf16.mxu0 %v2327_v18  ;;  %4189 = vmatprep.subr.bf16.mxu1 %v2329_v19  ;;  %v2385_v18 = vunpack.c.h.s8.bf16 %v937_v2  ;;  %v943_v19 = vld [vmem:[%s10914_s21 + $0x1148] sm:$0xff] }
 0x25c   : > { %3616 = vmatpush1.bf16.msra.mxu0 %v2326_v24  ;;  %4190 = vmatpush1.bf16.msra.mxu1 %v2328_v23  ;;  %v2384_v24 = vunpack.c.h.s8.bf16 %v936_v12  ;;  %v2391_v23 = vunpack.c.l.s8.bf16 %v943_v19 }
 0x25d   : > { %3617 = vmatprep.subr.bf16.mxu0 %v2335_v25  ;;  %4191 = vmatprep.subr.bf16.mxu1 %v2337_v26  ;;  %v2393_v25 = vunpack.c.l.s8.bf16 %v945_v20  ;;  %v942_v26 = vld [vmem:[%s10914_s21 + $0x1140] sm:$0xff] }
 0x25e   : > { %v2390_v27 = vunpack.c.l.s8.bf16 %v942_v26  ;;  %v2398_v34 = vunpack.c.h.s8.bf16 %v942_v26  ;;  %v975_v26 = vld [vmem:[%s10914_s21 + $0x1248] sm:$0xff] }
 0x260   : > { %3618 = vmatpush1.bf16.msra.mxu0 %v2334_v28  ;;  %4192 = vmatpush1.bf16.msra.mxu1 %v2336_v29  ;;  %v2392_v28 = vunpack.c.l.s8.bf16 %v944_v44  ;;  %v2399_v29 = vunpack.c.h.s8.bf16 %v943_v19  ;;  %v968_v19 = vld [vmem:[%s10914_s21 + $0x1210] sm:$0xff] }
 0x261   : > { %3619 = vmatprep.subr.bf16.mxu0 %v2343_v30  ;;  %4193 = vmatprep.subr.bf16.mxu1 %v2345_v32  ;;  %v2401_v30 = vunpack.c.h.s8.bf16 %v945_v20  ;;  %v951_v32 = vld [vmem:[%s10914_s21 + $0x1188] sm:$0xff]  ;;  %v11390_v20 = vrot.slane %v11339_v55, %v10975_v49 }
 0x264   : > { %3620 = vmatpush1.bf16.msra.mxu0 %v2342_v35  ;;  %4194 = vmatpush1.bf16.msra.mxu1 %v2344_v36  ;;  %v2400_v35 = vunpack.c.h.s8.bf16 %v944_v44  ;;  %v2407_v36 = vunpack.c.l.s8.bf16 %v951_v32  ;;  %v977_v44 = vld [vmem:[%s10914_s21 + $0x1258] sm:$0xff] }
 0x265   : > { %3621 = vmatprep.subr.bf16.mxu0 %v2351_v37  ;;  %4195 = vmatprep.subr.bf16.mxu1 %v2353_v40  ;;  %v2409_v37 = vunpack.c.l.s8.bf16 %v953_v33  ;;  %v950_v40 = vld [vmem:[%s10914_s21 + $0x1180] sm:$0xff] }
 0x266   : > { %v2406_v42 = vunpack.c.l.s8.bf16 %v950_v40  ;;  %v2414_v54 = vunpack.c.h.s8.bf16 %v950_v40  ;;  %v983_v40 = vld [vmem:[%s10914_s21 + $0x1288] sm:$0xff] }
 0x268   : > { %3622 = vmatpush1.bf16.msra.mxu0 %v2350_v45  ;;  %4196 = vmatpush1.bf16.msra.mxu1 %v2352_v46  ;;  %v2408_v45 = vunpack.c.l.s8.bf16 %v952_v41  ;;  %v2415_v46 = vunpack.c.h.s8.bf16 %v951_v32  ;;  %v974_v32 = vld [vmem:[%s10914_s21 + $0x1240] sm:$0xff] }
 0x269   : > { %3623 = vmatprep.subr.bf16.mxu0 %v2359_v48  ;;  %4197 = vmatprep.subr.bf16.mxu1 %v2361_v52  ;;  %v2417_v48 = vunpack.c.h.s8.bf16 %v953_v33  ;;  %v959_v52 = vld [vmem:[%s10914_s21 + $0x11c8] sm:$0xff]  ;;  %v976_v33 = vld [vmem:[%s10914_s21 + $0x1250] sm:$0xff] }
 0x26c   : > { %3624 = vmatpush1.bf16.msra.mxu0 %v2358_v56  ;;  %4198 = vmatpush1.bf16.msra.mxu1 %v2360_v57  ;;  %v2416_v56 = vunpack.c.h.s8.bf16 %v952_v41  ;;  %v2423_v57 = vunpack.c.l.s8.bf16 %v959_v52  ;;  %v985_v41 = vld [vmem:[%s10914_s21 + $0x1298] sm:$0xff] }
 0x26d   : > { %3625 = vmatprep.subr.bf16.mxu0 %v2367_v63  ;;  %4199 = vmatprep.subr.bf16.mxu1 %v2369_v0  ;;  %v2425_v63 = vunpack.c.l.s8.bf16 %v961_v51  ;;  %v958_v0 = vld [vmem:[%s10914_s21 + $0x11c0] sm:$0xff] }
 0x26e   : > { %v2422_v2 = vunpack.c.l.s8.bf16 %v958_v0  ;;  %v2430_v12 = vunpack.c.h.s8.bf16 %v958_v0  ;;  %v991_v0 = vld [vmem:[%s10914_s21 + $0x12c8] sm:$0xff] }
 0x270   : > { %3626 = vmatpush1.bf16.msra.mxu0 %v2366_v3  ;;  %4200 = vmatpush1.bf16.msra.mxu1 %v2368_v47  ;;  %v2424_v3 = vunpack.c.l.s8.bf16 %v960_v1  ;;  %v2431_v47 = vunpack.c.h.s8.bf16 %v959_v52  ;;  %v982_v52 = vld [vmem:[%s10914_s21 + $0x1280] sm:$0xff] }
 0x271   : > { %3627 = vmatprep.subr.bf16.mxu0 %v2375_v8  ;;  %4201 = vmatprep.subr.bf16.mxu1 %v2377_v9  ;;  %v2433_v8 = vunpack.c.h.s8.bf16 %v961_v51  ;;  %v967_v9 = vld [vmem:[%s10914_s21 + $0x1208] sm:$0xff]  ;;  %v984_v51 = vld [vmem:[%s10914_s21 + $0x1290] sm:$0xff] }
 0x274   : > { %3628 = vmatpush1.bf16.msra.mxu0 %v2374_v13  ;;  %4202 = vmatpush1.bf16.msra.mxu1 %v2376_v16  ;;  %v2432_v13 = vunpack.c.h.s8.bf16 %v960_v1  ;;  %v2439_v16 = vunpack.c.l.s8.bf16 %v967_v9  ;;  %v993_v1 = vld [vmem:[%s10914_s21 + $0x12d8] sm:$0xff] }
 0x275   : > { %3629 = vmatprep.subr.bf16.mxu0 %v2383_v17  ;;  %4203 = vmatprep.subr.bf16.mxu1 %v2385_v18  ;;  %v2441_v17 = vunpack.c.l.s8.bf16 %v969_v10  ;;  %v966_v18 = vld [vmem:[%s10914_s21 + $0x1200] sm:$0xff] }
 0x276   : > { %v2446_v55 = vunpack.c.h.s8.bf16 %v966_v18 }
 0x278   : > { %3630 = vmatpush1.bf16.msra.mxu0 %v2382_v21  ;;  %4204 = vmatpush1.bf16.msra.mxu1 %v2384_v24  ;;  %v2438_v21 = vunpack.c.l.s8.bf16 %v966_v18  ;;  %v2440_v24 = vunpack.c.l.s8.bf16 %v968_v19  ;;  %v999_v18 = vld [vmem:[%s10914_s21 + $0x1308] sm:$0xff] }
 0x279   : > { %3631 = vmatprep.subr.bf16.mxu0 %v2391_v23  ;;  %4205 = vmatprep.subr.bf16.mxu1 %v2393_v25  ;;  %v2447_v23 = vunpack.c.h.s8.bf16 %v967_v9  ;;  %v2449_v25 = vunpack.c.h.s8.bf16 %v969_v10  ;;  %v990_v9 = vld [vmem:[%s10914_s21 + $0x12c0] sm:$0xff]  ;;  %v992_v10 = vld [vmem:[%s10914_s21 + $0x12d0] sm:$0xff] }
 0x27c   : > { %3632 = vmatpush1.bf16.msra.mxu0 %v2390_v27  ;;  %4206 = vmatpush1.bf16.msra.mxu1 %v2392_v28  ;;  %v11396_v27 = vcombine.high %v11352_v14, %v11352_v14  ;;  %v2448_v28 = vunpack.c.h.s8.bf16 %v968_v19  ;;  %v1001_v19 = vld [vmem:[%s10914_s21 + $0x1318] sm:$0xff] }
 0x27d   : > { %3633 = vmatprep.subr.bf16.mxu0 %v2399_v29  ;;  %4207 = vmatprep.subr.bf16.mxu1 %v2401_v30  ;;  %v2455_v29 = vunpack.c.l.s8.bf16 %v975_v26  ;;  %v2457_v30 = vunpack.c.l.s8.bf16 %v977_v44 }
 0x280   : > { %3634 = vmatpush1.bf16.msra.mxu0 %v2398_v34  ;;  %4208 = vmatpush1.bf16.msra.mxu1 %v2400_v35  ;;  %v2454_v34 = vunpack.c.l.s8.bf16 %v974_v32  ;;  %v2456_v35 = vunpack.c.l.s8.bf16 %v976_v33 }
 0x281   : > { %3635 = vmatprep.subr.bf16.mxu0 %v2407_v36  ;;  %4209 = vmatprep.subr.bf16.mxu1 %v2409_v37  ;;  %v2463_v36 = vunpack.c.h.s8.bf16 %v975_v26  ;;  %v2465_v37 = vunpack.c.h.s8.bf16 %v977_v44  ;;  %v998_v26 = vld [vmem:[%s10914_s21 + $0x1300] sm:$0xff]  ;;  %v1000_v44 = vld [vmem:[%s10914_s21 + $0x1310] sm:$0xff] }
 0x284   : > { %3636 = vmatpush1.bf16.msra.mxu0 %v2406_v42  ;;  %4210 = vmatpush1.bf16.msra.mxu1 %v2408_v45  ;;  %v2462_v42 = vunpack.c.h.s8.bf16 %v974_v32  ;;  %v2464_v45 = vunpack.c.h.s8.bf16 %v976_v33  ;;  %v1007_v32 = vld [vmem:[%s10914_s21 + $0x1348] sm:$0xff]  ;;  %v1009_v33 = vld [vmem:[%s10914_s21 + $0x1358] sm:$0xff] }
 0x285   : > { %3637 = vmatprep.subr.bf16.mxu0 %v2415_v46  ;;  %4211 = vmatprep.subr.bf16.mxu1 %v2417_v48  ;;  %v2471_v46 = vunpack.c.l.s8.bf16 %v983_v40  ;;  %v2473_v48 = vunpack.c.l.s8.bf16 %v985_v41 }
 0x288   : > { %3638 = vmatpush1.bf16.msra.mxu0 %v2414_v54  ;;  %4212 = vmatpush1.bf16.msra.mxu1 %v2416_v56  ;;  %v2470_v54 = vunpack.c.l.s8.bf16 %v982_v52  ;;  %v2472_v56 = vunpack.c.l.s8.bf16 %v984_v51 }
 0x289   : > { %3639 = vmatprep.subr.bf16.mxu0 %v2423_v57  ;;  %4213 = vmatprep.subr.bf16.mxu1 %v2425_v63  ;;  %v2479_v57 = vunpack.c.h.s8.bf16 %v983_v40  ;;  %v2481_v63 = vunpack.c.h.s8.bf16 %v985_v41  ;;  %v1006_v40 = vld [vmem:[%s10914_s21 + $0x1340] sm:$0xff]  ;;  %v1008_v41 = vld [vmem:[%s10914_s21 + $0x1350] sm:$0xff] }
 0x28c   : > { %3640 = vmatpush1.bf16.msra.mxu0 %v2422_v2  ;;  %4214 = vmatpush1.bf16.msra.mxu1 %v2424_v3  ;;  %v2478_v2 = vunpack.c.h.s8.bf16 %v982_v52  ;;  %v2480_v3 = vunpack.c.h.s8.bf16 %v984_v51  ;;  %v1015_v52 = vld [vmem:[%s10914_s21 + $0x1388] sm:$0xff]  ;;  %v1017_v51 = vld [vmem:[%s10914_s21 + $0x1398] sm:$0xff] }
 0x28d   : > { %3641 = vmatprep.subr.bf16.mxu0 %v2431_v47  ;;  %4215 = vmatprep.subr.bf16.mxu1 %v2433_v8  ;;  %v2487_v47 = vunpack.c.l.s8.bf16 %v991_v0  ;;  %v2489_v8 = vunpack.c.l.s8.bf16 %v993_v1 }
 0x290   : > { %3642 = vmatpush1.bf16.msra.mxu0 %v2430_v12  ;;  %4216 = vmatpush1.bf16.msra.mxu1 %v2432_v13  ;;  %v2486_v12 = vunpack.c.l.s8.bf16 %v990_v9  ;;  %v2488_v13 = vunpack.c.l.s8.bf16 %v992_v10 }
 0x291   : > { %3652 = vmatprep.subr.bf16.mxu0 %v2439_v16  ;;  %4226 = vmatprep.subr.bf16.mxu1 %v2441_v17  ;;  %v2495_v16 = vunpack.c.h.s8.bf16 %v991_v0  ;;  %v2497_v17 = vunpack.c.h.s8.bf16 %v993_v1  ;;  %v1014_v0 = vld [vmem:[%s10914_s21 + $0x1380] sm:$0xff]  ;;  %v1016_v1 = vld [vmem:[%s10914_s21 + $0x1390] sm:$0xff] }
 0x293   : > { %3644 = vmatmul.mubr.bf16.vlgmr.msra.gmra.mrb[0].mxu0 %v11390_v20  ;;  %4218 = vmatmul.mubr.bf16.vlgmr.msra.gmra.mrb[0].mxu1 %v11390_v20 }
 0x294   : > { %3653 = vmatpush1.bf16.msra.mxu0 %v2438_v21  ;;  %4227 = vmatpush1.bf16.msra.mxu1 %v2440_v24  ;;  %v2494_v21 = vunpack.c.h.s8.bf16 %v990_v9  ;;  %v2496_v24 = vunpack.c.h.s8.bf16 %v992_v10  ;;  %v1023_v9 = vld [vmem:[%s10914_s21 + $0x13c8] sm:$0xff]  ;;  %v1025_v10 = vld [vmem:[%s10914_s21 + $0x13d8] sm:$0xff] }
 0x295   : > { %3654 = vmatprep.subr.bf16.mxu0 %v2447_v23  ;;  %4228 = vmatprep.subr.bf16.mxu1 %v2449_v25  ;;  %v2503_v23 = vunpack.c.l.s8.bf16 %v999_v18  ;;  %v2505_v25 = vunpack.c.l.s8.bf16 %v1001_v19 }
 0x296   : > { %3684 = vmatprep.mubr.bf16.mxu0 %v11396_v27  ;;  %4258 = vmatprep.mubr.bf16.mxu1 %v11396_v27 }
 0x298   : > { %3655 = vmatpush1.bf16.msra.mxu0 %v2446_v55  ;;  %4229 = vmatpush1.bf16.msra.mxu1 %v2448_v28  ;;  %v2502_v55 = vunpack.c.l.s8.bf16 %v998_v26  ;;  %v2504_v28 = vunpack.c.l.s8.bf16 %v1000_v44 }
 0x299   : > { %3656 = vmatprep.subr.bf16.mxu0 %v2455_v29  ;;  %4230 = vmatprep.subr.bf16.mxu1 %v2457_v30  ;;  %v2511_v29 = vunpack.c.h.s8.bf16 %v999_v18  ;;  %v2513_v30 = vunpack.c.h.s8.bf16 %v1001_v19  ;;  %v1022_v18 = vld [vmem:[%s10914_s21 + $0x13c0] sm:$0xff]  ;;  %v1024_v19 = vld [vmem:[%s10914_s21 + $0x13d0] sm:$0xff] }
 0x29c   : > { %3657 = vmatpush1.bf16.msra.mxu0 %v2454_v34  ;;  %4231 = vmatpush1.bf16.msra.mxu1 %v2456_v35  ;;  %v2510_v34 = vunpack.c.h.s8.bf16 %v998_v26  ;;  %v2512_v35 = vunpack.c.h.s8.bf16 %v1000_v44  ;;  %v2561_v26 = vunpack.c.h.s8.bf16 %v1025_v10  ;;  %v1031_v44 = vld [vmem:[%s10914_s21 + $0x1408] sm:$0xff] }
 0x29d   : > { %3658 = vmatprep.subr.bf16.mxu0 %v2463_v36  ;;  %4232 = vmatprep.subr.bf16.mxu1 %v2465_v37  ;;  %v2519_v36 = vunpack.c.l.s8.bf16 %v1007_v32  ;;  %v2521_v37 = vunpack.c.l.s8.bf16 %v1009_v33 }
 0x2a0   : > { %3659 = vmatpush1.bf16.msra.mxu0 %v2462_v42  ;;  %4233 = vmatpush1.bf16.msra.mxu1 %v2464_v45  ;;  %v2518_v42 = vunpack.c.l.s8.bf16 %v1006_v40  ;;  %v2520_v45 = vunpack.c.l.s8.bf16 %v1008_v41 }
 0x2a1   : > { %3660 = vmatprep.subr.bf16.mxu0 %v2471_v46  ;;  %4234 = vmatprep.subr.bf16.mxu1 %v2473_v48  ;;  %v2527_v46 = vunpack.c.h.s8.bf16 %v1007_v32  ;;  %v2529_v48 = vunpack.c.h.s8.bf16 %v1009_v33  ;;  %v1030_v33 = vld [vmem:[%s10914_s21 + $0x1400] sm:$0xff] }
 0x2a4   : > { %3661 = vmatpush1.bf16.msra.mxu0 %v2470_v54  ;;  %4235 = vmatpush1.bf16.msra.mxu1 %v2472_v56  ;;  %v2526_v54 = vunpack.c.h.s8.bf16 %v1006_v40  ;;  %v2528_v56 = vunpack.c.h.s8.bf16 %v1008_v41  ;;  %v2575_v41 = vunpack.c.h.s8.bf16 %v1031_v44 }
 0x2a5   : > { %3662 = vmatprep.subr.bf16.mxu0 %v2479_v57  ;;  %4236 = vmatprep.subr.bf16.mxu1 %v2481_v63  ;;  %v2535_v57 = vunpack.c.l.s8.bf16 %v1015_v52  ;;  %v2537_v63 = vunpack.c.l.s8.bf16 %v1017_v51 }
 0x2a8   : > { %3663 = vmatpush1.bf16.msra.mxu0 %v2478_v2  ;;  %4237 = vmatpush1.bf16.msra.mxu1 %v2480_v3  ;;  %v2534_v2 = vunpack.c.l.s8.bf16 %v1014_v0  ;;  %v2536_v3 = vunpack.c.l.s8.bf16 %v1016_v1 }
 0x2a9   : > { %3664 = vmatprep.subr.bf16.mxu0 %v2487_v47  ;;  %4238 = vmatprep.subr.bf16.mxu1 %v2489_v8  ;;  %v2543_v47 = vunpack.c.h.s8.bf16 %v1015_v52  ;;  %v2545_v8 = vunpack.c.h.s8.bf16 %v1017_v51  ;;  %v2574_v52 = vunpack.c.h.s8.bf16 %v1030_v33 }
 0x2ac   : > { %3665 = vmatpush1.bf16.msra.mxu0 %v2486_v12  ;;  %4239 = vmatpush1.bf16.msra.mxu1 %v2488_v13  ;;  %v2542_v12 = vunpack.c.h.s8.bf16 %v1014_v0  ;;  %v2544_v13 = vunpack.c.h.s8.bf16 %v1016_v1 }
 0x2ad   : > { %3666 = vmatprep.subr.bf16.mxu0 %v2495_v16  ;;  %4240 = vmatprep.subr.bf16.mxu1 %v2497_v17  ;;  %v2551_v16 = vunpack.c.l.s8.bf16 %v1023_v9  ;;  %v2553_v17 = vunpack.c.l.s8.bf16 %v1025_v10 }
 0x2b0   : > { %3667 = vmatpush1.bf16.msra.mxu0 %v2494_v21  ;;  %4241 = vmatpush1.bf16.msra.mxu1 %v2496_v24  ;;  %v3182_v21 = vcombine.high %v11333_v43, %v11333_v43  ;;  %v2550_v24 = vunpack.c.l.s8.bf16 %v1022_v18  ;;  %v2567_v43 = vunpack.c.l.s8.bf16 %v1031_v44 }
 0x2b1   : > { %3668 = vmatprep.subr.bf16.mxu0 %v2503_v23  ;;  %4242 = vmatprep.subr.bf16.mxu1 %v2505_v25  ;;  %v2552_v23 = vunpack.c.l.s8.bf16 %v1024_v19  ;;  %v2559_v25 = vunpack.c.h.s8.bf16 %v1023_v9 }
 0x2b4   : > { %3669 = vmatpush1.bf16.msra.mxu0 %v2502_v55  ;;  %4243 = vmatpush1.bf16.msra.mxu1 %v2504_v28  ;;  %v1033_v55 = vld [vmem:[%s10914_s21 + $0x1418] sm:$0xff]  ;;  %v11433_v28 = vrot.slane %v3182_v21, %v10975_v49 }
 0x2b5   : > { %3670 = vmatprep.subr.bf16.mxu0 %v2511_v29  ;;  %4244 = vmatprep.subr.bf16.mxu1 %v2513_v30  ;;  %v2558_v29 = vunpack.c.h.s8.bf16 %v1022_v18  ;;  %v2560_v30 = vunpack.c.h.s8.bf16 %v1024_v19  ;;  %v2569_v32 = vunpack.c.l.s8.bf16 %v1033_v55 }
 0x2b8   : > { %3671 = vmatpush1.bf16.msra.mxu0 %v2510_v34  ;;  %4245 = vmatpush1.bf16.msra.mxu1 %v2512_v35  ;;  %v1032_v34 = vld [vmem:[%s10914_s21 + $0x1410] sm:$0xff]  ;;  %v3198_v35 = vcombine.high %v11433_v28, %v11433_v28 }
 0x2b9   : > { %3672 = vmatprep.subr.bf16.mxu0 %v2519_v36  ;;  %4246 = vmatprep.subr.bf16.mxu1 %v2521_v37  ;;  %v11441_v36 = vcombine.high %v11390_v20, %v11390_v20  ;;  %v2566_v37 = vunpack.c.l.s8.bf16 %v1030_v33  ;;  %v2568_v40 = vunpack.c.l.s8.bf16 %v1032_v34  ;;  %v2576_v51 = vunpack.c.h.s8.bf16 %v1032_v34 }
 0x2bc   : > { %3673 = vmatpush1.bf16.msra.mxu0 %v2518_v42  ;;  %4247 = vmatpush1.bf16.msra.mxu1 %v2520_v45  ;;  %v2577_v42 = vunpack.c.h.s8.bf16 %v1033_v55  ;;  %v1039_v45 = vld [vmem:[%s10914_s21 + $0x1448] sm:$0xff] }
 0x2bd   : > { %3674 = vmatprep.subr.bf16.mxu0 %v2527_v46  ;;  %4248 = vmatprep.subr.bf16.mxu1 %v2529_v48  ;;  %v1041_v46 = vld [vmem:[%s10914_s21 + $0x1458] sm:$0xff]  ;;  %v11446_v48 = vrot.slane %v3198_v35, %v10975_v49 }
 0x2c0   : > { %3675 = vmatpush1.bf16.msra.mxu0 %v2526_v54  ;;  %4249 = vmatpush1.bf16.msra.mxu1 %v2528_v56  ;;  %v2583_v54 = vunpack.c.l.s8.bf16 %v1039_v45  ;;  %v2585_v56 = vunpack.c.l.s8.bf16 %v1041_v46 }
 0x2c1   : > { %3676 = vmatprep.subr.bf16.mxu0 %v2535_v57  ;;  %4250 = vmatprep.subr.bf16.mxu1 %v2537_v63  ;;  %v1038_v57 = vld [vmem:[%s10914_s21 + $0x1440] sm:$0xff]  ;;  %v1040_v63 = vld [vmem:[%s10914_s21 + $0x1450] sm:$0xff] }
 0x2c2   : > { %v2582_v0 = vunpack.c.l.s8.bf16 %v1038_v57  ;;  %v2584_v1 = vunpack.c.l.s8.bf16 %v1040_v63  ;;  %v2590_v9 = vunpack.c.h.s8.bf16 %v1038_v57  ;;  %v2592_v10 = vunpack.c.h.s8.bf16 %v1040_v63 }
 0x2c4   : > { %3677 = vmatpush1.bf16.msra.mxu0 %v2534_v2  ;;  %4251 = vmatpush1.bf16.msra.mxu1 %v2536_v3  ;;  %v2591_v2 = vunpack.c.h.s8.bf16 %v1039_v45  ;;  %v2593_v3 = vunpack.c.h.s8.bf16 %v1041_v46 }
 0x2c5   : > { %3678 = vmatprep.subr.bf16.mxu0 %v2543_v47  ;;  %4252 = vmatprep.subr.bf16.mxu1 %v2545_v8  ;;  %v1047_v47 = vld [vmem:[%s10914_s21 + $0x1488] sm:$0xff]  ;;  %v1049_v8 = vld [vmem:[%s10914_s21 + $0x1498] sm:$0xff] }
 0x2c6   : > { %v2607_v21 = vunpack.c.h.s8.bf16 %v1047_v47 }
 0x2c8   : > { %3679 = vmatpush1.bf16.msra.mxu0 %v2542_v12  ;;  %4253 = vmatpush1.bf16.msra.mxu1 %v2544_v13  ;;  %v2599_v12 = vunpack.c.l.s8.bf16 %v1047_v47  ;;  %v2601_v13 = vunpack.c.l.s8.bf16 %v1049_v8 }
 0x2c9   : > { %3680 = vmatprep.subr.bf16.mxu0 %v2551_v16  ;;  %4254 = vmatprep.subr.bf16.mxu1 %v2553_v17  ;;  %v1046_v16 = vld [vmem:[%s10914_s21 + $0x1480] sm:$0xff]  ;;  %v1048_v17 = vld [vmem:[%s10914_s21 + $0x1490] sm:$0xff] }
 0x2ca   : > { %v2598_v18 = vunpack.c.l.s8.bf16 %v1046_v16  ;;  %v2600_v19 = vunpack.c.l.s8.bf16 %v1048_v17  ;;  %v2608_v44 = vunpack.c.h.s8.bf16 %v1048_v17 }
 0x2cc   : > { %3681 = vmatpush1.bf16.msra.mxu0 %v2550_v24  ;;  %4255 = vmatpush1.bf16.msra.mxu1 %v2552_v23  ;;  %v2609_v24 = vunpack.c.h.s8.bf16 %v1049_v8  ;;  %v1055_v23 = vld [vmem:[%s10914_s21 + $0x14c8] sm:$0xff] }
 0x2cd   : > { %3682 = vmatprep.subr.bf16.mxu0 %v2559_v25  ;;  %4256 = vmatprep.subr.bf16.mxu1 %v2561_v26  ;;  %v1057_v25 = vld [vmem:[%s10914_s21 + $0x14d8] sm:$0xff]  ;;  %v2606_v26 = vunpack.c.h.s8.bf16 %v1046_v16  ;;  %v2615_v55 = vunpack.c.l.s8.bf16 %v1055_v23  ;;  %v2623_v34 = vunpack.c.h.s8.bf16 %v1055_v23 }
 0x2ce   : > { %v2625_v35 = vunpack.c.h.s8.bf16 %v1057_v25 }
 0x2d0   : > { %3683 = vmatpush1.bf16.msra.mxu0 %v2558_v29  ;;  %4257 = vmatpush1.bf16.msra.mxu1 %v2560_v30  ;;  %v2617_v29 = vunpack.c.l.s8.bf16 %v1057_v25  ;;  %v1054_v30 = vld [vmem:[%s10914_s21 + $0x14c0] sm:$0xff] }
 0x2d1   : > { %3693 = vmatprep.subr.bf16.mxu0 %v2567_v43  ;;  %4267 = vmatprep.subr.bf16.mxu1 %v2569_v32  ;;  %v1056_v43 = vld [vmem:[%s10914_s21 + $0x14d0] sm:$0xff]  ;;  %v2614_v32 = vunpack.c.l.s8.bf16 %v1054_v30 }
 0x2d2   : > { %v2616_v33 = vunpack.c.l.s8.bf16 %v1056_v43 }
 0x2d3   : > { %3685 = vmatmul.mubr.bf16.vlgmr.msra.gmra.mrb[0].mxu0 %v11441_v36  ;;  %4259 = vmatmul.mubr.bf16.vlgmr.msra.gmra.mrb[0].mxu1 %v11441_v36 }
 0x2d4   : > { %3694 = vmatpush1.bf16.msra.mxu0 %v2566_v37  ;;  %4268 = vmatpush1.bf16.msra.mxu1 %v2568_v40  ;;  %v1063_v37 = vld [vmem:[%s10914_s21 + $0x1508] sm:$0xff]  ;;  %v1065_v40 = vld [vmem:[%s10914_s21 + $0x1518] sm:$0xff] }
 0x2d5   : > { %3695 = vmatprep.subr.bf16.mxu0 %v2575_v41  ;;  %4269 = vmatprep.subr.bf16.mxu1 %v2577_v42  ;;  %v2622_v41 = vunpack.c.h.s8.bf16 %v1054_v30  ;;  %v2624_v42 = vunpack.c.h.s8.bf16 %v1056_v43  ;;  %v2631_v45 = vunpack.c.l.s8.bf16 %v1063_v37  ;;  %v2633_v46 = vunpack.c.l.s8.bf16 %v1065_v40 }
 0x2d6   : > { %3725 = vmatprep.mubr.bf16.mxu0 %v11446_v48  ;;  %4299 = vmatprep.mubr.bf16.mxu1 %v11446_v48  ;;  %v2639_v57 = vunpack.c.h.s8.bf16 %v1063_v37  ;;  %v2641_v63 = vunpack.c.h.s8.bf16 %v1065_v40 }
 0x2d8   : > { %3696 = vmatpush1.bf16.msra.mxu0 %v2574_v52  ;;  %4270 = vmatpush1.bf16.msra.mxu1 %v2576_v51  ;;  %v1062_v52 = vld [vmem:[%s10914_s21 + $0x1500] sm:$0xff]  ;;  %v1064_v51 = vld [vmem:[%s10914_s21 + $0x1510] sm:$0xff] }
 0x2d9   : > { %3697 = vmatprep.subr.bf16.mxu0 %v2583_v54  ;;  %4271 = vmatprep.subr.bf16.mxu1 %v2585_v56  ;;  %v2630_v54 = vunpack.c.l.s8.bf16 %v1062_v52  ;;  %v2632_v56 = vunpack.c.l.s8.bf16 %v1064_v51 }
 0x2dc   : > { %3698 = vmatpush1.bf16.msra.mxu0 %v2582_v0  ;;  %4272 = vmatpush1.bf16.msra.mxu1 %v2584_v1  ;;  %v1071_v0 = vld [vmem:[%s10914_s21 + $0x1548] sm:$0xff]  ;;  %v1073_v1 = vld [vmem:[%s10914_s21 + $0x1558] sm:$0xff] }
 0x2dd   : > { %3699 = vmatprep.subr.bf16.mxu0 %v2591_v2  ;;  %4273 = vmatprep.subr.bf16.mxu1 %v2593_v3  ;;  %v2638_v2 = vunpack.c.h.s8.bf16 %v1062_v52  ;;  %v2640_v3 = vunpack.c.h.s8.bf16 %v1064_v51  ;;  %v2647_v47 = vunpack.c.l.s8.bf16 %v1071_v0  ;;  %v2649_v8 = vunpack.c.l.s8.bf16 %v1073_v1 }
 0x2de   : > { %v2655_v16 = vunpack.c.h.s8.bf16 %v1071_v0  ;;  %v2657_v17 = vunpack.c.h.s8.bf16 %v1073_v1 }
 0x2e0   : > { %3700 = vmatpush1.bf16.msra.mxu0 %v2590_v9  ;;  %4274 = vmatpush1.bf16.msra.mxu1 %v2592_v10  ;;  %v1070_v9 = vld [vmem:[%s10914_s21 + $0x1540] sm:$0xff]  ;;  %v1072_v10 = vld [vmem:[%s10914_s21 + $0x1550] sm:$0xff] }
 0x2e1   : > { %3701 = vmatprep.subr.bf16.mxu0 %v2599_v12  ;;  %4275 = vmatprep.subr.bf16.mxu1 %v2601_v13  ;;  %v2646_v12 = vunpack.c.l.s8.bf16 %v1070_v9  ;;  %v2648_v13 = vunpack.c.l.s8.bf16 %v1072_v10 }
 0x2e4   : > { %3702 = vmatpush1.bf16.msra.mxu0 %v2598_v18  ;;  %4276 = vmatpush1.bf16.msra.mxu1 %v2600_v19  ;;  %v1079_v18 = vld [vmem:[%s10914_s21 + $0x1588] sm:$0xff]  ;;  %v1081_v19 = vld [vmem:[%s10914_s21 + $0x1598] sm:$0xff] }
 0x2e5   : > { %3703 = vmatprep.subr.bf16.mxu0 %v2607_v21  ;;  %4277 = vmatprep.subr.bf16.mxu1 %v2609_v24  ;;  %v2654_v21 = vunpack.c.h.s8.bf16 %v1070_v9  ;;  %v2656_v24 = vunpack.c.h.s8.bf16 %v1072_v10  ;;  %v2663_v23 = vunpack.c.l.s8.bf16 %v1079_v18  ;;  %v2665_v25 = vunpack.c.l.s8.bf16 %v1081_v19 }
 0x2e6   : > { %v2671_v30 = vunpack.c.h.s8.bf16 %v1079_v18  ;;  %v2673_v43 = vunpack.c.h.s8.bf16 %v1081_v19 }
 0x2e8   : > { %3704 = vmatpush1.bf16.msra.mxu0 %v2606_v26  ;;  %4278 = vmatpush1.bf16.msra.mxu1 %v2608_v44  ;;  %v1078_v26 = vld [vmem:[%s10914_s21 + $0x1580] sm:$0xff]  ;;  %v1080_v44 = vld [vmem:[%s10914_s21 + $0x1590] sm:$0xff] }
 0x2e9   : > { %3705 = vmatprep.subr.bf16.mxu0 %v2615_v55  ;;  %4279 = vmatprep.subr.bf16.mxu1 %v2617_v29  ;;  %v2662_v55 = vunpack.c.l.s8.bf16 %v1078_v26  ;;  %v2664_v29 = vunpack.c.l.s8.bf16 %v1080_v44 }
 0x2ec   : > { %3706 = vmatpush1.bf16.msra.mxu0 %v2614_v32  ;;  %4280 = vmatpush1.bf16.msra.mxu1 %v2616_v33  ;;  %v1087_v32 = vld [vmem:[%s10914_s21 + $0x15c8] sm:$0xff]  ;;  %v1089_v33 = vld [vmem:[%s10914_s21 + $0x15d8] sm:$0xff] }
 0x2ed   : > { %3707 = vmatprep.subr.bf16.mxu0 %v2623_v34  ;;  %4281 = vmatprep.subr.bf16.mxu1 %v2625_v35  ;;  %v2670_v34 = vunpack.c.h.s8.bf16 %v1078_v26  ;;  %v2672_v35 = vunpack.c.h.s8.bf16 %v1080_v44  ;;  %v2679_v37 = vunpack.c.l.s8.bf16 %v1087_v32  ;;  %v2681_v40 = vunpack.c.l.s8.bf16 %v1089_v33 }
 0x2ee   : > { %v2687_v52 = vunpack.c.h.s8.bf16 %v1087_v32  ;;  %v2689_v51 = vunpack.c.h.s8.bf16 %v1089_v33 }
 0x2f0   : > { %3708 = vmatpush1.bf16.msra.mxu0 %v2622_v41  ;;  %4282 = vmatpush1.bf16.msra.mxu1 %v2624_v42  ;;  %v1086_v41 = vld [vmem:[%s10914_s21 + $0x15c0] sm:$0xff]  ;;  %v1088_v42 = vld [vmem:[%s10914_s21 + $0x15d0] sm:$0xff] }
 0x2f1   : > { %3709 = vmatprep.subr.bf16.mxu0 %v2631_v45  ;;  %4283 = vmatprep.subr.bf16.mxu1 %v2633_v46  ;;  %v2678_v45 = vunpack.c.l.s8.bf16 %v1086_v41  ;;  %v2680_v46 = vunpack.c.l.s8.bf16 %v1088_v42 }
 0x2f4   : > { %3710 = vmatpush1.bf16.msra.mxu0 %v2630_v54  ;;  %4284 = vmatpush1.bf16.msra.mxu1 %v2632_v56  ;;  %v1095_v54 = vld [vmem:[%s10914_s21 + $0x1608] sm:$0xff]  ;;  %v1097_v56 = vld [vmem:[%s10914_s21 + $0x1618] sm:$0xff] }
 0x2f5   : > { %3711 = vmatprep.subr.bf16.mxu0 %v2639_v57  ;;  %4285 = vmatprep.subr.bf16.mxu1 %v2641_v63  ;;  %v2686_v57 = vunpack.c.h.s8.bf16 %v1086_v41  ;;  %v2688_v63 = vunpack.c.h.s8.bf16 %v1088_v42  ;;  %v2695_v0 = vunpack.c.l.s8.bf16 %v1095_v54  ;;  %v2697_v1 = vunpack.c.l.s8.bf16 %v1097_v56 }
 0x2f6   : > { %v2703_v10 = vunpack.c.h.s8.bf16 %v1095_v54 }
 0x2f8   : > { %3712 = vmatpush1.bf16.msra.mxu0 %v2638_v2  ;;  %4286 = vmatpush1.bf16.msra.mxu1 %v2640_v3  ;;  %v1094_v2 = vld [vmem:[%s10914_s21 + $0x1600] sm:$0xff]  ;;  %v1096_v3 = vld [vmem:[%s10914_s21 + $0x1610] sm:$0xff] }
 0x2f9   : > { %3713 = vmatprep.subr.bf16.mxu0 %v2647_v47  ;;  %4287 = vmatprep.subr.bf16.mxu1 %v2649_v8  ;;  %v11484_v47 = vrot.slane %v11433_v28, %v10975_v49  ;;  %v2694_v8 = vunpack.c.l.s8.bf16 %v1094_v2  ;;  %v2696_v9 = vunpack.c.l.s8.bf16 %v1096_v3  ;;  %v2702_v28 = vunpack.c.h.s8.bf16 %v1094_v2 }
 0x2fa   : > { %v2704_v18 = vunpack.c.h.s8.bf16 %v1096_v3 }
 0x2fc   : > { %3714 = vmatpush1.bf16.msra.mxu0 %v2646_v12  ;;  %4288 = vmatpush1.bf16.msra.mxu1 %v2648_v13  ;;  %v2705_v12 = vunpack.c.h.s8.bf16 %v1097_v56  ;;  %v1103_v13 = vld [vmem:[%s10914_s21 + $0x1648] sm:$0xff] }
 0x2fd   : > { %3715 = vmatprep.subr.bf16.mxu0 %v2655_v16  ;;  %4289 = vmatprep.subr.bf16.mxu1 %v2657_v17  ;;  %v1105_v16 = vld [vmem:[%s10914_s21 + $0x1658] sm:$0xff]  ;;  %v11490_v17 = vcombine.high %v11446_v48, %v11446_v48  ;;  %v2711_v19 = vunpack.c.l.s8.bf16 %v1103_v13  ;;  %v2719_v44 = vunpack.c.h.s8.bf16 %v1103_v13 }
 0x300   : > { %3716 = vmatpush1.bf16.msra.mxu0 %v2654_v21  ;;  %4290 = vmatpush1.bf16.msra.mxu1 %v2656_v24  ;;  %v2713_v21 = vunpack.c.l.s8.bf16 %v1105_v16  ;;  %v1102_v24 = vld [vmem:[%s10914_s21 + $0x1640] sm:$0xff] }
 0x301   : > { %3717 = vmatprep.subr.bf16.mxu0 %v2663_v23  ;;  %4291 = vmatprep.subr.bf16.mxu1 %v2665_v25  ;;  %v1104_v23 = vld [vmem:[%s10914_s21 + $0x1650] sm:$0xff]  ;;  %v2710_v25 = vunpack.c.l.s8.bf16 %v1102_v24 }
 0x302   : > { %v2712_v26 = vunpack.c.l.s8.bf16 %v1104_v23  ;;  %v2720_v32 = vunpack.c.h.s8.bf16 %v1104_v23 }
 0x304   : > { %3718 = vmatpush1.bf16.msra.mxu0 %v2662_v55  ;;  %4292 = vmatpush1.bf16.msra.mxu1 %v2664_v29  ;;  %v2721_v55 = vunpack.c.h.s8.bf16 %v1105_v16  ;;  %v1111_v29 = vld [vmem:[%s10914_s21 + $0x1688] sm:$0xff] }
 0x305   : > { %3719 = vmatprep.subr.bf16.mxu0 %v2671_v30  ;;  %4293 = vmatprep.subr.bf16.mxu1 %v2673_v43  ;;  %v1113_v30 = vld [vmem:[%s10914_s21 + $0x1698] sm:$0xff]  ;;  %v2718_v43 = vunpack.c.h.s8.bf16 %v1102_v24  ;;  %v2727_v33 = vunpack.c.l.s8.bf16 %v1111_v29  ;;  %v2735_v42 = vunpack.c.h.s8.bf16 %v1111_v29 }
 0x308   : > { %3720 = vmatpush1.bf16.msra.mxu0 %v2670_v34  ;;  %4294 = vmatpush1.bf16.msra.mxu1 %v2672_v35  ;;  %v2729_v34 = vunpack.c.l.s8.bf16 %v1113_v30  ;;  %v1110_v35 = vld [vmem:[%s10914_s21 + $0x1680] sm:$0xff] }
 0x309   : > { %3721 = vmatprep.subr.bf16.mxu0 %v2679_v37  ;;  %4295 = vmatprep.subr.bf16.mxu1 %v2681_v40  ;;  %v1112_v37 = vld [vmem:[%s10914_s21 + $0x1690] sm:$0xff]  ;;  %v2726_v40 = vunpack.c.l.s8.bf16 %v1110_v35 }
 0x30a   : > { %v2728_v41 = vunpack.c.l.s8.bf16 %v1112_v37  ;;  %v2736_v54 = vunpack.c.h.s8.bf16 %v1112_v37 }
 0x30c   : > { %3722 = vmatpush1.bf16.msra.mxu0 %v2678_v45  ;;  %4296 = vmatpush1.bf16.msra.mxu1 %v2680_v46  ;;  %v2737_v45 = vunpack.c.h.s8.bf16 %v1113_v30  ;;  %v1119_v46 = vld [vmem:[%s10914_s21 + $0x16c8] sm:$0xff] }
 0x30d   : > { %3723 = vmatprep.subr.bf16.mxu0 %v2687_v52  ;;  %4297 = vmatprep.subr.bf16.mxu1 %v2689_v51  ;;  %v1121_v52 = vld [vmem:[%s10914_s21 + $0x16d8] sm:$0xff]  ;;  %v2734_v51 = vunpack.c.h.s8.bf16 %v1110_v35  ;;  %v2743_v56 = vunpack.c.l.s8.bf16 %v1119_v46  ;;  %v2751_v3 = vunpack.c.h.s8.bf16 %v1119_v46 }
 0x310   : > { %3724 = vmatpush1.bf16.msra.mxu0 %v2686_v57  ;;  %4298 = vmatpush1.bf16.msra.mxu1 %v2688_v63  ;;  %v2745_v57 = vunpack.c.l.s8.bf16 %v1121_v52  ;;  %v1118_v63 = vld [vmem:[%s10914_s21 + $0x16c0] sm:$0xff] }
 0x311   : > { %3734 = vmatprep.subr.bf16.mxu0 %v2695_v0  ;;  %4308 = vmatprep.subr.bf16.mxu1 %v2697_v1  ;;  %v1120_v0 = vld [vmem:[%s10914_s21 + $0x16d0] sm:$0xff]  ;;  %v2742_v1 = vunpack.c.l.s8.bf16 %v1118_v63 }
 0x312   : > { %v2744_v2 = vunpack.c.l.s8.bf16 %v1120_v0  ;;  %v2752_v13 = vunpack.c.h.s8.bf16 %v1120_v0 }
 0x313   : > { %3726 = vmatmul.mubr.bf16.vlgmr.msra.gmra.mrb[0].mxu0 %v11484_v47  ;;  %4300 = vmatmul.mubr.bf16.vlgmr.msra.gmra.mrb[0].mxu1 %v11484_v47 }
 0x314   : > { %3735 = vmatpush1.bf16.msra.mxu0 %v2694_v8  ;;  %4309 = vmatpush1.bf16.msra.mxu1 %v2696_v9  ;;  %v2753_v8 = vunpack.c.h.s8.bf16 %v1121_v52  ;;  %v1127_v9 = vld [vmem:[%s10914_s21 + $0x1708] sm:$0xff] }
 0x315   : > { %3736 = vmatprep.subr.bf16.mxu0 %v2703_v10  ;;  %4310 = vmatprep.subr.bf16.mxu1 %v2705_v12  ;;  %v1129_v10 = vld [vmem:[%s10914_s21 + $0x1718] sm:$0xff]  ;;  %v2750_v12 = vunpack.c.h.s8.bf16 %v1118_v63  ;;  %v2759_v16 = vunpack.c.l.s8.bf16 %v1127_v9  ;;  %v2767_v23 = vunpack.c.h.s8.bf16 %v1127_v9 }
 0x316   : > { %3766 = vmatprep.mubr.bf16.mxu0 %v11490_v17  ;;  %4340 = vmatprep.mubr.bf16.mxu1 %v11490_v17 }
 0x318   : > { %3737 = vmatpush1.bf16.msra.mxu0 %v2702_v28  ;;  %4311 = vmatpush1.bf16.msra.mxu1 %v2704_v18  ;;  %v2761_v28 = vunpack.c.l.s8.bf16 %v1129_v10  ;;  %v1126_v18 = vld [vmem:[%s10914_s21 + $0x1700] sm:$0xff] }
 0x319   : > { %3738 = vmatprep.subr.bf16.mxu0 %v2711_v19  ;;  %4312 = vmatprep.subr.bf16.mxu1 %v2713_v21  ;;  %v1128_v19 = vld [vmem:[%s10914_s21 + $0x1710] sm:$0xff]  ;;  %v2758_v21 = vunpack.c.l.s8.bf16 %v1126_v18 }
 0x31a   : > { %v2760_v24 = vunpack.c.l.s8.bf16 %v1128_v19  ;;  %v2768_v29 = vunpack.c.h.s8.bf16 %v1128_v19 }
 0x31c   : > { %3739 = vmatpush1.bf16.msra.mxu0 %v2710_v25  ;;  %4313 = vmatpush1.bf16.msra.mxu1 %v2712_v26  ;;  %v2769_v25 = vunpack.c.h.s8.bf16 %v1129_v10  ;;  %v1135_v26 = vld [vmem:[%s10914_s21 + $0x1748] sm:$0xff] }
 0x31d   : > { %3740 = vmatprep.subr.bf16.mxu0 %v2719_v44  ;;  %4314 = vmatprep.subr.bf16.mxu1 %v2721_v55  ;;  %v1137_v44 = vld [vmem:[%s10914_s21 + $0x1758] sm:$0xff]  ;;  %v2766_v55 = vunpack.c.h.s8.bf16 %v1126_v18  ;;  %v2775_v30 = vunpack.c.l.s8.bf16 %v1135_v26  ;;  %v2783_v37 = vunpack.c.h.s8.bf16 %v1135_v26 }
 0x320   : > { %3741 = vmatpush1.bf16.msra.mxu0 %v2718_v43  ;;  %4315 = vmatpush1.bf16.msra.mxu1 %v2720_v32  ;;  %v2777_v43 = vunpack.c.l.s8.bf16 %v1137_v44  ;;  %v1134_v32 = vld [vmem:[%s10914_s21 + $0x1740] sm:$0xff] }
 0x321   : > { %3742 = vmatprep.subr.bf16.mxu0 %v2727_v33  ;;  %4316 = vmatprep.subr.bf16.mxu1 %v2729_v34  ;;  %v1136_v33 = vld [vmem:[%s10914_s21 + $0x1750] sm:$0xff]  ;;  %v2774_v34 = vunpack.c.l.s8.bf16 %v1134_v32 }
 0x322   : > { %v2776_v35 = vunpack.c.l.s8.bf16 %v1136_v33  ;;  %v2784_v46 = vunpack.c.h.s8.bf16 %v1136_v33  ;;  %v11533_v33 = vcombine.high %v11484_v47, %v11484_v47 }
 0x324   : > { %3743 = vmatpush1.bf16.msra.mxu0 %v2726_v40  ;;  %4317 = vmatpush1.bf16.msra.mxu1 %v2728_v41  ;;  %v2785_v40 = vunpack.c.h.s8.bf16 %v1137_v44  ;;  %v1143_v41 = vld [vmem:[%s10914_s21 + $0x1788] sm:$0xff] }
 0x325   : > { %3744 = vmatprep.subr.bf16.mxu0 %v2735_v42  ;;  %4318 = vmatprep.subr.bf16.mxu1 %v2737_v45  ;;  %v1145_v42 = vld [vmem:[%s10914_s21 + $0x1798] sm:$0xff]  ;;  %v2782_v45 = vunpack.c.h.s8.bf16 %v1134_v32  ;;  %v2791_v52 = vunpack.c.l.s8.bf16 %v1143_v41  ;;  %v2799_v0 = vunpack.c.h.s8.bf16 %v1143_v41  ;;  %v1167_v41 = vld [vmem:[%s10914_s21 + $0x1848] sm:$0xff] }
 0x328   : > { %3745 = vmatpush1.bf16.msra.mxu0 %v2734_v51  ;;  %4319 = vmatpush1.bf16.msra.mxu1 %v2736_v54  ;;  %v2793_v51 = vunpack.c.l.s8.bf16 %v1145_v42  ;;  %v1142_v54 = vld [vmem:[%s10914_s21 + $0x1780] sm:$0xff] }
 0x329   : > { %3746 = vmatprep.subr.bf16.mxu0 %v2743_v56  ;;  %4320 = vmatprep.subr.bf16.mxu1 %v2745_v57  ;;  %v1144_v56 = vld [vmem:[%s10914_s21 + $0x1790] sm:$0xff]  ;;  %v2790_v57 = vunpack.c.l.s8.bf16 %v1142_v54 }
 0x32a   : > { %v2792_v63 = vunpack.c.l.s8.bf16 %v1144_v56  ;;  %v2800_v9 = vunpack.c.h.s8.bf16 %v1144_v56  ;;  %v1166_v56 = vld [vmem:[%s10914_s21 + $0x1840] sm:$0xff] }
 0x32c   : > { %3747 = vmatpush1.bf16.msra.mxu0 %v2742_v1  ;;  %4321 = vmatpush1.bf16.msra.mxu1 %v2744_v2  ;;  %v2801_v1 = vunpack.c.h.s8.bf16 %v1145_v42  ;;  %v1151_v2 = vld [vmem:[%s10914_s21 + $0x17c8] sm:$0xff]  ;;  %v1169_v42 = vld [vmem:[%s10914_s21 + $0x1858] sm:$0xff] }
 0x32d   : > { %3748 = vmatprep.subr.bf16.mxu0 %v2751_v3  ;;  %4322 = vmatprep.subr.bf16.mxu1 %v2753_v8  ;;  %v1153_v3 = vld [vmem:[%s10914_s21 + $0x17d8] sm:$0xff]  ;;  %v2798_v8 = vunpack.c.h.s8.bf16 %v1142_v54  ;;  %v2807_v10 = vunpack.c.l.s8.bf16 %v1151_v2  ;;  %v2815_v19 = vunpack.c.h.s8.bf16 %v1151_v2  ;;  %v2841_v54 = vunpack.c.l.s8.bf16 %v1169_v42 }
 0x32e   : > { %v2849_v2 = vunpack.c.h.s8.bf16 %v1169_v42  ;;  %v1193_v42 = vld [vmem:[%s10914_s21 + $0x1918] sm:$0xff] }
 0x330   : > { %3749 = vmatpush1.bf16.msra.mxu0 %v2750_v12  ;;  %4323 = vmatpush1.bf16.msra.mxu1 %v2752_v13  ;;  %v2809_v12 = vunpack.c.l.s8.bf16 %v1153_v3  ;;  %v1150_v13 = vld [vmem:[%s10914_s21 + $0x17c0] sm:$0xff] }
 0x331   : > { %3750 = vmatprep.subr.bf16.mxu0 %v2759_v16  ;;  %4324 = vmatprep.subr.bf16.mxu1 %v2761_v28  ;;  %v1152_v16 = vld [vmem:[%s10914_s21 + $0x17d0] sm:$0xff]  ;;  %v2806_v28 = vunpack.c.l.s8.bf16 %v1150_v13  ;;  %v2814_v26 = vunpack.c.h.s8.bf16 %v1150_v13 }
 0x332   : > { %v2808_v18 = vunpack.c.l.s8.bf16 %v1152_v16  ;;  %v2816_v44 = vunpack.c.h.s8.bf16 %v1152_v16  ;;  %v1174_v16 = vld [vmem:[%s10914_s21 + $0x1880] sm:$0xff] }
 0x334   : > { %3751 = vmatpush1.bf16.msra.mxu0 %v2758_v21  ;;  %4325 = vmatpush1.bf16.msra.mxu1 %v2760_v24  ;;  %v2817_v21 = vunpack.c.h.s8.bf16 %v1153_v3  ;;  %v1159_v24 = vld [vmem:[%s10914_s21 + $0x1808] sm:$0xff] }
 0x335   : > { %3752 = vmatprep.subr.bf16.mxu0 %v2767_v23  ;;  %4326 = vmatprep.subr.bf16.mxu1 %v2769_v25  ;;  %v1161_v23 = vld [vmem:[%s10914_s21 + $0x1818] sm:$0xff]  ;;  %v11525_v25 = vld.sshfl [vmem:[%s10928_s29 + $0x18] sm:$0x33 pattern:$0x75316420] }
 0x336   : > { %v3238_v32 = vcombine.high %v11525_v25, %v11525_v25  ;;  %v1175_v3 = vld [vmem:[%s10914_s21 + $0x1888] sm:$0xff] }
 0x338   : > { %3753 = vmatpush1.bf16.msra.mxu0 %v2766_v55  ;;  %4327 = vmatpush1.bf16.msra.mxu1 %v2768_v29  ;;  %v2823_v55 = vunpack.c.l.s8.bf16 %v1159_v24  ;;  %v2825_v29 = vunpack.c.l.s8.bf16 %v1161_v23 }
 0x339   : > { %3754 = vmatprep.subr.bf16.mxu0 %v2775_v30  ;;  %4328 = vmatprep.subr.bf16.mxu1 %v2777_v43  ;;  %v1158_v30 = vld [vmem:[%s10914_s21 + $0x1800] sm:$0xff]  ;;  %v1160_v43 = vld [vmem:[%s10914_s21 + $0x1810] sm:$0xff] }
 0x33c   : > { %3755 = vmatpush1.bf16.msra.mxu0 %v2774_v34  ;;  %4329 = vmatpush1.bf16.msra.mxu1 %v2776_v35  ;;  %v2822_v34 = vunpack.c.l.s8.bf16 %v1158_v30  ;;  %v2824_v35 = vunpack.c.l.s8.bf16 %v1160_v43 }
 0x33d   : > { %3756 = vmatprep.subr.bf16.mxu0 %v2783_v37  ;;  %4330 = vmatprep.subr.bf16.mxu1 %v2785_v40  ;;  %v2831_v37 = vunpack.c.h.s8.bf16 %v1159_v24  ;;  %v2833_v40 = vunpack.c.h.s8.bf16 %v1161_v23  ;;  %v1183_v23 = vld [vmem:[%s10914_s21 + $0x18c8] sm:$0xff] }
 0x340   : > { %3757 = vmatpush1.bf16.msra.mxu0 %v2782_v45  ;;  %4331 = vmatpush1.bf16.msra.mxu1 %v2784_v46  ;;  %v11538_v45 = vrot.slane %v3238_v32, %v10975_v49  ;;  %v2830_v46 = vunpack.c.h.s8.bf16 %v1158_v30  ;;  %v1184_v32 = vld [vmem:[%s10914_s21 + $0x18d0] sm:$0xff] }
 0x341   : > { %3758 = vmatprep.subr.bf16.mxu0 %v2791_v52  ;;  %4332 = vmatprep.subr.bf16.mxu1 %v2793_v51  ;;  %v2832_v52 = vunpack.c.h.s8.bf16 %v1160_v43  ;;  %v2839_v51 = vunpack.c.l.s8.bf16 %v1167_v41  ;;  %v1182_v43 = vld [vmem:[%s10914_s21 + $0x18c0] sm:$0xff] }
 0x344   : > { %3759 = vmatpush1.bf16.msra.mxu0 %v2790_v57  ;;  %4333 = vmatpush1.bf16.msra.mxu1 %v2792_v63  ;;  %v1168_v57 = vld [vmem:[%s10914_s21 + $0x1850] sm:$0xff]  ;;  %v2838_v63 = vunpack.c.l.s8.bf16 %v1166_v56 }
 0x345   : > { %3760 = vmatprep.subr.bf16.mxu0 %v2799_v0  ;;  %4334 = vmatprep.subr.bf16.mxu1 %v2801_v1  ;;  %v2840_v0 = vunpack.c.l.s8.bf16 %v1168_v57  ;;  %v2847_v1 = vunpack.c.h.s8.bf16 %v1167_v41  ;;  %v1191_v41 = vld [vmem:[%s10914_s21 + $0x1908] sm:$0xff] }
 0x348   : > { %3761 = vmatpush1.bf16.msra.mxu0 %v2798_v8  ;;  %4335 = vmatpush1.bf16.msra.mxu1 %v2800_v9  ;;  %v1177_v8 = vld [vmem:[%s10914_s21 + $0x1898] sm:$0xff]  ;;  %v2846_v9 = vunpack.c.h.s8.bf16 %v1166_v56  ;;  %v1190_v56 = vld [vmem:[%s10914_s21 + $0x1900] sm:$0xff] }
 0x349   : > { %3762 = vmatprep.subr.bf16.mxu0 %v2807_v10  ;;  %4336 = vmatprep.subr.bf16.mxu1 %v2809_v12  ;;  %v2848_v10 = vunpack.c.h.s8.bf16 %v1168_v57  ;;  %v2855_v12 = vunpack.c.l.s8.bf16 %v1175_v3  ;;  %v2857_v13 = vunpack.c.l.s8.bf16 %v1177_v8  ;;  %v2865_v24 = vunpack.c.h.s8.bf16 %v1177_v8  ;;  %v1192_v57 = vld [vmem:[%s10914_s21 + $0x1910] sm:$0xff]  ;;  %v1201_v8 = vld [vmem:[%s10914_s21 + $0x1958] sm:$0xff] }
 0x34c   : > { %3763 = vmatpush1.bf16.msra.mxu0 %v2806_v28  ;;  %4337 = vmatpush1.bf16.msra.mxu1 %v2808_v18  ;;  %v1176_v28 = vld [vmem:[%s10914_s21 + $0x1890] sm:$0xff]  ;;  %v2854_v18 = vunpack.c.l.s8.bf16 %v1174_v16 }
 0x34d   : > { %3764 = vmatprep.subr.bf16.mxu0 %v2815_v19  ;;  %4338 = vmatprep.subr.bf16.mxu1 %v2817_v21  ;;  %v2856_v19 = vunpack.c.l.s8.bf16 %v1176_v28  ;;  %v2863_v21 = vunpack.c.h.s8.bf16 %v1175_v3  ;;  %v1199_v3 = vld [vmem:[%s10914_s21 + $0x1948] sm:$0xff] }
 0x350   : > { %3765 = vmatpush1.bf16.msra.mxu0 %v2814_v26  ;;  %4339 = vmatpush1.bf16.msra.mxu1 %v2816_v44  ;;  %v1185_v26 = vld [vmem:[%s10914_s21 + $0x18d8] sm:$0xff]  ;;  %v2862_v44 = vunpack.c.h.s8.bf16 %v1174_v16  ;;  %v1198_v16 = vld [vmem:[%s10914_s21 + $0x1940] sm:$0xff] }
 0x351   : > { %3775 = vmatprep.subr.bf16.mxu0 %v2823_v55  ;;  %4349 = vmatprep.subr.bf16.mxu1 %v2825_v29  ;;  %v2864_v55 = vunpack.c.h.s8.bf16 %v1176_v28  ;;  %v2871_v29 = vunpack.c.l.s8.bf16 %v1183_v23  ;;  %v2873_v30 = vunpack.c.l.s8.bf16 %v1185_v26  ;;  %v1200_v28 = vld [vmem:[%s10914_s21 + $0x1950] sm:$0xff] }
 0x353   : > { %3767 = vmatmul.mubr.bf16.vlgmr.msra.gmra.mrb[0].mxu0 %v11533_v33  ;;  %4341 = vmatmul.mubr.bf16.vlgmr.msra.gmra.mrb[0].mxu1 %v11533_v33 }
 0x354   : > { %3776 = vmatpush1.bf16.msra.mxu0 %v2822_v34  ;;  %4350 = vmatpush1.bf16.msra.mxu1 %v2824_v35  ;;  %v2870_v34 = vunpack.c.l.s8.bf16 %v1182_v43  ;;  %v2872_v35 = vunpack.c.l.s8.bf16 %v1184_v32 }
 0x355   : > { %3777 = vmatprep.subr.bf16.mxu0 %v2831_v37  ;;  %4351 = vmatprep.subr.bf16.mxu1 %v2833_v40  ;;  %v2879_v37 = vunpack.c.h.s8.bf16 %v1183_v23  ;;  %v2881_v40 = vunpack.c.h.s8.bf16 %v1185_v26  ;;  %v1207_v23 = vld [vmem:[%s10914_s21 + $0x1988] sm:$0xff]  ;;  %v1209_v26 = vld [vmem:[%s10914_s21 + $0x1998] sm:$0xff] }
 0x356   : > { %3807 = vmatprep.mubr.bf16.mxu0 %v11538_v45  ;;  %4381 = vmatprep.mubr.bf16.mxu1 %v11538_v45 }
 0x358   : > { %3778 = vmatpush1.bf16.msra.mxu0 %v2830_v46  ;;  %4352 = vmatpush1.bf16.msra.mxu1 %v2832_v52  ;;  %v2878_v46 = vunpack.c.h.s8.bf16 %v1182_v43  ;;  %v2880_v52 = vunpack.c.h.s8.bf16 %v1184_v32  ;;  %v1206_v43 = vld [vmem:[%s10914_s21 + $0x1980] sm:$0xff]  ;;  %v1208_v32 = vld [vmem:[%s10914_s21 + $0x1990] sm:$0xff] }
 0x359   : > { %3779 = vmatprep.subr.bf16.mxu0 %v2839_v51  ;;  %4353 = vmatprep.subr.bf16.mxu1 %v2841_v54  ;;  %v2887_v51 = vunpack.c.l.s8.bf16 %v1191_v41  ;;  %v2889_v54 = vunpack.c.l.s8.bf16 %v1193_v42 }
 0x35c   : > { %3780 = vmatpush1.bf16.msra.mxu0 %v2838_v63  ;;  %4354 = vmatpush1.bf16.msra.mxu1 %v2840_v0  ;;  %v2886_v63 = vunpack.c.l.s8.bf16 %v1190_v56  ;;  %v2888_v0 = vunpack.c.l.s8.bf16 %v1192_v57 }
 0x35d   : > { %3781 = vmatprep.subr.bf16.mxu0 %v2847_v1  ;;  %4355 = vmatprep.subr.bf16.mxu1 %v2849_v2  ;;  %v2895_v1 = vunpack.c.h.s8.bf16 %v1191_v41  ;;  %v2897_v2 = vunpack.c.h.s8.bf16 %v1193_v42  ;;  %v1215_v41 = vld [vmem:[%s10914_s21 + $0x19c8] sm:$0xff]  ;;  %v1217_v42 = vld [vmem:[%s10914_s21 + $0x19d8] sm:$0xff] }
 0x360   : > { %3782 = vmatpush1.bf16.msra.mxu0 %v2846_v9  ;;  %4356 = vmatpush1.bf16.msra.mxu1 %v2848_v10  ;;  %v2894_v9 = vunpack.c.h.s8.bf16 %v1190_v56  ;;  %v2896_v10 = vunpack.c.h.s8.bf16 %v1192_v57  ;;  %v1214_v56 = vld [vmem:[%s10914_s21 + $0x19c0] sm:$0xff]  ;;  %v1216_v57 = vld [vmem:[%s10914_s21 + $0x19d0] sm:$0xff] }
 0x361   : > { %3783 = vmatprep.subr.bf16.mxu0 %v2855_v12  ;;  %4357 = vmatprep.subr.bf16.mxu1 %v2857_v13  ;;  %v2903_v12 = vunpack.c.l.s8.bf16 %v1199_v3  ;;  %v2905_v13 = vunpack.c.l.s8.bf16 %v1201_v8 }
 0x364   : > { %3784 = vmatpush1.bf16.msra.mxu0 %v2854_v18  ;;  %4358 = vmatpush1.bf16.msra.mxu1 %v2856_v19  ;;  %v2902_v18 = vunpack.c.l.s8.bf16 %v1198_v16  ;;  %v2904_v19 = vunpack.c.l.s8.bf16 %v1200_v28 }
 0x365   : > { %3785 = vmatprep.subr.bf16.mxu0 %v2863_v21  ;;  %4359 = vmatprep.subr.bf16.mxu1 %v2865_v24  ;;  %v2911_v21 = vunpack.c.h.s8.bf16 %v1199_v3  ;;  %v2913_v24 = vunpack.c.h.s8.bf16 %v1201_v8  ;;  %v1223_v3 = vld [vmem:[%s10914_s21 + $0x1a08] sm:$0xff]  ;;  %v1225_v8 = vld [vmem:[%s10914_s21 + $0x1a18] sm:$0xff] }
 0x368   : > { %3786 = vmatpush1.bf16.msra.mxu0 %v2862_v44  ;;  %4360 = vmatpush1.bf16.msra.mxu1 %v2864_v55  ;;  %v2910_v44 = vunpack.c.h.s8.bf16 %v1198_v16  ;;  %v2912_v55 = vunpack.c.h.s8.bf16 %v1200_v28  ;;  %v1222_v16 = vld [vmem:[%s10914_s21 + $0x1a00] sm:$0xff]  ;;  %v1224_v28 = vld [vmem:[%s10914_s21 + $0x1a10] sm:$0xff] }
 0x369   : > { %3787 = vmatprep.subr.bf16.mxu0 %v2871_v29  ;;  %4361 = vmatprep.subr.bf16.mxu1 %v2873_v30  ;;  %v2919_v29 = vunpack.c.l.s8.bf16 %v1207_v23  ;;  %v2921_v30 = vunpack.c.l.s8.bf16 %v1209_v26 }
 0x36c   : > { %3788 = vmatpush1.bf16.msra.mxu0 %v2870_v34  ;;  %4362 = vmatpush1.bf16.msra.mxu1 %v2872_v35  ;;  %v2918_v34 = vunpack.c.l.s8.bf16 %v1206_v43  ;;  %v2920_v35 = vunpack.c.l.s8.bf16 %v1208_v32 }
 0x36d   : > { %3789 = vmatprep.subr.bf16.mxu0 %v2879_v37  ;;  %4363 = vmatprep.subr.bf16.mxu1 %v2881_v40  ;;  %v2927_v37 = vunpack.c.h.s8.bf16 %v1207_v23  ;;  %v2929_v40 = vunpack.c.h.s8.bf16 %v1209_v26  ;;  %v2961_v23 = vunpack.c.h.s8.bf16 %v1225_v8  ;;  %v1231_v26 = vld [vmem:[%s10914_s21 + $0x1a48] sm:$0xff] }
 0x370   : > { %3790 = vmatpush1.bf16.msra.mxu0 %v2878_v46  ;;  %4364 = vmatpush1.bf16.msra.mxu1 %v2880_v52  ;;  %v2926_v46 = vunpack.c.h.s8.bf16 %v1206_v43  ;;  %v2928_v52 = vunpack.c.h.s8.bf16 %v1208_v32  ;;  %v1230_v43 = vld [vmem:[%s10914_s21 + $0x1a40] sm:$0xff]  ;;  %v1232_v32 = vld [vmem:[%s10914_s21 + $0x1a50] sm:$0xff] }
 0x371   : > { %3791 = vmatprep.subr.bf16.mxu0 %v2887_v51  ;;  %4365 = vmatprep.subr.bf16.mxu1 %v2889_v54  ;;  %v2935_v51 = vunpack.c.l.s8.bf16 %v1215_v41  ;;  %v2937_v54 = vunpack.c.l.s8.bf16 %v1217_v42 }
 0x374   : > { %3792 = vmatpush1.bf16.msra.mxu0 %v2886_v63  ;;  %4366 = vmatpush1.bf16.msra.mxu1 %v2888_v0  ;;  %v2934_v63 = vunpack.c.l.s8.bf16 %v1214_v56  ;;  %v2936_v0 = vunpack.c.l.s8.bf16 %v1216_v57 }
 0x375   : > { %3793 = vmatprep.subr.bf16.mxu0 %v2895_v1  ;;  %4367 = vmatprep.subr.bf16.mxu1 %v2897_v2  ;;  %v2943_v1 = vunpack.c.h.s8.bf16 %v1215_v41  ;;  %v2945_v2 = vunpack.c.h.s8.bf16 %v1217_v42  ;;  %v1239_v41 = vld [vmem:[%s10914_s21 + $0x1a88] sm:$0xff]  ;;  %v1241_v42 = vld [vmem:[%s10914_s21 + $0x1a98] sm:$0xff] }
 0x378   : > { %3794 = vmatpush1.bf16.msra.mxu0 %v2894_v9  ;;  %4368 = vmatpush1.bf16.msra.mxu1 %v2896_v10  ;;  %v2942_v9 = vunpack.c.h.s8.bf16 %v1214_v56  ;;  %v2944_v10 = vunpack.c.h.s8.bf16 %v1216_v57  ;;  %v1238_v56 = vld [vmem:[%s10914_s21 + $0x1a80] sm:$0xff]  ;;  %v1240_v57 = vld [vmem:[%s10914_s21 + $0x1a90] sm:$0xff] }
 0x379   : > { %3795 = vmatprep.subr.bf16.mxu0 %v2903_v12  ;;  %4369 = vmatprep.subr.bf16.mxu1 %v2905_v13  ;;  %v2951_v12 = vunpack.c.l.s8.bf16 %v1223_v3  ;;  %v2953_v13 = vunpack.c.l.s8.bf16 %v1225_v8  ;;  %v1249_v8 = vld [vmem:[%s10914_s21 + $0x1ad8] sm:$0xff] }
 0x37c   : > { %3796 = vmatpush1.bf16.msra.mxu0 %v2902_v18  ;;  %4370 = vmatpush1.bf16.msra.mxu1 %v2904_v19  ;;  %v11576_v18 = vrot.slane %v11525_v25, %v10975_v49  ;;  %v2950_v19 = vunpack.c.l.s8.bf16 %v1222_v16  ;;  %v2958_v49 = vunpack.c.h.s8.bf16 %v1222_v16  ;;  %v2960_v25 = vunpack.c.h.s8.bf16 %v1224_v28  ;;  %v1246_v16 = vld [vmem:[%s10914_s21 + $0x1ac0] sm:$0xff] }
 0x37d   : > { %3797 = vmatprep.subr.bf16.mxu0 %v2911_v21  ;;  %4371 = vmatprep.subr.bf16.mxu1 %v2913_v24  ;;  %v2952_v21 = vunpack.c.l.s8.bf16 %v1224_v28  ;;  %v2959_v24 = vunpack.c.h.s8.bf16 %v1223_v3  ;;  %v1247_v3 = vld [vmem:[%s10914_s21 + $0x1ac8] sm:$0xff]  ;;  %v1248_v28 = vld [vmem:[%s10914_s21 + $0x1ad0] sm:$0xff] }
 0x380   : > { %3798 = vmatpush1.bf16.msra.mxu0 %v2910_v44  ;;  %4372 = vmatpush1.bf16.msra.mxu1 %v2912_v55  ;;  %v1233_v44 = vld [vmem:[%s10914_s21 + $0x1a58] sm:$0xff]  ;;  %v11582_v55 = vcombine.high %v11538_v45, %v11538_v45 }
 0x381   : > { %3799 = vmatprep.subr.bf16.mxu0 %v2919_v29  ;;  %4373 = vmatprep.subr.bf16.mxu1 %v2921_v30  ;;  %v2967_v29 = vunpack.c.l.s8.bf16 %v1231_v26  ;;  %v2969_v30 = vunpack.c.l.s8.bf16 %v1233_v44 }
 0x384   : > { %3800 = vmatpush1.bf16.msra.mxu0 %v2918_v34  ;;  %4374 = vmatpush1.bf16.msra.mxu1 %v2920_v35  ;;  %v2966_v34 = vunpack.c.l.s8.bf16 %v1230_v43  ;;  %v2968_v35 = vunpack.c.l.s8.bf16 %v1232_v32 }
 0x385   : > { %3801 = vmatprep.subr.bf16.mxu0 %v2927_v37  ;;  %4375 = vmatprep.subr.bf16.mxu1 %v2929_v40  ;;  %v2975_v37 = vunpack.c.h.s8.bf16 %v1231_v26  ;;  %v2977_v40 = vunpack.c.h.s8.bf16 %v1233_v44  ;;  %v1255_v26 = vld [vmem:[%s10914_s21 + $0x1b08] sm:$0xff]  ;;  %v1257_v44 = vld [vmem:[%s10914_s21 + $0x1b18] sm:$0xff] }
 0x388   : > { %3802 = vmatpush1.bf16.msra.mxu0 %v2926_v46  ;;  %4376 = vmatpush1.bf16.msra.mxu1 %v2928_v52  ;;  %v2974_v46 = vunpack.c.h.s8.bf16 %v1230_v43  ;;  %v2976_v52 = vunpack.c.h.s8.bf16 %v1232_v32  ;;  %v1254_v43 = vld [vmem:[%s10914_s21 + $0x1b00] sm:$0xff]  ;;  %v1256_v32 = vld [vmem:[%s10914_s21 + $0x1b10] sm:$0xff] }
 0x389   : > { %3803 = vmatprep.subr.bf16.mxu0 %v2935_v51  ;;  %4377 = vmatprep.subr.bf16.mxu1 %v2937_v54  ;;  %v2983_v51 = vunpack.c.l.s8.bf16 %v1239_v41  ;;  %v2985_v54 = vunpack.c.l.s8.bf16 %v1241_v42 }
 0x38c   : > { %3804 = vmatpush1.bf16.msra.mxu0 %v2934_v63  ;;  %4378 = vmatpush1.bf16.msra.mxu1 %v2936_v0  ;;  %v2982_v63 = vunpack.c.l.s8.bf16 %v1238_v56  ;;  %v2984_v0 = vunpack.c.l.s8.bf16 %v1240_v57 }
 0x38d   : > { %3805 = vmatprep.subr.bf16.mxu0 %v2943_v1  ;;  %4379 = vmatprep.subr.bf16.mxu1 %v2945_v2  ;;  %v2991_v1 = vunpack.c.h.s8.bf16 %v1239_v41  ;;  %v2993_v2 = vunpack.c.h.s8.bf16 %v1241_v42  ;;  %v1263_v41 = vld [vmem:[%s10914_s21 + $0x1b48] sm:$0xff]  ;;  %v1265_v42 = vld [vmem:[%s10914_s21 + $0x1b58] sm:$0xff] }
 0x390   : > { %3806 = vmatpush1.bf16.msra.mxu0 %v2942_v9  ;;  %4380 = vmatpush1.bf16.msra.mxu1 %v2944_v10  ;;  %v2990_v9 = vunpack.c.h.s8.bf16 %v1238_v56  ;;  %v2992_v10 = vunpack.c.h.s8.bf16 %v1240_v57  ;;  %v1262_v56 = vld [vmem:[%s10914_s21 + $0x1b40] sm:$0xff]  ;;  %v1264_v57 = vld [vmem:[%s10914_s21 + $0x1b50] sm:$0xff] }
 0x391   : > { %3816 = vmatprep.subr.bf16.mxu0 %v2951_v12  ;;  %4390 = vmatprep.subr.bf16.mxu1 %v2953_v13  ;;  %v2999_v12 = vunpack.c.l.s8.bf16 %v1247_v3  ;;  %v3001_v13 = vunpack.c.l.s8.bf16 %v1249_v8 }
 0x393   : > { %3808 = vmatmul.mubr.bf16.vlgmr.msra.gmra.mrb[0].mxu0 %v11576_v18  ;;  %4382 = vmatmul.mubr.bf16.vlgmr.msra.gmra.mrb[0].mxu1 %v11576_v18 }
 0x394   : > { %3817 = vmatpush1.bf16.msra.mxu0 %v2950_v19  ;;  %4391 = vmatpush1.bf16.msra.mxu1 %v2952_v21  ;;  %v2998_v19 = vunpack.c.l.s8.bf16 %v1246_v16  ;;  %v3000_v21 = vunpack.c.l.s8.bf16 %v1248_v28 }
 0x395   : > { %3818 = vmatprep.subr.bf16.mxu0 %v2959_v24  ;;  %4392 = vmatprep.subr.bf16.mxu1 %v2961_v23  ;;  %v3007_v24 = vunpack.c.h.s8.bf16 %v1247_v3  ;;  %v3009_v23 = vunpack.c.h.s8.bf16 %v1249_v8  ;;  %v1271_v3 = vld [vmem:[%s10914_s21 + $0x1b88] sm:$0xff]  ;;  %v1273_v8 = vld [vmem:[%s10914_s21 + $0x1b98] sm:$0xff] }
 0x396   : > { %3848 = vmatprep.mubr.bf16.mxu0 %v11582_v55  ;;  %4422 = vmatprep.mubr.bf16.mxu1 %v11582_v55 }
 0x398   : > { %3819 = vmatpush1.bf16.msra.mxu0 %v2958_v49  ;;  %4393 = vmatpush1.bf16.msra.mxu1 %v2960_v25  ;;  %v3006_v49 = vunpack.c.h.s8.bf16 %v1246_v16  ;;  %v3008_v25 = vunpack.c.h.s8.bf16 %v1248_v28  ;;  %v1270_v16 = vld [vmem:[%s10914_s21 + $0x1b80] sm:$0xff]  ;;  %v1272_v28 = vld [vmem:[%s10914_s21 + $0x1b90] sm:$0xff] }
 0x399   : > { %3820 = vmatprep.subr.bf16.mxu0 %v2967_v29  ;;  %4394 = vmatprep.subr.bf16.mxu1 %v2969_v30  ;;  %v3015_v29 = vunpack.c.l.s8.bf16 %v1255_v26  ;;  %v3017_v30 = vunpack.c.l.s8.bf16 %v1257_v44 }
 0x39c   : > { %3821 = vmatpush1.bf16.msra.mxu0 %v2966_v34  ;;  %4395 = vmatpush1.bf16.msra.mxu1 %v2968_v35  ;;  %v3014_v34 = vunpack.c.l.s8.bf16 %v1254_v43  ;;  %v3016_v35 = vunpack.c.l.s8.bf16 %v1256_v32 }
 0x39d   : > { %3822 = vmatprep.subr.bf16.mxu0 %v2975_v37  ;;  %4396 = vmatprep.subr.bf16.mxu1 %v2977_v40  ;;  %v3023_v37 = vunpack.c.h.s8.bf16 %v1255_v26  ;;  %v3025_v40 = vunpack.c.h.s8.bf16 %v1257_v44  ;;  %v1279_v26 = vld [vmem:[%s10914_s21 + $0x1bc8] sm:$0xff]  ;;  %v1281_v44 = vld [vmem:[%s10914_s21 + $0x1bd8] sm:$0xff] }
 0x3a0   : > { %3823 = vmatpush1.bf16.msra.mxu0 %v2974_v46  ;;  %4397 = vmatpush1.bf16.msra.mxu1 %v2976_v52  ;;  %v3022_v46 = vunpack.c.h.s8.bf16 %v1254_v43  ;;  %v3024_v52 = vunpack.c.h.s8.bf16 %v1256_v32  ;;  %v1278_v43 = vld [vmem:[%s10914_s21 + $0x1bc0] sm:$0xff]  ;;  %v1280_v32 = vld [vmem:[%s10914_s21 + $0x1bd0] sm:$0xff] }
 0x3a1   : > { %3824 = vmatprep.subr.bf16.mxu0 %v2983_v51  ;;  %4398 = vmatprep.subr.bf16.mxu1 %v2985_v54  ;;  %v3031_v51 = vunpack.c.l.s8.bf16 %v1263_v41  ;;  %v3033_v54 = vunpack.c.l.s8.bf16 %v1265_v42 }
 0x3a4   : > { %3825 = vmatpush1.bf16.msra.mxu0 %v2982_v63  ;;  %4399 = vmatpush1.bf16.msra.mxu1 %v2984_v0  ;;  %v3030_v63 = vunpack.c.l.s8.bf16 %v1262_v56  ;;  %v3032_v0 = vunpack.c.l.s8.bf16 %v1264_v57 }
 0x3a5   : > { %3826 = vmatprep.subr.bf16.mxu0 %v2991_v1  ;;  %4400 = vmatprep.subr.bf16.mxu1 %v2993_v2  ;;  %v3039_v1 = vunpack.c.h.s8.bf16 %v1263_v41  ;;  %v3041_v2 = vunpack.c.h.s8.bf16 %v1265_v42  ;;  %v395_v41 = vld [vmem:[%s10914_s21 + $0x28] sm:$0xff]  ;;  %v397_v42 = vld [vmem:[%s10914_s21 + $0x38] sm:$0xff] }
 0x3a8   : > { %3827 = vmatpush1.bf16.msra.mxu0 %v2990_v9  ;;  %4401 = vmatpush1.bf16.msra.mxu1 %v2992_v10  ;;  %v3038_v9 = vunpack.c.h.s8.bf16 %v1262_v56  ;;  %v3040_v10 = vunpack.c.h.s8.bf16 %v1264_v57  ;;  %v394_v56 = vld [vmem:[%s10914_s21 + $0x20] sm:$0xff]  ;;  %v396_v57 = vld [vmem:[%s10914_s21 + $0x30] sm:$0xff] }
 0x3a9   : > { %3828 = vmatprep.subr.bf16.mxu0 %v2999_v12  ;;  %4402 = vmatprep.subr.bf16.mxu1 %v3001_v13  ;;  %v3047_v12 = vunpack.c.l.s8.bf16 %v1271_v3  ;;  %v3049_v13 = vunpack.c.l.s8.bf16 %v1273_v8 }
 0x3ac   : > { %3829 = vmatpush1.bf16.msra.mxu0 %v2998_v19  ;;  %4403 = vmatpush1.bf16.msra.mxu1 %v3000_v21  ;;  %v3046_v19 = vunpack.c.l.s8.bf16 %v1270_v16  ;;  %v3048_v21 = vunpack.c.l.s8.bf16 %v1272_v28 }
 0x3ad   : > { %3830 = vmatprep.subr.bf16.mxu0 %v3007_v24  ;;  %4404 = vmatprep.subr.bf16.mxu1 %v3009_v23  ;;  %v3055_v24 = vunpack.c.h.s8.bf16 %v1271_v3  ;;  %v3057_v23 = vunpack.c.h.s8.bf16 %v1273_v8  ;;  %v1301_v3 = vunpack.c.h.s8.bf16 %v397_v42  ;;  %v403_v8 = vld [vmem:[%s10914_s21 + $0x68] sm:$0xff] }
 0x3b0   : > { %3831 = vmatpush1.bf16.msra.mxu0 %v3006_v49  ;;  %4405 = vmatpush1.bf16.msra.mxu1 %v3008_v25  ;;  %v3054_v49 = vunpack.c.h.s8.bf16 %v1270_v16  ;;  %v3056_v25 = vunpack.c.h.s8.bf16 %v1272_v28  ;;  %v402_v28 = vld [vmem:[%s10914_s21 + $0x60] sm:$0xff] }
 0x3b1   : > { %3832 = vmatprep.subr.bf16.mxu0 %v3015_v29  ;;  %4406 = vmatprep.subr.bf16.mxu1 %v3017_v30  ;;  %v3063_v29 = vunpack.c.l.s8.bf16 %v1279_v26  ;;  %v3065_v30 = vunpack.c.l.s8.bf16 %v1281_v44 }
 0x3b4   : > { %3833 = vmatpush1.bf16.msra.mxu0 %v3014_v34  ;;  %4407 = vmatpush1.bf16.msra.mxu1 %v3016_v35  ;;  %v3062_v34 = vunpack.c.l.s8.bf16 %v1278_v43  ;;  %v3064_v35 = vunpack.c.l.s8.bf16 %v1280_v32 }
 0x3b5   : > { %3834 = vmatprep.subr.bf16.mxu0 %v3023_v37  ;;  %4408 = vmatprep.subr.bf16.mxu1 %v3025_v40  ;;  %v3071_v37 = vunpack.c.h.s8.bf16 %v1279_v26  ;;  %v3073_v40 = vunpack.c.h.s8.bf16 %v1281_v44  ;;  %v411_v44 = vld [vmem:[%s10914_s21 + $0xa8] sm:$0xff] }
 0x3b8   : > { %3835 = vmatpush1.bf16.msra.mxu0 %v3022_v46  ;;  %4409 = vmatpush1.bf16.msra.mxu1 %v3024_v52  ;;  %v3070_v46 = vunpack.c.h.s8.bf16 %v1278_v43  ;;  %v3072_v52 = vunpack.c.h.s8.bf16 %v1280_v32  ;;  %v410_v43 = vld [vmem:[%s10914_s21 + $0xa0] sm:$0xff]  ;;  %v412_v32 = vld [vmem:[%s10914_s21 + $0xb0] sm:$0xff] }
 0x3b9   : > { %3836 = vmatprep.subr.bf16.mxu0 %v3031_v51  ;;  %4410 = vmatprep.subr.bf16.mxu1 %v3033_v54  ;;  %v1291_v51 = vunpack.c.l.s8.bf16 %v395_v41  ;;  %v1293_v54 = vunpack.c.l.s8.bf16 %v397_v42  ;;  %v421_v42 = vld [vmem:[%s10914_s21 + $0xf8] sm:$0xff] }
 0x3bc   : > { %3837 = vmatpush1.bf16.msra.mxu0 %v3030_v63  ;;  %4411 = vmatpush1.bf16.msra.mxu1 %v3032_v0  ;;  %v11620_v63 = vcombine.high %v11576_v18, %v11576_v18  ;;  %v1290_v0 = vunpack.c.l.s8.bf16 %v394_v56 }
 0x3bd   : > { %3838 = vmatprep.subr.bf16.mxu0 %v3039_v1  ;;  %4412 = vmatprep.subr.bf16.mxu1 %v3041_v2  ;;  %v1292_v1 = vunpack.c.l.s8.bf16 %v396_v57  ;;  %v1299_v2 = vunpack.c.h.s8.bf16 %v395_v41  ;;  %v419_v41 = vld [vmem:[%s10914_s21 + $0xe8] sm:$0xff] }
 0x3c0   : > { %3839 = vmatpush1.bf16.msra.mxu0 %v3038_v9  ;;  %4413 = vmatpush1.bf16.msra.mxu1 %v3040_v10  ;;  %v405_v9 = vld [vmem:[%s10914_s21 + $0x78] sm:$0xff]  ;;  %v1298_v10 = vunpack.c.h.s8.bf16 %v394_v56  ;;  %v418_v56 = vld [vmem:[%s10914_s21 + $0xe0] sm:$0xff] }
 0x3c1   : > { %3840 = vmatprep.subr.bf16.mxu0 %v3047_v12  ;;  %4414 = vmatprep.subr.bf16.mxu1 %v3049_v13  ;;  %v1300_v12 = vunpack.c.h.s8.bf16 %v396_v57  ;;  %v1307_v13 = vunpack.c.l.s8.bf16 %v403_v8  ;;  %v1309_v16 = vunpack.c.l.s8.bf16 %v405_v9  ;;  %v1317_v26 = vunpack.c.h.s8.bf16 %v405_v9  ;;  %v420_v57 = vld [vmem:[%s10914_s21 + $0xf0] sm:$0xff]  ;;  %v429_v9 = vld [vmem:[%s10914_s21 + $0x138] sm:$0xff] }
 0x3c4   : > { %3841 = vmatpush1.bf16.msra.mxu0 %v3046_v19  ;;  %4415 = vmatpush1.bf16.msra.mxu1 %v3048_v21  ;;  %v404_v19 = vld [vmem:[%s10914_s21 + $0x70] sm:$0xff]  ;;  %v1306_v21 = vunpack.c.l.s8.bf16 %v402_v28 }
 0x3c5   : > { %3842 = vmatprep.subr.bf16.mxu0 %v3055_v24  ;;  %4416 = vmatprep.subr.bf16.mxu1 %v3057_v23  ;;  %v1308_v24 = vunpack.c.l.s8.bf16 %v404_v19  ;;  %v1315_v23 = vunpack.c.h.s8.bf16 %v403_v8  ;;  %v427_v8 = vld [vmem:[%s10914_s21 + $0x128] sm:$0xff] }
 0x3c8   : > { %3843 = vmatpush1.bf16.msra.mxu0 %v3054_v49  ;;  %4417 = vmatpush1.bf16.msra.mxu1 %v3056_v25  ;;  %v413_v49 = vld [vmem:[%s10914_s21 + $0xb8] sm:$0xff]  ;;  %v1314_v25 = vunpack.c.h.s8.bf16 %v402_v28  ;;  %v426_v28 = vld [vmem:[%s10914_s21 + $0x120] sm:$0xff] }
 0x3c9   : > { %3844 = vmatprep.subr.bf16.mxu0 %v3063_v29  ;;  %4418 = vmatprep.subr.bf16.mxu1 %v3065_v30  ;;  %v1316_v29 = vunpack.c.h.s8.bf16 %v404_v19  ;;  %v1325_v30 = vunpack.c.l.s8.bf16 %v413_v49  ;;  %v428_v19 = vld [vmem:[%s10914_s21 + $0x130] sm:$0xff] }
 0x3cc   : > { %3845 = vmatpush1.bf16.msra.mxu0 %v3062_v34  ;;  %4419 = vmatpush1.bf16.msra.mxu1 %v3064_v35  ;;  %v1322_v34 = vunpack.c.l.s8.bf16 %v410_v43  ;;  %v1324_v35 = vunpack.c.l.s8.bf16 %v412_v32 }
 0x3cd   : > { %3846 = vmatprep.subr.bf16.mxu0 %v3071_v37  ;;  %4420 = vmatprep.subr.bf16.mxu1 %v3073_v40  ;;  %v1331_v37 = vunpack.c.h.s8.bf16 %v411_v44  ;;  %v1333_v40 = vunpack.c.h.s8.bf16 %v413_v49  ;;  %v437_v49 = vld [vmem:[%s10914_s21 + $0x178] sm:$0xff] }
 0x3d0   : > { %3847 = vmatpush1.bf16.msra.mxu0 %v3070_v46  ;;  %4421 = vmatpush1.bf16.msra.mxu1 %v3072_v52  ;;  %v1330_v46 = vunpack.c.h.s8.bf16 %v410_v43  ;;  %v1332_v52 = vunpack.c.h.s8.bf16 %v412_v32  ;;  %v434_v43 = vld [vmem:[%s10914_s21 + $0x160] sm:$0xff]  ;;  %v436_v32 = vld [vmem:[%s10914_s21 + $0x170] sm:$0xff] }
 0x3d1   : > { %4431 = vmatprep.subr.bf16.mxu0 %v1291_v51  ;;  %5005 = vmatprep.subr.bf16.mxu1 %v1293_v54  ;;  %v1339_v51 = vunpack.c.l.s8.bf16 %v419_v41  ;;  %v1341_v54 = vunpack.c.l.s8.bf16 %v421_v42 }
 0x3d3   : > { %3849 = vmatmul.mubr.bf16.vlgmr.msra.gmra.mrb[0].mxu0 %v11620_v63  ;;  %4423 = vmatmul.mubr.bf16.vlgmr.msra.gmra.mrb[0].mxu1 %v11620_v63 }
 0x3d4   : > { %4432 = vmatpush1.bf16.msra.mxu0 %v1290_v0  ;;  %5006 = vmatpush1.bf16.msra.mxu1 %v1292_v1  ;;  %v1338_v0 = vunpack.c.l.s8.bf16 %v418_v56  ;;  %v1340_v1 = vunpack.c.l.s8.bf16 %v420_v57 }
 0x3d5   : > { %4433 = vmatprep.subr.bf16.mxu0 %v1299_v2  ;;  %5007 = vmatprep.subr.bf16.mxu1 %v1301_v3  ;;  %v1347_v2 = vunpack.c.h.s8.bf16 %v419_v41  ;;  %v1349_v3 = vunpack.c.h.s8.bf16 %v421_v42  ;;  %v443_v41 = vld [vmem:[%s10914_s21 + $0x1a8] sm:$0xff]  ;;  %v445_v42 = vld [vmem:[%s10914_s21 + $0x1b8] sm:$0xff] }
 0x3d6   : > { %4463 = vmatprep.mubr.bf16.mxu0 %v10986_v58  ;;  %5037 = vmatprep.mubr.bf16.mxu1 %v10986_v58  ;;  %v1323_v58 = vunpack.c.l.s8.bf16 %v411_v44  ;;  %v435_v44 = vld [vmem:[%s10914_s21 + $0x168] sm:$0xff] }
 0x3d8   : > { %4434 = vmatpush1.bf16.msra.mxu0 %v1298_v10  ;;  %5008 = vmatpush1.bf16.msra.mxu1 %v1300_v12  ;;  %v1346_v10 = vunpack.c.h.s8.bf16 %v418_v56  ;;  %v1348_v12 = vunpack.c.h.s8.bf16 %v420_v57  ;;  %v442_v56 = vld [vmem:[%s10914_s21 + $0x1a0] sm:$0xff]  ;;  %v444_v57 = vld [vmem:[%s10914_s21 + $0x1b0] sm:$0xff] }
 0x3d9   : > { %4435 = vmatprep.subr.bf16.mxu0 %v1307_v13  ;;  %5009 = vmatprep.subr.bf16.mxu1 %v1309_v16  ;;  %v1355_v13 = vunpack.c.l.s8.bf16 %v427_v8  ;;  %v1357_v16 = vunpack.c.l.s8.bf16 %v429_v9 }
 0x3dc   : > { %4436 = vmatpush1.bf16.msra.mxu0 %v1306_v21  ;;  %5010 = vmatpush1.bf16.msra.mxu1 %v1308_v24  ;;  %v1354_v21 = vunpack.c.l.s8.bf16 %v426_v28  ;;  %v1356_v24 = vunpack.c.l.s8.bf16 %v428_v19 }
 0x3dd   : > { %4437 = vmatprep.subr.bf16.mxu0 %v1315_v23  ;;  %5011 = vmatprep.subr.bf16.mxu1 %v1317_v26  ;;  %v1363_v23 = vunpack.c.h.s8.bf16 %v427_v8  ;;  %v1365_v26 = vunpack.c.h.s8.bf16 %v429_v9  ;;  %v451_v8 = vld [vmem:[%s10914_s21 + $0x1e8] sm:$0xff]  ;;  %v453_v9 = vld [vmem:[%s10914_s21 + $0x1f8] sm:$0xff] }
 0x3e0   : > { %4438 = vmatpush1.bf16.msra.mxu0 %v1314_v25  ;;  %5012 = vmatpush1.bf16.msra.mxu1 %v1316_v29  ;;  %v1362_v25 = vunpack.c.h.s8.bf16 %v426_v28  ;;  %v1364_v29 = vunpack.c.h.s8.bf16 %v428_v19  ;;  %v450_v28 = vld [vmem:[%s10914_s21 + $0x1e0] sm:$0xff]  ;;  %v452_v19 = vld [vmem:[%s10914_s21 + $0x1f0] sm:$0xff] }
 0x3e1   : > { %4439 = vmatprep.subr.bf16.mxu0 %v1323_v58  ;;  %5013 = vmatprep.subr.bf16.mxu1 %v1325_v30  ;;  %v1371_v58 = vunpack.c.l.s8.bf16 %v435_v44  ;;  %v1373_v30 = vunpack.c.l.s8.bf16 %v437_v49 }
 0x3e4   : > { %4440 = vmatpush1.bf16.msra.mxu0 %v1322_v34  ;;  %5014 = vmatpush1.bf16.msra.mxu1 %v1324_v35  ;;  %v1370_v34 = vunpack.c.l.s8.bf16 %v434_v43  ;;  %v1372_v35 = vunpack.c.l.s8.bf16 %v436_v32 }
 0x3e5   : > { %4441 = vmatprep.subr.bf16.mxu0 %v1331_v37  ;;  %5015 = vmatprep.subr.bf16.mxu1 %v1333_v40  ;;  %v1379_v37 = vunpack.c.h.s8.bf16 %v435_v44  ;;  %v1381_v40 = vunpack.c.h.s8.bf16 %v437_v49  ;;  %v459_v44 = vld [vmem:[%s10914_s21 + $0x228] sm:$0xff]  ;;  %v461_v49 = vld [vmem:[%s10914_s21 + $0x238] sm:$0xff] }
 0x3e8   : > { %4442 = vmatpush1.bf16.msra.mxu0 %v1330_v46  ;;  %5016 = vmatpush1.bf16.msra.mxu1 %v1332_v52  ;;  %v1378_v46 = vunpack.c.h.s8.bf16 %v434_v43  ;;  %v1380_v52 = vunpack.c.h.s8.bf16 %v436_v32  ;;  %v458_v43 = vld [vmem:[%s10914_s21 + $0x220] sm:$0xff]  ;;  %v460_v32 = vld [vmem:[%s10914_s21 + $0x230] sm:$0xff] }
 0x3e9   : > { %4443 = vmatprep.subr.bf16.mxu0 %v1339_v51  ;;  %5017 = vmatprep.subr.bf16.mxu1 %v1341_v54  ;;  %v1387_v51 = vunpack.c.l.s8.bf16 %v443_v41  ;;  %v1389_v54 = vunpack.c.l.s8.bf16 %v445_v42 }
 0x3ec   : > { %4444 = vmatpush1.bf16.msra.mxu0 %v1338_v0  ;;  %5018 = vmatpush1.bf16.msra.mxu1 %v1340_v1  ;;  %v1386_v0 = vunpack.c.l.s8.bf16 %v442_v56  ;;  %v1388_v1 = vunpack.c.l.s8.bf16 %v444_v57 }
 0x3ed   : > { %4445 = vmatprep.subr.bf16.mxu0 %v1347_v2  ;;  %5019 = vmatprep.subr.bf16.mxu1 %v1349_v3  ;;  %v1395_v2 = vunpack.c.h.s8.bf16 %v443_v41  ;;  %v1397_v3 = vunpack.c.h.s8.bf16 %v445_v42  ;;  %v467_v41 = vld [vmem:[%s10914_s21 + $0x268] sm:$0xff]  ;;  %v469_v42 = vld [vmem:[%s10914_s21 + $0x278] sm:$0xff] }
 0x3f0   : > { %4446 = vmatpush1.bf16.msra.mxu0 %v1346_v10  ;;  %5020 = vmatpush1.bf16.msra.mxu1 %v1348_v12  ;;  %v1394_v10 = vunpack.c.h.s8.bf16 %v442_v56  ;;  %v1396_v12 = vunpack.c.h.s8.bf16 %v444_v57  ;;  %v466_v56 = vld [vmem:[%s10914_s21 + $0x260] sm:$0xff]  ;;  %v468_v57 = vld [vmem:[%s10914_s21 + $0x270] sm:$0xff] }
 0x3f1   : > { %4447 = vmatprep.subr.bf16.mxu0 %v1355_v13  ;;  %5021 = vmatprep.subr.bf16.mxu1 %v1357_v16  ;;  %v1403_v13 = vunpack.c.l.s8.bf16 %v451_v8  ;;  %v1405_v16 = vunpack.c.l.s8.bf16 %v453_v9 }
 0x3f4   : > { %4448 = vmatpush1.bf16.msra.mxu0 %v1354_v21  ;;  %5022 = vmatpush1.bf16.msra.mxu1 %v1356_v24  ;;  %v1402_v21 = vunpack.c.l.s8.bf16 %v450_v28  ;;  %v1404_v24 = vunpack.c.l.s8.bf16 %v452_v19 }
 0x3f5   : > { %4449 = vmatprep.subr.bf16.mxu0 %v1363_v23  ;;  %5023 = vmatprep.subr.bf16.mxu1 %v1365_v26  ;;  %v1411_v23 = vunpack.c.h.s8.bf16 %v451_v8  ;;  %v1413_v26 = vunpack.c.h.s8.bf16 %v453_v9  ;;  %v477_v8 = vld [vmem:[%s10914_s21 + $0x2b8] sm:$0xff]  ;;  %v1442_v9 = vunpack.c.h.s8.bf16 %v466_v56 }
 0x3f8   : > { %4450 = vmatpush1.bf16.msra.mxu0 %v1362_v25  ;;  %5024 = vmatpush1.bf16.msra.mxu1 %v1364_v29  ;;  %v1410_v25 = vunpack.c.h.s8.bf16 %v450_v28  ;;  %v1412_v29 = vunpack.c.h.s8.bf16 %v452_v19 }
 0x3f9   : > { %4451 = vmatprep.subr.bf16.mxu0 %v1371_v58  ;;  %5025 = vmatprep.subr.bf16.mxu1 %v1373_v30  ;;  %v1419_v58 = vunpack.c.l.s8.bf16 %v459_v44  ;;  %v1421_v30 = vunpack.c.l.s8.bf16 %v461_v49 }
 0x3fc   : > { %4452 = vmatpush1.bf16.msra.mxu0 %v1370_v34  ;;  %5026 = vmatpush1.bf16.msra.mxu1 %v1372_v35  ;;  %v1418_v34 = vunpack.c.l.s8.bf16 %v458_v43  ;;  %v1420_v35 = vunpack.c.l.s8.bf16 %v460_v32 }
 0x3fd   : > { %4453 = vmatprep.subr.bf16.mxu0 %v1379_v37  ;;  %5027 = vmatprep.subr.bf16.mxu1 %v1381_v40  ;;  %v1427_v37 = vunpack.c.h.s8.bf16 %v459_v44  ;;  %v1429_v40 = vunpack.c.h.s8.bf16 %v461_v49 }
 0x400   : > { %4454 = vmatpush1.bf16.msra.mxu0 %v1378_v46  ;;  %5028 = vmatpush1.bf16.msra.mxu1 %v1380_v52  ;;  %v1426_v46 = vunpack.c.h.s8.bf16 %v458_v43  ;;  %v1428_v52 = vunpack.c.h.s8.bf16 %v460_v32 }
 0x401   : > { %4455 = vmatprep.subr.bf16.mxu0 %v1387_v51  ;;  %5029 = vmatprep.subr.bf16.mxu1 %v1389_v54  ;;  %v1435_v51 = vunpack.c.l.s8.bf16 %v467_v41  ;;  %v1437_v54 = vunpack.c.l.s8.bf16 %v469_v42 }
 0x404   : > { %4456 = vmatpush1.bf16.msra.mxu0 %v1386_v0  ;;  %5030 = vmatpush1.bf16.msra.mxu1 %v1388_v1  ;;  %v1434_v0 = vunpack.c.l.s8.bf16 %v466_v56  ;;  %v1443_v1 = vunpack.c.h.s8.bf16 %v467_v41 }
 0x405   : > { %4457 = vmatprep.subr.bf16.mxu0 %v1395_v2  ;;  %5031 = vmatprep.subr.bf16.mxu1 %v1397_v3  ;;  %v1445_v2 = vunpack.c.h.s8.bf16 %v469_v42  ;;  %v475_v3 = vld [vmem:[%s10914_s21 + $0x2a8] sm:$0xff] }
 0x408   : > { %4458 = vmatpush1.bf16.msra.mxu0 %v1394_v10  ;;  %5032 = vmatpush1.bf16.msra.mxu1 %v1396_v12  ;;  %v1444_v10 = vunpack.c.h.s8.bf16 %v468_v57  ;;  %v1453_v12 = vunpack.c.l.s8.bf16 %v477_v8 }
 0x409   : > { %4459 = vmatprep.subr.bf16.mxu0 %v1403_v13  ;;  %5033 = vmatprep.subr.bf16.mxu1 %v1405_v16  ;;  %v474_v13 = vld [vmem:[%s10914_s21 + $0x2a0] sm:$0xff]  ;;  %v476_v16 = vld [vmem:[%s10914_s21 + $0x2b0] sm:$0xff] }
 0x40a   : > { %v1450_v28 = vunpack.c.l.s8.bf16 %v474_v13  ;;  %v1452_v19 = vunpack.c.l.s8.bf16 %v476_v16  ;;  %v1458_v44 = vunpack.c.h.s8.bf16 %v474_v13  ;;  %v1460_v49 = vunpack.c.h.s8.bf16 %v476_v16 }
 0x40c   : > { %4460 = vmatpush1.bf16.msra.mxu0 %v1402_v21  ;;  %5034 = vmatpush1.bf16.msra.mxu1 %v1404_v24  ;;  %v1459_v21 = vunpack.c.h.s8.bf16 %v475_v3  ;;  %v1461_v24 = vunpack.c.h.s8.bf16 %v477_v8 }
 0x40d   : > { %4461 = vmatprep.subr.bf16.mxu0 %v1411_v23  ;;  %5035 = vmatprep.subr.bf16.mxu1 %v1413_v26  ;;  %v483_v23 = vld [vmem:[%s10914_s21 + $0x2e8] sm:$0xff]  ;;  %v485_v26 = vld [vmem:[%s10914_s21 + $0x2f8] sm:$0xff] }
 0x410   : > { %4462 = vmatpush1.bf16.msra.mxu0 %v1410_v25  ;;  %5036 = vmatpush1.bf16.msra.mxu1 %v1412_v29  ;;  %v1467_v25 = vunpack.c.l.s8.bf16 %v483_v23  ;;  %v1469_v29 = vunpack.c.l.s8.bf16 %v485_v26 }
 0x411   : > { %4472 = vmatprep.subr.bf16.mxu0 %v1419_v58  ;;  %5046 = vmatprep.subr.bf16.mxu1 %v1421_v30  ;;  %v482_v58 = vld [vmem:[%s10914_s21 + $0x2e0] sm:$0xff]  ;;  %v484_v30 = vld [vmem:[%s10914_s21 + $0x2f0] sm:$0xff] }
 0x412   : > { %v1466_v43 = vunpack.c.l.s8.bf16 %v482_v58  ;;  %v1468_v32 = vunpack.c.l.s8.bf16 %v484_v30  ;;  %v1474_v41 = vunpack.c.h.s8.bf16 %v482_v58  ;;  %v1476_v42 = vunpack.c.h.s8.bf16 %v484_v30 }
 0x413   : > { %4464 = vmatmul.mubr.bf16.vlgmr.msra.gmra.mrb[4].mxu0 %v11010_v53  ;;  %5038 = vmatmul.mubr.bf16.vlgmr.msra.gmra.mrb[4].mxu1 %v11010_v53  ;;  %v1436_v53 = vunpack.c.l.s8.bf16 %v468_v57 }
 0x414   : > { %4473 = vmatpush1.bf16.msra.mxu0 %v1418_v34  ;;  %5047 = vmatpush1.bf16.msra.mxu1 %v1420_v35  ;;  %v1475_v34 = vunpack.c.h.s8.bf16 %v483_v23  ;;  %v1477_v35 = vunpack.c.h.s8.bf16 %v485_v26 }
 0x415   : > { %4474 = vmatprep.subr.bf16.mxu0 %v1427_v37  ;;  %5048 = vmatprep.subr.bf16.mxu1 %v1429_v40  ;;  %v491_v37 = vld [vmem:[%s10914_s21 + $0x328] sm:$0xff]  ;;  %v493_v40 = vld [vmem:[%s10914_s21 + $0x338] sm:$0xff] }
 0x416   : > { %4504 = vmatprep.mubr.bf16.mxu0 %v11016_v61  ;;  %5078 = vmatprep.mubr.bf16.mxu1 %v11016_v61  ;;  %v1451_v61 = vunpack.c.l.s8.bf16 %v475_v3 }
 0x418   : > { %4475 = vmatpush1.bf16.msra.mxu0 %v1426_v46  ;;  %5049 = vmatpush1.bf16.msra.mxu1 %v1428_v52  ;;  %v1483_v46 = vunpack.c.l.s8.bf16 %v491_v37  ;;  %v1485_v52 = vunpack.c.l.s8.bf16 %v493_v40 }
 0x419   : > { %4476 = vmatprep.subr.bf16.mxu0 %v1435_v51  ;;  %5050 = vmatprep.subr.bf16.mxu1 %v1437_v54  ;;  %v490_v51 = vld [vmem:[%s10914_s21 + $0x320] sm:$0xff]  ;;  %v492_v54 = vld [vmem:[%s10914_s21 + $0x330] sm:$0xff] }
 0x41a   : > { %v1482_v56 = vunpack.c.l.s8.bf16 %v490_v51  ;;  %v1484_v57 = vunpack.c.l.s8.bf16 %v492_v54  ;;  %v1490_v3 = vunpack.c.h.s8.bf16 %v490_v51  ;;  %v1492_v8 = vunpack.c.h.s8.bf16 %v492_v54 }
 0x41c   : > { %4477 = vmatpush1.bf16.msra.mxu0 %v1434_v0  ;;  %5051 = vmatpush1.bf16.msra.mxu1 %v1436_v53  ;;  %v1491_v0 = vunpack.c.h.s8.bf16 %v491_v37  ;;  %v1493_v53 = vunpack.c.h.s8.bf16 %v493_v40 }
 0x41d   : > { %4478 = vmatprep.subr.bf16.mxu0 %v1443_v1  ;;  %5052 = vmatprep.subr.bf16.mxu1 %v1445_v2  ;;  %v499_v1 = vld [vmem:[%s10914_s21 + $0x368] sm:$0xff]  ;;  %v501_v2 = vld [vmem:[%s10914_s21 + $0x378] sm:$0xff] }
 0x420   : > { %4479 = vmatpush1.bf16.msra.mxu0 %v1442_v9  ;;  %5053 = vmatpush1.bf16.msra.mxu1 %v1444_v10  ;;  %v1499_v9 = vunpack.c.l.s8.bf16 %v499_v1  ;;  %v1501_v10 = vunpack.c.l.s8.bf16 %v501_v2 }
 0x421   : > { %4480 = vmatprep.subr.bf16.mxu0 %v1451_v61  ;;  %5054 = vmatprep.subr.bf16.mxu1 %v1453_v12  ;;  %v498_v61 = vld [vmem:[%s10914_s21 + $0x360] sm:$0xff]  ;;  %v500_v12 = vld [vmem:[%s10914_s21 + $0x370] sm:$0xff] }
 0x422   : > { %v1498_v13 = vunpack.c.l.s8.bf16 %v498_v61  ;;  %v1500_v16 = vunpack.c.l.s8.bf16 %v500_v12  ;;  %v1506_v23 = vunpack.c.h.s8.bf16 %v498_v61  ;;  %v1508_v26 = vunpack.c.h.s8.bf16 %v500_v12 }
 0x424   : > { %4481 = vmatpush1.bf16.msra.mxu0 %v1450_v28  ;;  %5055 = vmatpush1.bf16.msra.mxu1 %v1452_v19  ;;  %v1507_v28 = vunpack.c.h.s8.bf16 %v499_v1  ;;  %v1509_v19 = vunpack.c.h.s8.bf16 %v501_v2 }
 0x425   : > { %4482 = vmatprep.subr.bf16.mxu0 %v1459_v21  ;;  %5056 = vmatprep.subr.bf16.mxu1 %v1461_v24  ;;  %v507_v21 = vld [vmem:[%s10914_s21 + $0x3a8] sm:$0xff]  ;;  %v509_v24 = vld [vmem:[%s10914_s21 + $0x3b8] sm:$0xff] }
 0x428   : > { %4483 = vmatpush1.bf16.msra.mxu0 %v1458_v44  ;;  %5057 = vmatpush1.bf16.msra.mxu1 %v1460_v49  ;;  %v1515_v44 = vunpack.c.l.s8.bf16 %v507_v21  ;;  %v1517_v49 = vunpack.c.l.s8.bf16 %v509_v24 }
 0x429   : > { %4484 = vmatprep.subr.bf16.mxu0 %v1467_v25  ;;  %5058 = vmatprep.subr.bf16.mxu1 %v1469_v29  ;;  %v506_v25 = vld [vmem:[%s10914_s21 + $0x3a0] sm:$0xff]  ;;  %v508_v29 = vld [vmem:[%s10914_s21 + $0x3b0] sm:$0xff] }
 0x42a   : > { %v1514_v58 = vunpack.c.l.s8.bf16 %v506_v25  ;;  %v1516_v30 = vunpack.c.l.s8.bf16 %v508_v29  ;;  %v1522_v37 = vunpack.c.h.s8.bf16 %v506_v25  ;;  %v1524_v40 = vunpack.c.h.s8.bf16 %v508_v29 }
 0x42c   : > { %4485 = vmatpush1.bf16.msra.mxu0 %v1466_v43  ;;  %5059 = vmatpush1.bf16.msra.mxu1 %v1468_v32  ;;  %v1523_v43 = vunpack.c.h.s8.bf16 %v507_v21  ;;  %v1525_v32 = vunpack.c.h.s8.bf16 %v509_v24 }
 0x42d   : > { %4486 = vmatprep.subr.bf16.mxu0 %v1475_v34  ;;  %5060 = vmatprep.subr.bf16.mxu1 %v1477_v35  ;;  %v515_v34 = vld [vmem:[%s10914_s21 + $0x3e8] sm:$0xff]  ;;  %v517_v35 = vld [vmem:[%s10914_s21 + $0x3f8] sm:$0xff] }
 0x430   : > { %4487 = vmatpush1.bf16.msra.mxu0 %v1474_v41  ;;  %5061 = vmatpush1.bf16.msra.mxu1 %v1476_v42  ;;  %v1531_v41 = vunpack.c.l.s8.bf16 %v515_v34  ;;  %v1533_v42 = vunpack.c.l.s8.bf16 %v517_v35 }
 0x431   : > { %4488 = vmatprep.subr.bf16.mxu0 %v1483_v46  ;;  %5062 = vmatprep.subr.bf16.mxu1 %v1485_v52  ;;  %v514_v46 = vld [vmem:[%s10914_s21 + $0x3e0] sm:$0xff]  ;;  %v516_v52 = vld [vmem:[%s10914_s21 + $0x3f0] sm:$0xff] }
 0x432   : > { %v1530_v51 = vunpack.c.l.s8.bf16 %v514_v46  ;;  %v1532_v54 = vunpack.c.l.s8.bf16 %v516_v52  ;;  %v1538_v1 = vunpack.c.h.s8.bf16 %v514_v46  ;;  %v1540_v2 = vunpack.c.h.s8.bf16 %v516_v52 }
 0x434   : > { %4489 = vmatpush1.bf16.msra.mxu0 %v1482_v56  ;;  %5063 = vmatpush1.bf16.msra.mxu1 %v1484_v57  ;;  %v1539_v56 = vunpack.c.h.s8.bf16 %v515_v34  ;;  %v1541_v57 = vunpack.c.h.s8.bf16 %v517_v35 }
 0x435   : > { %4490 = vmatprep.subr.bf16.mxu0 %v1491_v0  ;;  %5064 = vmatprep.subr.bf16.mxu1 %v1493_v53  ;;  %v523_v0 = vld [vmem:[%s10914_s21 + $0x428] sm:$0xff]  ;;  %v525_v53 = vld [vmem:[%s10914_s21 + $0x438] sm:$0xff] }
 0x438   : > { %4491 = vmatpush1.bf16.msra.mxu0 %v1490_v3  ;;  %5065 = vmatpush1.bf16.msra.mxu1 %v1492_v8  ;;  %v1547_v3 = vunpack.c.l.s8.bf16 %v523_v0  ;;  %v1549_v8 = vunpack.c.l.s8.bf16 %v525_v53 }
 0x439   : > { %4492 = vmatprep.subr.bf16.mxu0 %v1499_v9  ;;  %5066 = vmatprep.subr.bf16.mxu1 %v1501_v10  ;;  %v522_v9 = vld [vmem:[%s10914_s21 + $0x420] sm:$0xff]  ;;  %v524_v10 = vld [vmem:[%s10914_s21 + $0x430] sm:$0xff] }
 0x43a   : > { %v1546_v61 = vunpack.c.l.s8.bf16 %v522_v9  ;;  %v1548_v12 = vunpack.c.l.s8.bf16 %v524_v10  ;;  %v1554_v21 = vunpack.c.h.s8.bf16 %v522_v9  ;;  %v1556_v24 = vunpack.c.h.s8.bf16 %v524_v10 }
 0x43c   : > { %4493 = vmatpush1.bf16.msra.mxu0 %v1498_v13  ;;  %5067 = vmatpush1.bf16.msra.mxu1 %v1500_v16  ;;  %v1555_v13 = vunpack.c.h.s8.bf16 %v523_v0  ;;  %v1557_v16 = vunpack.c.h.s8.bf16 %v525_v53 }
 0x43d   : > { %4494 = vmatprep.subr.bf16.mxu0 %v1507_v28  ;;  %5068 = vmatprep.subr.bf16.mxu1 %v1509_v19  ;;  %v531_v28 = vld [vmem:[%s10914_s21 + $0x468] sm:$0xff]  ;;  %v533_v19 = vld [vmem:[%s10914_s21 + $0x478] sm:$0xff] }
 0x43e   : > { %v1571_v29 = vunpack.c.h.s8.bf16 %v531_v28 }
 0x440   : > { %4495 = vmatpush1.bf16.msra.mxu0 %v1506_v23  ;;  %5069 = vmatpush1.bf16.msra.mxu1 %v1508_v26  ;;  %v1563_v23 = vunpack.c.l.s8.bf16 %v531_v28  ;;  %v1565_v26 = vunpack.c.l.s8.bf16 %v533_v19 }
 0x441   : > { %4496 = vmatprep.subr.bf16.mxu0 %v1515_v44  ;;  %5070 = vmatprep.subr.bf16.mxu1 %v1517_v49  ;;  %v530_v44 = vld [vmem:[%s10914_s21 + $0x460] sm:$0xff]  ;;  %v532_v49 = vld [vmem:[%s10914_s21 + $0x470] sm:$0xff] }
 0x442   : > { %v1562_v25 = vunpack.c.l.s8.bf16 %v530_v44  ;;  %v1572_v34 = vunpack.c.h.s8.bf16 %v532_v49 }
 0x444   : > { %4497 = vmatpush1.bf16.msra.mxu0 %v1514_v58  ;;  %5071 = vmatpush1.bf16.msra.mxu1 %v1516_v30  ;;  %v1573_v58 = vunpack.c.h.s8.bf16 %v533_v19  ;;  %v539_v30 = vld [vmem:[%s10914_s21 + $0x4a8] sm:$0xff] }
 0x445   : > { %4498 = vmatprep.subr.bf16.mxu0 %v1523_v43  ;;  %5072 = vmatprep.subr.bf16.mxu1 %v1525_v32  ;;  %v541_v43 = vld [vmem:[%s10914_s21 + $0x4b8] sm:$0xff]  ;;  %v1570_v32 = vunpack.c.h.s8.bf16 %v530_v44  ;;  %v1587_v46 = vunpack.c.h.s8.bf16 %v539_v30 }
 0x446   : > { %v1581_v35 = vunpack.c.l.s8.bf16 %v541_v43  ;;  %v1589_v52 = vunpack.c.h.s8.bf16 %v541_v43 }
 0x448   : > { %4499 = vmatpush1.bf16.msra.mxu0 %v1522_v37  ;;  %5073 = vmatpush1.bf16.msra.mxu1 %v1524_v40  ;;  %v538_v37 = vld [vmem:[%s10914_s21 + $0x4a0] sm:$0xff]  ;;  %v540_v40 = vld [vmem:[%s10914_s21 + $0x4b0] sm:$0xff] }
 0x449   : > { %4500 = vmatprep.subr.bf16.mxu0 %v1531_v41  ;;  %5074 = vmatprep.subr.bf16.mxu1 %v1533_v42  ;;  %v1578_v41 = vunpack.c.l.s8.bf16 %v538_v37  ;;  %v1580_v42 = vunpack.c.l.s8.bf16 %v540_v40 }
 0x44c   : > { %4501 = vmatpush1.bf16.msra.mxu0 %v1530_v51  ;;  %5075 = vmatpush1.bf16.msra.mxu1 %v1532_v54  ;;  %v547_v51 = vld [vmem:[%s10914_s21 + $0x4e8] sm:$0xff]  ;;  %v549_v54 = vld [vmem:[%s10914_s21 + $0x4f8] sm:$0xff] }
 0x44d   : > { %4502 = vmatprep.subr.bf16.mxu0 %v1539_v56  ;;  %5076 = vmatprep.subr.bf16.mxu1 %v1541_v57  ;;  %v1586_v56 = vunpack.c.h.s8.bf16 %v538_v37  ;;  %v1588_v57 = vunpack.c.h.s8.bf16 %v540_v40  ;;  %v1595_v0 = vunpack.c.l.s8.bf16 %v547_v51  ;;  %v1597_v53 = vunpack.c.l.s8.bf16 %v549_v54 }
 0x44e   : > { %v1603_v9 = vunpack.c.h.s8.bf16 %v547_v51  ;;  %v1605_v10 = vunpack.c.h.s8.bf16 %v549_v54 }
 0x450   : > { %4503 = vmatpush1.bf16.msra.mxu0 %v1538_v1  ;;  %5077 = vmatpush1.bf16.msra.mxu1 %v1540_v2  ;;  %v546_v1 = vld [vmem:[%s10914_s21 + $0x4e0] sm:$0xff]  ;;  %v548_v2 = vld [vmem:[%s10914_s21 + $0x4f0] sm:$0xff] }
 0x451   : > { %4513 = vmatprep.subr.bf16.mxu0 %v1547_v3  ;;  %5087 = vmatprep.subr.bf16.mxu1 %v1549_v8  ;;  %v1594_v3 = vunpack.c.l.s8.bf16 %v546_v1  ;;  %v1596_v8 = vunpack.c.l.s8.bf16 %v548_v2 }
 0x453   : > { %4505 = vmatmul.mubr.bf16.vlgmr.msra.gmra.mrb[4].mxu0 %v11061_v31  ;;  %5079 = vmatmul.mubr.bf16.vlgmr.msra.gmra.mrb[4].mxu1 %v11061_v31  ;;  %v1564_v31 = vunpack.c.l.s8.bf16 %v532_v49 }
 0x454   : > { %4514 = vmatpush1.bf16.msra.mxu0 %v1546_v61  ;;  %5088 = vmatpush1.bf16.msra.mxu1 %v1548_v12  ;;  %v555_v61 = vld [vmem:[%s10914_s21 + $0x528] sm:$0xff]  ;;  %v557_v12 = vld [vmem:[%s10914_s21 + $0x538] sm:$0xff] }
 0x455   : > { %4515 = vmatprep.subr.bf16.mxu0 %v1555_v13  ;;  %5089 = vmatprep.subr.bf16.mxu1 %v1557_v16  ;;  %v1602_v13 = vunpack.c.h.s8.bf16 %v546_v1  ;;  %v1604_v16 = vunpack.c.h.s8.bf16 %v548_v2  ;;  %v1611_v28 = vunpack.c.l.s8.bf16 %v555_v61  ;;  %v1613_v19 = vunpack.c.l.s8.bf16 %v557_v12 }
 0x456   : > { %4545 = vmatprep.mubr.bf16.mxu0 %v11066_v39  ;;  %5119 = vmatprep.mubr.bf16.mxu1 %v11066_v39  ;;  %v1579_v39 = vunpack.c.l.s8.bf16 %v539_v30  ;;  %v1619_v44 = vunpack.c.h.s8.bf16 %v555_v61  ;;  %v1621_v49 = vunpack.c.h.s8.bf16 %v557_v12 }
 0x458   : > { %4516 = vmatpush1.bf16.msra.mxu0 %v1554_v21  ;;  %5090 = vmatpush1.bf16.msra.mxu1 %v1556_v24  ;;  %v554_v21 = vld [vmem:[%s10914_s21 + $0x520] sm:$0xff]  ;;  %v556_v24 = vld [vmem:[%s10914_s21 + $0x530] sm:$0xff] }
 0x459   : > { %4517 = vmatprep.subr.bf16.mxu0 %v1563_v23  ;;  %5091 = vmatprep.subr.bf16.mxu1 %v1565_v26  ;;  %v1610_v23 = vunpack.c.l.s8.bf16 %v554_v21  ;;  %v1612_v26 = vunpack.c.l.s8.bf16 %v556_v24 }
 0x45c   : > { %4518 = vmatpush1.bf16.msra.mxu0 %v1562_v25  ;;  %5092 = vmatpush1.bf16.msra.mxu1 %v1564_v31  ;;  %v563_v25 = vld [vmem:[%s10914_s21 + $0x568] sm:$0xff]  ;;  %v565_v31 = vld [vmem:[%s10914_s21 + $0x578] sm:$0xff] }
 0x45d   : > { %4519 = vmatprep.subr.bf16.mxu0 %v1571_v29  ;;  %5093 = vmatprep.subr.bf16.mxu1 %v1573_v58  ;;  %v1618_v29 = vunpack.c.h.s8.bf16 %v554_v21  ;;  %v1620_v58 = vunpack.c.h.s8.bf16 %v556_v24  ;;  %v1627_v30 = vunpack.c.l.s8.bf16 %v563_v25  ;;  %v1629_v43 = vunpack.c.l.s8.bf16 %v565_v31 }
 0x45e   : > { %v1635_v37 = vunpack.c.h.s8.bf16 %v563_v25  ;;  %v1637_v40 = vunpack.c.h.s8.bf16 %v565_v31 }
 0x460   : > { %4520 = vmatpush1.bf16.msra.mxu0 %v1570_v32  ;;  %5094 = vmatpush1.bf16.msra.mxu1 %v1572_v34  ;;  %v562_v32 = vld [vmem:[%s10914_s21 + $0x560] sm:$0xff]  ;;  %v564_v34 = vld [vmem:[%s10914_s21 + $0x570] sm:$0xff] }
 0x461   : > { %4521 = vmatprep.subr.bf16.mxu0 %v1579_v39  ;;  %5095 = vmatprep.subr.bf16.mxu1 %v1581_v35  ;;  %v1626_v39 = vunpack.c.l.s8.bf16 %v562_v32  ;;  %v1628_v35 = vunpack.c.l.s8.bf16 %v564_v34 }
 0x464   : > { %4522 = vmatpush1.bf16.msra.mxu0 %v1578_v41  ;;  %5096 = vmatpush1.bf16.msra.mxu1 %v1580_v42  ;;  %v571_v41 = vld [vmem:[%s10914_s21 + $0x5a8] sm:$0xff]  ;;  %v573_v42 = vld [vmem:[%s10914_s21 + $0x5b8] sm:$0xff] }
 0x465   : > { %4523 = vmatprep.subr.bf16.mxu0 %v1587_v46  ;;  %5097 = vmatprep.subr.bf16.mxu1 %v1589_v52  ;;  %v1634_v46 = vunpack.c.h.s8.bf16 %v562_v32  ;;  %v1636_v52 = vunpack.c.h.s8.bf16 %v564_v34  ;;  %v1643_v51 = vunpack.c.l.s8.bf16 %v571_v41  ;;  %v1645_v54 = vunpack.c.l.s8.bf16 %v573_v42 }
 0x466   : > { %v1651_v1 = vunpack.c.h.s8.bf16 %v571_v41  ;;  %v1653_v2 = vunpack.c.h.s8.bf16 %v573_v42 }
 0x468   : > { %4524 = vmatpush1.bf16.msra.mxu0 %v1586_v56  ;;  %5098 = vmatpush1.bf16.msra.mxu1 %v1588_v57  ;;  %v570_v56 = vld [vmem:[%s10914_s21 + $0x5a0] sm:$0xff]  ;;  %v572_v57 = vld [vmem:[%s10914_s21 + $0x5b0] sm:$0xff] }
 0x469   : > { %4525 = vmatprep.subr.bf16.mxu0 %v1595_v0  ;;  %5099 = vmatprep.subr.bf16.mxu1 %v1597_v53  ;;  %v1642_v0 = vunpack.c.l.s8.bf16 %v570_v56  ;;  %v1644_v53 = vunpack.c.l.s8.bf16 %v572_v57 }
 0x46c   : > { %4526 = vmatpush1.bf16.msra.mxu0 %v1594_v3  ;;  %5100 = vmatpush1.bf16.msra.mxu1 %v1596_v8  ;;  %v579_v3 = vld [vmem:[%s10914_s21 + $0x5e8] sm:$0xff]  ;;  %v581_v8 = vld [vmem:[%s10914_s21 + $0x5f8] sm:$0xff] }
 0x46d   : > { %4527 = vmatprep.subr.bf16.mxu0 %v1603_v9  ;;  %5101 = vmatprep.subr.bf16.mxu1 %v1605_v10  ;;  %v1650_v9 = vunpack.c.h.s8.bf16 %v570_v56  ;;  %v1652_v10 = vunpack.c.h.s8.bf16 %v572_v57  ;;  %v1659_v61 = vunpack.c.l.s8.bf16 %v579_v3  ;;  %v1661_v12 = vunpack.c.l.s8.bf16 %v581_v8  ;;  %v603_v57 = vld [vmem:[%s10914_s21 + $0x6a8] sm:$0xff] }
 0x46e   : > { %v1667_v21 = vunpack.c.h.s8.bf16 %v579_v3  ;;  %v1669_v24 = vunpack.c.h.s8.bf16 %v581_v8  ;;  %v602_v3 = vld [vmem:[%s10914_s21 + $0x6a0] sm:$0xff]  ;;  %v604_v8 = vld [vmem:[%s10914_s21 + $0x6b0] sm:$0xff] }
 0x470   : > { %4528 = vmatpush1.bf16.msra.mxu0 %v1602_v13  ;;  %5102 = vmatpush1.bf16.msra.mxu1 %v1604_v16  ;;  %v578_v13 = vld [vmem:[%s10914_s21 + $0x5e0] sm:$0xff]  ;;  %v580_v16 = vld [vmem:[%s10914_s21 + $0x5f0] sm:$0xff] }
 0x471   : > { %4529 = vmatprep.subr.bf16.mxu0 %v1611_v28  ;;  %5103 = vmatprep.subr.bf16.mxu1 %v1613_v19  ;;  %v1658_v28 = vunpack.c.l.s8.bf16 %v578_v13  ;;  %v1660_v19 = vunpack.c.l.s8.bf16 %v580_v16 }
 0x474   : > { %4530 = vmatpush1.bf16.msra.mxu0 %v1610_v23  ;;  %5104 = vmatpush1.bf16.msra.mxu1 %v1612_v26  ;;  %v587_v23 = vld [vmem:[%s10914_s21 + $0x628] sm:$0xff]  ;;  %v589_v26 = vld [vmem:[%s10914_s21 + $0x638] sm:$0xff] }
 0x475   : > { %4531 = vmatprep.subr.bf16.mxu0 %v1619_v44  ;;  %5105 = vmatprep.subr.bf16.mxu1 %v1621_v49  ;;  %v1666_v44 = vunpack.c.h.s8.bf16 %v578_v13  ;;  %v1668_v49 = vunpack.c.h.s8.bf16 %v580_v16  ;;  %v1675_v25 = vunpack.c.l.s8.bf16 %v587_v23  ;;  %v1677_v31 = vunpack.c.l.s8.bf16 %v589_v26 }
 0x476   : > { %v1683_v32 = vunpack.c.h.s8.bf16 %v587_v23  ;;  %v1685_v34 = vunpack.c.h.s8.bf16 %v589_v26  ;;  %v1715_v13 = vunpack.c.h.s8.bf16 %v603_v57  ;;  %v1716_v23 = vunpack.c.h.s8.bf16 %v604_v8 }
 0x478   : > { %4532 = vmatpush1.bf16.msra.mxu0 %v1618_v29  ;;  %5106 = vmatpush1.bf16.msra.mxu1 %v1620_v58  ;;  %v586_v29 = vld [vmem:[%s10914_s21 + $0x620] sm:$0xff]  ;;  %v588_v58 = vld [vmem:[%s10914_s21 + $0x630] sm:$0xff] }
 0x479   : > { %4533 = vmatprep.subr.bf16.mxu0 %v1627_v30  ;;  %5107 = vmatprep.subr.bf16.mxu1 %v1629_v43  ;;  %v1674_v30 = vunpack.c.l.s8.bf16 %v586_v29  ;;  %v1676_v43 = vunpack.c.l.s8.bf16 %v588_v58 }
 0x47c   : > { %4534 = vmatpush1.bf16.msra.mxu0 %v1626_v39  ;;  %5108 = vmatpush1.bf16.msra.mxu1 %v1628_v35  ;;  %v595_v39 = vld [vmem:[%s10914_s21 + $0x668] sm:$0xff]  ;;  %v597_v35 = vld [vmem:[%s10914_s21 + $0x678] sm:$0xff] }
 0x47d   : > { %4535 = vmatprep.subr.bf16.mxu0 %v1635_v37  ;;  %5109 = vmatprep.subr.bf16.mxu1 %v1637_v40  ;;  %v1682_v37 = vunpack.c.h.s8.bf16 %v586_v29  ;;  %v1684_v40 = vunpack.c.h.s8.bf16 %v588_v58  ;;  %v1691_v41 = vunpack.c.l.s8.bf16 %v595_v39  ;;  %v1693_v42 = vunpack.c.l.s8.bf16 %v597_v35 }
 0x47e   : > { %v1701_v56 = vunpack.c.h.s8.bf16 %v597_v35 }
 0x480   : > { %4536 = vmatpush1.bf16.msra.mxu0 %v1634_v46  ;;  %5110 = vmatpush1.bf16.msra.mxu1 %v1636_v52  ;;  %v594_v46 = vld [vmem:[%s10914_s21 + $0x660] sm:$0xff]  ;;  %v596_v52 = vld [vmem:[%s10914_s21 + $0x670] sm:$0xff] }
 0x481   : > { %4537 = vmatprep.subr.bf16.mxu0 %v1643_v51  ;;  %5111 = vmatprep.subr.bf16.mxu1 %v1645_v54  ;;  %v1690_v51 = vunpack.c.l.s8.bf16 %v594_v46  ;;  %v1699_v54 = vunpack.c.h.s8.bf16 %v595_v39 }
 0x484   : > { %4538 = vmatpush1.bf16.msra.mxu0 %v1642_v0  ;;  %5112 = vmatpush1.bf16.msra.mxu1 %v1644_v53  ;;  %v605_v0 = vld [vmem:[%s10914_s21 + $0x6b8] sm:$0xff]  ;;  %v1698_v53 = vunpack.c.h.s8.bf16 %v594_v46 }
 0x485   : > { %4539 = vmatprep.subr.bf16.mxu0 %v1651_v1  ;;  %5113 = vmatprep.subr.bf16.mxu1 %v1653_v2  ;;  %v1700_v1 = vunpack.c.h.s8.bf16 %v596_v52  ;;  %v1709_v2 = vunpack.c.l.s8.bf16 %v605_v0  ;;  %v1717_v16 = vunpack.c.h.s8.bf16 %v605_v0 }
 0x488   : > { %4540 = vmatpush1.bf16.msra.mxu0 %v1650_v9  ;;  %5114 = vmatpush1.bf16.msra.mxu1 %v1652_v10  ;;  %v10768_v9 = vmov 1983009808  }
 0x489   : > { %4541 = vmatprep.subr.bf16.mxu0 %v1659_v61  ;;  %5115 = vmatprep.subr.bf16.mxu1 %v1661_v12  ;;  %v5590_v10 = vunpack.c.l.s4 %v10768_v9  ;;  %v1706_v61 = vunpack.c.l.s8.bf16 %v602_v3  ;;  %v1708_v12 = vunpack.c.l.s8.bf16 %v604_v8  ;;  %v620_v8 = vld [vmem:[%s10914_s21 + $0x730] sm:$0xff] }
 0x48c   : > { %4542 = vmatpush1.bf16.msra.mxu0 %v1658_v28  ;;  %5116 = vmatpush1.bf16.msra.mxu1 %v1660_v19  ;;  %v5591_v28 = vunpack.c.0.s8 %v5590_v10  ;;  %v611_v19 = vld [vmem:[%s10914_s21 + $0x6e8] sm:$0xff] }
 0x48d   : > { %4543 = vmatprep.subr.bf16.mxu0 %v1667_v21  ;;  %5117 = vmatprep.subr.bf16.mxu1 %v1669_v24  ;;  %v613_v21 = vld [vmem:[%s10914_s21 + $0x6f8] sm:$0xff]  ;;  %v1714_v24 = vunpack.c.h.s8.bf16 %v602_v3  ;;  %v1723_v26 = vunpack.c.l.s8.bf16 %v611_v19  ;;  %v1731_v46 = vunpack.c.h.s8.bf16 %v611_v19  ;;  %v618_v3 = vld [vmem:[%s10914_s21 + $0x720] sm:$0xff] }
 0x48e   : > { %v11747_v58 = vsub.s32 %v5591_v28, %v10965_v38  ;;  %v1738_v10 = vunpack.c.l.s8.bf16 %v618_v3  ;;  %v629_v28 = vld [vmem:[%s10914_s21 + $0x778] sm:$0xff]  ;;  %v1746_v19 = vunpack.c.h.s8.bf16 %v618_v3 }
 0x490   : > { %4544 = vmatpush1.bf16.msra.mxu0 %v1666_v44  ;;  %5118 = vmatpush1.bf16.msra.mxu1 %v1668_v49  ;;  %v1725_v44 = vunpack.c.l.s8.bf16 %v613_v21  ;;  %v610_v49 = vld [vmem:[%s10914_s21 + $0x6e0] sm:$0xff] }
 0x491   : > { %4554 = vmatprep.subr.bf16.mxu0 %v1675_v25  ;;  %5128 = vmatprep.subr.bf16.mxu1 %v1677_v31  ;;  %v612_v25 = vld [vmem:[%s10914_s21 + $0x6f0] sm:$0xff] }
 0x493   : > { %4546 = vmatmul.mubr.bf16.vlgmr.msra.gmra.mrb[4].mxu0 %v11104_v15  ;;  %5120 = vmatmul.mubr.bf16.vlgmr.msra.gmra.mrb[4].mxu1 %v11104_v15  ;;  %v1692_v15 = vunpack.c.l.s8.bf16 %v596_v52  ;;  %v1733_v52 = vunpack.c.h.s8.bf16 %v613_v21  ;;  %v1748_v21 = vunpack.c.h.s8.bf16 %v620_v8 }
 0x494   : > { %4555 = vmatpush1.bf16.msra.mxu0 %v1674_v30  ;;  %5129 = vmatpush1.bf16.msra.mxu1 %v1676_v43 }
 0x495   : > { %4556 = vmatprep.subr.bf16.mxu0 %v1683_v32  ;;  %5130 = vmatprep.subr.bf16.mxu1 %v1685_v34 }
 0x496   : > { %4586 = vmatprep.mubr.bf16.mxu0 %v11110_v22  ;;  %5160 = vmatprep.mubr.bf16.mxu1 %v11110_v22  ;;  %v1707_v22 = vunpack.c.l.s8.bf16 %v603_v57  ;;  %v3078_v57 = vld [vmem:[#allocation2] sm:$0xff] }
 0x498   : > { %4557 = vmatpush1.bf16.msra.mxu0 %v1682_v37  ;;  %5131 = vmatpush1.bf16.msra.mxu1 %v1684_v40  ;;  %v1722_v37 = vunpack.c.l.s8.bf16 %v610_v49  ;;  %v1724_v40 = vunpack.c.l.s8.bf16 %v612_v25 }
 0x499   : > { %4558 = vmatprep.subr.bf16.mxu0 %v1691_v41  ;;  %5132 = vmatprep.subr.bf16.mxu1 %v1693_v42 }
 0x49c   : > { %4559 = vmatpush1.bf16.msra.mxu0 %v1690_v51  ;;  %5133 = vmatpush1.bf16.msra.mxu1 %v1692_v15 }
 0x49d   : > { %4560 = vmatprep.subr.bf16.mxu0 %v1699_v54  ;;  %5134 = vmatprep.subr.bf16.mxu1 %v1701_v56  ;;  %v619_v54 = vld [vmem:[%s10914_s21 + $0x728] sm:$0xff]  ;;  %v621_v56 = vld [vmem:[%s10914_s21 + $0x738] sm:$0xff] }
 0x4a0   : > { %4561 = vmatpush1.bf16.msra.mxu0 %v1698_v53  ;;  %5135 = vmatpush1.bf16.msra.mxu1 %v1700_v1  ;;  %v1730_v53 = vunpack.c.h.s8.bf16 %v610_v49  ;;  %v1732_v1 = vunpack.c.h.s8.bf16 %v612_v25 }
 0x4a1   : > { %4562 = vmatprep.subr.bf16.mxu0 %v1707_v22  ;;  %5136 = vmatprep.subr.bf16.mxu1 %v1709_v2  ;;  %v1739_v22 = vunpack.c.l.s8.bf16 %v619_v54  ;;  %v1741_v2 = vunpack.c.l.s8.bf16 %v621_v56 }
 0x4a4   : > { %4563 = vmatpush1.bf16.msra.mxu0 %v1706_v61  ;;  %5137 = vmatpush1.bf16.msra.mxu1 %v1708_v12  ;;  %v1740_v61 = vunpack.c.l.s8.bf16 %v620_v8  ;;  %v1747_v12 = vunpack.c.h.s8.bf16 %v619_v54 }
 0x4a5   : > { %4564 = vmatprep.subr.bf16.mxu0 %v1715_v13  ;;  %5138 = vmatprep.subr.bf16.mxu1 %v1717_v16  ;;  %v1749_v13 = vunpack.c.h.s8.bf16 %v621_v56  ;;  %v627_v16 = vld [vmem:[%s10914_s21 + $0x768] sm:$0xff] }
 0x4a6   : > { %v3850_v31 = vpop.f32.mrb[0].mxu0  ;;  %v4424_v29 = vpop.f32.mrb[0].mxu1 }
 0x4a7   : > { %v3852_v30 = vpop.f32.mrb[1].mxu0  ;;  %v4426_v43 = vpop.f32.mrb[1].mxu1 }
 0x4a8   : > { %v5587_v32 = vcombine.low %v3850_v31, %v3852_v30  ;;  %v5588_v34 = vcombine.low %v4424_v29, %v4426_v43  ;;  %v3854_v39 = vpop.f32.mrb[2].mxu0  ;;  %v4428_v35 = vpop.f32.mrb[2].mxu1  ;;  %4565 = vmatpush1.bf16.msra.mxu0 %v1714_v24  ;;  %5139 = vmatpush1.bf16.msra.mxu1 %v1716_v23  ;;  %v1755_v24 = vunpack.c.l.s8.bf16 %v627_v16  ;;  %v1757_v23 = vunpack.c.l.s8.bf16 %v629_v28  ;;  %v635_v30 = vld [vmem:[%s10914_s21 + $0x7a8] sm:$0xff]  ;;  %v637_v43 = vld [vmem:[%s10914_s21 + $0x7b8] sm:$0xff] }
 0x4a9   : > { %v3855_v41 = vpop.f32.mrb[3].mxu0  ;;  %v4429_v42 = vpop.f32.mrb[3].mxu1  ;;  %4566 = vmatprep.subr.bf16.mxu0 %v1723_v26  ;;  %5140 = vmatprep.subr.bf16.mxu1 %v1725_v44  ;;  %v626_v26 = vld [vmem:[%s10914_s21 + $0x760] sm:$0xff]  ;;  %v628_v44 = vld [vmem:[%s10914_s21 + $0x770] sm:$0xff]  ;;  %v1763_v31 = vunpack.c.h.s8.bf16 %v627_v16  ;;  %v1765_v29 = vunpack.c.h.s8.bf16 %v629_v28  ;;  %v1771_v39 = vunpack.c.l.s8.bf16 %v635_v30  ;;  %v1773_v35 = vunpack.c.l.s8.bf16 %v637_v43 }
 0x4aa   : > { %v5595_v51 = vrot.slane %v5587_v32, %v11747_v58  ;;  %v5602_v15 = vrot.slane %v5588_v34, %v11747_v58  ;;  %v1754_v49 = vunpack.c.l.s8.bf16 %v626_v26  ;;  %v1756_v25 = vunpack.c.l.s8.bf16 %v628_v44  ;;  %v650_v28 = vld [vmem:[%s10914_s21 + $0x820] sm:$0xff] }
 0x4ab   : > { %v1762_v32 = vunpack.c.h.s8.bf16 %v626_v26  ;;  %v1764_v34 = vunpack.c.h.s8.bf16 %v628_v44  ;;  %v659_v44 = vld [vmem:[%s10914_s21 + $0x868] sm:$0xff] }
 0x4ac   : > { %v5603_v0 = vcombine.low %v5595_v51, %v5602_v15  ;;  %4567 = vmatpush1.bf16.msra.mxu0 %v1722_v37  ;;  %5141 = vmatpush1.bf16.msra.mxu1 %v1724_v40  ;;  %v634_v37 = vld [vmem:[%s10914_s21 + $0x7a0] sm:$0xff]  ;;  %v636_v40 = vld [vmem:[%s10914_s21 + $0x7b0] sm:$0xff]  ;;  %v643_v51 = vld [vmem:[%s10914_s21 + $0x7e8] sm:$0xff] }
 0x4ad   : > { %4568 = vmatprep.subr.bf16.mxu0 %v1731_v46  ;;  %5142 = vmatprep.subr.bf16.mxu1 %v1733_v52  ;;  %v1770_v41 = vunpack.c.l.s8.bf16 %v634_v37  ;;  %v1772_v42 = vunpack.c.l.s8.bf16 %v636_v40  ;;  %v1779_v46 = vunpack.c.h.s8.bf16 %v635_v30  ;;  %v1781_v52 = vunpack.c.h.s8.bf16 %v637_v43  ;;  %v645_v15 = vld [vmem:[%s10914_s21 + $0x7f8] sm:$0xff]  ;;  %v658_v43 = vld [vmem:[%s10914_s21 + $0x860] sm:$0xff] }
 0x4ae   : > { %v5623_v9 = vadd.f32 %v5603_v0, %v3078_v57  ;;  %v1778_v54 = vunpack.c.h.s8.bf16 %v634_v37  ;;  %v1780_v56 = vunpack.c.h.s8.bf16 %v636_v40  ;;  %v1787_v57 = vunpack.c.l.s8.bf16 %v643_v51  ;;  %v667_v37 = vld [vmem:[%s10914_s21 + $0x8a8] sm:$0xff]  ;;  %v669_v40 = vld [vmem:[%s10914_s21 + $0x8b8] sm:$0xff] }
 0x4af   : > { %v1789_v0 = vunpack.c.l.s8.bf16 %v645_v15  ;;  %v1795_v3 = vunpack.c.h.s8.bf16 %v643_v51  ;;  %v1797_v8 = vunpack.c.h.s8.bf16 %v645_v15  ;;  %v668_v51 = vld [vmem:[%s10914_s21 + $0x8b0] sm:$0xff] }
 0x4b0   : > { %5625 = vst [vmem:[#allocation2] sm:$0xff] %v5623_v9  ;;  %4569 = vmatpush1.bf16.msra.mxu0 %v1730_v53  ;;  %5143 = vmatpush1.bf16.msra.mxu1 %v1732_v1  ;;  %v642_v53 = vld [vmem:[%s10914_s21 + $0x7e0] sm:$0xff]  ;;  %v644_v1 = vld [vmem:[%s10914_s21 + $0x7f0] sm:$0xff]  ;;  %v651_v9 = vld [vmem:[%s10914_s21 + $0x828] sm:$0xff] }
 0x4b1   : > { %4570 = vmatprep.subr.bf16.mxu0 %v1739_v22  ;;  %5144 = vmatprep.subr.bf16.mxu1 %v1741_v2  ;;  %v1786_v22 = vunpack.c.l.s8.bf16 %v642_v53  ;;  %v1788_v2 = vunpack.c.l.s8.bf16 %v644_v1 }
 0x4b4   : > { %4571 = vmatpush1.bf16.msra.mxu0 %v1738_v10  ;;  %5145 = vmatpush1.bf16.msra.mxu1 %v1740_v61  ;;  %v653_v10 = vld [vmem:[%s10914_s21 + $0x838] sm:$0xff]  ;;  %v1794_v61 = vunpack.c.h.s8.bf16 %v642_v53 }
 0x4b5   : > { %4572 = vmatprep.subr.bf16.mxu0 %v1747_v12  ;;  %5146 = vmatprep.subr.bf16.mxu1 %v1749_v13  ;;  %v1796_v12 = vunpack.c.h.s8.bf16 %v644_v1  ;;  %v1803_v13 = vunpack.c.l.s8.bf16 %v651_v9  ;;  %v1805_v16 = vunpack.c.l.s8.bf16 %v653_v10  ;;  %v1813_v26 = vunpack.c.h.s8.bf16 %v653_v10  ;;  %v677_v53 = vld [vmem:[%s10914_s21 + $0x8f8] sm:$0xff] }
 0x4b8   : > { %4573 = vmatpush1.bf16.msra.mxu0 %v1746_v19  ;;  %5147 = vmatpush1.bf16.msra.mxu1 %v1748_v21  ;;  %v652_v19 = vld [vmem:[%s10914_s21 + $0x830] sm:$0xff]  ;;  %v1802_v21 = vunpack.c.l.s8.bf16 %v650_v28 }
 0x4b9   : > { %4574 = vmatprep.subr.bf16.mxu0 %v1755_v24  ;;  %5148 = vmatprep.subr.bf16.mxu1 %v1757_v23  ;;  %v1804_v24 = vunpack.c.l.s8.bf16 %v652_v19  ;;  %v1811_v23 = vunpack.c.h.s8.bf16 %v651_v9  ;;  %v676_v9 = vld [vmem:[%s10914_s21 + $0x8f0] sm:$0xff] }
 0x4bc   : > { %4575 = vmatpush1.bf16.msra.mxu0 %v1754_v49  ;;  %5149 = vmatpush1.bf16.msra.mxu1 %v1756_v25  ;;  %v661_v49 = vld [vmem:[%s10914_s21 + $0x878] sm:$0xff]  ;;  %v1810_v25 = vunpack.c.h.s8.bf16 %v650_v28 }
 0x4bd   : > { %4576 = vmatprep.subr.bf16.mxu0 %v1763_v31  ;;  %5150 = vmatprep.subr.bf16.mxu1 %v1765_v29  ;;  %v1812_v31 = vunpack.c.h.s8.bf16 %v652_v19  ;;  %v1819_v29 = vunpack.c.l.s8.bf16 %v659_v44  ;;  %v1821_v30 = vunpack.c.l.s8.bf16 %v661_v49  ;;  %v685_v28 = vld [vmem:[%s10914_s21 + $0x938] sm:$0xff] }
 0x4c0   : > { %4577 = vmatpush1.bf16.msra.mxu0 %v1762_v32  ;;  %5151 = vmatpush1.bf16.msra.mxu1 %v1764_v34  ;;  %v660_v32 = vld [vmem:[%s10914_s21 + $0x870] sm:$0xff]  ;;  %v1818_v34 = vunpack.c.l.s8.bf16 %v658_v43 }
 0x4c1   : > { %4578 = vmatprep.subr.bf16.mxu0 %v1771_v39  ;;  %5152 = vmatprep.subr.bf16.mxu1 %v1773_v35  ;;  %v1827_v39 = vunpack.c.h.s8.bf16 %v659_v44  ;;  %v1829_v35 = vunpack.c.h.s8.bf16 %v661_v49  ;;  %v684_v44 = vld [vmem:[%s10914_s21 + $0x930] sm:$0xff] }
 0x4c4   : > { %4579 = vmatpush1.bf16.msra.mxu0 %v1770_v41  ;;  %5153 = vmatpush1.bf16.msra.mxu1 %v1772_v42  ;;  %v1826_v41 = vunpack.c.h.s8.bf16 %v658_v43  ;;  %v1828_v42 = vunpack.c.h.s8.bf16 %v660_v32  ;;  %v693_v43 = vld [vmem:[%s10914_s21 + $0x978] sm:$0xff] }
 0x4c5   : > { %4580 = vmatprep.subr.bf16.mxu0 %v1779_v46  ;;  %5154 = vmatprep.subr.bf16.mxu1 %v1781_v52  ;;  %v1837_v46 = vunpack.c.l.s8.bf16 %v669_v40  ;;  %v666_v52 = vld [vmem:[%s10914_s21 + $0x8a0] sm:$0xff] }
 0x4c6   : > { %v1834_v15 = vunpack.c.l.s8.bf16 %v666_v52  ;;  %v1842_v1 = vunpack.c.h.s8.bf16 %v666_v52  ;;  %v701_v52 = vld [vmem:[%s10914_s21 + $0x9b8] sm:$0xff] }
 0x4c8   : > { %4581 = vmatpush1.bf16.msra.mxu0 %v1778_v54  ;;  %5155 = vmatpush1.bf16.msra.mxu1 %v1780_v56  ;;  %v1836_v54 = vunpack.c.l.s8.bf16 %v668_v51  ;;  %v1843_v56 = vunpack.c.h.s8.bf16 %v667_v37 }
 0x4c9   : > { %4582 = vmatprep.subr.bf16.mxu0 %v1787_v57  ;;  %5156 = vmatprep.subr.bf16.mxu1 %v1789_v0  ;;  %v1845_v57 = vunpack.c.h.s8.bf16 %v669_v40  ;;  %v675_v0 = vld [vmem:[%s10914_s21 + $0x8e8] sm:$0xff] }
 0x4cc   : > { %4583 = vmatpush1.bf16.msra.mxu0 %v1786_v22  ;;  %5157 = vmatpush1.bf16.msra.mxu1 %v1788_v2  ;;  %v1844_v22 = vunpack.c.h.s8.bf16 %v668_v51  ;;  %v1851_v2 = vunpack.c.l.s8.bf16 %v675_v0 }
 0x4cd   : > { %4584 = vmatprep.subr.bf16.mxu0 %v1795_v3  ;;  %5158 = vmatprep.subr.bf16.mxu1 %v1797_v8  ;;  %v1853_v3 = vunpack.c.l.s8.bf16 %v677_v53  ;;  %v674_v8 = vld [vmem:[%s10914_s21 + $0x8e0] sm:$0xff] }
 0x4ce   : > { %v1850_v10 = vunpack.c.l.s8.bf16 %v674_v8  ;;  %v1858_v19 = vunpack.c.h.s8.bf16 %v674_v8  ;;  %v709_v8 = vld [vmem:[%s10914_s21 + $0x9f8] sm:$0xff] }
 0x4d0   : > { %4585 = vmatpush1.bf16.msra.mxu0 %v1794_v61  ;;  %5159 = vmatpush1.bf16.msra.mxu1 %v1796_v12  ;;  %v1852_v61 = vunpack.c.l.s8.bf16 %v676_v9  ;;  %v1859_v12 = vunpack.c.h.s8.bf16 %v675_v0  ;;  %v700_v0 = vld [vmem:[%s10914_s21 + $0x9b0] sm:$0xff] }
 0x4d1   : > { %4595 = vmatprep.subr.bf16.mxu0 %v1803_v13  ;;  %5169 = vmatprep.subr.bf16.mxu1 %v1805_v16  ;;  %v1861_v13 = vunpack.c.h.s8.bf16 %v677_v53  ;;  %v683_v16 = vld [vmem:[%s10914_s21 + $0x928] sm:$0xff] }
 0x4d3   : > { %4587 = vmatmul.mubr.bf16.vlgmr.msra.gmra.mrb[4].mxu0 %v11157_v4  ;;  %5161 = vmatmul.mubr.bf16.vlgmr.msra.gmra.mrb[4].mxu1 %v11157_v4  ;;  %v1820_v4 = vunpack.c.l.s8.bf16 %v660_v32 }
 0x4d4   : > { %4596 = vmatpush1.bf16.msra.mxu0 %v1802_v21  ;;  %5170 = vmatpush1.bf16.msra.mxu1 %v1804_v24  ;;  %v1860_v21 = vunpack.c.h.s8.bf16 %v676_v9  ;;  %v1867_v24 = vunpack.c.l.s8.bf16 %v683_v16 }
 0x4d5   : > { %4597 = vmatprep.subr.bf16.mxu0 %v1811_v23  ;;  %5171 = vmatprep.subr.bf16.mxu1 %v1813_v26  ;;  %v1869_v23 = vunpack.c.l.s8.bf16 %v685_v28  ;;  %v682_v26 = vld [vmem:[%s10914_s21 + $0x920] sm:$0xff] }
 0x4d6   : > { %4627 = vmatprep.mubr.bf16.mxu0 %v11162_v11  ;;  %5201 = vmatprep.mubr.bf16.mxu1 %v11162_v11  ;;  %v1835_v11 = vunpack.c.l.s8.bf16 %v667_v37  ;;  %v1866_v49 = vunpack.c.l.s8.bf16 %v682_v26  ;;  %v1874_v32 = vunpack.c.h.s8.bf16 %v682_v26  ;;  %v692_v37 = vld [vmem:[%s10914_s21 + $0x970] sm:$0xff]  ;;  %v717_v26 = vld [vmem:[%s10914_s21 + $0xa38] sm:$0xff] }
 0x4d8   : > { %4598 = vmatpush1.bf16.msra.mxu0 %v1810_v25  ;;  %5172 = vmatpush1.bf16.msra.mxu1 %v1812_v31  ;;  %v1868_v25 = vunpack.c.l.s8.bf16 %v684_v44  ;;  %v1875_v31 = vunpack.c.h.s8.bf16 %v683_v16  ;;  %v708_v16 = vld [vmem:[%s10914_s21 + $0x9f0] sm:$0xff] }
 0x4d9   : > { %4599 = vmatprep.subr.bf16.mxu0 %v1819_v29  ;;  %5173 = vmatprep.subr.bf16.mxu1 %v1821_v30  ;;  %v1877_v29 = vunpack.c.h.s8.bf16 %v685_v28  ;;  %v691_v30 = vld [vmem:[%s10914_s21 + $0x968] sm:$0xff] }
 0x4dc   : > { %4600 = vmatpush1.bf16.msra.mxu0 %v1818_v34  ;;  %5174 = vmatpush1.bf16.msra.mxu1 %v1820_v4  ;;  %v1876_v34 = vunpack.c.h.s8.bf16 %v684_v44  ;;  %v1883_v4 = vunpack.c.l.s8.bf16 %v691_v30 }
 0x4dd   : > { %4601 = vmatprep.subr.bf16.mxu0 %v1827_v39  ;;  %5175 = vmatprep.subr.bf16.mxu1 %v1829_v35  ;;  %v1885_v39 = vunpack.c.l.s8.bf16 %v693_v43  ;;  %v690_v35 = vld [vmem:[%s10914_s21 + $0x960] sm:$0xff] }
 0x4de   : > { %v1882_v40 = vunpack.c.l.s8.bf16 %v690_v35  ;;  %v1890_v51 = vunpack.c.h.s8.bf16 %v690_v35  ;;  %v725_v35 = vld [vmem:[%s10914_s21 + $0xa78] sm:$0xff] }
 0x4e0   : > { %4602 = vmatpush1.bf16.msra.mxu0 %v1826_v41  ;;  %5176 = vmatpush1.bf16.msra.mxu1 %v1828_v42  ;;  %v1884_v41 = vunpack.c.l.s8.bf16 %v692_v37  ;;  %v1891_v42 = vunpack.c.h.s8.bf16 %v691_v30  ;;  %v716_v30 = vld [vmem:[%s10914_s21 + $0xa30] sm:$0xff] }
 0x4e1   : > { %4603 = vmatprep.subr.bf16.mxu0 %v1835_v11  ;;  %5177 = vmatprep.subr.bf16.mxu1 %v1837_v46  ;;  %v1893_v11 = vunpack.c.h.s8.bf16 %v693_v43  ;;  %v699_v46 = vld [vmem:[%s10914_s21 + $0x9a8] sm:$0xff] }
 0x4e4   : > { %4604 = vmatpush1.bf16.msra.mxu0 %v1834_v15  ;;  %5178 = vmatpush1.bf16.msra.mxu1 %v1836_v54  ;;  %v1892_v15 = vunpack.c.h.s8.bf16 %v692_v37  ;;  %v1899_v54 = vunpack.c.l.s8.bf16 %v699_v46 }
 0x4e5   : > { %4605 = vmatprep.subr.bf16.mxu0 %v1843_v56  ;;  %5179 = vmatprep.subr.bf16.mxu1 %v1845_v57  ;;  %v1901_v56 = vunpack.c.l.s8.bf16 %v701_v52  ;;  %v698_v57 = vld [vmem:[%s10914_s21 + $0x9a0] sm:$0xff] }
 0x4e6   : > { %v1898_v53 = vunpack.c.l.s8.bf16 %v698_v57  ;;  %v1906_v9 = vunpack.c.h.s8.bf16 %v698_v57 }
 0x4e8   : > { %4606 = vmatpush1.bf16.msra.mxu0 %v1842_v1  ;;  %5180 = vmatpush1.bf16.msra.mxu1 %v1844_v22  ;;  %v1900_v1 = vunpack.c.l.s8.bf16 %v700_v0  ;;  %v1907_v22 = vunpack.c.h.s8.bf16 %v699_v46  ;;  %v724_v46 = vld [vmem:[%s10914_s21 + $0xa70] sm:$0xff] }
 0x4e9   : > { %4607 = vmatprep.subr.bf16.mxu0 %v1851_v2  ;;  %5181 = vmatprep.subr.bf16.mxu1 %v1853_v3  ;;  %v1909_v2 = vunpack.c.h.s8.bf16 %v701_v52  ;;  %v707_v3 = vld [vmem:[%s10914_s21 + $0x9e8] sm:$0xff] }
 0x4ec   : > { %4608 = vmatpush1.bf16.msra.mxu0 %v1850_v10  ;;  %5182 = vmatpush1.bf16.msra.mxu1 %v1852_v61  ;;  %v1908_v10 = vunpack.c.h.s8.bf16 %v700_v0  ;;  %v1915_v61 = vunpack.c.l.s8.bf16 %v707_v3  ;;  %v1956_v0 = vunpack.c.h.s8.bf16 %v724_v46 }
 0x4ed   : > { %4609 = vmatprep.subr.bf16.mxu0 %v1859_v12  ;;  %5183 = vmatprep.subr.bf16.mxu1 %v1861_v13  ;;  %v1917_v12 = vunpack.c.l.s8.bf16 %v709_v8  ;;  %v706_v13 = vld [vmem:[%s10914_s21 + $0x9e0] sm:$0xff] }
 0x4ee   : > { %v1914_v28 = vunpack.c.l.s8.bf16 %v706_v13  ;;  %v1922_v44 = vunpack.c.h.s8.bf16 %v706_v13 }
 0x4f0   : > { %4610 = vmatpush1.bf16.msra.mxu0 %v1858_v19  ;;  %5184 = vmatpush1.bf16.msra.mxu1 %v1860_v21  ;;  %v1916_v19 = vunpack.c.l.s8.bf16 %v708_v16  ;;  %v1923_v21 = vunpack.c.h.s8.bf16 %v707_v3 }
 0x4f1   : > { %4611 = vmatprep.subr.bf16.mxu0 %v1867_v24  ;;  %5185 = vmatprep.subr.bf16.mxu1 %v1869_v23  ;;  %v1925_v24 = vunpack.c.h.s8.bf16 %v709_v8  ;;  %v715_v23 = vld [vmem:[%s10914_s21 + $0xa28] sm:$0xff] }
 0x4f4   : > { %4612 = vmatpush1.bf16.msra.mxu0 %v1866_v49  ;;  %5186 = vmatpush1.bf16.msra.mxu1 %v1868_v25  ;;  %v1924_v49 = vunpack.c.h.s8.bf16 %v708_v16  ;;  %v1931_v25 = vunpack.c.l.s8.bf16 %v715_v23 }
 0x4f5   : > { %4613 = vmatprep.subr.bf16.mxu0 %v1875_v31  ;;  %5187 = vmatprep.subr.bf16.mxu1 %v1877_v29  ;;  %v1933_v31 = vunpack.c.l.s8.bf16 %v717_v26  ;;  %v714_v29 = vld [vmem:[%s10914_s21 + $0xa20] sm:$0xff] }
 0x4f6   : > { %v1930_v43 = vunpack.c.l.s8.bf16 %v714_v29  ;;  %v1938_v37 = vunpack.c.h.s8.bf16 %v714_v29 }
 0x4f8   : > { %4614 = vmatpush1.bf16.msra.mxu0 %v1874_v32  ;;  %5188 = vmatpush1.bf16.msra.mxu1 %v1876_v34  ;;  %v1932_v32 = vunpack.c.l.s8.bf16 %v716_v30  ;;  %v1939_v34 = vunpack.c.h.s8.bf16 %v715_v23 }
 0x4f9   : > { %4615 = vmatprep.subr.bf16.mxu0 %v1883_v4  ;;  %5189 = vmatprep.subr.bf16.mxu1 %v1885_v39  ;;  %v1941_v4 = vunpack.c.h.s8.bf16 %v717_v26  ;;  %v723_v39 = vld [vmem:[%s10914_s21 + $0xa68] sm:$0xff] }
 0x4fc   : > { %4616 = vmatpush1.bf16.msra.mxu0 %v1882_v40  ;;  %5190 = vmatpush1.bf16.msra.mxu1 %v1884_v41  ;;  %v1940_v40 = vunpack.c.h.s8.bf16 %v716_v30  ;;  %v1947_v41 = vunpack.c.l.s8.bf16 %v723_v39 }
 0x4fd   : > { %4617 = vmatprep.subr.bf16.mxu0 %v1891_v42  ;;  %5191 = vmatprep.subr.bf16.mxu1 %v1893_v11  ;;  %v1949_v42 = vunpack.c.l.s8.bf16 %v725_v35  ;;  %v722_v11 = vld [vmem:[%s10914_s21 + $0xa60] sm:$0xff] }
 0x4fe   : > { %v1946_v52 = vunpack.c.l.s8.bf16 %v722_v11  ;;  %v1954_v57 = vunpack.c.h.s8.bf16 %v722_v11 }
 0x500   : > { %4618 = vmatpush1.bf16.msra.mxu0 %v1890_v51  ;;  %5192 = vmatpush1.bf16.msra.mxu1 %v1892_v15  ;;  %v1955_v51 = vunpack.c.h.s8.bf16 %v723_v39  ;;  %v1957_v15 = vunpack.c.h.s8.bf16 %v725_v35 }
 0x501   : > { %4619 = vmatprep.subr.bf16.mxu0 %v1899_v54  ;;  %5193 = vmatprep.subr.bf16.mxu1 %v1901_v56  ;;  %v731_v54 = vld [vmem:[%s10914_s21 + $0xaa8] sm:$0xff]  ;;  %v733_v56 = vld [vmem:[%s10914_s21 + $0xab8] sm:$0xff] }
 0x502   : > { %v1971_v8 = vunpack.c.h.s8.bf16 %v731_v54 }
 0x504   : > { %4620 = vmatpush1.bf16.msra.mxu0 %v1898_v53  ;;  %5194 = vmatpush1.bf16.msra.mxu1 %v1900_v1  ;;  %v1965_v53 = vunpack.c.l.s8.bf16 %v733_v56  ;;  %v730_v1 = vld [vmem:[%s10914_s21 + $0xaa0] sm:$0xff] }
 0x505   : > { %4621 = vmatprep.subr.bf16.mxu0 %v1907_v22  ;;  %5195 = vmatprep.subr.bf16.mxu1 %v1909_v2  ;;  %v732_v22 = vld [vmem:[%s10914_s21 + $0xab0] sm:$0xff]  ;;  %v1962_v2 = vunpack.c.l.s8.bf16 %v730_v1 }
 0x506   : > { %v1964_v3 = vunpack.c.l.s8.bf16 %v732_v22  ;;  %v1972_v13 = vunpack.c.h.s8.bf16 %v732_v22 }
 0x508   : > { %4622 = vmatpush1.bf16.msra.mxu0 %v1906_v9  ;;  %5196 = vmatpush1.bf16.msra.mxu1 %v1908_v10  ;;  %v1973_v9 = vunpack.c.h.s8.bf16 %v733_v56  ;;  %v739_v10 = vld [vmem:[%s10914_s21 + $0xae8] sm:$0xff] }
 0x509   : > { %4623 = vmatprep.subr.bf16.mxu0 %v1915_v61  ;;  %5197 = vmatprep.subr.bf16.mxu1 %v1917_v12  ;;  %v741_v61 = vld [vmem:[%s10914_s21 + $0xaf8] sm:$0xff]  ;;  %v1970_v12 = vunpack.c.h.s8.bf16 %v730_v1  ;;  %v1979_v16 = vunpack.c.l.s8.bf16 %v739_v10  ;;  %v1987_v26 = vunpack.c.h.s8.bf16 %v739_v10 }
 0x50c   : > { %4624 = vmatpush1.bf16.msra.mxu0 %v1914_v28  ;;  %5198 = vmatpush1.bf16.msra.mxu1 %v1916_v19  ;;  %v1981_v28 = vunpack.c.l.s8.bf16 %v741_v61  ;;  %v738_v19 = vld [vmem:[%s10914_s21 + $0xae0] sm:$0xff] }
 0x50d   : > { %4625 = vmatprep.subr.bf16.mxu0 %v1923_v21  ;;  %5199 = vmatprep.subr.bf16.mxu1 %v1925_v24  ;;  %v740_v21 = vld [vmem:[%s10914_s21 + $0xaf0] sm:$0xff]  ;;  %v1978_v24 = vunpack.c.l.s8.bf16 %v738_v19 }
 0x50e   : > { %v1980_v23 = vunpack.c.l.s8.bf16 %v740_v21  ;;  %v1988_v29 = vunpack.c.h.s8.bf16 %v740_v21 }
 0x510   : > { %4626 = vmatpush1.bf16.msra.mxu0 %v1922_v44  ;;  %5200 = vmatpush1.bf16.msra.mxu1 %v1924_v49  ;;  %v1989_v44 = vunpack.c.h.s8.bf16 %v741_v61  ;;  %v747_v49 = vld [vmem:[%s10914_s21 + $0xb28] sm:$0xff] }
 0x511   : > { %4636 = vmatprep.subr.bf16.mxu0 %v1931_v25  ;;  %5210 = vmatprep.subr.bf16.mxu1 %v1933_v31  ;;  %v749_v25 = vld [vmem:[%s10914_s21 + $0xb38] sm:$0xff]  ;;  %v1986_v31 = vunpack.c.h.s8.bf16 %v738_v19  ;;  %v1995_v30 = vunpack.c.l.s8.bf16 %v747_v49  ;;  %v2003_v35 = vunpack.c.h.s8.bf16 %v747_v49 }
 0x513   : > { %4628 = vmatmul.mubr.bf16.vlgmr.msra.gmra.mrb[4].mxu0 %v11200_v62  ;;  %5202 = vmatmul.mubr.bf16.vlgmr.msra.gmra.mrb[4].mxu1 %v11200_v62  ;;  %v1948_v62 = vunpack.c.l.s8.bf16 %v724_v46 }
 0x514   : > { %4637 = vmatpush1.bf16.msra.mxu0 %v1930_v43  ;;  %5211 = vmatpush1.bf16.msra.mxu1 %v1932_v32  ;;  %v1997_v43 = vunpack.c.l.s8.bf16 %v749_v25  ;;  %v746_v32 = vld [vmem:[%s10914_s21 + $0xb20] sm:$0xff] }
 0x515   : > { %4638 = vmatprep.subr.bf16.mxu0 %v1939_v34  ;;  %5212 = vmatprep.subr.bf16.mxu1 %v1941_v4  ;;  %v748_v34 = vld [vmem:[%s10914_s21 + $0xb30] sm:$0xff]  ;;  %v1994_v4 = vunpack.c.l.s8.bf16 %v746_v32 }
 0x516   : > { %4668 = vmatprep.mubr.bf16.mxu0 %v11206_v6  ;;  %5242 = vmatprep.mubr.bf16.mxu1 %v11206_v6  ;;  %v1963_v6 = vunpack.c.l.s8.bf16 %v731_v54  ;;  %v1996_v39 = vunpack.c.l.s8.bf16 %v748_v34  ;;  %v2004_v11 = vunpack.c.h.s8.bf16 %v748_v34 }
 0x518   : > { %4639 = vmatpush1.bf16.msra.mxu0 %v1938_v37  ;;  %5213 = vmatpush1.bf16.msra.mxu1 %v1940_v40  ;;  %v2005_v37 = vunpack.c.h.s8.bf16 %v749_v25  ;;  %v755_v40 = vld [vmem:[%s10914_s21 + $0xb68] sm:$0xff] }
 0x519   : > { %4640 = vmatprep.subr.bf16.mxu0 %v1947_v41  ;;  %5214 = vmatprep.subr.bf16.mxu1 %v1949_v42  ;;  %v757_v41 = vld [vmem:[%s10914_s21 + $0xb78] sm:$0xff]  ;;  %v2002_v42 = vunpack.c.h.s8.bf16 %v746_v32  ;;  %v2011_v46 = vunpack.c.l.s8.bf16 %v755_v40  ;;  %v2019_v56 = vunpack.c.h.s8.bf16 %v755_v40 }
 0x51c   : > { %4641 = vmatpush1.bf16.msra.mxu0 %v1946_v52  ;;  %5215 = vmatpush1.bf16.msra.mxu1 %v1948_v62  ;;  %v2013_v52 = vunpack.c.l.s8.bf16 %v757_v41  ;;  %v754_v62 = vld [vmem:[%s10914_s21 + $0xb60] sm:$0xff] }
 0x51d   : > { %4642 = vmatprep.subr.bf16.mxu0 %v1955_v51  ;;  %5216 = vmatprep.subr.bf16.mxu1 %v1957_v15  ;;  %v756_v51 = vld [vmem:[%s10914_s21 + $0xb70] sm:$0xff]  ;;  %v2010_v15 = vunpack.c.l.s8.bf16 %v754_v62 }
 0x51e   : > { %v2012_v54 = vunpack.c.l.s8.bf16 %v756_v51  ;;  %v2020_v1 = vunpack.c.h.s8.bf16 %v756_v51 }
 0x520   : > { %4643 = vmatpush1.bf16.msra.mxu0 %v1954_v57  ;;  %5217 = vmatpush1.bf16.msra.mxu1 %v1956_v0  ;;  %v2021_v57 = vunpack.c.h.s8.bf16 %v757_v41  ;;  %v763_v0 = vld [vmem:[%s10914_s21 + $0xba8] sm:$0xff] }
 0x521   : > { %4644 = vmatprep.subr.bf16.mxu0 %v1963_v6  ;;  %5218 = vmatprep.subr.bf16.mxu1 %v1965_v53  ;;  %v765_v6 = vld [vmem:[%s10914_s21 + $0xbb8] sm:$0xff]  ;;  %v2018_v53 = vunpack.c.h.s8.bf16 %v754_v62  ;;  %v2027_v22 = vunpack.c.l.s8.bf16 %v763_v0  ;;  %v2035_v61 = vunpack.c.h.s8.bf16 %v763_v0 }
 0x524   : > { %4645 = vmatpush1.bf16.msra.mxu0 %v1962_v2  ;;  %5219 = vmatpush1.bf16.msra.mxu1 %v1964_v3  ;;  %v2029_v2 = vunpack.c.l.s8.bf16 %v765_v6  ;;  %v762_v3 = vld [vmem:[%s10914_s21 + $0xba0] sm:$0xff] }
 0x525   : > { %4646 = vmatprep.subr.bf16.mxu0 %v1971_v8  ;;  %5220 = vmatprep.subr.bf16.mxu1 %v1973_v9  ;;  %v764_v8 = vld [vmem:[%s10914_s21 + $0xbb0] sm:$0xff]  ;;  %v2026_v9 = vunpack.c.l.s8.bf16 %v762_v3 }
 0x526   : > { %v2028_v10 = vunpack.c.l.s8.bf16 %v764_v8  ;;  %v2036_v19 = vunpack.c.h.s8.bf16 %v764_v8  ;;  %v794_v8 = vld [vmem:[%s10914_s21 + $0xca0] sm:$0xff] }
 0x528   : > { %4647 = vmatpush1.bf16.msra.mxu0 %v1970_v12  ;;  %5221 = vmatpush1.bf16.msra.mxu1 %v1972_v13  ;;  %v2037_v12 = vunpack.c.h.s8.bf16 %v765_v6  ;;  %v771_v13 = vld [vmem:[%s10914_s21 + $0xbe8] sm:$0xff] }
 0x529   : > { %4648 = vmatprep.subr.bf16.mxu0 %v1979_v16  ;;  %5222 = vmatprep.subr.bf16.mxu1 %v1981_v28  ;;  %v773_v16 = vld [vmem:[%s10914_s21 + $0xbf8] sm:$0xff]  ;;  %v2034_v28 = vunpack.c.h.s8.bf16 %v762_v3  ;;  %v2043_v21 = vunpack.c.l.s8.bf16 %v771_v13  ;;  %v2051_v25 = vunpack.c.h.s8.bf16 %v771_v13 }
 0x52c   : > { %4649 = vmatpush1.bf16.msra.mxu0 %v1978_v24  ;;  %5223 = vmatpush1.bf16.msra.mxu1 %v1980_v23  ;;  %v2045_v24 = vunpack.c.l.s8.bf16 %v773_v16  ;;  %v770_v23 = vld [vmem:[%s10914_s21 + $0xbe0] sm:$0xff] }
 0x52d   : > { %4650 = vmatprep.subr.bf16.mxu0 %v1987_v26  ;;  %5224 = vmatprep.subr.bf16.mxu1 %v1989_v44  ;;  %v772_v26 = vld [vmem:[%s10914_s21 + $0xbf0] sm:$0xff]  ;;  %v2042_v44 = vunpack.c.l.s8.bf16 %v770_v23 }
 0x52e   : > { %v2044_v49 = vunpack.c.l.s8.bf16 %v772_v26  ;;  %v2052_v32 = vunpack.c.h.s8.bf16 %v772_v26  ;;  %v802_v26 = vld [vmem:[%s10914_s21 + $0xce0] sm:$0xff] }
 0x530   : > { %4651 = vmatpush1.bf16.msra.mxu0 %v1986_v31  ;;  %5225 = vmatpush1.bf16.msra.mxu1 %v1988_v29  ;;  %v2053_v31 = vunpack.c.h.s8.bf16 %v773_v16  ;;  %v779_v29 = vld [vmem:[%s10914_s21 + $0xc28] sm:$0xff] }
 0x531   : > { %4652 = vmatprep.subr.bf16.mxu0 %v1995_v30  ;;  %5226 = vmatprep.subr.bf16.mxu1 %v1997_v43  ;;  %v781_v30 = vld [vmem:[%s10914_s21 + $0xc38] sm:$0xff]  ;;  %v2050_v43 = vunpack.c.h.s8.bf16 %v770_v23  ;;  %v2059_v34 = vunpack.c.l.s8.bf16 %v779_v29  ;;  %v2067_v41 = vunpack.c.h.s8.bf16 %v779_v29  ;;  %v803_v16 = vld [vmem:[%s10914_s21 + $0xce8] sm:$0xff] }
 0x534   : > { %4653 = vmatpush1.bf16.msra.mxu0 %v1994_v4  ;;  %5227 = vmatpush1.bf16.msra.mxu1 %v1996_v39  ;;  %v2061_v4 = vunpack.c.l.s8.bf16 %v781_v30  ;;  %v778_v39 = vld [vmem:[%s10914_s21 + $0xc20] sm:$0xff] }
 0x535   : > { %4654 = vmatprep.subr.bf16.mxu0 %v2003_v35  ;;  %5228 = vmatprep.subr.bf16.mxu1 %v2005_v37  ;;  %v780_v35 = vld [vmem:[%s10914_s21 + $0xc30] sm:$0xff]  ;;  %v2058_v37 = vunpack.c.l.s8.bf16 %v778_v39 }
 0x536   : > { %v2060_v40 = vunpack.c.l.s8.bf16 %v780_v35  ;;  %v2068_v62 = vunpack.c.h.s8.bf16 %v780_v35  ;;  %v810_v35 = vld [vmem:[%s10914_s21 + $0xd20] sm:$0xff] }
 0x538   : > { %4655 = vmatpush1.bf16.msra.mxu0 %v2002_v42  ;;  %5229 = vmatpush1.bf16.msra.mxu1 %v2004_v11  ;;  %v2069_v42 = vunpack.c.h.s8.bf16 %v781_v30  ;;  %v787_v11 = vld [vmem:[%s10914_s21 + $0xc68] sm:$0xff] }
 0x539   : > { %4656 = vmatprep.subr.bf16.mxu0 %v2011_v46  ;;  %5230 = vmatprep.subr.bf16.mxu1 %v2013_v52  ;;  %v789_v46 = vld [vmem:[%s10914_s21 + $0xc78] sm:$0xff]  ;;  %v2066_v52 = vunpack.c.h.s8.bf16 %v778_v39  ;;  %v2075_v51 = vunpack.c.l.s8.bf16 %v787_v11  ;;  %v2083_v0 = vunpack.c.h.s8.bf16 %v787_v11  ;;  %v811_v30 = vld [vmem:[%s10914_s21 + $0xd28] sm:$0xff] }
 0x53a   : > { %v2085_v6 = vunpack.c.h.s8.bf16 %v789_v46 }
 0x53c   : > { %4657 = vmatpush1.bf16.msra.mxu0 %v2010_v15  ;;  %5231 = vmatpush1.bf16.msra.mxu1 %v2012_v54  ;;  %v2077_v15 = vunpack.c.l.s8.bf16 %v789_v46  ;;  %v786_v54 = vld [vmem:[%s10914_s21 + $0xc60] sm:$0xff]  ;;  %v819_v46 = vld [vmem:[%s10914_s21 + $0xd68] sm:$0xff] }
 0x53d   : > { %4658 = vmatprep.subr.bf16.mxu0 %v2019_v56  ;;  %5232 = vmatprep.subr.bf16.mxu1 %v2021_v57  ;;  %v788_v56 = vld [vmem:[%s10914_s21 + $0xc70] sm:$0xff]  ;;  %v2074_v57 = vunpack.c.l.s8.bf16 %v786_v54 }
 0x540   : > { %4659 = vmatpush1.bf16.msra.mxu0 %v2018_v53  ;;  %5233 = vmatpush1.bf16.msra.mxu1 %v2020_v1  ;;  %v795_v53 = vld [vmem:[%s10914_s21 + $0xca8] sm:$0xff]  ;;  %v797_v1 = vld [vmem:[%s10914_s21 + $0xcb8] sm:$0xff] }
 0x541   : > { %4660 = vmatprep.subr.bf16.mxu0 %v2027_v22  ;;  %5234 = vmatprep.subr.bf16.mxu1 %v2029_v2  ;;  %v2082_v22 = vunpack.c.h.s8.bf16 %v786_v54  ;;  %v2084_v2 = vunpack.c.h.s8.bf16 %v788_v56  ;;  %v2093_v3 = vunpack.c.l.s8.bf16 %v797_v1  ;;  %v2101_v13 = vunpack.c.h.s8.bf16 %v797_v1  ;;  %v827_v1 = vld [vmem:[%s10914_s21 + $0xda8] sm:$0xff] }
 0x544   : > { %4661 = vmatpush1.bf16.msra.mxu0 %v2026_v9  ;;  %5235 = vmatpush1.bf16.msra.mxu1 %v2028_v10  ;;  %v796_v9 = vld [vmem:[%s10914_s21 + $0xcb0] sm:$0xff]  ;;  %v2090_v10 = vunpack.c.l.s8.bf16 %v794_v8 }
 0x545   : > { %4662 = vmatprep.subr.bf16.mxu0 %v2035_v61  ;;  %5236 = vmatprep.subr.bf16.mxu1 %v2037_v12  ;;  %v2092_v61 = vunpack.c.l.s8.bf16 %v796_v9  ;;  %v2099_v12 = vunpack.c.h.s8.bf16 %v795_v53 }
 0x548   : > { %4663 = vmatpush1.bf16.msra.mxu0 %v2034_v28  ;;  %5237 = vmatpush1.bf16.msra.mxu1 %v2036_v19  ;;  %v805_v28 = vld [vmem:[%s10914_s21 + $0xcf8] sm:$0xff]  ;;  %v2098_v19 = vunpack.c.h.s8.bf16 %v794_v8 }
 0x549   : > { %4664 = vmatprep.subr.bf16.mxu0 %v2043_v21  ;;  %5238 = vmatprep.subr.bf16.mxu1 %v2045_v24  ;;  %v2100_v21 = vunpack.c.h.s8.bf16 %v796_v9  ;;  %v2107_v24 = vunpack.c.l.s8.bf16 %v803_v16  ;;  %v2109_v23 = vunpack.c.l.s8.bf16 %v805_v28  ;;  %v2117_v29 = vunpack.c.h.s8.bf16 %v805_v28  ;;  %v826_v9 = vld [vmem:[%s10914_s21 + $0xda0] sm:$0xff]  ;;  %v835_v28 = vld [vmem:[%s10914_s21 + $0xde8] sm:$0xff] }
 0x54c   : > { %4665 = vmatpush1.bf16.msra.mxu0 %v2042_v44  ;;  %5239 = vmatpush1.bf16.msra.mxu1 %v2044_v49  ;;  %v804_v44 = vld [vmem:[%s10914_s21 + $0xcf0] sm:$0xff]  ;;  %v2106_v49 = vunpack.c.l.s8.bf16 %v802_v26 }
 0x54d   : > { %4666 = vmatprep.subr.bf16.mxu0 %v2051_v25  ;;  %5240 = vmatprep.subr.bf16.mxu1 %v2053_v31  ;;  %v2108_v25 = vunpack.c.l.s8.bf16 %v804_v44  ;;  %v2115_v31 = vunpack.c.h.s8.bf16 %v803_v16 }
 0x550   : > { %4667 = vmatpush1.bf16.msra.mxu0 %v2050_v43  ;;  %5241 = vmatpush1.bf16.msra.mxu1 %v2052_v32  ;;  %v813_v43 = vld [vmem:[%s10914_s21 + $0xd38] sm:$0xff]  ;;  %v2114_v32 = vunpack.c.h.s8.bf16 %v802_v26 }
 0x551   : > { %4677 = vmatprep.subr.bf16.mxu0 %v2059_v34  ;;  %5251 = vmatprep.subr.bf16.mxu1 %v2061_v4  ;;  %v2116_v34 = vunpack.c.h.s8.bf16 %v804_v44  ;;  %v2123_v4 = vunpack.c.l.s8.bf16 %v811_v30  ;;  %v2125_v39 = vunpack.c.l.s8.bf16 %v813_v43  ;;  %v2133_v11 = vunpack.c.h.s8.bf16 %v813_v43  ;;  %v834_v44 = vld [vmem:[%s10914_s21 + $0xde0] sm:$0xff]  ;;  %v843_v43 = vld [vmem:[%s10914_s21 + $0xe28] sm:$0xff] }
 0x553   : > { %4669 = vmatmul.mubr.bf16.vlgmr.msra.gmra.mrb[4].mxu0 %v11251_v59  ;;  %5243 = vmatmul.mubr.bf16.vlgmr.msra.gmra.mrb[4].mxu1 %v11251_v59  ;;  %v2076_v59 = vunpack.c.l.s8.bf16 %v788_v56  ;;  %v818_v56 = vld [vmem:[%s10914_s21 + $0xd60] sm:$0xff] }
 0x554   : > { %4678 = vmatpush1.bf16.msra.mxu0 %v2058_v37  ;;  %5252 = vmatpush1.bf16.msra.mxu1 %v2060_v40  ;;  %v812_v37 = vld [vmem:[%s10914_s21 + $0xd30] sm:$0xff]  ;;  %v2122_v40 = vunpack.c.l.s8.bf16 %v810_v35 }
 0x555   : > { %4679 = vmatprep.subr.bf16.mxu0 %v2067_v41  ;;  %5253 = vmatprep.subr.bf16.mxu1 %v2069_v42  ;;  %v2124_v41 = vunpack.c.l.s8.bf16 %v812_v37  ;;  %v2131_v42 = vunpack.c.h.s8.bf16 %v811_v30 }
 0x556   : > { %4709 = vmatprep.mubr.bf16.mxu0 %v11256_v5  ;;  %5283 = vmatprep.mubr.bf16.mxu1 %v11256_v5  ;;  %v2091_v5 = vunpack.c.l.s8.bf16 %v795_v53 }
 0x558   : > { %4680 = vmatpush1.bf16.msra.mxu0 %v2066_v52  ;;  %5254 = vmatpush1.bf16.msra.mxu1 %v2068_v62  ;;  %v821_v52 = vld [vmem:[%s10914_s21 + $0xd78] sm:$0xff]  ;;  %v2130_v62 = vunpack.c.h.s8.bf16 %v810_v35 }
 0x559   : > { %4681 = vmatprep.subr.bf16.mxu0 %v2075_v51  ;;  %5255 = vmatprep.subr.bf16.mxu1 %v2077_v15  ;;  %v2132_v51 = vunpack.c.h.s8.bf16 %v812_v37  ;;  %v2139_v15 = vunpack.c.l.s8.bf16 %v819_v46  ;;  %v2141_v54 = vunpack.c.l.s8.bf16 %v821_v52  ;;  %v2149_v53 = vunpack.c.h.s8.bf16 %v821_v52  ;;  %v842_v37 = vld [vmem:[%s10914_s21 + $0xe20] sm:$0xff]  ;;  %v851_v52 = vld [vmem:[%s10914_s21 + $0xe68] sm:$0xff] }
 0x55c   : > { %4682 = vmatpush1.bf16.msra.mxu0 %v2074_v57  ;;  %5256 = vmatpush1.bf16.msra.mxu1 %v2076_v59  ;;  %v820_v57 = vld [vmem:[%s10914_s21 + $0xd70] sm:$0xff]  ;;  %v2138_v59 = vunpack.c.l.s8.bf16 %v818_v56 }
 0x55d   : > { %4683 = vmatprep.subr.bf16.mxu0 %v2083_v0  ;;  %5257 = vmatprep.subr.bf16.mxu1 %v2085_v6  ;;  %v2140_v0 = vunpack.c.l.s8.bf16 %v820_v57  ;;  %v2147_v6 = vunpack.c.h.s8.bf16 %v819_v46 }
 0x560   : > { %4684 = vmatpush1.bf16.msra.mxu0 %v2082_v22  ;;  %5258 = vmatpush1.bf16.msra.mxu1 %v2084_v2  ;;  %v829_v22 = vld [vmem:[%s10914_s21 + $0xdb8] sm:$0xff]  ;;  %v2146_v2 = vunpack.c.h.s8.bf16 %v818_v56 }
 0x561   : > { %4685 = vmatprep.subr.bf16.mxu0 %v2091_v5  ;;  %5259 = vmatprep.subr.bf16.mxu1 %v2093_v3  ;;  %v2148_v5 = vunpack.c.h.s8.bf16 %v820_v57  ;;  %v2155_v3 = vunpack.c.l.s8.bf16 %v827_v1  ;;  %v2157_v8 = vunpack.c.l.s8.bf16 %v829_v22  ;;  %v2165_v16 = vunpack.c.h.s8.bf16 %v829_v22  ;;  %v850_v57 = vld [vmem:[%s10914_s21 + $0xe60] sm:$0xff]  ;;  %v861_v22 = vld [vmem:[%s10914_s21 + $0xeb8] sm:$0xff] }
 0x564   : > { %4686 = vmatpush1.bf16.msra.mxu0 %v2090_v10  ;;  %5260 = vmatpush1.bf16.msra.mxu1 %v2092_v61  ;;  %v828_v10 = vld [vmem:[%s10914_s21 + $0xdb0] sm:$0xff]  ;;  %v2154_v61 = vunpack.c.l.s8.bf16 %v826_v9 }
 0x565   : > { %4687 = vmatprep.subr.bf16.mxu0 %v2099_v12  ;;  %5261 = vmatprep.subr.bf16.mxu1 %v2101_v13  ;;  %v2156_v12 = vunpack.c.l.s8.bf16 %v828_v10  ;;  %v2163_v13 = vunpack.c.h.s8.bf16 %v827_v1  ;;  %v859_v1 = vld [vmem:[%s10914_s21 + $0xea8] sm:$0xff] }
 0x568   : > { %4688 = vmatpush1.bf16.msra.mxu0 %v2098_v19  ;;  %5262 = vmatpush1.bf16.msra.mxu1 %v2100_v21  ;;  %v837_v19 = vld [vmem:[%s10914_s21 + $0xdf8] sm:$0xff]  ;;  %v2162_v21 = vunpack.c.h.s8.bf16 %v826_v9  ;;  %v860_v9 = vld [vmem:[%s10914_s21 + $0xeb0] sm:$0xff] }
 0x569   : > { %4689 = vmatprep.subr.bf16.mxu0 %v2107_v24  ;;  %5263 = vmatprep.subr.bf16.mxu1 %v2109_v23  ;;  %v2164_v24 = vunpack.c.h.s8.bf16 %v828_v10  ;;  %v2171_v23 = vunpack.c.l.s8.bf16 %v835_v28  ;;  %v2173_v26 = vunpack.c.l.s8.bf16 %v837_v19  ;;  %v2181_v30 = vunpack.c.h.s8.bf16 %v837_v19 }
 0x56c   : > { %4690 = vmatpush1.bf16.msra.mxu0 %v2106_v49  ;;  %5264 = vmatpush1.bf16.msra.mxu1 %v2108_v25  ;;  %v836_v49 = vld [vmem:[%s10914_s21 + $0xdf0] sm:$0xff]  ;;  %v2170_v25 = vunpack.c.l.s8.bf16 %v834_v44 }
 0x56d   : > { %4691 = vmatprep.subr.bf16.mxu0 %v2115_v31  ;;  %5265 = vmatprep.subr.bf16.mxu1 %v2117_v29  ;;  %v2172_v31 = vunpack.c.l.s8.bf16 %v836_v49  ;;  %v2179_v29 = vunpack.c.h.s8.bf16 %v835_v28  ;;  %v869_v28 = vld [vmem:[%s10914_s21 + $0xef8] sm:$0xff] }
 0x570   : > { %4692 = vmatpush1.bf16.msra.mxu0 %v2114_v32  ;;  %5266 = vmatpush1.bf16.msra.mxu1 %v2116_v34  ;;  %v845_v32 = vld [vmem:[%s10914_s21 + $0xe38] sm:$0xff]  ;;  %v2178_v34 = vunpack.c.h.s8.bf16 %v834_v44  ;;  %v868_v44 = vld [vmem:[%s10914_s21 + $0xef0] sm:$0xff] }
 0x571   : > { %4693 = vmatprep.subr.bf16.mxu0 %v2123_v4  ;;  %5267 = vmatprep.subr.bf16.mxu1 %v2125_v39  ;;  %v2180_v4 = vunpack.c.h.s8.bf16 %v836_v49  ;;  %v2187_v39 = vunpack.c.l.s8.bf16 %v843_v43  ;;  %v2189_v35 = vunpack.c.l.s8.bf16 %v845_v32  ;;  %v2197_v46 = vunpack.c.h.s8.bf16 %v845_v32 }
 0x574   : > { %4694 = vmatpush1.bf16.msra.mxu0 %v2122_v40  ;;  %5268 = vmatpush1.bf16.msra.mxu1 %v2124_v41  ;;  %v844_v40 = vld [vmem:[%s10914_s21 + $0xe30] sm:$0xff]  ;;  %v2186_v41 = vunpack.c.l.s8.bf16 %v842_v37 }
 0x575   : > { %4695 = vmatprep.subr.bf16.mxu0 %v2131_v42  ;;  %5269 = vmatprep.subr.bf16.mxu1 %v2133_v11  ;;  %v2188_v42 = vunpack.c.l.s8.bf16 %v844_v40  ;;  %v2195_v11 = vunpack.c.h.s8.bf16 %v843_v43  ;;  %v877_v43 = vld [vmem:[%s10914_s21 + $0xf38] sm:$0xff] }
 0x578   : > { %4696 = vmatpush1.bf16.msra.mxu0 %v2130_v62  ;;  %5270 = vmatpush1.bf16.msra.mxu1 %v2132_v51  ;;  %v853_v62 = vld [vmem:[%s10914_s21 + $0xe78] sm:$0xff]  ;;  %v2194_v51 = vunpack.c.h.s8.bf16 %v842_v37  ;;  %v876_v37 = vld [vmem:[%s10914_s21 + $0xf30] sm:$0xff] }
 0x579   : > { %4697 = vmatprep.subr.bf16.mxu0 %v2139_v15  ;;  %5271 = vmatprep.subr.bf16.mxu1 %v2141_v54  ;;  %v2196_v15 = vunpack.c.h.s8.bf16 %v844_v40  ;;  %v2203_v54 = vunpack.c.l.s8.bf16 %v851_v52  ;;  %v2205_v56 = vunpack.c.l.s8.bf16 %v853_v62 }
 0x57c   : > { %4698 = vmatpush1.bf16.msra.mxu0 %v2138_v59  ;;  %5272 = vmatpush1.bf16.msra.mxu1 %v2140_v0  ;;  %v852_v59 = vld [vmem:[%s10914_s21 + $0xe70] sm:$0xff]  ;;  %v2202_v0 = vunpack.c.l.s8.bf16 %v850_v57 }
 0x57d   : > { %4699 = vmatprep.subr.bf16.mxu0 %v2147_v6  ;;  %5273 = vmatprep.subr.bf16.mxu1 %v2149_v53  ;;  %v2211_v6 = vunpack.c.h.s8.bf16 %v851_v52  ;;  %v2213_v53 = vunpack.c.h.s8.bf16 %v853_v62  ;;  %v885_v52 = vld [vmem:[%s10914_s21 + $0xf78] sm:$0xff] }
 0x580   : > { %4700 = vmatpush1.bf16.msra.mxu0 %v2146_v2  ;;  %5274 = vmatpush1.bf16.msra.mxu1 %v2148_v5  ;;  %v2210_v2 = vunpack.c.h.s8.bf16 %v850_v57  ;;  %v2212_v5 = vunpack.c.h.s8.bf16 %v852_v59  ;;  %v884_v57 = vld [vmem:[%s10914_s21 + $0xf70] sm:$0xff] }
 0x581   : > { %4701 = vmatprep.subr.bf16.mxu0 %v2155_v3  ;;  %5275 = vmatprep.subr.bf16.mxu1 %v2157_v8  ;;  %v2221_v3 = vunpack.c.l.s8.bf16 %v861_v22  ;;  %v858_v8 = vld [vmem:[%s10914_s21 + $0xea0] sm:$0xff] }
 0x582   : > { %v2218_v10 = vunpack.c.l.s8.bf16 %v858_v8  ;;  %v2226_v19 = vunpack.c.h.s8.bf16 %v858_v8  ;;  %v892_v8 = vld [vmem:[%s10914_s21 + $0xfb0] sm:$0xff] }
 0x584   : > { %4702 = vmatpush1.bf16.msra.mxu0 %v2154_v61  ;;  %5276 = vmatpush1.bf16.msra.mxu1 %v2156_v12  ;;  %v2220_v61 = vunpack.c.l.s8.bf16 %v860_v9  ;;  %v2227_v12 = vunpack.c.h.s8.bf16 %v859_v1 }
 0x585   : > { %4703 = vmatprep.subr.bf16.mxu0 %v2163_v13  ;;  %5277 = vmatprep.subr.bf16.mxu1 %v2165_v16  ;;  %v2229_v13 = vunpack.c.h.s8.bf16 %v861_v22  ;;  %v867_v16 = vld [vmem:[%s10914_s21 + $0xee8] sm:$0xff] }
 0x588   : > { %4704 = vmatpush1.bf16.msra.mxu0 %v2162_v21  ;;  %5278 = vmatpush1.bf16.msra.mxu1 %v2164_v24  ;;  %v2228_v21 = vunpack.c.h.s8.bf16 %v860_v9  ;;  %v2235_v24 = vunpack.c.l.s8.bf16 %v867_v16 }
 0x589   : > { %4705 = vmatprep.subr.bf16.mxu0 %v2171_v23  ;;  %5279 = vmatprep.subr.bf16.mxu1 %v2173_v26  ;;  %v2237_v23 = vunpack.c.l.s8.bf16 %v869_v28  ;;  %v866_v26 = vld [vmem:[%s10914_s21 + $0xee0] sm:$0xff] }
 0x58a   : > { %v2234_v49 = vunpack.c.l.s8.bf16 %v866_v26  ;;  %v2242_v32 = vunpack.c.h.s8.bf16 %v866_v26  ;;  %v900_v26 = vld [vmem:[%s10914_s21 + $0xff0] sm:$0xff] }
 0x58c   : > { %4706 = vmatpush1.bf16.msra.mxu0 %v2170_v25  ;;  %5280 = vmatpush1.bf16.msra.mxu1 %v2172_v31  ;;  %v2236_v25 = vunpack.c.l.s8.bf16 %v868_v44  ;;  %v2243_v31 = vunpack.c.h.s8.bf16 %v867_v16  ;;  %v901_v16 = vld [vmem:[%s10914_s21 + $0xff8] sm:$0xff] }
 0x58d   : > { %4707 = vmatprep.subr.bf16.mxu0 %v2179_v29  ;;  %5281 = vmatprep.subr.bf16.mxu1 %v2181_v30  ;;  %v2245_v29 = vunpack.c.h.s8.bf16 %v869_v28  ;;  %v875_v30 = vld [vmem:[%s10914_s21 + $0xf28] sm:$0xff] }
 0x590   : > { %4708 = vmatpush1.bf16.msra.mxu0 %v2178_v34  ;;  %5282 = vmatpush1.bf16.msra.mxu1 %v2180_v4  ;;  %v2244_v34 = vunpack.c.h.s8.bf16 %v868_v44  ;;  %v2251_v4 = vunpack.c.l.s8.bf16 %v875_v30 }
 0x591   : > { %4718 = vmatprep.subr.bf16.mxu0 %v2187_v39  ;;  %5292 = vmatprep.subr.bf16.mxu1 %v2189_v35  ;;  %v2253_v39 = vunpack.c.l.s8.bf16 %v877_v43  ;;  %v874_v35 = vld [vmem:[%s10914_s21 + $0xf20] sm:$0xff] }
 0x592   : > { %v2250_v40 = vunpack.c.l.s8.bf16 %v874_v35  ;;  %v2258_v62 = vunpack.c.h.s8.bf16 %v874_v35  ;;  %v908_v35 = vld [vmem:[%s10914_s21 + $0x1030] sm:$0xff] }
 0x593   : > { %4710 = vmatmul.mubr.bf16.vlgmr.msra.gmra.mrb[4].mxu0 %v11294_v50  ;;  %5284 = vmatmul.mubr.bf16.vlgmr.msra.gmra.mrb[4].mxu1 %v11294_v50  ;;  %v2204_v50 = vunpack.c.l.s8.bf16 %v852_v59 }
 0x594   : > { %4719 = vmatpush1.bf16.msra.mxu0 %v2186_v41  ;;  %5293 = vmatpush1.bf16.msra.mxu1 %v2188_v42  ;;  %v2252_v41 = vunpack.c.l.s8.bf16 %v876_v37  ;;  %v2259_v42 = vunpack.c.h.s8.bf16 %v875_v30  ;;  %v909_v30 = vld [vmem:[%s10914_s21 + $0x1038] sm:$0xff] }
 0x595   : > { %4720 = vmatprep.subr.bf16.mxu0 %v2195_v11  ;;  %5294 = vmatprep.subr.bf16.mxu1 %v2197_v46  ;;  %v2261_v11 = vunpack.c.h.s8.bf16 %v877_v43  ;;  %v883_v46 = vld [vmem:[%s10914_s21 + $0xf68] sm:$0xff] }
 0x596   : > { %4750 = vmatprep.mubr.bf16.mxu0 %v11300_v7  ;;  %5324 = vmatprep.mubr.bf16.mxu1 %v11300_v7  ;;  %v2219_v7 = vunpack.c.l.s8.bf16 %v859_v1  ;;  %v893_v1 = vld [vmem:[%s10914_s21 + $0xfb8] sm:$0xff] }
 0x598   : > { %4721 = vmatpush1.bf16.msra.mxu0 %v2194_v51  ;;  %5295 = vmatpush1.bf16.msra.mxu1 %v2196_v15  ;;  %v2260_v51 = vunpack.c.h.s8.bf16 %v876_v37  ;;  %v2267_v15 = vunpack.c.l.s8.bf16 %v883_v46 }
 0x599   : > { %4722 = vmatprep.subr.bf16.mxu0 %v2203_v54  ;;  %5296 = vmatprep.subr.bf16.mxu1 %v2205_v56  ;;  %v2269_v54 = vunpack.c.l.s8.bf16 %v885_v52  ;;  %v882_v56 = vld [vmem:[%s10914_s21 + $0xf60] sm:$0xff] }
 0x59a   : > { %v2266_v59 = vunpack.c.l.s8.bf16 %v882_v56  ;;  %v2274_v22 = vunpack.c.h.s8.bf16 %v882_v56  ;;  %v916_v56 = vld [vmem:[%s10914_s21 + $0x1070] sm:$0xff] }
 0x59c   : > { %4723 = vmatpush1.bf16.msra.mxu0 %v2202_v0  ;;  %5297 = vmatpush1.bf16.msra.mxu1 %v2204_v50  ;;  %v2268_v0 = vunpack.c.l.s8.bf16 %v884_v57  ;;  %v2275_v50 = vunpack.c.h.s8.bf16 %v883_v46  ;;  %v917_v46 = vld [vmem:[%s10914_s21 + $0x1078] sm:$0xff] }
 0x59d   : > { %4724 = vmatprep.subr.bf16.mxu0 %v2211_v6  ;;  %5298 = vmatprep.subr.bf16.mxu1 %v2213_v53  ;;  %v2277_v6 = vunpack.c.h.s8.bf16 %v885_v52  ;;  %v891_v53 = vld [vmem:[%s10914_s21 + $0xfa8] sm:$0xff] }
 0x5a0   : > { %4725 = vmatpush1.bf16.msra.mxu0 %v2210_v2  ;;  %5299 = vmatpush1.bf16.msra.mxu1 %v2212_v5  ;;  %v2276_v2 = vunpack.c.h.s8.bf16 %v884_v57  ;;  %v2283_v5 = vunpack.c.l.s8.bf16 %v891_v53 }
 0x5a1   : > { %4726 = vmatprep.subr.bf16.mxu0 %v2219_v7  ;;  %5300 = vmatprep.subr.bf16.mxu1 %v2221_v3  ;;  %v2285_v7 = vunpack.c.l.s8.bf16 %v893_v1  ;;  %v890_v3 = vld [vmem:[%s10914_s21 + $0xfa0] sm:$0xff] }
 0x5a2   : > { %v2282_v9 = vunpack.c.l.s8.bf16 %v890_v3  ;;  %v2290_v28 = vunpack.c.h.s8.bf16 %v890_v3 }
 0x5a4   : > { %4727 = vmatpush1.bf16.msra.mxu0 %v2218_v10  ;;  %5301 = vmatpush1.bf16.msra.mxu1 %v2220_v61  ;;  %v2284_v10 = vunpack.c.l.s8.bf16 %v892_v8  ;;  %v2291_v61 = vunpack.c.h.s8.bf16 %v891_v53 }
 0x5a5   : > { %4728 = vmatprep.subr.bf16.mxu0 %v2227_v12  ;;  %5302 = vmatprep.subr.bf16.mxu1 %v2229_v13  ;;  %v2293_v12 = vunpack.c.h.s8.bf16 %v893_v1  ;;  %v899_v13 = vld [vmem:[%s10914_s21 + $0xfe8] sm:$0xff]  ;;  %v2340_v1 = vunpack.c.h.s8.bf16 %v916_v56 }
 0x5a8   : > { %4729 = vmatpush1.bf16.msra.mxu0 %v2226_v19  ;;  %5303 = vmatpush1.bf16.msra.mxu1 %v2228_v21  ;;  %v2292_v19 = vunpack.c.h.s8.bf16 %v892_v8  ;;  %v2299_v21 = vunpack.c.l.s8.bf16 %v899_v13 }
 0x5a9   : > { %4730 = vmatprep.subr.bf16.mxu0 %v2235_v24  ;;  %5304 = vmatprep.subr.bf16.mxu1 %v2237_v23  ;;  %v2301_v24 = vunpack.c.l.s8.bf16 %v901_v16  ;;  %v898_v23 = vld [vmem:[%s10914_s21 + $0xfe0] sm:$0xff] }
 0x5aa   : > { %v2298_v44 = vunpack.c.l.s8.bf16 %v898_v23  ;;  %v2306_v43 = vunpack.c.h.s8.bf16 %v898_v23 }
 0x5ac   : > { %4731 = vmatpush1.bf16.msra.mxu0 %v2234_v49  ;;  %5305 = vmatpush1.bf16.msra.mxu1 %v2236_v25  ;;  %v2300_v49 = vunpack.c.l.s8.bf16 %v900_v26  ;;  %v2307_v25 = vunpack.c.h.s8.bf16 %v899_v13 }
 0x5ad   : > { %4732 = vmatprep.subr.bf16.mxu0 %v2243_v31  ;;  %5306 = vmatprep.subr.bf16.mxu1 %v2245_v29  ;;  %v2309_v31 = vunpack.c.h.s8.bf16 %v901_v16  ;;  %v907_v29 = vld [vmem:[%s10914_s21 + $0x1028] sm:$0xff] }
 0x5b0   : > { %4733 = vmatpush1.bf16.msra.mxu0 %v2242_v32  ;;  %5307 = vmatpush1.bf16.msra.mxu1 %v2244_v34  ;;  %v2308_v32 = vunpack.c.h.s8.bf16 %v900_v26  ;;  %v2315_v34 = vunpack.c.l.s8.bf16 %v907_v29 }
 0x5b1   : > { %4734 = vmatprep.subr.bf16.mxu0 %v2251_v4  ;;  %5308 = vmatprep.subr.bf16.mxu1 %v2253_v39  ;;  %v2317_v4 = vunpack.c.l.s8.bf16 %v909_v30  ;;  %v906_v39 = vld [vmem:[%s10914_s21 + $0x1020] sm:$0xff] }
 0x5b2   : > { %v2314_v37 = vunpack.c.l.s8.bf16 %v906_v39  ;;  %v2322_v52 = vunpack.c.h.s8.bf16 %v906_v39 }
 0x5b4   : > { %4735 = vmatpush1.bf16.msra.mxu0 %v2250_v40  ;;  %5309 = vmatpush1.bf16.msra.mxu1 %v2252_v41  ;;  %v2316_v40 = vunpack.c.l.s8.bf16 %v908_v35  ;;  %v2323_v41 = vunpack.c.h.s8.bf16 %v907_v29 }
 0x5b5   : > { %4736 = vmatprep.subr.bf16.mxu0 %v2259_v42  ;;  %5310 = vmatprep.subr.bf16.mxu1 %v2261_v11  ;;  %v2325_v42 = vunpack.c.h.s8.bf16 %v909_v30  ;;  %v915_v11 = vld [vmem:[%s10914_s21 + $0x1068] sm:$0xff] }
 0x5b8   : > { %4737 = vmatpush1.bf16.msra.mxu0 %v2258_v62  ;;  %5311 = vmatpush1.bf16.msra.mxu1 %v2260_v51  ;;  %v2324_v62 = vunpack.c.h.s8.bf16 %v908_v35  ;;  %v2331_v51 = vunpack.c.l.s8.bf16 %v915_v11 }
 0x5b9   : > { %4738 = vmatprep.subr.bf16.mxu0 %v2267_v15  ;;  %5312 = vmatprep.subr.bf16.mxu1 %v2269_v54  ;;  %v2333_v15 = vunpack.c.l.s8.bf16 %v917_v46  ;;  %v914_v54 = vld [vmem:[%s10914_s21 + $0x1060] sm:$0xff] }
 0x5ba   : > { %v2330_v57 = vunpack.c.l.s8.bf16 %v914_v54  ;;  %v2338_v53 = vunpack.c.h.s8.bf16 %v914_v54 }
 0x5bc   : > { %4739 = vmatpush1.bf16.msra.mxu0 %v2266_v59  ;;  %5313 = vmatpush1.bf16.msra.mxu1 %v2268_v0  ;;  %v2339_v59 = vunpack.c.h.s8.bf16 %v915_v11  ;;  %v2341_v0 = vunpack.c.h.s8.bf16 %v917_v46 }
 0x5bd   : > { %4740 = vmatprep.subr.bf16.mxu0 %v2275_v50  ;;  %5314 = vmatprep.subr.bf16.mxu1 %v2277_v6  ;;  %v923_v50 = vld [vmem:[%s10914_s21 + $0x10a8] sm:$0xff]  ;;  %v925_v6 = vld [vmem:[%s10914_s21 + $0x10b8] sm:$0xff] }
 0x5be   : > { %v2355_v8 = vunpack.c.h.s8.bf16 %v923_v50 }
 0x5c0   : > { %4741 = vmatpush1.bf16.msra.mxu0 %v2274_v22  ;;  %5315 = vmatpush1.bf16.msra.mxu1 %v2276_v2  ;;  %v2349_v22 = vunpack.c.l.s8.bf16 %v925_v6  ;;  %v922_v2 = vld [vmem:[%s10914_s21 + $0x10a0] sm:$0xff] }
 0x5c1   : > { %4742 = vmatprep.subr.bf16.mxu0 %v2283_v5  ;;  %5316 = vmatprep.subr.bf16.mxu1 %v2285_v7  ;;  %v924_v5 = vld [vmem:[%s10914_s21 + $0x10b0] sm:$0xff]  ;;  %v2346_v7 = vunpack.c.l.s8.bf16 %v922_v2 }
 0x5c2   : > { %v2348_v3 = vunpack.c.l.s8.bf16 %v924_v5  ;;  %v2356_v13 = vunpack.c.h.s8.bf16 %v924_v5 }
 0x5c4   : > { %4743 = vmatpush1.bf16.msra.mxu0 %v2282_v9  ;;  %5317 = vmatpush1.bf16.msra.mxu1 %v2284_v10  ;;  %v2357_v9 = vunpack.c.h.s8.bf16 %v925_v6  ;;  %v931_v10 = vld [vmem:[%s10914_s21 + $0x10e8] sm:$0xff] }
 0x5c5   : > { %4744 = vmatprep.subr.bf16.mxu0 %v2291_v61  ;;  %5318 = vmatprep.subr.bf16.mxu1 %v2293_v12  ;;  %v933_v61 = vld [vmem:[%s10914_s21 + $0x10f8] sm:$0xff]  ;;  %v2354_v12 = vunpack.c.h.s8.bf16 %v922_v2  ;;  %v2363_v16 = vunpack.c.l.s8.bf16 %v931_v10  ;;  %v2371_v26 = vunpack.c.h.s8.bf16 %v931_v10 }
 0x5c8   : > { %4745 = vmatpush1.bf16.msra.mxu0 %v2290_v28  ;;  %5319 = vmatpush1.bf16.msra.mxu1 %v2292_v19  ;;  %v2365_v28 = vunpack.c.l.s8.bf16 %v933_v61  ;;  %v930_v19 = vld [vmem:[%s10914_s21 + $0x10e0] sm:$0xff] }
 0x5c9   : > { %4746 = vmatprep.subr.bf16.mxu0 %v2299_v21  ;;  %5320 = vmatprep.subr.bf16.mxu1 %v2301_v24  ;;  %v932_v21 = vld [vmem:[%s10914_s21 + $0x10f0] sm:$0xff]  ;;  %v2362_v24 = vunpack.c.l.s8.bf16 %v930_v19 }
 0x5ca   : > { %v2364_v23 = vunpack.c.l.s8.bf16 %v932_v21  ;;  %v2372_v29 = vunpack.c.h.s8.bf16 %v932_v21 }
 0x5cc   : > { %4747 = vmatpush1.bf16.msra.mxu0 %v2298_v44  ;;  %5321 = vmatpush1.bf16.msra.mxu1 %v2300_v49  ;;  %v2373_v44 = vunpack.c.h.s8.bf16 %v933_v61  ;;  %v939_v49 = vld [vmem:[%s10914_s21 + $0x1128] sm:$0xff] }
 0x5cd   : > { %4748 = vmatprep.subr.bf16.mxu0 %v2307_v25  ;;  %5322 = vmatprep.subr.bf16.mxu1 %v2309_v31  ;;  %v941_v25 = vld [vmem:[%s10914_s21 + $0x1138] sm:$0xff]  ;;  %v2370_v31 = vunpack.c.h.s8.bf16 %v930_v19  ;;  %v2379_v30 = vunpack.c.l.s8.bf16 %v939_v49  ;;  %v2387_v35 = vunpack.c.h.s8.bf16 %v939_v49 }
 0x5d0   : > { %4749 = vmatpush1.bf16.msra.mxu0 %v2306_v43  ;;  %5323 = vmatpush1.bf16.msra.mxu1 %v2308_v32  ;;  %v2381_v43 = vunpack.c.l.s8.bf16 %v941_v25  ;;  %v938_v32 = vld [vmem:[%s10914_s21 + $0x1120] sm:$0xff] }
 0x5d1   : > { %4759 = vmatprep.subr.bf16.mxu0 %v2315_v34  ;;  %5333 = vmatprep.subr.bf16.mxu1 %v2317_v4  ;;  %v940_v34 = vld [vmem:[%s10914_s21 + $0x1130] sm:$0xff]  ;;  %v2378_v4 = vunpack.c.l.s8.bf16 %v938_v32 }
 0x5d2   : > { %v2380_v39 = vunpack.c.l.s8.bf16 %v940_v34  ;;  %v2388_v11 = vunpack.c.h.s8.bf16 %v940_v34 }
 0x5d3   : > { %4751 = vmatmul.mubr.bf16.vlgmr.msra.gmra.mrb[4].mxu0 %v11347_v60  ;;  %5325 = vmatmul.mubr.bf16.vlgmr.msra.gmra.mrb[4].mxu1 %v11347_v60  ;;  %v2332_v60 = vunpack.c.l.s8.bf16 %v916_v56 }
 0x5d4   : > { %4760 = vmatpush1.bf16.msra.mxu0 %v2314_v37  ;;  %5334 = vmatpush1.bf16.msra.mxu1 %v2316_v40  ;;  %v2389_v37 = vunpack.c.h.s8.bf16 %v941_v25  ;;  %v947_v40 = vld [vmem:[%s10914_s21 + $0x1168] sm:$0xff] }
 0x5d5   : > { %4761 = vmatprep.subr.bf16.mxu0 %v2323_v41  ;;  %5335 = vmatprep.subr.bf16.mxu1 %v2325_v42  ;;  %v949_v41 = vld [vmem:[%s10914_s21 + $0x1178] sm:$0xff]  ;;  %v2386_v42 = vunpack.c.h.s8.bf16 %v938_v32  ;;  %v2395_v46 = vunpack.c.l.s8.bf16 %v947_v40  ;;  %v2403_v56 = vunpack.c.h.s8.bf16 %v947_v40 }
 0x5d6   : > { %4791 = vmatprep.mubr.bf16.mxu0 %v11352_v14  ;;  %5365 = vmatprep.mubr.bf16.mxu1 %v11352_v14  ;;  %v2347_v14 = vunpack.c.l.s8.bf16 %v923_v50 }
 0x5d8   : > { %4762 = vmatpush1.bf16.msra.mxu0 %v2322_v52  ;;  %5336 = vmatpush1.bf16.msra.mxu1 %v2324_v62  ;;  %v2397_v52 = vunpack.c.l.s8.bf16 %v949_v41  ;;  %v946_v62 = vld [vmem:[%s10914_s21 + $0x1160] sm:$0xff] }
 0x5d9   : > { %4763 = vmatprep.subr.bf16.mxu0 %v2331_v51  ;;  %5337 = vmatprep.subr.bf16.mxu1 %v2333_v15  ;;  %v948_v51 = vld [vmem:[%s10914_s21 + $0x1170] sm:$0xff]  ;;  %v2394_v15 = vunpack.c.l.s8.bf16 %v946_v62 }
 0x5da   : > { %v2396_v54 = vunpack.c.l.s8.bf16 %v948_v51  ;;  %v2404_v50 = vunpack.c.h.s8.bf16 %v948_v51 }
 0x5dc   : > { %4764 = vmatpush1.bf16.msra.mxu0 %v2330_v57  ;;  %5338 = vmatpush1.bf16.msra.mxu1 %v2332_v60  ;;  %v2405_v57 = vunpack.c.h.s8.bf16 %v949_v41  ;;  %v955_v60 = vld [vmem:[%s10914_s21 + $0x11a8] sm:$0xff] }
 0x5dd   : > { %4765 = vmatprep.subr.bf16.mxu0 %v2339_v59  ;;  %5339 = vmatprep.subr.bf16.mxu1 %v2341_v0  ;;  %v957_v59 = vld [vmem:[%s10914_s21 + $0x11b8] sm:$0xff]  ;;  %v2402_v0 = vunpack.c.h.s8.bf16 %v946_v62  ;;  %v2411_v6 = vunpack.c.l.s8.bf16 %v955_v60  ;;  %v2419_v5 = vunpack.c.h.s8.bf16 %v955_v60 }
 0x5e0   : > { %4766 = vmatpush1.bf16.msra.mxu0 %v2338_v53  ;;  %5340 = vmatpush1.bf16.msra.mxu1 %v2340_v1  ;;  %v2413_v53 = vunpack.c.l.s8.bf16 %v957_v59  ;;  %v954_v1 = vld [vmem:[%s10914_s21 + $0x11a0] sm:$0xff] }
 0x5e1   : > { %4767 = vmatprep.subr.bf16.mxu0 %v2347_v14  ;;  %5341 = vmatprep.subr.bf16.mxu1 %v2349_v22  ;;  %v956_v14 = vld [vmem:[%s10914_s21 + $0x11b0] sm:$0xff]  ;;  %v2410_v22 = vunpack.c.l.s8.bf16 %v954_v1 }
 0x5e2   : > { %v2412_v2 = vunpack.c.l.s8.bf16 %v956_v14  ;;  %v2420_v10 = vunpack.c.h.s8.bf16 %v956_v14  ;;  %v995_v14 = vld [vmem:[%s10914_s21 + $0x12e8] sm:$0xff] }
 0x5e4   : > { %4768 = vmatpush1.bf16.msra.mxu0 %v2346_v7  ;;  %5342 = vmatpush1.bf16.msra.mxu1 %v2348_v3  ;;  %v2421_v7 = vunpack.c.h.s8.bf16 %v957_v59  ;;  %v963_v3 = vld [vmem:[%s10914_s21 + $0x11e8] sm:$0xff]  ;;  %v986_v59 = vld [vmem:[%s10914_s21 + $0x12a0] sm:$0xff] }
 0x5e5   : > { %4769 = vmatprep.subr.bf16.mxu0 %v2355_v8  ;;  %5343 = vmatprep.subr.bf16.mxu1 %v2357_v9  ;;  %v965_v8 = vld [vmem:[%s10914_s21 + $0x11f8] sm:$0xff]  ;;  %v2418_v9 = vunpack.c.h.s8.bf16 %v954_v1  ;;  %v2427_v61 = vunpack.c.l.s8.bf16 %v963_v3  ;;  %v2435_v21 = vunpack.c.h.s8.bf16 %v963_v3 }
 0x5e8   : > { %4770 = vmatpush1.bf16.msra.mxu0 %v2354_v12  ;;  %5344 = vmatpush1.bf16.msra.mxu1 %v2356_v13  ;;  %v2429_v12 = vunpack.c.l.s8.bf16 %v965_v8  ;;  %v962_v13 = vld [vmem:[%s10914_s21 + $0x11e0] sm:$0xff] }
 0x5e9   : > { %4771 = vmatprep.subr.bf16.mxu0 %v2363_v16  ;;  %5345 = vmatprep.subr.bf16.mxu1 %v2365_v28  ;;  %v964_v16 = vld [vmem:[%s10914_s21 + $0x11f0] sm:$0xff]  ;;  %v2426_v28 = vunpack.c.l.s8.bf16 %v962_v13 }
 0x5ea   : > { %v2428_v19 = vunpack.c.l.s8.bf16 %v964_v16  ;;  %v2436_v49 = vunpack.c.h.s8.bf16 %v964_v16  ;;  %v1003_v16 = vld [vmem:[%s10914_s21 + $0x1328] sm:$0xff] }
 0x5ec   : > { %4772 = vmatpush1.bf16.msra.mxu0 %v2362_v24  ;;  %5346 = vmatpush1.bf16.msra.mxu1 %v2364_v23  ;;  %v2437_v24 = vunpack.c.h.s8.bf16 %v965_v8  ;;  %v971_v23 = vld [vmem:[%s10914_s21 + $0x1228] sm:$0xff]  ;;  %v994_v8 = vld [vmem:[%s10914_s21 + $0x12e0] sm:$0xff] }
 0x5ed   : > { %4773 = vmatprep.subr.bf16.mxu0 %v2371_v26  ;;  %5347 = vmatprep.subr.bf16.mxu1 %v2373_v44  ;;  %v973_v26 = vld [vmem:[%s10914_s21 + $0x1238] sm:$0xff]  ;;  %v2434_v44 = vunpack.c.h.s8.bf16 %v962_v13  ;;  %v2443_v25 = vunpack.c.l.s8.bf16 %v971_v23  ;;  %v2451_v34 = vunpack.c.h.s8.bf16 %v971_v23 }
 0x5f0   : > { %4774 = vmatpush1.bf16.msra.mxu0 %v2370_v31  ;;  %5348 = vmatpush1.bf16.msra.mxu1 %v2372_v29  ;;  %v2445_v31 = vunpack.c.l.s8.bf16 %v973_v26  ;;  %v970_v29 = vld [vmem:[%s10914_s21 + $0x1220] sm:$0xff] }
 0x5f1   : > { %4775 = vmatprep.subr.bf16.mxu0 %v2379_v30  ;;  %5349 = vmatprep.subr.bf16.mxu1 %v2381_v43  ;;  %v972_v30 = vld [vmem:[%s10914_s21 + $0x1230] sm:$0xff]  ;;  %v2442_v43 = vunpack.c.l.s8.bf16 %v970_v29 }
 0x5f2   : > { %v2444_v32 = vunpack.c.l.s8.bf16 %v972_v30  ;;  %v2452_v40 = vunpack.c.h.s8.bf16 %v972_v30  ;;  %v1011_v30 = vld [vmem:[%s10914_s21 + $0x1368] sm:$0xff] }
 0x5f4   : > { %4776 = vmatpush1.bf16.msra.mxu0 %v2378_v4  ;;  %5350 = vmatpush1.bf16.msra.mxu1 %v2380_v39  ;;  %v2453_v4 = vunpack.c.h.s8.bf16 %v973_v26  ;;  %v979_v39 = vld [vmem:[%s10914_s21 + $0x1268] sm:$0xff]  ;;  %v1002_v26 = vld [vmem:[%s10914_s21 + $0x1320] sm:$0xff] }
 0x5f5   : > { %4777 = vmatprep.subr.bf16.mxu0 %v2387_v35  ;;  %5351 = vmatprep.subr.bf16.mxu1 %v2389_v37  ;;  %v981_v35 = vld [vmem:[%s10914_s21 + $0x1278] sm:$0xff]  ;;  %v2450_v37 = vunpack.c.h.s8.bf16 %v970_v29  ;;  %v2459_v41 = vunpack.c.l.s8.bf16 %v979_v39  ;;  %v2467_v62 = vunpack.c.h.s8.bf16 %v979_v39 }
 0x5f6   : > { %v2469_v51 = vunpack.c.h.s8.bf16 %v981_v35 }
 0x5f8   : > { %4778 = vmatpush1.bf16.msra.mxu0 %v2386_v42  ;;  %5352 = vmatpush1.bf16.msra.mxu1 %v2388_v11  ;;  %v2461_v42 = vunpack.c.l.s8.bf16 %v981_v35  ;;  %v978_v11 = vld [vmem:[%s10914_s21 + $0x1260] sm:$0xff] }
 0x5f9   : > { %4779 = vmatprep.subr.bf16.mxu0 %v2395_v46  ;;  %5353 = vmatprep.subr.bf16.mxu1 %v2397_v52  ;;  %v980_v46 = vld [vmem:[%s10914_s21 + $0x1270] sm:$0xff]  ;;  %v2458_v52 = vunpack.c.l.s8.bf16 %v978_v11  ;;  %v1010_v35 = vld [vmem:[%s10914_s21 + $0x1360] sm:$0xff] }
 0x5fc   : > { %4780 = vmatpush1.bf16.msra.mxu0 %v2394_v15  ;;  %5354 = vmatpush1.bf16.msra.mxu1 %v2396_v54  ;;  %v987_v15 = vld [vmem:[%s10914_s21 + $0x12a8] sm:$0xff]  ;;  %v989_v54 = vld [vmem:[%s10914_s21 + $0x12b8] sm:$0xff] }
 0x5fd   : > { %4781 = vmatprep.subr.bf16.mxu0 %v2403_v56  ;;  %5355 = vmatprep.subr.bf16.mxu1 %v2405_v57  ;;  %v2466_v56 = vunpack.c.h.s8.bf16 %v978_v11  ;;  %v2468_v57 = vunpack.c.h.s8.bf16 %v980_v46  ;;  %v2477_v60 = vunpack.c.l.s8.bf16 %v989_v54  ;;  %v2485_v1 = vunpack.c.h.s8.bf16 %v989_v54  ;;  %v1018_v54 = vld [vmem:[%s10914_s21 + $0x13a0] sm:$0xff] }
 0x600   : > { %4782 = vmatpush1.bf16.msra.mxu0 %v2402_v0  ;;  %5356 = vmatpush1.bf16.msra.mxu1 %v2404_v50  ;;  %v988_v0 = vld [vmem:[%s10914_s21 + $0x12b0] sm:$0xff]  ;;  %v2474_v50 = vunpack.c.l.s8.bf16 %v986_v59 }
 0x601   : > { %4783 = vmatprep.subr.bf16.mxu0 %v2411_v6  ;;  %5357 = vmatprep.subr.bf16.mxu1 %v2413_v53  ;;  %v2476_v6 = vunpack.c.l.s8.bf16 %v988_v0  ;;  %v2483_v53 = vunpack.c.h.s8.bf16 %v987_v15 }
 0x604   : > { %4784 = vmatpush1.bf16.msra.mxu0 %v2410_v22  ;;  %5358 = vmatpush1.bf16.msra.mxu1 %v2412_v2  ;;  %v997_v22 = vld [vmem:[%s10914_s21 + $0x12f8] sm:$0xff]  ;;  %v2482_v2 = vunpack.c.h.s8.bf16 %v986_v59 }
 0x605   : > { %4785 = vmatprep.subr.bf16.mxu0 %v2419_v5  ;;  %5359 = vmatprep.subr.bf16.mxu1 %v2421_v7  ;;  %v2484_v5 = vunpack.c.h.s8.bf16 %v988_v0  ;;  %v2491_v7 = vunpack.c.l.s8.bf16 %v995_v14  ;;  %v2493_v3 = vunpack.c.l.s8.bf16 %v997_v22  ;;  %v2501_v13 = vunpack.c.h.s8.bf16 %v997_v22  ;;  %v1027_v0 = vld [vmem:[%s10914_s21 + $0x13e8] sm:$0xff]  ;;  %v1026_v22 = vld [vmem:[%s10914_s21 + $0x13e0] sm:$0xff] }
 0x608   : > { %4786 = vmatpush1.bf16.msra.mxu0 %v2418_v9  ;;  %5360 = vmatpush1.bf16.msra.mxu1 %v2420_v10  ;;  %v996_v9 = vld [vmem:[%s10914_s21 + $0x12f0] sm:$0xff]  ;;  %v2490_v10 = vunpack.c.l.s8.bf16 %v994_v8 }
 0x609   : > { %4787 = vmatprep.subr.bf16.mxu0 %v2427_v61  ;;  %5361 = vmatprep.subr.bf16.mxu1 %v2429_v12  ;;  %v2492_v61 = vunpack.c.l.s8.bf16 %v996_v9  ;;  %v2499_v12 = vunpack.c.h.s8.bf16 %v995_v14 }
 0x60c   : > { %4788 = vmatpush1.bf16.msra.mxu0 %v2426_v28  ;;  %5362 = vmatpush1.bf16.msra.mxu1 %v2428_v19  ;;  %v1005_v28 = vld [vmem:[%s10914_s21 + $0x1338] sm:$0xff]  ;;  %v2498_v19 = vunpack.c.h.s8.bf16 %v994_v8 }
 0x60d   : > { %4789 = vmatprep.subr.bf16.mxu0 %v2435_v21  ;;  %5363 = vmatprep.subr.bf16.mxu1 %v2437_v24  ;;  %v2500_v21 = vunpack.c.h.s8.bf16 %v996_v9  ;;  %v2507_v24 = vunpack.c.l.s8.bf16 %v1003_v16  ;;  %v2509_v23 = vunpack.c.l.s8.bf16 %v1005_v28  ;;  %v2517_v29 = vunpack.c.h.s8.bf16 %v1005_v28  ;;  %v1035_v9 = vld [vmem:[%s10914_s21 + $0x1428] sm:$0xff]  ;;  %v1034_v28 = vld [vmem:[%s10914_s21 + $0x1420] sm:$0xff] }
 0x610   : > { %4790 = vmatpush1.bf16.msra.mxu0 %v2434_v44  ;;  %5364 = vmatpush1.bf16.msra.mxu1 %v2436_v49  ;;  %v1004_v44 = vld [vmem:[%s10914_s21 + $0x1330] sm:$0xff]  ;;  %v2506_v49 = vunpack.c.l.s8.bf16 %v1002_v26 }
 0x611   : > { %4800 = vmatprep.subr.bf16.mxu0 %v2443_v25  ;;  %5374 = vmatprep.subr.bf16.mxu1 %v2445_v31  ;;  %v2508_v25 = vunpack.c.l.s8.bf16 %v1004_v44  ;;  %v2515_v31 = vunpack.c.h.s8.bf16 %v1003_v16 }
 0x613   : > { %4792 = vmatmul.mubr.bf16.vlgmr.msra.gmra.mrb[4].mxu0 %v11390_v20  ;;  %5366 = vmatmul.mubr.bf16.vlgmr.msra.gmra.mrb[4].mxu1 %v11390_v20  ;;  %v2460_v20 = vunpack.c.l.s8.bf16 %v980_v46  ;;  %v1019_v46 = vld [vmem:[%s10914_s21 + $0x13a8] sm:$0xff] }
 0x614   : > { %4801 = vmatpush1.bf16.msra.mxu0 %v2442_v43  ;;  %5375 = vmatpush1.bf16.msra.mxu1 %v2444_v32  ;;  %v1013_v43 = vld [vmem:[%s10914_s21 + $0x1378] sm:$0xff]  ;;  %v2514_v32 = vunpack.c.h.s8.bf16 %v1002_v26 }
 0x615   : > { %4802 = vmatprep.subr.bf16.mxu0 %v2451_v34  ;;  %5376 = vmatprep.subr.bf16.mxu1 %v2453_v4  ;;  %v2516_v34 = vunpack.c.h.s8.bf16 %v1004_v44  ;;  %v2523_v4 = vunpack.c.l.s8.bf16 %v1011_v30  ;;  %v2525_v39 = vunpack.c.l.s8.bf16 %v1013_v43  ;;  %v2533_v11 = vunpack.c.h.s8.bf16 %v1013_v43  ;;  %v1043_v44 = vld [vmem:[%s10914_s21 + $0x1468] sm:$0xff]  ;;  %v1042_v43 = vld [vmem:[%s10914_s21 + $0x1460] sm:$0xff] }
 0x616   : > { %4832 = vmatprep.mubr.bf16.mxu0 %v11396_v27  ;;  %5406 = vmatprep.mubr.bf16.mxu1 %v11396_v27  ;;  %v2475_v27 = vunpack.c.l.s8.bf16 %v987_v15 }
 0x618   : > { %4803 = vmatpush1.bf16.msra.mxu0 %v2450_v37  ;;  %5377 = vmatpush1.bf16.msra.mxu1 %v2452_v40  ;;  %v1012_v37 = vld [vmem:[%s10914_s21 + $0x1370] sm:$0xff]  ;;  %v2522_v40 = vunpack.c.l.s8.bf16 %v1010_v35 }
 0x619   : > { %4804 = vmatprep.subr.bf16.mxu0 %v2459_v41  ;;  %5378 = vmatprep.subr.bf16.mxu1 %v2461_v42  ;;  %v2524_v41 = vunpack.c.l.s8.bf16 %v1012_v37  ;;  %v2531_v42 = vunpack.c.h.s8.bf16 %v1011_v30 }
 0x61c   : > { %4805 = vmatpush1.bf16.msra.mxu0 %v2458_v52  ;;  %5379 = vmatpush1.bf16.msra.mxu1 %v2460_v20  ;;  %v1021_v52 = vld [vmem:[%s10914_s21 + $0x13b8] sm:$0xff]  ;;  %v2530_v20 = vunpack.c.h.s8.bf16 %v1010_v35  ;;  %v1051_v35 = vld [vmem:[%s10914_s21 + $0x14a8] sm:$0xff] }
 0x61d   : > { %4806 = vmatprep.subr.bf16.mxu0 %v2467_v62  ;;  %5380 = vmatprep.subr.bf16.mxu1 %v2469_v51  ;;  %v2532_v62 = vunpack.c.h.s8.bf16 %v1012_v37  ;;  %v2539_v51 = vunpack.c.l.s8.bf16 %v1019_v46  ;;  %v2541_v15 = vunpack.c.l.s8.bf16 %v1021_v52  ;;  %v2549_v59 = vunpack.c.h.s8.bf16 %v1021_v52  ;;  %v1053_v37 = vld [vmem:[%s10914_s21 + $0x14b8] sm:$0xff] }
 0x620   : > { %4807 = vmatpush1.bf16.msra.mxu0 %v2466_v56  ;;  %5381 = vmatpush1.bf16.msra.mxu1 %v2468_v57  ;;  %v1020_v56 = vld [vmem:[%s10914_s21 + $0x13b0] sm:$0xff]  ;;  %v2538_v57 = vunpack.c.l.s8.bf16 %v1018_v54 }
 0x621   : > { %4808 = vmatprep.subr.bf16.mxu0 %v2475_v27  ;;  %5382 = vmatprep.subr.bf16.mxu1 %v2477_v60  ;;  %v2540_v27 = vunpack.c.l.s8.bf16 %v1020_v56  ;;  %v2547_v60 = vunpack.c.h.s8.bf16 %v1019_v46  ;;  %v1052_v46 = vld [vmem:[%s10914_s21 + $0x14b0] sm:$0xff] }
 0x624   : > { %4809 = vmatpush1.bf16.msra.mxu0 %v2474_v50  ;;  %5383 = vmatpush1.bf16.msra.mxu1 %v2476_v6  ;;  %v1029_v50 = vld [vmem:[%s10914_s21 + $0x13f8] sm:$0xff]  ;;  %v2546_v6 = vunpack.c.h.s8.bf16 %v1018_v54 }
 0x625   : > { %4810 = vmatprep.subr.bf16.mxu0 %v2483_v53  ;;  %5384 = vmatprep.subr.bf16.mxu1 %v2485_v1  ;;  %v2548_v53 = vunpack.c.h.s8.bf16 %v1020_v56  ;;  %v2555_v1 = vunpack.c.l.s8.bf16 %v1027_v0  ;;  %v2557_v14 = vunpack.c.l.s8.bf16 %v1029_v50  ;;  %v2565_v8 = vunpack.c.h.s8.bf16 %v1029_v50  ;;  %v1061_v54 = vld [vmem:[%s10914_s21 + $0x14f8] sm:$0xff] }
 0x628   : > { %4811 = vmatpush1.bf16.msra.mxu0 %v2482_v2  ;;  %5385 = vmatpush1.bf16.msra.mxu1 %v2484_v5  ;;  %v1028_v2 = vld [vmem:[%s10914_s21 + $0x13f0] sm:$0xff]  ;;  %v2554_v5 = vunpack.c.l.s8.bf16 %v1026_v22 }
 0x629   : > { %4812 = vmatprep.subr.bf16.mxu0 %v2491_v7  ;;  %5386 = vmatprep.subr.bf16.mxu1 %v2493_v3  ;;  %v2556_v7 = vunpack.c.l.s8.bf16 %v1028_v2  ;;  %v2563_v3 = vunpack.c.h.s8.bf16 %v1027_v0  ;;  %v1060_v0 = vld [vmem:[%s10914_s21 + $0x14f0] sm:$0xff] }
 0x62c   : > { %4813 = vmatpush1.bf16.msra.mxu0 %v2490_v10  ;;  %5387 = vmatpush1.bf16.msra.mxu1 %v2492_v61  ;;  %v1037_v10 = vld [vmem:[%s10914_s21 + $0x1438] sm:$0xff]  ;;  %v2562_v61 = vunpack.c.h.s8.bf16 %v1026_v22 }
 0x62d   : > { %4814 = vmatprep.subr.bf16.mxu0 %v2499_v12  ;;  %5388 = vmatprep.subr.bf16.mxu1 %v2501_v13  ;;  %v2564_v12 = vunpack.c.h.s8.bf16 %v1028_v2  ;;  %v2571_v13 = vunpack.c.l.s8.bf16 %v1035_v9  ;;  %v2573_v16 = vunpack.c.l.s8.bf16 %v1037_v10  ;;  %v2581_v26 = vunpack.c.h.s8.bf16 %v1037_v10  ;;  %v1069_v22 = vld [vmem:[%s10914_s21 + $0x1538] sm:$0xff] }
 0x630   : > { %4815 = vmatpush1.bf16.msra.mxu0 %v2498_v19  ;;  %5389 = vmatpush1.bf16.msra.mxu1 %v2500_v21  ;;  %v1036_v19 = vld [vmem:[%s10914_s21 + $0x1430] sm:$0xff]  ;;  %v2570_v21 = vunpack.c.l.s8.bf16 %v1034_v28 }
 0x631   : > { %4816 = vmatprep.subr.bf16.mxu0 %v2507_v24  ;;  %5390 = vmatprep.subr.bf16.mxu1 %v2509_v23  ;;  %v2572_v24 = vunpack.c.l.s8.bf16 %v1036_v19  ;;  %v2579_v23 = vunpack.c.h.s8.bf16 %v1035_v9  ;;  %v1068_v9 = vld [vmem:[%s10914_s21 + $0x1530] sm:$0xff] }
 0x634   : > { %4817 = vmatpush1.bf16.msra.mxu0 %v2506_v49  ;;  %5391 = vmatpush1.bf16.msra.mxu1 %v2508_v25  ;;  %v1045_v49 = vld [vmem:[%s10914_s21 + $0x1478] sm:$0xff]  ;;  %v2578_v25 = vunpack.c.h.s8.bf16 %v1034_v28 }
 0x635   : > { %4818 = vmatprep.subr.bf16.mxu0 %v2515_v31  ;;  %5392 = vmatprep.subr.bf16.mxu1 %v2517_v29  ;;  %v2580_v31 = vunpack.c.h.s8.bf16 %v1036_v19  ;;  %v2587_v29 = vunpack.c.l.s8.bf16 %v1043_v44  ;;  %v2589_v30 = vunpack.c.l.s8.bf16 %v1045_v49  ;;  %v1077_v28 = vld [vmem:[%s10914_s21 + $0x1578] sm:$0xff] }
 0x638   : > { %4819 = vmatpush1.bf16.msra.mxu0 %v2514_v32  ;;  %5393 = vmatpush1.bf16.msra.mxu1 %v2516_v34  ;;  %v1044_v32 = vld [vmem:[%s10914_s21 + $0x1470] sm:$0xff]  ;;  %v2586_v34 = vunpack.c.l.s8.bf16 %v1042_v43 }
 0x639   : > { %4820 = vmatprep.subr.bf16.mxu0 %v2523_v4  ;;  %5394 = vmatprep.subr.bf16.mxu1 %v2525_v39  ;;  %v2595_v4 = vunpack.c.h.s8.bf16 %v1043_v44  ;;  %v2597_v39 = vunpack.c.h.s8.bf16 %v1045_v49  ;;  %v1076_v44 = vld [vmem:[%s10914_s21 + $0x1570] sm:$0xff] }
 0x63c   : > { %4821 = vmatpush1.bf16.msra.mxu0 %v2522_v40  ;;  %5395 = vmatpush1.bf16.msra.mxu1 %v2524_v41  ;;  %v2594_v40 = vunpack.c.h.s8.bf16 %v1042_v43  ;;  %v2596_v41 = vunpack.c.h.s8.bf16 %v1044_v32  ;;  %v1085_v43 = vld [vmem:[%s10914_s21 + $0x15b8] sm:$0xff] }
 0x63d   : > { %4822 = vmatprep.subr.bf16.mxu0 %v2531_v42  ;;  %5396 = vmatprep.subr.bf16.mxu1 %v2533_v11  ;;  %v2605_v42 = vunpack.c.l.s8.bf16 %v1053_v37  ;;  %v1050_v11 = vld [vmem:[%s10914_s21 + $0x14a0] sm:$0xff] }
 0x63e   : > { %v2602_v52 = vunpack.c.l.s8.bf16 %v1050_v11  ;;  %v2610_v56 = vunpack.c.h.s8.bf16 %v1050_v11  ;;  %v1093_v11 = vld [vmem:[%s10914_s21 + $0x15f8] sm:$0xff] }
 0x640   : > { %4823 = vmatpush1.bf16.msra.mxu0 %v2530_v20  ;;  %5397 = vmatpush1.bf16.msra.mxu1 %v2532_v62  ;;  %v2604_v20 = vunpack.c.l.s8.bf16 %v1052_v46  ;;  %v2611_v62 = vunpack.c.h.s8.bf16 %v1051_v35 }
 0x641   : > { %4824 = vmatprep.subr.bf16.mxu0 %v2539_v51  ;;  %5398 = vmatprep.subr.bf16.mxu1 %v2541_v15  ;;  %v2613_v51 = vunpack.c.h.s8.bf16 %v1053_v37  ;;  %v1059_v15 = vld [vmem:[%s10914_s21 + $0x14e8] sm:$0xff] }
 0x644   : > { %4825 = vmatpush1.bf16.msra.mxu0 %v2538_v57  ;;  %5399 = vmatpush1.bf16.msra.mxu1 %v2540_v27  ;;  %v2612_v57 = vunpack.c.h.s8.bf16 %v1052_v46  ;;  %v2619_v27 = vunpack.c.l.s8.bf16 %v1059_v15 }
 0x645   : > { %4826 = vmatprep.subr.bf16.mxu0 %v2547_v60  ;;  %5400 = vmatprep.subr.bf16.mxu1 %v2549_v59  ;;  %v2621_v60 = vunpack.c.l.s8.bf16 %v1061_v54  ;;  %v1058_v59 = vld [vmem:[%s10914_s21 + $0x14e0] sm:$0xff] }
 0x646   : > { %v2618_v50 = vunpack.c.l.s8.bf16 %v1058_v59  ;;  %v2626_v2 = vunpack.c.h.s8.bf16 %v1058_v59  ;;  %v1101_v59 = vld [vmem:[%s10914_s21 + $0x1638] sm:$0xff] }
 0x648   : > { %4827 = vmatpush1.bf16.msra.mxu0 %v2546_v6  ;;  %5401 = vmatpush1.bf16.msra.mxu1 %v2548_v53  ;;  %v2620_v6 = vunpack.c.l.s8.bf16 %v1060_v0  ;;  %v2627_v53 = vunpack.c.h.s8.bf16 %v1059_v15  ;;  %v1092_v15 = vld [vmem:[%s10914_s21 + $0x15f0] sm:$0xff] }
 0x649   : > { %4828 = vmatprep.subr.bf16.mxu0 %v2555_v1  ;;  %5402 = vmatprep.subr.bf16.mxu1 %v2557_v14  ;;  %v2629_v1 = vunpack.c.h.s8.bf16 %v1061_v54  ;;  %v1067_v14 = vld [vmem:[%s10914_s21 + $0x1528] sm:$0xff] }
 0x64c   : > { %4829 = vmatpush1.bf16.msra.mxu0 %v2554_v5  ;;  %5403 = vmatpush1.bf16.msra.mxu1 %v2556_v7  ;;  %v2628_v5 = vunpack.c.h.s8.bf16 %v1060_v0  ;;  %v2635_v7 = vunpack.c.l.s8.bf16 %v1067_v14 }
 0x64d   : > { %4830 = vmatprep.subr.bf16.mxu0 %v2563_v3  ;;  %5404 = vmatprep.subr.bf16.mxu1 %v2565_v8  ;;  %v2637_v3 = vunpack.c.l.s8.bf16 %v1069_v22  ;;  %v1066_v8 = vld [vmem:[%s10914_s21 + $0x1520] sm:$0xff] }
 0x64e   : > { %v2634_v10 = vunpack.c.l.s8.bf16 %v1066_v8  ;;  %v2642_v19 = vunpack.c.h.s8.bf16 %v1066_v8  ;;  %v1109_v8 = vld [vmem:[%s10914_s21 + $0x1678] sm:$0xff] }
 0x650   : > { %4831 = vmatpush1.bf16.msra.mxu0 %v2562_v61  ;;  %5405 = vmatpush1.bf16.msra.mxu1 %v2564_v12  ;;  %v2636_v61 = vunpack.c.l.s8.bf16 %v1068_v9  ;;  %v2643_v12 = vunpack.c.h.s8.bf16 %v1067_v14  ;;  %v1100_v14 = vld [vmem:[%s10914_s21 + $0x1630] sm:$0xff] }
 0x651   : > { %4841 = vmatprep.subr.bf16.mxu0 %v2571_v13  ;;  %5415 = vmatprep.subr.bf16.mxu1 %v2573_v16  ;;  %v2645_v13 = vunpack.c.h.s8.bf16 %v1069_v22  ;;  %v1075_v16 = vld [vmem:[%s10914_s21 + $0x1568] sm:$0xff] }
 0x653   : > { %4833 = vmatmul.mubr.bf16.vlgmr.msra.gmra.mrb[4].mxu0 %v11441_v36  ;;  %5407 = vmatmul.mubr.bf16.vlgmr.msra.gmra.mrb[4].mxu1 %v11441_v36  ;;  %v2588_v36 = vunpack.c.l.s8.bf16 %v1044_v32 }
 0x654   : > { %4842 = vmatpush1.bf16.msra.mxu0 %v2570_v21  ;;  %5416 = vmatpush1.bf16.msra.mxu1 %v2572_v24  ;;  %v2644_v21 = vunpack.c.h.s8.bf16 %v1068_v9  ;;  %v2651_v24 = vunpack.c.l.s8.bf16 %v1075_v16 }
 0x655   : > { %4843 = vmatprep.subr.bf16.mxu0 %v2579_v23  ;;  %5417 = vmatprep.subr.bf16.mxu1 %v2581_v26  ;;  %v2653_v23 = vunpack.c.l.s8.bf16 %v1077_v28  ;;  %v1074_v26 = vld [vmem:[%s10914_s21 + $0x1560] sm:$0xff] }
 0x656   : > { %4873 = vmatprep.mubr.bf16.mxu0 %v11446_v48  ;;  %5447 = vmatprep.mubr.bf16.mxu1 %v11446_v48  ;;  %v2603_v48 = vunpack.c.l.s8.bf16 %v1051_v35  ;;  %v2650_v49 = vunpack.c.l.s8.bf16 %v1074_v26  ;;  %v2658_v32 = vunpack.c.h.s8.bf16 %v1074_v26  ;;  %v1084_v35 = vld [vmem:[%s10914_s21 + $0x15b0] sm:$0xff] }
 0x658   : > { %4844 = vmatpush1.bf16.msra.mxu0 %v2578_v25  ;;  %5418 = vmatpush1.bf16.msra.mxu1 %v2580_v31  ;;  %v2652_v25 = vunpack.c.l.s8.bf16 %v1076_v44  ;;  %v2659_v31 = vunpack.c.h.s8.bf16 %v1075_v16  ;;  %v1108_v16 = vld [vmem:[%s10914_s21 + $0x1670] sm:$0xff] }
 0x659   : > { %4845 = vmatprep.subr.bf16.mxu0 %v2587_v29  ;;  %5419 = vmatprep.subr.bf16.mxu1 %v2589_v30  ;;  %v2661_v29 = vunpack.c.h.s8.bf16 %v1077_v28  ;;  %v1083_v30 = vld [vmem:[%s10914_s21 + $0x15a8] sm:$0xff] }
 0x65c   : > { %4846 = vmatpush1.bf16.msra.mxu0 %v2586_v34  ;;  %5420 = vmatpush1.bf16.msra.mxu1 %v2588_v36  ;;  %v2660_v34 = vunpack.c.h.s8.bf16 %v1076_v44  ;;  %v2667_v36 = vunpack.c.l.s8.bf16 %v1083_v30  ;;  %v2724_v44 = vunpack.c.h.s8.bf16 %v1108_v16 }
 0x65d   : > { %4847 = vmatprep.subr.bf16.mxu0 %v2595_v4  ;;  %5421 = vmatprep.subr.bf16.mxu1 %v2597_v39  ;;  %v2669_v4 = vunpack.c.l.s8.bf16 %v1085_v43  ;;  %v1082_v39 = vld [vmem:[%s10914_s21 + $0x15a0] sm:$0xff] }
 0x65e   : > { %v2666_v37 = vunpack.c.l.s8.bf16 %v1082_v39  ;;  %v2674_v46 = vunpack.c.h.s8.bf16 %v1082_v39 }
 0x660   : > { %4848 = vmatpush1.bf16.msra.mxu0 %v2594_v40  ;;  %5422 = vmatpush1.bf16.msra.mxu1 %v2596_v41  ;;  %v2668_v40 = vunpack.c.l.s8.bf16 %v1084_v35  ;;  %v2675_v41 = vunpack.c.h.s8.bf16 %v1083_v30 }
 0x661   : > { %4849 = vmatprep.subr.bf16.mxu0 %v2603_v48  ;;  %5423 = vmatprep.subr.bf16.mxu1 %v2605_v42  ;;  %v2677_v48 = vunpack.c.h.s8.bf16 %v1085_v43  ;;  %v1091_v42 = vld [vmem:[%s10914_s21 + $0x15e8] sm:$0xff] }
 0x664   : > { %4850 = vmatpush1.bf16.msra.mxu0 %v2602_v52  ;;  %5424 = vmatpush1.bf16.msra.mxu1 %v2604_v20  ;;  %v2676_v52 = vunpack.c.h.s8.bf16 %v1084_v35  ;;  %v2683_v20 = vunpack.c.l.s8.bf16 %v1091_v42 }
 0x665   : > { %4851 = vmatprep.subr.bf16.mxu0 %v2611_v62  ;;  %5425 = vmatprep.subr.bf16.mxu1 %v2613_v51  ;;  %v2685_v62 = vunpack.c.l.s8.bf16 %v1093_v11  ;;  %v1090_v51 = vld [vmem:[%s10914_s21 + $0x15e0] sm:$0xff] }
 0x666   : > { %v2682_v54 = vunpack.c.l.s8.bf16 %v1090_v51  ;;  %v2690_v0 = vunpack.c.h.s8.bf16 %v1090_v51 }
 0x668   : > { %4852 = vmatpush1.bf16.msra.mxu0 %v2610_v56  ;;  %5426 = vmatpush1.bf16.msra.mxu1 %v2612_v57  ;;  %v2684_v56 = vunpack.c.l.s8.bf16 %v1092_v15  ;;  %v2691_v57 = vunpack.c.h.s8.bf16 %v1091_v42 }
 0x669   : > { %4853 = vmatprep.subr.bf16.mxu0 %v2619_v27  ;;  %5427 = vmatprep.subr.bf16.mxu1 %v2621_v60  ;;  %v2693_v27 = vunpack.c.h.s8.bf16 %v1093_v11  ;;  %v1099_v60 = vld [vmem:[%s10914_s21 + $0x1628] sm:$0xff] }
 0x66c   : > { %4854 = vmatpush1.bf16.msra.mxu0 %v2618_v50  ;;  %5428 = vmatpush1.bf16.msra.mxu1 %v2620_v6  ;;  %v2692_v50 = vunpack.c.h.s8.bf16 %v1092_v15  ;;  %v2699_v6 = vunpack.c.l.s8.bf16 %v1099_v60 }
 0x66d   : > { %4855 = vmatprep.subr.bf16.mxu0 %v2627_v53  ;;  %5429 = vmatprep.subr.bf16.mxu1 %v2629_v1  ;;  %v2701_v53 = vunpack.c.l.s8.bf16 %v1101_v59  ;;  %v1098_v1 = vld [vmem:[%s10914_s21 + $0x1620] sm:$0xff] }
 0x66e   : > { %v2698_v22 = vunpack.c.l.s8.bf16 %v1098_v1  ;;  %v2706_v9 = vunpack.c.h.s8.bf16 %v1098_v1 }
 0x670   : > { %4856 = vmatpush1.bf16.msra.mxu0 %v2626_v2  ;;  %5430 = vmatpush1.bf16.msra.mxu1 %v2628_v5  ;;  %v2700_v2 = vunpack.c.l.s8.bf16 %v1100_v14  ;;  %v2707_v5 = vunpack.c.h.s8.bf16 %v1099_v60 }
 0x671   : > { %4857 = vmatprep.subr.bf16.mxu0 %v2635_v7  ;;  %5431 = vmatprep.subr.bf16.mxu1 %v2637_v3  ;;  %v2709_v7 = vunpack.c.h.s8.bf16 %v1101_v59  ;;  %v1107_v3 = vld [vmem:[%s10914_s21 + $0x1668] sm:$0xff] }
 0x674   : > { %4858 = vmatpush1.bf16.msra.mxu0 %v2634_v10  ;;  %5432 = vmatpush1.bf16.msra.mxu1 %v2636_v61  ;;  %v2708_v10 = vunpack.c.h.s8.bf16 %v1100_v14  ;;  %v2715_v61 = vunpack.c.l.s8.bf16 %v1107_v3 }
 0x675   : > { %4859 = vmatprep.subr.bf16.mxu0 %v2643_v12  ;;  %5433 = vmatprep.subr.bf16.mxu1 %v2645_v13  ;;  %v2717_v12 = vunpack.c.l.s8.bf16 %v1109_v8  ;;  %v1106_v13 = vld [vmem:[%s10914_s21 + $0x1660] sm:$0xff] }
 0x676   : > { %v2714_v28 = vunpack.c.l.s8.bf16 %v1106_v13  ;;  %v2722_v26 = vunpack.c.h.s8.bf16 %v1106_v13 }
 0x678   : > { %4860 = vmatpush1.bf16.msra.mxu0 %v2642_v19  ;;  %5434 = vmatpush1.bf16.msra.mxu1 %v2644_v21  ;;  %v2723_v19 = vunpack.c.h.s8.bf16 %v1107_v3  ;;  %v2725_v21 = vunpack.c.h.s8.bf16 %v1109_v8 }
 0x679   : > { %4861 = vmatprep.subr.bf16.mxu0 %v2651_v24  ;;  %5435 = vmatprep.subr.bf16.mxu1 %v2653_v23  ;;  %v1115_v24 = vld [vmem:[%s10914_s21 + $0x16a8] sm:$0xff]  ;;  %v1117_v23 = vld [vmem:[%s10914_s21 + $0x16b8] sm:$0xff] }
 0x67a   : > { %v2739_v43 = vunpack.c.h.s8.bf16 %v1115_v24 }
 0x67c   : > { %4862 = vmatpush1.bf16.msra.mxu0 %v2650_v49  ;;  %5436 = vmatpush1.bf16.msra.mxu1 %v2652_v25  ;;  %v2733_v49 = vunpack.c.l.s8.bf16 %v1117_v23  ;;  %v1114_v25 = vld [vmem:[%s10914_s21 + $0x16a0] sm:$0xff] }
 0x67d   : > { %4863 = vmatprep.subr.bf16.mxu0 %v2659_v31  ;;  %5437 = vmatprep.subr.bf16.mxu1 %v2661_v29  ;;  %v1116_v31 = vld [vmem:[%s10914_s21 + $0x16b0] sm:$0xff]  ;;  %v2730_v29 = vunpack.c.l.s8.bf16 %v1114_v25 }
 0x67e   : > { %v2732_v30 = vunpack.c.l.s8.bf16 %v1116_v31  ;;  %v2740_v39 = vunpack.c.h.s8.bf16 %v1116_v31 }
 0x680   : > { %4864 = vmatpush1.bf16.msra.mxu0 %v2658_v32  ;;  %5438 = vmatpush1.bf16.msra.mxu1 %v2660_v34  ;;  %v2741_v32 = vunpack.c.h.s8.bf16 %v1117_v23  ;;  %v1123_v34 = vld [vmem:[%s10914_s21 + $0x16e8] sm:$0xff] }
 0x681   : > { %4865 = vmatprep.subr.bf16.mxu0 %v2667_v36  ;;  %5439 = vmatprep.subr.bf16.mxu1 %v2669_v4  ;;  %v1125_v36 = vld [vmem:[%s10914_s21 + $0x16f8] sm:$0xff]  ;;  %v2738_v4 = vunpack.c.h.s8.bf16 %v1114_v25  ;;  %v2747_v35 = vunpack.c.l.s8.bf16 %v1123_v34  ;;  %v2755_v11 = vunpack.c.h.s8.bf16 %v1123_v34 }
 0x684   : > { %4866 = vmatpush1.bf16.msra.mxu0 %v2666_v37  ;;  %5440 = vmatpush1.bf16.msra.mxu1 %v2668_v40  ;;  %v2749_v37 = vunpack.c.l.s8.bf16 %v1125_v36  ;;  %v1122_v40 = vld [vmem:[%s10914_s21 + $0x16e0] sm:$0xff] }
 0x685   : > { %4867 = vmatprep.subr.bf16.mxu0 %v2675_v41  ;;  %5441 = vmatprep.subr.bf16.mxu1 %v2677_v48  ;;  %v1124_v41 = vld [vmem:[%s10914_s21 + $0x16f0] sm:$0xff]  ;;  %v2746_v48 = vunpack.c.l.s8.bf16 %v1122_v40 }
 0x686   : > { %v2748_v42 = vunpack.c.l.s8.bf16 %v1124_v41  ;;  %v2756_v51 = vunpack.c.h.s8.bf16 %v1124_v41 }
 0x688   : > { %4868 = vmatpush1.bf16.msra.mxu0 %v2674_v46  ;;  %5442 = vmatpush1.bf16.msra.mxu1 %v2676_v52  ;;  %v2757_v46 = vunpack.c.h.s8.bf16 %v1125_v36  ;;  %v1131_v52 = vld [vmem:[%s10914_s21 + $0x1728] sm:$0xff] }
 0x689   : > { %4869 = vmatprep.subr.bf16.mxu0 %v2683_v20  ;;  %5443 = vmatprep.subr.bf16.mxu1 %v2685_v62  ;;  %v1133_v20 = vld [vmem:[%s10914_s21 + $0x1738] sm:$0xff]  ;;  %v2754_v62 = vunpack.c.h.s8.bf16 %v1122_v40  ;;  %v2763_v15 = vunpack.c.l.s8.bf16 %v1131_v52  ;;  %v2771_v59 = vunpack.c.h.s8.bf16 %v1131_v52 }
 0x68c   : > { %4870 = vmatpush1.bf16.msra.mxu0 %v2682_v54  ;;  %5444 = vmatpush1.bf16.msra.mxu1 %v2684_v56  ;;  %v2765_v54 = vunpack.c.l.s8.bf16 %v1133_v20  ;;  %v1130_v56 = vld [vmem:[%s10914_s21 + $0x1720] sm:$0xff] }
 0x68d   : > { %4871 = vmatprep.subr.bf16.mxu0 %v2691_v57  ;;  %5445 = vmatprep.subr.bf16.mxu1 %v2693_v27  ;;  %v1132_v57 = vld [vmem:[%s10914_s21 + $0x1730] sm:$0xff]  ;;  %v2762_v27 = vunpack.c.l.s8.bf16 %v1130_v56 }
 0x68e   : > { %v2764_v60 = vunpack.c.l.s8.bf16 %v1132_v57  ;;  %v2772_v1 = vunpack.c.h.s8.bf16 %v1132_v57 }
 0x690   : > { %4872 = vmatpush1.bf16.msra.mxu0 %v2690_v0  ;;  %5446 = vmatpush1.bf16.msra.mxu1 %v2692_v50  ;;  %v2773_v0 = vunpack.c.h.s8.bf16 %v1133_v20  ;;  %v1139_v50 = vld [vmem:[%s10914_s21 + $0x1768] sm:$0xff] }
 0x691   : > { %4882 = vmatprep.subr.bf16.mxu0 %v2699_v6  ;;  %5456 = vmatprep.subr.bf16.mxu1 %v2701_v53  ;;  %v1141_v6 = vld [vmem:[%s10914_s21 + $0x1778] sm:$0xff]  ;;  %v2770_v53 = vunpack.c.h.s8.bf16 %v1130_v56  ;;  %v2779_v14 = vunpack.c.l.s8.bf16 %v1139_v50  ;;  %v2787_v8 = vunpack.c.h.s8.bf16 %v1139_v50 }
 0x693   : > { %4874 = vmatmul.mubr.bf16.vlgmr.msra.gmra.mrb[4].mxu0 %v11484_v47  ;;  %5448 = vmatmul.mubr.bf16.vlgmr.msra.gmra.mrb[4].mxu1 %v11484_v47  ;;  %v2716_v47 = vunpack.c.l.s8.bf16 %v1108_v16 }
 0x694   : > { %4883 = vmatpush1.bf16.msra.mxu0 %v2698_v22  ;;  %5457 = vmatpush1.bf16.msra.mxu1 %v2700_v2  ;;  %v2781_v22 = vunpack.c.l.s8.bf16 %v1141_v6  ;;  %v1138_v2 = vld [vmem:[%s10914_s21 + $0x1760] sm:$0xff] }
 0x695   : > { %4884 = vmatprep.subr.bf16.mxu0 %v2707_v5  ;;  %5458 = vmatprep.subr.bf16.mxu1 %v2709_v7  ;;  %v1140_v5 = vld [vmem:[%s10914_s21 + $0x1770] sm:$0xff]  ;;  %v2778_v7 = vunpack.c.l.s8.bf16 %v1138_v2 }
 0x696   : > { %4914 = vmatprep.mubr.bf16.mxu0 %v11490_v17  ;;  %5488 = vmatprep.mubr.bf16.mxu1 %v11490_v17  ;;  %v2731_v17 = vunpack.c.l.s8.bf16 %v1115_v24  ;;  %v2780_v3 = vunpack.c.l.s8.bf16 %v1140_v5  ;;  %v2788_v13 = vunpack.c.h.s8.bf16 %v1140_v5  ;;  %v1178_v5 = vld [vmem:[%s10914_s21 + $0x18a0] sm:$0xff] }
 0x698   : > { %4885 = vmatpush1.bf16.msra.mxu0 %v2706_v9  ;;  %5459 = vmatpush1.bf16.msra.mxu1 %v2708_v10  ;;  %v2789_v9 = vunpack.c.h.s8.bf16 %v1141_v6  ;;  %v1147_v10 = vld [vmem:[%s10914_s21 + $0x17a8] sm:$0xff] }
 0x699   : > { %4886 = vmatprep.subr.bf16.mxu0 %v2715_v61  ;;  %5460 = vmatprep.subr.bf16.mxu1 %v2717_v12  ;;  %v1149_v61 = vld [vmem:[%s10914_s21 + $0x17b8] sm:$0xff]  ;;  %v2786_v12 = vunpack.c.h.s8.bf16 %v1138_v2  ;;  %v2795_v16 = vunpack.c.l.s8.bf16 %v1147_v10  ;;  %v2803_v23 = vunpack.c.h.s8.bf16 %v1147_v10 }
 0x69c   : > { %4887 = vmatpush1.bf16.msra.mxu0 %v2714_v28  ;;  %5461 = vmatpush1.bf16.msra.mxu1 %v2716_v47  ;;  %v2797_v28 = vunpack.c.l.s8.bf16 %v1149_v61  ;;  %v1146_v47 = vld [vmem:[%s10914_s21 + $0x17a0] sm:$0xff] }
 0x69d   : > { %4888 = vmatprep.subr.bf16.mxu0 %v2723_v19  ;;  %5462 = vmatprep.subr.bf16.mxu1 %v2725_v21  ;;  %v1148_v19 = vld [vmem:[%s10914_s21 + $0x17b0] sm:$0xff]  ;;  %v2794_v21 = vunpack.c.l.s8.bf16 %v1146_v47 }
 0x69e   : > { %v2796_v24 = vunpack.c.l.s8.bf16 %v1148_v19  ;;  %v2804_v25 = vunpack.c.h.s8.bf16 %v1148_v19  ;;  %v1186_v19 = vld [vmem:[%s10914_s21 + $0x18e0] sm:$0xff] }
 0x6a0   : > { %4889 = vmatpush1.bf16.msra.mxu0 %v2722_v26  ;;  %5463 = vmatpush1.bf16.msra.mxu1 %v2724_v44  ;;  %v2805_v26 = vunpack.c.h.s8.bf16 %v1149_v61  ;;  %v1155_v44 = vld [vmem:[%s10914_s21 + $0x17e8] sm:$0xff] }
 0x6a1   : > { %4890 = vmatprep.subr.bf16.mxu0 %v2731_v17  ;;  %5464 = vmatprep.subr.bf16.mxu1 %v2733_v49  ;;  %v1157_v17 = vld [vmem:[%s10914_s21 + $0x17f8] sm:$0xff]  ;;  %v2802_v49 = vunpack.c.h.s8.bf16 %v1146_v47  ;;  %v2811_v31 = vunpack.c.l.s8.bf16 %v1155_v44  ;;  %v2819_v36 = vunpack.c.h.s8.bf16 %v1155_v44  ;;  %v1187_v61 = vld [vmem:[%s10914_s21 + $0x18e8] sm:$0xff] }
 0x6a4   : > { %4891 = vmatpush1.bf16.msra.mxu0 %v2730_v29  ;;  %5465 = vmatpush1.bf16.msra.mxu1 %v2732_v30  ;;  %v2813_v29 = vunpack.c.l.s8.bf16 %v1157_v17  ;;  %v1154_v30 = vld [vmem:[%s10914_s21 + $0x17e0] sm:$0xff] }
 0x6a5   : > { %4892 = vmatprep.subr.bf16.mxu0 %v2739_v43  ;;  %5466 = vmatprep.subr.bf16.mxu1 %v2741_v32  ;;  %v1156_v43 = vld [vmem:[%s10914_s21 + $0x17f0] sm:$0xff]  ;;  %v2810_v32 = vunpack.c.l.s8.bf16 %v1154_v30 }
 0x6a6   : > { %v2812_v34 = vunpack.c.l.s8.bf16 %v1156_v43  ;;  %v2820_v40 = vunpack.c.h.s8.bf16 %v1156_v43  ;;  %v1194_v43 = vld [vmem:[%s10914_s21 + $0x1920] sm:$0xff] }
 0x6a8   : > { %4893 = vmatpush1.bf16.msra.mxu0 %v2738_v4  ;;  %5467 = vmatpush1.bf16.msra.mxu1 %v2740_v39  ;;  %v2821_v4 = vunpack.c.h.s8.bf16 %v1157_v17  ;;  %v1163_v39 = vld [vmem:[%s10914_s21 + $0x1828] sm:$0xff] }
 0x6a9   : > { %4894 = vmatprep.subr.bf16.mxu0 %v2747_v35  ;;  %5468 = vmatprep.subr.bf16.mxu1 %v2749_v37  ;;  %v1165_v35 = vld [vmem:[%s10914_s21 + $0x1838] sm:$0xff]  ;;  %v2818_v37 = vunpack.c.h.s8.bf16 %v1154_v30  ;;  %v2827_v41 = vunpack.c.l.s8.bf16 %v1163_v39  ;;  %v2835_v20 = vunpack.c.h.s8.bf16 %v1163_v39  ;;  %v1195_v17 = vld [vmem:[%s10914_s21 + $0x1928] sm:$0xff] }
 0x6ac   : > { %4895 = vmatpush1.bf16.msra.mxu0 %v2746_v48  ;;  %5469 = vmatpush1.bf16.msra.mxu1 %v2748_v42  ;;  %v2829_v48 = vunpack.c.l.s8.bf16 %v1165_v35  ;;  %v1162_v42 = vld [vmem:[%s10914_s21 + $0x1820] sm:$0xff] }
 0x6ad   : > { %4896 = vmatprep.subr.bf16.mxu0 %v2755_v11  ;;  %5470 = vmatprep.subr.bf16.mxu1 %v2757_v46  ;;  %v1164_v11 = vld [vmem:[%s10914_s21 + $0x1830] sm:$0xff]  ;;  %v2826_v46 = vunpack.c.l.s8.bf16 %v1162_v42 }
 0x6ae   : > { %v2828_v52 = vunpack.c.l.s8.bf16 %v1164_v11  ;;  %v2836_v56 = vunpack.c.h.s8.bf16 %v1164_v11  ;;  %v1202_v11 = vld [vmem:[%s10914_s21 + $0x1960] sm:$0xff] }
 0x6b0   : > { %4897 = vmatpush1.bf16.msra.mxu0 %v2754_v62  ;;  %5471 = vmatpush1.bf16.msra.mxu1 %v2756_v51  ;;  %v2837_v62 = vunpack.c.h.s8.bf16 %v1165_v35  ;;  %v1171_v51 = vld [vmem:[%s10914_s21 + $0x1868] sm:$0xff] }
 0x6b1   : > { %4898 = vmatprep.subr.bf16.mxu0 %v2763_v15  ;;  %5472 = vmatprep.subr.bf16.mxu1 %v2765_v54  ;;  %v1173_v15 = vld [vmem:[%s10914_s21 + $0x1878] sm:$0xff]  ;;  %v2834_v54 = vunpack.c.h.s8.bf16 %v1162_v42  ;;  %v2843_v57 = vunpack.c.l.s8.bf16 %v1171_v51  ;;  %v2851_v50 = vunpack.c.h.s8.bf16 %v1171_v51  ;;  %v1203_v35 = vld [vmem:[%s10914_s21 + $0x1968] sm:$0xff] }
 0x6b2   : > { %v2853_v6 = vunpack.c.h.s8.bf16 %v1173_v15 }
 0x6b4   : > { %4899 = vmatpush1.bf16.msra.mxu0 %v2762_v27  ;;  %5473 = vmatpush1.bf16.msra.mxu1 %v2764_v60  ;;  %v2845_v27 = vunpack.c.l.s8.bf16 %v1173_v15  ;;  %v1170_v60 = vld [vmem:[%s10914_s21 + $0x1860] sm:$0xff]  ;;  %v1211_v15 = vld [vmem:[%s10914_s21 + $0x19a8] sm:$0xff] }
 0x6b5   : > { %4900 = vmatprep.subr.bf16.mxu0 %v2771_v59  ;;  %5474 = vmatprep.subr.bf16.mxu1 %v2773_v0  ;;  %v1172_v59 = vld [vmem:[%s10914_s21 + $0x1870] sm:$0xff]  ;;  %v2842_v0 = vunpack.c.l.s8.bf16 %v1170_v60 }
 0x6b8   : > { %4901 = vmatpush1.bf16.msra.mxu0 %v2770_v53  ;;  %5475 = vmatpush1.bf16.msra.mxu1 %v2772_v1  ;;  %v1179_v53 = vld [vmem:[%s10914_s21 + $0x18a8] sm:$0xff]  ;;  %v1181_v1 = vld [vmem:[%s10914_s21 + $0x18b8] sm:$0xff] }
 0x6b9   : > { %4902 = vmatprep.subr.bf16.mxu0 %v2779_v14  ;;  %5476 = vmatprep.subr.bf16.mxu1 %v2781_v22  ;;  %v2850_v14 = vunpack.c.h.s8.bf16 %v1170_v60  ;;  %v2852_v22 = vunpack.c.h.s8.bf16 %v1172_v59  ;;  %v2861_v2 = vunpack.c.l.s8.bf16 %v1181_v1  ;;  %v2869_v10 = vunpack.c.h.s8.bf16 %v1181_v1  ;;  %v1219_v1 = vld [vmem:[%s10914_s21 + $0x19e8] sm:$0xff] }
 0x6bc   : > { %4903 = vmatpush1.bf16.msra.mxu0 %v2778_v7  ;;  %5477 = vmatpush1.bf16.msra.mxu1 %v2780_v3  ;;  %v1180_v7 = vld [vmem:[%s10914_s21 + $0x18b0] sm:$0xff]  ;;  %v2858_v3 = vunpack.c.l.s8.bf16 %v1178_v5 }
 0x6bd   : > { %4904 = vmatprep.subr.bf16.mxu0 %v2787_v8  ;;  %5478 = vmatprep.subr.bf16.mxu1 %v2789_v9  ;;  %v2860_v8 = vunpack.c.l.s8.bf16 %v1180_v7  ;;  %v2867_v9 = vunpack.c.h.s8.bf16 %v1179_v53 }
 0x6c0   : > { %4905 = vmatpush1.bf16.msra.mxu0 %v2786_v12  ;;  %5479 = vmatpush1.bf16.msra.mxu1 %v2788_v13  ;;  %v1189_v12 = vld [vmem:[%s10914_s21 + $0x18f8] sm:$0xff]  ;;  %v2866_v13 = vunpack.c.h.s8.bf16 %v1178_v5 }
 0x6c1   : > { %4906 = vmatprep.subr.bf16.mxu0 %v2795_v16  ;;  %5480 = vmatprep.subr.bf16.mxu1 %v2797_v28  ;;  %v2868_v16 = vunpack.c.h.s8.bf16 %v1180_v7  ;;  %v2875_v28 = vunpack.c.l.s8.bf16 %v1187_v61  ;;  %v2877_v47 = vunpack.c.l.s8.bf16 %v1189_v12  ;;  %v2885_v44 = vunpack.c.h.s8.bf16 %v1189_v12  ;;  %v1218_v7 = vld [vmem:[%s10914_s21 + $0x19e0] sm:$0xff]  ;;  %v1227_v12 = vld [vmem:[%s10914_s21 + $0x1a28] sm:$0xff] }
 0x6c4   : > { %4907 = vmatpush1.bf16.msra.mxu0 %v2794_v21  ;;  %5481 = vmatpush1.bf16.msra.mxu1 %v2796_v24  ;;  %v1188_v21 = vld [vmem:[%s10914_s21 + $0x18f0] sm:$0xff]  ;;  %v2874_v24 = vunpack.c.l.s8.bf16 %v1186_v19 }
 0x6c5   : > { %4908 = vmatprep.subr.bf16.mxu0 %v2803_v23  ;;  %5482 = vmatprep.subr.bf16.mxu1 %v2805_v26  ;;  %v2876_v23 = vunpack.c.l.s8.bf16 %v1188_v21  ;;  %v2883_v26 = vunpack.c.h.s8.bf16 %v1187_v61 }
 0x6c8   : > { %4909 = vmatpush1.bf16.msra.mxu0 %v2802_v49  ;;  %5483 = vmatpush1.bf16.msra.mxu1 %v2804_v25  ;;  %v1197_v49 = vld [vmem:[%s10914_s21 + $0x1938] sm:$0xff]  ;;  %v2882_v25 = vunpack.c.h.s8.bf16 %v1186_v19 }
 0x6c9   : > { %4910 = vmatprep.subr.bf16.mxu0 %v2811_v31  ;;  %5484 = vmatprep.subr.bf16.mxu1 %v2813_v29  ;;  %v2884_v31 = vunpack.c.h.s8.bf16 %v1188_v21  ;;  %v2891_v29 = vunpack.c.l.s8.bf16 %v1195_v17  ;;  %v2893_v30 = vunpack.c.l.s8.bf16 %v1197_v49  ;;  %v2901_v39 = vunpack.c.h.s8.bf16 %v1197_v49  ;;  %v1226_v21 = vld [vmem:[%s10914_s21 + $0x1a20] sm:$0xff]  ;;  %v1235_v49 = vld [vmem:[%s10914_s21 + $0x1a68] sm:$0xff] }
 0x6cc   : > { %4911 = vmatpush1.bf16.msra.mxu0 %v2810_v32  ;;  %5485 = vmatpush1.bf16.msra.mxu1 %v2812_v34  ;;  %v1196_v32 = vld [vmem:[%s10914_s21 + $0x1930] sm:$0xff]  ;;  %v2890_v34 = vunpack.c.l.s8.bf16 %v1194_v43 }
 0x6cd   : > { %4912 = vmatprep.subr.bf16.mxu0 %v2819_v36  ;;  %5486 = vmatprep.subr.bf16.mxu1 %v2821_v4  ;;  %v2892_v36 = vunpack.c.l.s8.bf16 %v1196_v32  ;;  %v2899_v4 = vunpack.c.h.s8.bf16 %v1195_v17 }
 0x6d0   : > { %4913 = vmatpush1.bf16.msra.mxu0 %v2818_v37  ;;  %5487 = vmatpush1.bf16.msra.mxu1 %v2820_v40  ;;  %v1205_v37 = vld [vmem:[%s10914_s21 + $0x1978] sm:$0xff]  ;;  %v2898_v40 = vunpack.c.h.s8.bf16 %v1194_v43 }
 0x6d1   : > { %4923 = vmatprep.subr.bf16.mxu0 %v2827_v41  ;;  %5497 = vmatprep.subr.bf16.mxu1 %v2829_v48  ;;  %v2900_v41 = vunpack.c.h.s8.bf16 %v1196_v32  ;;  %v2907_v48 = vunpack.c.l.s8.bf16 %v1203_v35  ;;  %v2909_v42 = vunpack.c.l.s8.bf16 %v1205_v37  ;;  %v2917_v51 = vunpack.c.h.s8.bf16 %v1205_v37  ;;  %v1234_v32 = vld [vmem:[%s10914_s21 + $0x1a60] sm:$0xff]  ;;  %v1245_v37 = vld [vmem:[%s10914_s21 + $0x1ab8] sm:$0xff] }
 0x6d3   : > { %4915 = vmatmul.mubr.bf16.vlgmr.msra.gmra.mrb[4].mxu0 %v11533_v33  ;;  %5489 = vmatmul.mubr.bf16.vlgmr.msra.gmra.mrb[4].mxu1 %v11533_v33  ;;  %v2844_v33 = vunpack.c.l.s8.bf16 %v1172_v59  ;;  %v1210_v59 = vld [vmem:[%s10914_s21 + $0x19a0] sm:$0xff] }
 0x6d4   : > { %4924 = vmatpush1.bf16.msra.mxu0 %v2826_v46  ;;  %5498 = vmatpush1.bf16.msra.mxu1 %v2828_v52  ;;  %v1204_v46 = vld [vmem:[%s10914_s21 + $0x1970] sm:$0xff]  ;;  %v2906_v52 = vunpack.c.l.s8.bf16 %v1202_v11 }
 0x6d5   : > { %4925 = vmatprep.subr.bf16.mxu0 %v2835_v20  ;;  %5499 = vmatprep.subr.bf16.mxu1 %v2837_v62  ;;  %v2908_v20 = vunpack.c.l.s8.bf16 %v1204_v46  ;;  %v2915_v62 = vunpack.c.h.s8.bf16 %v1203_v35  ;;  %v1243_v35 = vld [vmem:[%s10914_s21 + $0x1aa8] sm:$0xff] }
 0x6d6   : > { %4955 = vmatprep.mubr.bf16.mxu0 %v11538_v45  ;;  %5529 = vmatprep.mubr.bf16.mxu1 %v11538_v45  ;;  %v2859_v45 = vunpack.c.l.s8.bf16 %v1179_v53 }
 0x6d8   : > { %4926 = vmatpush1.bf16.msra.mxu0 %v2834_v54  ;;  %5500 = vmatpush1.bf16.msra.mxu1 %v2836_v56  ;;  %v1213_v54 = vld [vmem:[%s10914_s21 + $0x19b8] sm:$0xff]  ;;  %v2914_v56 = vunpack.c.h.s8.bf16 %v1202_v11  ;;  %v1244_v11 = vld [vmem:[%s10914_s21 + $0x1ab0] sm:$0xff] }
 0x6d9   : > { %4927 = vmatprep.subr.bf16.mxu0 %v2843_v57  ;;  %5501 = vmatprep.subr.bf16.mxu1 %v2845_v27  ;;  %v2916_v57 = vunpack.c.h.s8.bf16 %v1204_v46  ;;  %v2923_v27 = vunpack.c.l.s8.bf16 %v1211_v15  ;;  %v2925_v60 = vunpack.c.l.s8.bf16 %v1213_v54  ;;  %v2933_v53 = vunpack.c.h.s8.bf16 %v1213_v54 }
 0x6dc   : > { %4928 = vmatpush1.bf16.msra.mxu0 %v2842_v0  ;;  %5502 = vmatpush1.bf16.msra.mxu1 %v2844_v33  ;;  %v1212_v0 = vld [vmem:[%s10914_s21 + $0x19b0] sm:$0xff]  ;;  %v2922_v33 = vunpack.c.l.s8.bf16 %v1210_v59 }
 0x6dd   : > { %4929 = vmatprep.subr.bf16.mxu0 %v2851_v50  ;;  %5503 = vmatprep.subr.bf16.mxu1 %v2853_v6  ;;  %v2924_v50 = vunpack.c.l.s8.bf16 %v1212_v0  ;;  %v2931_v6 = vunpack.c.h.s8.bf16 %v1211_v15  ;;  %v1253_v15 = vld [vmem:[%s10914_s21 + $0x1af8] sm:$0xff] }
 0x6e0   : > { %4930 = vmatpush1.bf16.msra.mxu0 %v2850_v14  ;;  %5504 = vmatpush1.bf16.msra.mxu1 %v2852_v22  ;;  %v1221_v14 = vld [vmem:[%s10914_s21 + $0x19f8] sm:$0xff]  ;;  %v2930_v22 = vunpack.c.h.s8.bf16 %v1210_v59  ;;  %v1252_v59 = vld [vmem:[%s10914_s21 + $0x1af0] sm:$0xff] }
 0x6e1   : > { %4931 = vmatprep.subr.bf16.mxu0 %v2859_v45  ;;  %5505 = vmatprep.subr.bf16.mxu1 %v2861_v2  ;;  %v2932_v45 = vunpack.c.h.s8.bf16 %v1212_v0  ;;  %v2939_v2 = vunpack.c.l.s8.bf16 %v1219_v1  ;;  %v2941_v5 = vunpack.c.l.s8.bf16 %v1221_v14  ;;  %v2949_v61 = vunpack.c.h.s8.bf16 %v1221_v14 }
 0x6e4   : > { %4932 = vmatpush1.bf16.msra.mxu0 %v2858_v3  ;;  %5506 = vmatpush1.bf16.msra.mxu1 %v2860_v8  ;;  %v1220_v3 = vld [vmem:[%s10914_s21 + $0x19f0] sm:$0xff]  ;;  %v2938_v8 = vunpack.c.l.s8.bf16 %v1218_v7 }
 0x6e5   : > { %4933 = vmatprep.subr.bf16.mxu0 %v2867_v9  ;;  %5507 = vmatprep.subr.bf16.mxu1 %v2869_v10  ;;  %v2940_v9 = vunpack.c.l.s8.bf16 %v1220_v3  ;;  %v2947_v10 = vunpack.c.h.s8.bf16 %v1219_v1  ;;  %v1261_v1 = vld [vmem:[%s10914_s21 + $0x1b38] sm:$0xff] }
 0x6e8   : > { %4934 = vmatpush1.bf16.msra.mxu0 %v2866_v13  ;;  %5508 = vmatpush1.bf16.msra.mxu1 %v2868_v16  ;;  %v1229_v13 = vld [vmem:[%s10914_s21 + $0x1a38] sm:$0xff]  ;;  %v2946_v16 = vunpack.c.h.s8.bf16 %v1218_v7  ;;  %v1260_v7 = vld [vmem:[%s10914_s21 + $0x1b30] sm:$0xff] }
 0x6e9   : > { %4935 = vmatprep.subr.bf16.mxu0 %v2875_v28  ;;  %5509 = vmatprep.subr.bf16.mxu1 %v2877_v47  ;;  %v2948_v28 = vunpack.c.h.s8.bf16 %v1220_v3  ;;  %v2955_v47 = vunpack.c.l.s8.bf16 %v1227_v12  ;;  %v2957_v19 = vunpack.c.l.s8.bf16 %v1229_v13  ;;  %v2965_v17 = vunpack.c.h.s8.bf16 %v1229_v13 }
 0x6ec   : > { %4936 = vmatpush1.bf16.msra.mxu0 %v2874_v24  ;;  %5510 = vmatpush1.bf16.msra.mxu1 %v2876_v23  ;;  %v1228_v24 = vld [vmem:[%s10914_s21 + $0x1a30] sm:$0xff]  ;;  %v2954_v23 = vunpack.c.l.s8.bf16 %v1226_v21 }
 0x6ed   : > { %4937 = vmatprep.subr.bf16.mxu0 %v2883_v26  ;;  %5511 = vmatprep.subr.bf16.mxu1 %v2885_v44  ;;  %v2956_v26 = vunpack.c.l.s8.bf16 %v1228_v24  ;;  %v2963_v44 = vunpack.c.h.s8.bf16 %v1227_v12  ;;  %v1269_v12 = vld [vmem:[%s10914_s21 + $0x1b78] sm:$0xff] }
 0x6f0   : > { %4938 = vmatpush1.bf16.msra.mxu0 %v2882_v25  ;;  %5512 = vmatpush1.bf16.msra.mxu1 %v2884_v31  ;;  %v1237_v25 = vld [vmem:[%s10914_s21 + $0x1a78] sm:$0xff]  ;;  %v2962_v31 = vunpack.c.h.s8.bf16 %v1226_v21  ;;  %v1268_v21 = vld [vmem:[%s10914_s21 + $0x1b70] sm:$0xff] }
 0x6f1   : > { %4939 = vmatprep.subr.bf16.mxu0 %v2891_v29  ;;  %5513 = vmatprep.subr.bf16.mxu1 %v2893_v30  ;;  %v2964_v29 = vunpack.c.h.s8.bf16 %v1228_v24  ;;  %v2971_v30 = vunpack.c.l.s8.bf16 %v1235_v49  ;;  %v2973_v43 = vunpack.c.l.s8.bf16 %v1237_v25 }
 0x6f4   : > { %4940 = vmatpush1.bf16.msra.mxu0 %v2890_v34  ;;  %5514 = vmatpush1.bf16.msra.mxu1 %v2892_v36  ;;  %v1236_v34 = vld [vmem:[%s10914_s21 + $0x1a70] sm:$0xff]  ;;  %v2970_v36 = vunpack.c.l.s8.bf16 %v1234_v32 }
 0x6f5   : > { %4941 = vmatprep.subr.bf16.mxu0 %v2899_v4  ;;  %5515 = vmatprep.subr.bf16.mxu1 %v2901_v39  ;;  %v2979_v4 = vunpack.c.h.s8.bf16 %v1235_v49  ;;  %v2981_v39 = vunpack.c.h.s8.bf16 %v1237_v25  ;;  %v1277_v49 = vld [vmem:[%s10914_s21 + $0x1bb8] sm:$0xff] }
 0x6f8   : > { %4942 = vmatpush1.bf16.msra.mxu0 %v2898_v40  ;;  %5516 = vmatpush1.bf16.msra.mxu1 %v2900_v41  ;;  %v2978_v40 = vunpack.c.h.s8.bf16 %v1234_v32  ;;  %v2980_v41 = vunpack.c.h.s8.bf16 %v1236_v34  ;;  %v1276_v32 = vld [vmem:[%s10914_s21 + $0x1bb0] sm:$0xff] }
 0x6f9   : > { %4943 = vmatprep.subr.bf16.mxu0 %v2907_v48  ;;  %5517 = vmatprep.subr.bf16.mxu1 %v2909_v42  ;;  %v2989_v48 = vunpack.c.l.s8.bf16 %v1245_v37  ;;  %v1242_v42 = vld [vmem:[%s10914_s21 + $0x1aa0] sm:$0xff] }
 0x6fa   : > { %v2986_v46 = vunpack.c.l.s8.bf16 %v1242_v42  ;;  %v2994_v54 = vunpack.c.h.s8.bf16 %v1242_v42  ;;  %v1284_v42 = vld [vmem:[%s10914_s21 + $0x1bf0] sm:$0xff] }
 0x6fc   : > { %4944 = vmatpush1.bf16.msra.mxu0 %v2906_v52  ;;  %5518 = vmatpush1.bf16.msra.mxu1 %v2908_v20  ;;  %v2988_v52 = vunpack.c.l.s8.bf16 %v1244_v11  ;;  %v2995_v20 = vunpack.c.h.s8.bf16 %v1243_v35 }
 0x6fd   : > { %4945 = vmatprep.subr.bf16.mxu0 %v2915_v62  ;;  %5519 = vmatprep.subr.bf16.mxu1 %v2917_v51  ;;  %v2997_v62 = vunpack.c.h.s8.bf16 %v1245_v37  ;;  %v1251_v51 = vld [vmem:[%s10914_s21 + $0x1ae8] sm:$0xff] }
 0x700   : > { %4946 = vmatpush1.bf16.msra.mxu0 %v2914_v56  ;;  %5520 = vmatpush1.bf16.msra.mxu1 %v2916_v57  ;;  %v2996_v56 = vunpack.c.h.s8.bf16 %v1244_v11  ;;  %v3003_v57 = vunpack.c.l.s8.bf16 %v1251_v51 }
 0x701   : > { %4947 = vmatprep.subr.bf16.mxu0 %v2923_v27  ;;  %5521 = vmatprep.subr.bf16.mxu1 %v2925_v60  ;;  %v3005_v27 = vunpack.c.l.s8.bf16 %v1253_v15  ;;  %v1250_v60 = vld [vmem:[%s10914_s21 + $0x1ae0] sm:$0xff] }
 0x702   : > { %v3002_v0 = vunpack.c.l.s8.bf16 %v1250_v60  ;;  %v3010_v14 = vunpack.c.h.s8.bf16 %v1250_v60 }
 0x704   : > { %4948 = vmatpush1.bf16.msra.mxu0 %v2922_v33  ;;  %5522 = vmatpush1.bf16.msra.mxu1 %v2924_v50  ;;  %v3004_v33 = vunpack.c.l.s8.bf16 %v1252_v59  ;;  %v3011_v50 = vunpack.c.h.s8.bf16 %v1251_v51  ;;  %v3076_v51 = vunpack.c.h.s8.bf16 %v1284_v42 }
 0x705   : > { %4949 = vmatprep.subr.bf16.mxu0 %v2931_v6  ;;  %5523 = vmatprep.subr.bf16.mxu1 %v2933_v53  ;;  %v3013_v6 = vunpack.c.h.s8.bf16 %v1253_v15  ;;  %v1259_v53 = vld [vmem:[%s10914_s21 + $0x1b28] sm:$0xff] }
 0x708   : > { %4950 = vmatpush1.bf16.msra.mxu0 %v2930_v22  ;;  %5524 = vmatpush1.bf16.msra.mxu1 %v2932_v45  ;;  %v3012_v22 = vunpack.c.h.s8.bf16 %v1252_v59  ;;  %v3019_v45 = vunpack.c.l.s8.bf16 %v1259_v53 }
 0x709   : > { %4951 = vmatprep.subr.bf16.mxu0 %v2939_v2  ;;  %5525 = vmatprep.subr.bf16.mxu1 %v2941_v5  ;;  %v3021_v2 = vunpack.c.l.s8.bf16 %v1261_v1  ;;  %v1258_v5 = vld [vmem:[%s10914_s21 + $0x1b20] sm:$0xff] }
 0x70a   : > { %v3018_v3 = vunpack.c.l.s8.bf16 %v1258_v5  ;;  %v3026_v13 = vunpack.c.h.s8.bf16 %v1258_v5 }
 0x70c   : > { %4952 = vmatpush1.bf16.msra.mxu0 %v2938_v8  ;;  %5526 = vmatpush1.bf16.msra.mxu1 %v2940_v9  ;;  %v3020_v8 = vunpack.c.l.s8.bf16 %v1260_v7  ;;  %v3027_v9 = vunpack.c.h.s8.bf16 %v1259_v53 }
 0x70d   : > { %4953 = vmatprep.subr.bf16.mxu0 %v2947_v10  ;;  %5527 = vmatprep.subr.bf16.mxu1 %v2949_v61  ;;  %v3029_v10 = vunpack.c.h.s8.bf16 %v1261_v1  ;;  %v1267_v61 = vld [vmem:[%s10914_s21 + $0x1b68] sm:$0xff]  ;;  %v3079_v1 = vld [vmem:[#allocation2 + $0x8] sm:$0xff] }
 0x710   : > { %4954 = vmatpush1.bf16.msra.mxu0 %v2946_v16  ;;  %5528 = vmatpush1.bf16.msra.mxu1 %v2948_v28  ;;  %v3028_v16 = vunpack.c.h.s8.bf16 %v1260_v7  ;;  %v3035_v28 = vunpack.c.l.s8.bf16 %v1267_v61  ;;  %v5836_v7 = vld [vmem:[%s10941_s1 + $0x28] sm:$0xff] (!%p9801_p6) }
 0x711   : > { %4964 = vmatprep.subr.bf16.mxu0 %v2955_v47  ;;  %5538 = vmatprep.subr.bf16.mxu1 %v2957_v19  ;;  %v3037_v47 = vunpack.c.l.s8.bf16 %v1269_v12  ;;  %v1266_v19 = vld [vmem:[%s10914_s21 + $0x1b60] sm:$0xff] }
 0x712   : > { %v3034_v24 = vunpack.c.l.s8.bf16 %v1266_v19  ;;  %v3042_v25 = vunpack.c.h.s8.bf16 %v1266_v19  ;;  %v5851_v19 = vld [vmem:[%s10941_s1 + $0xa0] sm:$0xff] (!%p9801_p6) }
 0x713   : > { %4956 = vmatmul.mubr.bf16.vlgmr.msra.gmra.mrb[4].mxu0 %v11576_v18  ;;  %5530 = vmatmul.mubr.bf16.vlgmr.msra.gmra.mrb[4].mxu1 %v11576_v18  ;;  %v2972_v18 = vunpack.c.l.s8.bf16 %v1236_v34 }
 0x714   : > { %4965 = vmatpush1.bf16.msra.mxu0 %v2954_v23  ;;  %5539 = vmatpush1.bf16.msra.mxu1 %v2956_v26  ;;  %v3036_v23 = vunpack.c.l.s8.bf16 %v1268_v21  ;;  %v3043_v26 = vunpack.c.h.s8.bf16 %v1267_v61 }
 0x715   : > { %4966 = vmatprep.subr.bf16.mxu0 %v2963_v44  ;;  %5540 = vmatprep.subr.bf16.mxu1 %v2965_v17  ;;  %v3045_v44 = vunpack.c.h.s8.bf16 %v1269_v12  ;;  %v1275_v17 = vld [vmem:[%s10914_s21 + $0x1ba8] sm:$0xff] }
 0x716   : > { %4996 = vmatprep.mubr.bf16.mxu0 %v11582_v55  ;;  %5570 = vmatprep.mubr.bf16.mxu1 %v11582_v55  ;;  %v2987_v55 = vunpack.c.l.s8.bf16 %v1243_v35  ;;  %v1285_v35 = vld [vmem:[%s10914_s21 + $0x1bf8] sm:$0xff] }
 0x718   : > { %4967 = vmatpush1.bf16.msra.mxu0 %v2962_v31  ;;  %5541 = vmatpush1.bf16.msra.mxu1 %v2964_v29  ;;  %v3044_v31 = vunpack.c.h.s8.bf16 %v1268_v21  ;;  %v3051_v29 = vunpack.c.l.s8.bf16 %v1275_v17  ;;  %v5848_v21 = vld [vmem:[%s10941_s1 + $0x88] sm:$0xff] (!%p9801_p6) }
 0x719   : > { %4968 = vmatprep.subr.bf16.mxu0 %v2971_v30  ;;  %5542 = vmatprep.subr.bf16.mxu1 %v2973_v43  ;;  %v3053_v30 = vunpack.c.l.s8.bf16 %v1277_v49  ;;  %v1274_v43 = vld [vmem:[%s10914_s21 + $0x1ba0] sm:$0xff] }
 0x71a   : > { %v3050_v34 = vunpack.c.l.s8.bf16 %v1274_v43  ;;  %v3058_v37 = vunpack.c.h.s8.bf16 %v1274_v43 }
 0x71c   : > { %4969 = vmatpush1.bf16.msra.mxu0 %v2970_v36  ;;  %5543 = vmatpush1.bf16.msra.mxu1 %v2972_v18  ;;  %v3052_v36 = vunpack.c.l.s8.bf16 %v1276_v32  ;;  %v3059_v18 = vunpack.c.h.s8.bf16 %v1275_v17 }
 0x71d   : > { %4970 = vmatprep.subr.bf16.mxu0 %v2979_v4  ;;  %5544 = vmatprep.subr.bf16.mxu1 %v2981_v39  ;;  %v3061_v4 = vunpack.c.h.s8.bf16 %v1277_v49  ;;  %v1283_v39 = vld [vmem:[%s10914_s21 + $0x1be8] sm:$0xff]  ;;  %v5855_v49 = vld [vmem:[%s10941_s1 + $0xc0] sm:$0xff] (!%p9801_p6) }
 0x720   : > { %4971 = vmatpush1.bf16.msra.mxu0 %v2978_v40  ;;  %5545 = vmatpush1.bf16.msra.mxu1 %v2980_v41  ;;  %v3060_v40 = vunpack.c.h.s8.bf16 %v1276_v32  ;;  %v3067_v41 = vunpack.c.l.s8.bf16 %v1283_v39 }
 0x721   : > { %4972 = vmatprep.subr.bf16.mxu0 %v2987_v55  ;;  %5546 = vmatprep.subr.bf16.mxu1 %v2989_v48  ;;  %v3069_v55 = vunpack.c.l.s8.bf16 %v1285_v35  ;;  %v1282_v48 = vld [vmem:[%s10914_s21 + $0x1be0] sm:$0xff] }
 0x722   : > { %v3066_v11 = vunpack.c.l.s8.bf16 %v1282_v48 }
 0x724   : > { %4973 = vmatpush1.bf16.msra.mxu0 %v2986_v46  ;;  %5547 = vmatpush1.bf16.msra.mxu1 %v2988_v52  ;;  %v3068_v46 = vunpack.c.l.s8.bf16 %v1284_v42  ;;  %v3075_v52 = vunpack.c.h.s8.bf16 %v1283_v39  ;;  %v5868_v39 = vld [vmem:[%s10941_s1 + $0x128] sm:$0xff] (!%p9801_p6) }
 0x725   : > { %4974 = vmatprep.subr.bf16.mxu0 %v2995_v20  ;;  %5548 = vmatprep.subr.bf16.mxu1 %v2997_v62  ;;  %v3077_v20 = vunpack.c.h.s8.bf16 %v1285_v35  ;;  %v3074_v62 = vunpack.c.h.s8.bf16 %v1282_v48  ;;  %v5875_v48 = vld [vmem:[%s10941_s1 + $0x160] sm:$0xff] (!%p9801_p6)  ;;  %v5872_v42 = vld [vmem:[%s10941_s1 + $0x148] sm:$0xff] (!%p9801_p6) }
 0x728   : > { %4975 = vmatpush1.bf16.msra.mxu0 %v2994_v54  ;;  %5549 = vmatpush1.bf16.msra.mxu1 %v2996_v56 }
 0x729   : > { %4976 = vmatprep.subr.bf16.mxu0 %v3003_v57  ;;  %5550 = vmatprep.subr.bf16.mxu1 %v3005_v27 }
 0x72c   : > { %4977 = vmatpush1.bf16.msra.mxu0 %v3002_v0  ;;  %5551 = vmatpush1.bf16.msra.mxu1 %v3004_v33 }
 0x72d   : > { %4978 = vmatprep.subr.bf16.mxu0 %v3011_v50  ;;  %5552 = vmatprep.subr.bf16.mxu1 %v3013_v6 }
 0x730   : > { %4979 = vmatpush1.bf16.msra.mxu0 %v3010_v14  ;;  %5553 = vmatpush1.bf16.msra.mxu1 %v3012_v22 }
 0x731   : > { %4980 = vmatprep.subr.bf16.mxu0 %v3019_v45  ;;  %5554 = vmatprep.subr.bf16.mxu1 %v3021_v2  ;;  %v5835_v45 = vld [vmem:[%s10941_s1 + $0x20] sm:$0xff] (!%p9801_p6)  ;;  %v5832_v2 = vld [vmem:[%s10941_s1 + $0x8] sm:$0xff] (!%p9801_p6) }
 0x732   : > { %v9804_v61 = vcombine.low (!%p9801_p6), %v5832_v2, %v5836_v7 }
 0x734   : > { %4981 = vmatpush1.bf16.msra.mxu0 %v3018_v3  ;;  %5555 = vmatpush1.bf16.msra.mxu1 %v3020_v8  ;;  %v5839_v8 = vld [vmem:[%s10941_s1 + $0x40] sm:$0xff] (!%p9801_p6) }
 0x735   : > { %4982 = vmatprep.subr.bf16.mxu0 %v3027_v9  ;;  %5556 = vmatprep.subr.bf16.mxu1 %v3029_v10  ;;  %v5843_v9 = vld [vmem:[%s10941_s1 + $0x60] sm:$0xff] (!%p9801_p6)  ;;  %v9805_v10 = vcombine.high (!%p9801_p6), %v5832_v2, %v5836_v7  ;;  %v5892_v7 = vld [vmem:[%s10941_s1 + $0x1e8] sm:$0xff] (!%p9801_p6) }
 0x736   : > { %v9811_v12 = vcombine.high (!%p9801_p6), %v5839_v8, %v5843_v9  ;;  %v12190_v2 = vld [vmem:[%s365_s17] sm:$0xff] (!%p9801_p6) }
 0x738   : > { %4983 = vmatpush1.bf16.msra.mxu0 %v3026_v13  ;;  %5557 = vmatpush1.bf16.msra.mxu1 %v3028_v16  ;;  %v5840_v13 = vld [vmem:[%s10941_s1 + $0x48] sm:$0xff] (!%p9801_p6) }
 0x739   : > { %4984 = vmatprep.subr.bf16.mxu0 %v3035_v28  ;;  %5558 = vmatprep.subr.bf16.mxu1 %v3037_v47  ;;  %v5844_v16 = vld [vmem:[%s10941_s1 + $0x68] sm:$0xff] (!%p9801_p6)  ;;  %v5847_v28 = vld [vmem:[%s10941_s1 + $0x80] sm:$0xff] (!%p9801_p6) }
 0x73a   : > { %v9813_v47 = vcombine.high (!%p9801_p6), %v5840_v13, %v5844_v16 }
 0x73c   : > { %4985 = vmatpush1.bf16.msra.mxu0 %v3034_v24  ;;  %5559 = vmatpush1.bf16.msra.mxu1 %v3036_v23  ;;  %v5852_v24 = vld [vmem:[%s10941_s1 + $0xa8] sm:$0xff] (!%p9801_p6)  ;;  %v9810_v23 = vcombine.low (!%p9801_p6), %v5839_v8, %v5843_v9 }
 0x73d   : > { %4986 = vmatprep.subr.bf16.mxu0 %v3043_v26  ;;  %5560 = vmatprep.subr.bf16.mxu1 %v3045_v44  ;;  %v9812_v26 = vcombine.low (!%p9801_p6), %v5840_v13, %v5844_v16  ;;  %v9819_v44 = vcombine.high (!%p9801_p6), %v5847_v28, %v5851_v19  ;;  %v9821_v17 = vcombine.high (!%p9801_p6), %v5848_v21, %v5852_v24 }
 0x73e   : > { %v9820_v43 = vcombine.low (!%p9801_p6), %v5848_v21, %v5852_v24  ;;  %v5895_v24 = vld [vmem:[%s10941_s1 + $0x200] sm:$0xff] (!%p9801_p6) }
 0x740   : > { %4987 = vmatpush1.bf16.msra.mxu0 %v3042_v25  ;;  %5561 = vmatpush1.bf16.msra.mxu1 %v3044_v31  ;;  %v5859_v25 = vld [vmem:[%s10941_s1 + $0xe0] sm:$0xff] (!%p9801_p6)  ;;  %v5856_v31 = vld [vmem:[%s10941_s1 + $0xc8] sm:$0xff] (!%p9801_p6) }
 0x741   : > { %4988 = vmatprep.subr.bf16.mxu0 %v3051_v29  ;;  %5562 = vmatprep.subr.bf16.mxu1 %v3053_v30  ;;  %v5860_v29 = vld [vmem:[%s10941_s1 + $0xe8] sm:$0xff] (!%p9801_p6)  ;;  %v9818_v30 = vcombine.low (!%p9801_p6), %v5847_v28, %v5851_v19  ;;  %v9827_v32 = vcombine.high (!%p9801_p6), %v5855_v49, %v5859_v25  ;;  %v9826_v35 = vcombine.low (!%p9801_p6), %v5855_v49, %v5859_v25 }
 0x742   : > { %v5900_v49 = vld [vmem:[%s10941_s1 + $0x228] sm:$0xff] (!%p9801_p6) }
 0x744   : > { %4989 = vmatpush1.bf16.msra.mxu0 %v3050_v34  ;;  %5563 = vmatpush1.bf16.msra.mxu1 %v3052_v36  ;;  %v9829_v34 = vcombine.high (!%p9801_p6), %v5856_v31, %v5860_v29  ;;  %v5863_v36 = vld [vmem:[%s10941_s1 + $0x100] sm:$0xff] (!%p9801_p6) }
 0x745   : > { %4990 = vmatprep.subr.bf16.mxu0 %v3059_v18  ;;  %5564 = vmatprep.subr.bf16.mxu1 %v3061_v4  ;;  %v5867_v18 = vld [vmem:[%s10941_s1 + $0x120] sm:$0xff] (!%p9801_p6)  ;;  %v5864_v4 = vld [vmem:[%s10941_s1 + $0x108] sm:$0xff] (!%p9801_p6) }
 0x748   : > { %4991 = vmatpush1.bf16.msra.mxu0 %v3058_v37  ;;  %5565 = vmatpush1.bf16.msra.mxu1 %v3060_v40  ;;  %v9828_v37 = vcombine.low (!%p9801_p6), %v5856_v31, %v5860_v29  ;;  %v9835_v40 = vcombine.high (!%p9801_p6), %v5863_v36, %v5867_v18 }
 0x749   : > { %4992 = vmatprep.subr.bf16.mxu0 %v3067_v41  ;;  %5566 = vmatprep.subr.bf16.mxu1 %v3069_v55  ;;  %v9837_v41 = vcombine.high (!%p9801_p6), %v5864_v4, %v5868_v39  ;;  %v5871_v55 = vld [vmem:[%s10941_s1 + $0x140] sm:$0xff] (!%p9801_p6) }
 0x74c   : > { %4993 = vmatpush1.bf16.msra.mxu0 %v3066_v11  ;;  %5567 = vmatpush1.bf16.msra.mxu1 %v3068_v46  ;;  %v5876_v11 = vld [vmem:[%s10941_s1 + $0x168] sm:$0xff] (!%p9801_p6)  ;;  %v9834_v46 = vcombine.low (!%p9801_p6), %v5863_v36, %v5867_v18 }
 0x74d   : > { %4994 = vmatprep.subr.bf16.mxu0 %v3075_v52  ;;  %5568 = vmatprep.subr.bf16.mxu1 %v3077_v20  ;;  %v9836_v52 = vcombine.low (!%p9801_p6), %v5864_v4, %v5868_v39  ;;  %v9843_v20 = vcombine.high (!%p9801_p6), %v5871_v55, %v5875_v48  ;;  %v5903_v4 = vld [vmem:[%s10941_s1 + $0x240] sm:$0xff] (!%p9801_p6) }
 0x74e   : > { %v5907_v39 = vld [vmem:[%s10941_s1 + $0x260] sm:$0xff] (!%p9801_p6) }
 0x750   : > { %4995 = vmatpush1.bf16.msra.mxu0 %v3074_v62  ;;  %5569 = vmatpush1.bf16.msra.mxu1 %v3076_v51  ;;  %v9845_v62 = vcombine.high (!%p9801_p6), %v5872_v42, %v5876_v11  ;;  %v5879_v51 = vld [vmem:[%s10941_s1 + $0x180] sm:$0xff] (!%p9801_p6) }
 0x751   : > { %9109 = vmatprep.subr.bf16.mxu1 (!%p9801_p6), %v9805_v10 }
 0x753   : > { %4997 = vmatmul.mubr.bf16.vlgmr.msra.gmra.mrb[4].mxu0 %v11620_v63  ;;  %5571 = vmatmul.mubr.bf16.vlgmr.msra.gmra.mrb[4].mxu1 %v11620_v63  ;;  %v5831_v63 = vld [vmem:[%s10941_s1] sm:$0xff] (!%p9801_p6) }
 0x754   : > { %v9803_v5 = vcombine.high (!%p9801_p6), %v5831_v63, %v5835_v45  ;;  %v9802_v3 = vcombine.low (!%p9801_p6), %v5831_v63, %v5835_v45  ;;  %9110 = vmatpush1.bf16.msra.mxu1 (!%p9801_p6), %v9804_v61 }
 0x755   : > { %9111 = vmatprep.subr.bf16.mxu1 (!%p9801_p6), %v9813_v47 }
 0x756   : > { %8945 = vmatprep.subr.bf16.mxu0 (!%p9801_p6), %v9803_v5  ;;  %v5888_v5 = vld [vmem:[%s10941_s1 + $0x1c8] sm:$0xff] (!%p9801_p6) }
 0x757   : > { %8946 = vmatpush1.bf16.msra.mxu0 (!%p9801_p6), %v9802_v3  ;;  %v9861_v21 = vcombine.high (!%p9801_p6), %v5888_v5, %v5892_v7 }
 0x758   : > { %8947 = vmatprep.subr.bf16.mxu0 (!%p9801_p6), %v9811_v12  ;;  %9112 = vmatpush1.bf16.msra.mxu1 (!%p9801_p6), %v9812_v26 }
 0x759   : > { %9113 = vmatprep.subr.bf16.mxu1 (!%p9801_p6), %v9821_v17  ;;  %v5896_v17 = vld [vmem:[%s10941_s1 + $0x208] sm:$0xff] (!%p9801_p6) }
 0x75a   : > { %v9869_v18 = vcombine.high (!%p9801_p6), %v5896_v17, %v5900_v49 }
 0x75b   : > { %8948 = vmatpush1.bf16.msra.mxu0 (!%p9801_p6), %v9810_v23  ;;  %v5899_v23 = vld [vmem:[%s10941_s1 + $0x220] sm:$0xff] (!%p9801_p6) }
 0x75c   : > { %8949 = vmatprep.subr.bf16.mxu0 (!%p9801_p6), %v9819_v44  ;;  %9114 = vmatpush1.bf16.msra.mxu1 (!%p9801_p6), %v9820_v43 }
 0x75d   : > { %9115 = vmatprep.subr.bf16.mxu1 (!%p9801_p6), %v9829_v34  ;;  %v9867_v34 = vcombine.high (!%p9801_p6), %v5895_v24, %v5899_v23 }
 0x75f   : > { %8950 = vmatpush1.bf16.msra.mxu0 (!%p9801_p6), %v9818_v30  ;;  %v5631_v30 = vld [vmem:[#allocation2] sm:$0xff] (!%p9801_p6) }
 0x760   : > { %8951 = vmatprep.subr.bf16.mxu0 (!%p9801_p6), %v9827_v32  ;;  %9116 = vmatpush1.bf16.msra.mxu1 (!%p9801_p6), %v9828_v37  ;;  %v9860_v32 = vcombine.low (!%p9801_p6), %v5888_v5, %v5892_v7  ;;  %v5904_v37 = vld [vmem:[%s10941_s1 + $0x248] sm:$0xff] (!%p9801_p6) }
 0x761   : > { %9117 = vmatprep.subr.bf16.mxu1 (!%p9801_p6), %v9837_v41 }
 0x763   : > { %8952 = vmatpush1.bf16.msra.mxu0 (!%p9801_p6), %v9826_v35 }
 0x764   : > { %8953 = vmatprep.subr.bf16.mxu0 (!%p9801_p6), %v9835_v40  ;;  %9118 = vmatpush1.bf16.msra.mxu1 (!%p9801_p6), %v9836_v52  ;;  %v5908_v40 = vld [vmem:[%s10941_s1 + $0x268] sm:$0xff] (!%p9801_p6)  ;;  %v5911_v52 = vld [vmem:[%s10941_s1 + $0x280] sm:$0xff] (!%p9801_p6) }
 0x765   : > { %9119 = vmatprep.subr.bf16.mxu1 (!%p9801_p6), %v9845_v62  ;;  %v5912_v62 = vld [vmem:[%s10941_s1 + $0x288] sm:$0xff] (!%p9801_p6) }
 0x767   : > { %8954 = vmatpush1.bf16.msra.mxu0 (!%p9801_p6), %v9834_v46  ;;  %v9877_v46 = vcombine.high (!%p9801_p6), %v5904_v37, %v5908_v40 }
 0x768   : > { %8955 = vmatprep.subr.bf16.mxu0 (!%p9801_p6), %v9843_v20  ;;  %v5915_v20 = vld [vmem:[%s10941_s1 + $0x2a0] sm:$0xff] (!%p9801_p6) }
 0x826   : > { %v4998_v15 = vpop.f32.mrb[4].mxu0  ;;  %v5572_v54 = vpop.f32.mrb[4].mxu1 }
 0x827   : > { %v5000_v56 = vpop.f32.mrb[5].mxu0  ;;  %v5574_v57 = vpop.f32.mrb[5].mxu1 }
 0x828   : > { %v5604_v27 = vcombine.low %v4998_v15, %v5000_v56  ;;  %v5605_v60 = vcombine.low %v5572_v54, %v5574_v57  ;;  %v5002_v59 = vpop.f32.mrb[6].mxu0  ;;  %v5576_v0 = vpop.f32.mrb[6].mxu1  ;;  %v5883_v15 = vld [vmem:[%s10941_s1 + $0x1a0] sm:$0xff] (!%p9801_p6)  ;;  %v12159_v54 = vsub.s32 (!%p9801_p6), 0, %v10965_v38  ;;  %v12162_v56 = vsub.s32 (!%p9801_p6), 1, %v10965_v38  ;;  %v5880_v57 = vld [vmem:[%s10941_s1 + $0x188] sm:$0xff] (!%p9801_p6) }
 0x829   : > { %v5003_v33 = vpop.f32.mrb[7].mxu0  ;;  %v5577_v50 = vpop.f32.mrb[7].mxu1  ;;  %v12170_v59 = vsub.s32 (!%p9801_p6), 3, %v10965_v38  ;;  %v9842_v0 = vcombine.low (!%p9801_p6), %v5871_v55, %v5875_v48  ;;  %v9866_v55 = vcombine.low (!%p9801_p6), %v5895_v24, %v5899_v23  ;;  %v9868_v48 = vcombine.low (!%p9801_p6), %v5896_v17, %v5900_v49  ;;  %v5936_v24 = vld [vmem:[%s10941_s1 + $0x348] sm:$0xff] (!%p9801_p6) }
 0x82a   : > { %v5612_v6 = vrot.slane %v5604_v27, %v11747_v58  ;;  %v5619_v53 = vrot.slane %v5605_v60, %v11747_v58  ;;  %5630 = sbr.rel (%p9801_p6) target bundleno = 2805 (0xaf5), region = 56  ;;  %v5884_v27 = vld [vmem:[%s10941_s1 + $0x1a8] sm:$0xff] (!%p9801_p6)  ;;  %v12167_v60 = vsub.s32 (!%p9801_p6), 2, %v10965_v38  ;;  %v9844_v33 = vcombine.low (!%p9801_p6), %v5872_v42, %v5876_v11 }
 0x82b   : > { %v9851_v50 = vcombine.high (!%p9801_p6), %v5879_v51, %v5883_v15  ;;  %v5710_v9 = vrot.slane (!%p9801_p6), %v12190_v2, %v12159_v54  ;;  %v5714_v10 = vrot.slane (!%p9801_p6), %v12190_v2, %v12162_v56  ;;  %8956 = vmatpush1.bf16.msra.mxu0 (!%p9801_p6), %v9842_v0  ;;  %v9852_v61 = vcombine.low (!%p9801_p6), %v5880_v57, %v5884_v27  ;;  %v5940_v23 = vld [vmem:[%s10941_s1 + $0x368] sm:$0xff] (!%p9801_p6) }
 0x82c   : > { %v5620_v14 = vcombine.low %v5612_v6, %v5619_v53  ;;  %v12177_v6 = vld [vmem:[%s361_s11] sm:$0xff] (!%p9801_p6)  ;;  %v9853_v53 = vcombine.high (!%p9801_p6), %v5880_v57, %v5884_v27  ;;  %v5718_v13 = vrot.slane (!%p9801_p6), %v12190_v2, %v12167_v60  ;;  %v5722_v16 = vrot.slane (!%p9801_p6), %v12190_v2, %v12170_v59  ;;  %9120 = vmatpush1.bf16.msra.mxu1 (!%p9801_p6), %v9844_v33 }
 0x82d   : > { %v5638_v63 = vrot.slane (!%p9801_p6), %v12177_v6, %v12159_v54  ;;  %v5642_v45 = vrot.slane (!%p9801_p6), %v12177_v6, %v12162_v56  ;;  %v5646_v3 = vrot.slane (!%p9801_p6), %v12177_v6, %v12167_v60  ;;  %v5650_v8 = vrot.slane (!%p9801_p6), %v12177_v6, %v12170_v59  ;;  %8957 = vmatprep.subr.bf16.mxu0 (!%p9801_p6), %v9851_v50 }
 0x82e   : > { %v5624_v22 = vadd.f32 %v5620_v14, %v3079_v1  ;;  %v9850_v1 = vcombine.low (!%p9801_p6), %v5879_v51, %v5883_v15  ;;  %v5887_v14 = vld [vmem:[%s10941_s1 + $0x1c0] sm:$0xff] (!%p9801_p6)  ;;  %v5739_v19 = vcombine.low (!%p9801_p6), %v5710_v9, %v5714_v10  ;;  %9121 = vmatprep.subr.bf16.mxu1 (!%p9801_p6), %v9853_v53  ;;  %v5740_v44 = vcombine.low (!%p9801_p6), %v5718_v13, %v5722_v16  ;;  %v5916_v51 = vld [vmem:[%s10941_s1 + $0x2a8] sm:$0xff] (!%p9801_p6) }
 0x82f   : > { %v5667_v12 = vcombine.low (!%p9801_p6), %v5638_v63, %v5642_v45  ;;  %v5668_v47 = vcombine.low (!%p9801_p6), %v5646_v3, %v5650_v8  ;;  %v9875_v42 = vcombine.high (!%p9801_p6), %v5903_v4, %v5907_v39  ;;  %v9874_v57 = vcombine.low (!%p9801_p6), %v5903_v4, %v5907_v39  ;;  %v5919_v53 = vld [vmem:[%s10941_s1 + $0x2c0] sm:$0xff] (!%p9801_p6) }
 0x830   : > { %5626 = vst [vmem:[#allocation2 + $0x8] sm:$0xff] %v5624_v22  ;;  %v5891_v22 = vld [vmem:[%s10941_s1 + $0x1e0] sm:$0xff] (!%p9801_p6)  ;;  %v5747_v31 = vrot.slane (!%p9801_p6), %v5739_v19, %v11747_v58  ;;  %8958 = vmatpush1.bf16.msra.mxu0 (!%p9801_p6), %v9850_v1  ;;  %v5754_v43 = vrot.slane (!%p9801_p6), %v5740_v44, %v11747_v58  ;;  %9122 = vmatpush1.bf16.msra.mxu1 (!%p9801_p6), %v9852_v61  ;;  %v5928_v61 = vld [vmem:[%s10941_s1 + $0x308] sm:$0xff] (!%p9801_p6) }
 0x831   : > { %v9859_v28 = vcombine.high %v5887_v14, %v5891_v22  ;;  %v5675_v26 = vrot.slane %v5667_v12, %v11747_v58  ;;  %v5682_v25 = vrot.slane %v5668_v47, %v11747_v58  ;;  %v9858_v29 = vcombine.low %v5887_v14, %v5891_v22  ;;  %9123 = vmatprep.subr.bf16.mxu1 %v9861_v21  ;;  %v5923_v1 = vld [vmem:[%s10941_s1 + $0x2e0] sm:$0xff]  ;;  %v5920_v14 = vld [vmem:[%s10941_s1 + $0x2c8] sm:$0xff] }
 0x832   : > { %v5755_v35 = vcombine.low %v5747_v31, %v5754_v43  ;;  %v9876_v27 = vcombine.low %v5904_v37, %v5908_v40  ;;  %v9883_v0 = vcombine.high %v5911_v52, %v5915_v20  ;;  %v9885_v50 = vcombine.high %v5912_v62, %v5916_v51  ;;  %v5924_v22 = vld [vmem:[%s10941_s1 + $0x2e8] sm:$0xff]  ;;  %v5927_v9 = vld [vmem:[%s10941_s1 + $0x300] sm:$0xff] }
 0x833   : > { %8959 = vmatprep.subr.bf16.mxu0 %v9859_v28  ;;  %v5683_v36 = vcombine.low %v5675_v26, %v5682_v25  ;;  %v9882_v45 = vcombine.low %v5911_v52, %v5915_v20  ;;  %v9884_v5 = vcombine.low %v5912_v62, %v5916_v51  ;;  %v9891_v7 = vcombine.high %v5919_v53, %v5923_v1  ;;  %v5931_v10 = vld [vmem:[%s10941_s1 + $0x320] sm:$0xff]  ;;  %v5932_v12 = vld [vmem:[%s10941_s1 + $0x328] sm:$0xff] }
 0x834   : > { %8960 = vmatpush1.bf16.msra.mxu0 %v9858_v29  ;;  %9124 = vmatpush1.bf16.msra.mxu1 %v9860_v32  ;;  %v9893_v8 = vcombine.high %v5920_v14, %v5924_v22  ;;  %v9890_v13 = vcombine.low %v5919_v53, %v5923_v1  ;;  %v9892_v16 = vcombine.low %v5920_v14, %v5924_v22  ;;  %v5935_v19 = vld [vmem:[%s10941_s1 + $0x340] sm:$0xff]  ;;  %v5944_v29 = vld [vmem:[%s10941_s1 + $0x388] sm:$0xff]  ;;  %v12268_v62 = vsub.s32 6, %v10965_v38 }
 0x835   : > { %v5703_v41 = vmul.f32 %v5683_v36, %v5631_v30  ;;  %8961 = vmatprep.subr.bf16.mxu0 %v9867_v34  ;;  %9125 = vmatprep.subr.bf16.mxu1 %v9869_v18  ;;  %v9899_v28 = vcombine.high %v5927_v9, %v5931_v10  ;;  %v9901_v47 = vcombine.high %v5928_v61, %v5932_v12  ;;  %v5939_v21 = vld [vmem:[%s10941_s1 + $0x360] sm:$0xff]  ;;  %v5948_v30 = vld [vmem:[%s10941_s1 + $0x3a8] sm:$0xff]  ;;  %v12278_v14 = vsub.s32 7, %v10965_v38 }
 0x836   : > { %v9898_v26 = vcombine.low %v5927_v9, %v5931_v10  ;;  %v9900_v44 = vcombine.low %v5928_v61, %v5932_v12  ;;  %v9907_v17 = vcombine.high %v5935_v19, %v5939_v21  ;;  %v9909_v49 = vcombine.high %v5936_v24, %v5940_v23  ;;  %v5943_v25 = vld [vmem:[%s10941_s1 + $0x380] sm:$0xff]  ;;  %v5956_v37 = vld [vmem:[%s10941_s1 + $0x3e8] sm:$0xff] }
 0x837   : > { %v5775_v11 = vadd.f32 %v5755_v35, %v5703_v41  ;;  %v5947_v31 = vld [vmem:[%s10941_s1 + $0x3a0] sm:$0xff]  ;;  %v9906_v43 = vcombine.low %v5935_v19, %v5939_v21  ;;  %v9908_v32 = vcombine.low %v5936_v24, %v5940_v23  ;;  %v9917_v36 = vcombine.high %v5944_v29, %v5948_v30  ;;  %v5952_v35 = vld [vmem:[%s10941_s1 + $0x3c8] sm:$0xff] }
 0x838   : > { %8962 = vmatpush1.bf16.msra.mxu0 %v9866_v55  ;;  %9126 = vmatpush1.bf16.msra.mxu1 %v9868_v48  ;;  %v9915_v34 = vcombine.high %v5943_v25, %v5947_v31  ;;  %v5951_v18 = vld [vmem:[%s10941_s1 + $0x3c0] sm:$0xff]  ;;  %v9914_v40 = vcombine.low %v5943_v25, %v5947_v31  ;;  %v12257_v41 = vsub.s32 4, %v10965_v38  ;;  %v12260_v55 = vsub.s32 5, %v10965_v38  ;;  %v5960_v51 = vld [vmem:[%s10941_s1 + $0x408] sm:$0xff] }
 0x839   : > { %v12222_v15 = vmax.f32 %v5775_v11, 0.0  ;;  %8963 = vmatprep.subr.bf16.mxu0 %v9875_v42  ;;  %9127 = vmatprep.subr.bf16.mxu1 %v9877_v46  ;;  %v5955_v4 = vld [vmem:[%s10941_s1 + $0x3e0] sm:$0xff]  ;;  %v9916_v48 = vcombine.low %v5944_v29, %v5948_v30  ;;  %v9925_v11 = vcombine.high %v5952_v35, %v5956_v37  ;;  %v5666_v10 = vrot.slane %v12177_v6, %v12278_v14  ;;  %v5980_v23 = vld [vmem:[%s10941_s1 + $0x4a8] sm:$0xff] }
 0x83a   : > { %v9923_v42 = vcombine.high %v5951_v18, %v5955_v4  ;;  %v5959_v46 = vld [vmem:[%s10941_s1 + $0x400] sm:$0xff]  ;;  %v5726_v24 = vrot.slane %v12190_v2, %v12257_v41  ;;  %v5632_v30 = vld [vmem:[#allocation2 + $0x8] sm:$0xff] }
 0x83b   : > { %v12226_v33 = vrot.slane %v12222_v15, %v11747_v58  ;;  %v5781_v39 = vcombine.high %v12222_v15, %v12222_v15  ;;  %v5963_v52 = vld [vmem:[%s10941_s1 + $0x420] sm:$0xff]  ;;  %v5964_v15 = vld [vmem:[%s10941_s1 + $0x428] sm:$0xff] }
 0x83c   : > { %8964 = vmatpush1.bf16.msra.mxu0 %v9874_v57  ;;  %9128 = vmatpush1.bf16.msra.mxu1 %v9876_v27  ;;  %v9922_v57 = vcombine.low %v5951_v18, %v5955_v4  ;;  %v5654_v27 = vrot.slane %v12177_v6, %v12257_v41  ;;  %v9931_v53 = vcombine.high %v5959_v46, %v5963_v52  ;;  %v5967_v1 = vld [vmem:[%s10941_s1 + $0x440] sm:$0xff]  ;;  %v5984_v4 = vld [vmem:[%s10941_s1 + $0x4c8] sm:$0xff] }
 0x83d   : > { %v5796_v63 = vcombine.high %v12226_v33, %v12226_v33  ;;  %8965 = vmatprep.subr.bf16.mxu0 %v9883_v0  ;;  %9129 = vmatprep.subr.bf16.mxu1 %v9885_v50  ;;  %v12265_v20 = vrot.slane %v5781_v39, %v11747_v58  ;;  %v5658_v0 = vrot.slane %v12177_v6, %v12260_v55  ;;  %v5987_v18 = vld [vmem:[%s10941_s1 + $0x4e0] sm:$0xff]  ;;  %v5988_v39 = vld [vmem:[%s10941_s1 + $0x4e8] sm:$0xff] }
 0x83e   : > { %v9924_v50 = vcombine.low %v5952_v35, %v5956_v37  ;;  %v9933_v22 = vcombine.high %v5960_v51, %v5964_v15  ;;  %v12289_v9 = vpack.c.bf16 %v12226_v33, %v12226_v33  ;;  %v9930_v38 = vcombine.low %v5959_v46, %v5963_v52 }
 0x83f   : > { %v12234_v3 = vpack.c.bf16 %v5796_v63, %v5796_v63  ;;  %v5971_v63 = vld [vmem:[%s10941_s1 + $0x460] sm:$0xff]  ;;  %v5684_v61 = vcombine.low %v5654_v27, %v5658_v0  ;;  %v9932_v12 = vcombine.low %v5960_v51, %v5964_v15  ;;  %v9957_v52 = vcombine.high %v5984_v4, %v5988_v39  ;;  %v5996_v27 = vld [vmem:[%s10941_s1 + $0x528] sm:$0xff] }
 0x840   : > { %8966 = vmatpush1.bf16.msra.mxu0 %v9882_v45  ;;  %9130 = vmatpush1.bf16.msra.mxu1 %v9884_v5  ;;  %v5968_v45 = vld [vmem:[%s10941_s1 + $0x448] sm:$0xff]  ;;  %v5991_v51 = vld [vmem:[%s10941_s1 + $0x500] sm:$0xff] }
 0x841   : > { %8977 = vmatprep.mubr.bf16.mxu0 %v12234_v3  ;;  %9141 = vmatprep.mubr.bf16.mxu1 %v12234_v3  ;;  %v5972_v5 = vld [vmem:[%s10941_s1 + $0x468] sm:$0xff]  ;;  %v5692_v21 = vrot.slane %v5684_v61, %v11747_v58  ;;  %v5995_v15 = vld [vmem:[%s10941_s1 + $0x520] sm:$0xff] }
 0x842   : > { %8967 = vmatprep.subr.bf16.mxu0 %v9891_v7  ;;  %9131 = vmatprep.subr.bf16.mxu1 %v9893_v8  ;;  %v5797_v7 = vcombine.high %v12265_v20, %v12265_v20  ;;  %v5662_v8 = vrot.slane %v12177_v6, %v12268_v62  ;;  %v5976_v6 = vld [vmem:[%s10941_s1 + $0x488] sm:$0xff]  ;;  %v9940_v25 = vcombine.low %v5968_v45, %v5972_v5 }
 0x844   : > { %8968 = vmatpush1.bf16.msra.mxu0 %v9890_v13  ;;  %9132 = vmatpush1.bf16.msra.mxu1 %v9892_v16  ;;  %v9939_v13 = vcombine.high %v5967_v1, %v5971_v63  ;;  %v9941_v16 = vcombine.high %v5968_v45, %v5972_v5  ;;  %v12295_v19 = vpack.c.bf16 %v5797_v7, %v5797_v7  ;;  %v6003_v45 = vld [vmem:[%s10941_s1 + $0x560] sm:$0xff]  ;;  %v6000_v5 = vld [vmem:[%s10941_s1 + $0x548] sm:$0xff] }
 0x845   : > { %8969 = vmatprep.subr.bf16.mxu0 %v9899_v28  ;;  %9133 = vmatprep.subr.bf16.mxu1 %v9901_v47  ;;  %v5975_v28 = vld [vmem:[%s10941_s1 + $0x480] sm:$0xff]  ;;  %v5685_v33 = vcombine.low %v5662_v8, %v5666_v10  ;;  %v6004_v7 = vld [vmem:[%s10941_s1 + $0x568] sm:$0xff]  ;;  %v9962_v8 = vcombine.low %v5991_v51, %v5995_v15 }
 0x846   : > { %v5979_v47 = vld [vmem:[%s10941_s1 + $0x4a0] sm:$0xff]  ;;  %v9973_v61 = vcombine.high %v6000_v5, %v6004_v7 }
 0x847   : > { %v5699_v31 = vrot.slane %v5685_v33, %v11747_v58  ;;  %v9947_v29 = vcombine.high %v5975_v28, %v5979_v47  ;;  %v9972_v33 = vcombine.low %v6000_v5, %v6004_v7 }
 0x848   : > { %8970 = vmatpush1.bf16.msra.mxu0 %v9898_v26  ;;  %9134 = vmatpush1.bf16.msra.mxu1 %v9900_v44  ;;  %v5730_v26 = vrot.slane %v12190_v2, %v12260_v55  ;;  %v5734_v44 = vrot.slane %v12190_v2, %v12268_v62 }
 0x849   : > { %8971 = vmatprep.subr.bf16.mxu0 %v9907_v17  ;;  %9135 = vmatprep.subr.bf16.mxu1 %v9909_v49  ;;  %v5738_v17 = vrot.slane %v12190_v2, %v12278_v14  ;;  %v9938_v49 = vcombine.low %v5967_v1, %v5971_v63  ;;  %v5700_v2 = vcombine.low %v5692_v21, %v5699_v31  ;;  %v5999_v63 = vld [vmem:[%s10941_s1 + $0x540] sm:$0xff] }
 0x84a   : > { %v9963_v1 = vcombine.high %v5991_v51, %v5995_v15  ;;  %v9971_v10 = vcombine.high %v5999_v63, %v6003_v45  ;;  %v6040_v51 = vld [vmem:[%s10941_s1 + $0x688] sm:$0xff] }
 0x84b   : > { %v6044_v15 = vld [vmem:[%s10941_s1 + $0x6a8] sm:$0xff] }
 0x84c   : > { %8972 = vmatpush1.bf16.msra.mxu0 %v9906_v43  ;;  %9136 = vmatpush1.bf16.msra.mxu1 %v9908_v32  ;;  %v5756_v43 = vcombine.low %v5726_v24, %v5730_v26  ;;  %v5757_v32 = vcombine.low %v5734_v44, %v5738_v17  ;;  %v6016_v26 = vld [vmem:[%s10941_s1 + $0x5c8] sm:$0xff]  ;;  %v10012_v7 = vcombine.low %v6040_v51, %v6044_v15 }
 0x84d   : > { %8973 = vmatprep.subr.bf16.mxu0 %v9915_v34  ;;  %9137 = vmatprep.subr.bf16.mxu1 %v9917_v36  ;;  %v9949_v34 = vcombine.high %v5976_v6, %v5980_v23  ;;  %v5983_v36 = vld [vmem:[%s10941_s1 + $0x4c0] sm:$0xff]  ;;  %v6020_v44 = vld [vmem:[%s10941_s1 + $0x5e8] sm:$0xff] }
 0x84e   : > { %v5764_v35 = vrot.slane %v5756_v43, %v11747_v58  ;;  %v5771_v37 = vrot.slane %v5757_v32, %v11747_v58  ;;  %v9989_v31 = vcombine.high %v6016_v26, %v6020_v44  ;;  %v6024_v43 = vld [vmem:[%s10941_s1 + $0x608] sm:$0xff] }
 0x84f   : > { %v6028_v32 = vld [vmem:[%s10941_s1 + $0x628] sm:$0xff] }
 0x850   : > { %8974 = vmatpush1.bf16.msra.mxu0 %v9914_v40  ;;  %9138 = vmatpush1.bf16.msra.mxu1 %v9916_v48  ;;  %v9946_v40 = vcombine.low %v5975_v28, %v5979_v47  ;;  %v5704_v48 = vmul.f32 %v5700_v2, %v5632_v30  ;;  %v5772_v46 = vcombine.low %v5764_v35, %v5771_v37  ;;  %v6012_v28 = vld [vmem:[%s10941_s1 + $0x5a8] sm:$0xff]  ;;  %v6027_v30 = vld [vmem:[%s10941_s1 + $0x620] sm:$0xff] }
 0x851   : > { %8975 = vmatprep.subr.bf16.mxu0 %v9923_v42  ;;  %9139 = vmatprep.subr.bf16.mxu1 %v9925_v11  ;;  %v9948_v42 = vcombine.low %v5976_v6, %v5980_v23  ;;  %v9955_v11 = vcombine.high %v5983_v36, %v5987_v18  ;;  %v9970_v47 = vcombine.low %v5999_v63, %v6003_v45  ;;  %v6015_v6 = vld [vmem:[%s10941_s1 + $0x5c0] sm:$0xff]  ;;  %v6032_v35 = vld [vmem:[%s10941_s1 + $0x648] sm:$0xff] }
 0x852   : > { %v12323_v0 = vadd.f32 %v5772_v46, %v5704_v48  ;;  %v6019_v23 = vld [vmem:[%s10941_s1 + $0x5e0] sm:$0xff]  ;;  %v9997_v2 = vcombine.high %v6024_v43, %v6028_v32  ;;  %v6036_v37 = vld [vmem:[%s10941_s1 + $0x668] sm:$0xff]  ;;  %v9996_v48 = vcombine.low %v6024_v43, %v6028_v32 }
 0x853   : > { %v6039_v46 = vld [vmem:[%s10941_s1 + $0x680] sm:$0xff]  ;;  %v6048_v63 = vld [vmem:[%s10941_s1 + $0x6c8] sm:$0xff] }
 0x854   : > { %8976 = vmatpush1.bf16.msra.mxu0 %v9922_v57  ;;  %9140 = vmatpush1.bf16.msra.mxu1 %v9924_v50  ;;  %v5992_v57 = vld [vmem:[%s10941_s1 + $0x508] sm:$0xff]  ;;  %v9954_v50 = vcombine.low %v5983_v36, %v5987_v18  ;;  %v9988_v36 = vcombine.low %v6016_v26, %v6020_v44 }
 0x855   : > { %8986 = vmatprep.subr.bf16.mxu0 %v9931_v53  ;;  %9150 = vmatprep.subr.bf16.mxu1 %v9933_v22  ;;  %v9956_v53 = vcombine.low %v5984_v4, %v5988_v39  ;;  %v9965_v22 = vcombine.high %v5992_v57, %v5996_v27  ;;  %v6031_v4 = vld [vmem:[%s10941_s1 + $0x640] sm:$0xff]  ;;  %v6052_v45 = vld [vmem:[%s10941_s1 + $0x6e8] sm:$0xff] }
 0x856   : > { %v6035_v39 = vld [vmem:[%s10941_s1 + $0x660] sm:$0xff] }
 0x857   : > { %8978 = vmatmul.mubr.bf16.vlgmr.msra.gmra.mrb[0].mxu0 %v12289_v9  ;;  %9142 = vmatmul.mubr.bf16.vlgmr.msra.gmra.mrb[0].mxu1 %v12289_v9 }
 0x858   : > { %8987 = vmatpush1.bf16.msra.mxu0 %v9930_v38  ;;  %9151 = vmatpush1.bf16.msra.mxu1 %v9932_v12  ;;  %v9964_v38 = vcombine.low %v5992_v57, %v5996_v27  ;;  %v6007_v12 = vld [vmem:[%s10941_s1 + $0x580] sm:$0xff]  ;;  %v10002_v57 = vcombine.low %v6031_v4, %v6035_v39  ;;  %v10004_v27 = vcombine.low %v6032_v35, %v6036_v37 }
 0x859   : > { %8988 = vmatprep.subr.bf16.mxu0 %v9939_v13  ;;  %9152 = vmatprep.subr.bf16.mxu1 %v9941_v16  ;;  %v6011_v13 = vld [vmem:[%s10941_s1 + $0x5a0] sm:$0xff]  ;;  %v6008_v16 = vld [vmem:[%s10941_s1 + $0x588] sm:$0xff] }
 0x85a   : > { %9018 = vmatprep.mubr.bf16.mxu0 %v12295_v19  ;;  %9182 = vmatprep.mubr.bf16.mxu1 %v12295_v19  ;;  %v9979_v21 = vcombine.high %v6007_v12, %v6011_v13  ;;  %v9981_v24 = vcombine.high %v6008_v16, %v6012_v28  ;;  %v9978_v17 = vcombine.low %v6007_v12, %v6011_v13  ;;  %v6056_v12 = vld [vmem:[%s10941_s1 + $0x708] sm:$0xff] }
 0x85b   : > { %v6060_v13 = vld [vmem:[%s10941_s1 + $0x728] sm:$0xff] }
 0x85c   : > { %8989 = vmatpush1.bf16.msra.mxu0 %v9938_v49  ;;  %9153 = vmatpush1.bf16.msra.mxu1 %v9940_v25  ;;  %v9980_v49 = vcombine.low %v6008_v16, %v6012_v28  ;;  %v9987_v25 = vcombine.high %v6015_v6, %v6019_v23  ;;  %v10020_v28 = vcombine.low %v6048_v63, %v6052_v45 }
 0x85d   : > { %8990 = vmatprep.subr.bf16.mxu0 %v9947_v29  ;;  %9154 = vmatprep.subr.bf16.mxu1 %v9949_v34  ;;  %v6023_v29 = vld [vmem:[%s10941_s1 + $0x600] sm:$0xff]  ;;  %v9986_v34 = vcombine.low %v6015_v6, %v6019_v23  ;;  %v6064_v6 = vld [vmem:[%s10941_s1 + $0x748] sm:$0xff]  ;;  %v10028_v44 = vcombine.low %v6056_v12, %v6060_v13 }
 0x85e   : > { %v9995_v18 = vcombine.high %v6023_v29, %v6027_v30  ;;  %v6068_v23 = vld [vmem:[%s10941_s1 + $0x768] sm:$0xff] }
 0x85f   : > { %v10036_v32 = vcombine.low %v6064_v6, %v6068_v23 }
 0x860   : > { %8991 = vmatpush1.bf16.msra.mxu0 %v9946_v40  ;;  %9155 = vmatpush1.bf16.msra.mxu1 %v9948_v42  ;;  %v9994_v40 = vcombine.low %v6023_v29, %v6027_v30  ;;  %v10003_v42 = vcombine.high %v6031_v4, %v6035_v39  ;;  %v6072_v29 = vld [vmem:[%s10941_s1 + $0x788] sm:$0xff]  ;;  %v12368_v4 = vmax.f32 %v12323_v0, 0.0 }
 0x861   : > { %8992 = vmatprep.subr.bf16.mxu0 %v9955_v11  ;;  %9156 = vmatprep.subr.bf16.mxu1 %v9957_v52  ;;  %v10005_v11 = vcombine.high %v6032_v35, %v6036_v37  ;;  %v6043_v52 = vld [vmem:[%s10941_s1 + $0x6a0] sm:$0xff]  ;;  %v6076_v30 = vld [vmem:[%s10941_s1 + $0x7a8] sm:$0xff] }
 0x862   : > { %v10010_v5 = vcombine.low %v6039_v46, %v6043_v52  ;;  %v6080_v39 = vld [vmem:[%s10941_s1 + $0x7c8] sm:$0xff] }
 0x863   : > { %v6084_v35 = vld [vmem:[%s10941_s1 + $0x7e8] sm:$0xff] }
 0x864   : > { %8993 = vmatpush1.bf16.msra.mxu0 %v9954_v50  ;;  %9157 = vmatpush1.bf16.msra.mxu1 %v9956_v53  ;;  %v10011_v50 = vcombine.high %v6039_v46, %v6043_v52  ;;  %v10013_v53 = vcombine.high %v6040_v51, %v6044_v15  ;;  %v6091_v46 = vld [vmem:[%s10941_s1 + $0x820] sm:$0xff]  ;;  %v12376_v52 = vrot.slane %v12368_v4, %v11747_v58  ;;  %v6088_v0 = vld [vmem:[%s10941_s1 + $0x808] sm:$0xff] }
 0x865   : > { %8994 = vmatprep.subr.bf16.mxu0 %v9963_v1  ;;  %9158 = vmatprep.subr.bf16.mxu1 %v9965_v22  ;;  %v6047_v1 = vld [vmem:[%s10941_s1 + $0x6c0] sm:$0xff]  ;;  %v6092_v51 = vld [vmem:[%s10941_s1 + $0x828] sm:$0xff] }
 0x866   : > { %v6051_v22 = vld [vmem:[%s10941_s1 + $0x6e0] sm:$0xff] }
 0x867   : > { %v10018_v16 = vcombine.low %v6047_v1, %v6051_v22 }
 0x868   : > { %8995 = vmatpush1.bf16.msra.mxu0 %v9962_v8  ;;  %9159 = vmatpush1.bf16.msra.mxu1 %v9964_v38  ;;  %v10019_v8 = vcombine.high %v6047_v1, %v6051_v22  ;;  %v10021_v38 = vcombine.high %v6048_v63, %v6052_v45  ;;  %v6099_v1 = vld [vmem:[%s10941_s1 + $0x860] sm:$0xff]  ;;  %v5813_v22 = vcombine.high %v12376_v52, %v12376_v52  ;;  %v6096_v45 = vld [vmem:[%s10941_s1 + $0x848] sm:$0xff] }
 0x869   : > { %8996 = vmatprep.subr.bf16.mxu0 %v9971_v10  ;;  %9160 = vmatprep.subr.bf16.mxu1 %v9973_v61  ;;  %v6055_v10 = vld [vmem:[%s10941_s1 + $0x700] sm:$0xff]  ;;  %v12386_v63 = vpack.c.bf16 %v12265_v20, %v12265_v20  ;;  %v6104_v20 = vld [vmem:[%s10941_s1 + $0x888] sm:$0xff] }
 0x86a   : > { %v6059_v61 = vld [vmem:[%s10941_s1 + $0x720] sm:$0xff] }
 0x86b   : > { %v10026_v26 = vcombine.low %v6055_v10, %v6059_v61 }
 0x86c   : > { %8997 = vmatpush1.bf16.msra.mxu0 %v9970_v47  ;;  %9161 = vmatpush1.bf16.msra.mxu1 %v9972_v33  ;;  %v10027_v47 = vcombine.high %v6055_v10, %v6059_v61  ;;  %v10029_v33 = vcombine.high %v6056_v12, %v6060_v13  ;;  %v6103_v61 = vld [vmem:[%s10941_s1 + $0x880] sm:$0xff]  ;;  %v12392_v13 = vpack.c.bf16 %v5813_v22, %v5813_v22 }
 0x86d   : > { %8998 = vmatprep.subr.bf16.mxu0 %v9979_v21  ;;  %9162 = vmatprep.subr.bf16.mxu1 %v9981_v24  ;;  %v6063_v21 = vld [vmem:[%s10941_s1 + $0x740] sm:$0xff] }
 0x86e   : > { %v6067_v24 = vld [vmem:[%s10941_s1 + $0x760] sm:$0xff] }
 0x86f   : > { %v10034_v43 = vcombine.low %v6063_v21, %v6067_v24  ;;  %v6107_v12 = vld [vmem:[%s10941_s1 + $0x8a0] sm:$0xff] }
 0x870   : > { %8999 = vmatpush1.bf16.msra.mxu0 %v9978_v17  ;;  %9163 = vmatpush1.bf16.msra.mxu1 %v9980_v49  ;;  %v10035_v17 = vcombine.high %v6063_v21, %v6067_v24  ;;  %v10037_v49 = vcombine.high %v6064_v6, %v6068_v23  ;;  %v6111_v24 = vld [vmem:[%s10941_s1 + $0x8c0] sm:$0xff]  ;;  %v6112_v23 = vld [vmem:[%s10941_s1 + $0x8c8] sm:$0xff] }
 0x871   : > { %9000 = vmatprep.subr.bf16.mxu0 %v9987_v25  ;;  %9164 = vmatprep.subr.bf16.mxu1 %v9989_v31  ;;  %v6071_v25 = vld [vmem:[%s10941_s1 + $0x780] sm:$0xff] }
 0x872   : > { %v6075_v31 = vld [vmem:[%s10941_s1 + $0x7a0] sm:$0xff] }
 0x873   : > { %v10042_v37 = vcombine.low %v6071_v25, %v6075_v31  ;;  %v6115_v6 = vld [vmem:[%s10941_s1 + $0x8e0] sm:$0xff] }
 0x874   : > { %9001 = vmatpush1.bf16.msra.mxu0 %v9986_v34  ;;  %9165 = vmatpush1.bf16.msra.mxu1 %v9988_v36  ;;  %v10043_v34 = vcombine.high %v6071_v25, %v6075_v31  ;;  %v10045_v36 = vcombine.high %v6072_v29, %v6076_v30  ;;  %v6119_v31 = vld [vmem:[%s10941_s1 + $0x900] sm:$0xff] }
 0x875   : > { %9002 = vmatprep.subr.bf16.mxu0 %v9995_v18  ;;  %9166 = vmatprep.subr.bf16.mxu1 %v9997_v2  ;;  %v6079_v18 = vld [vmem:[%s10941_s1 + $0x7c0] sm:$0xff] }
 0x876   : > { %v6083_v2 = vld [vmem:[%s10941_s1 + $0x7e0] sm:$0xff] }
 0x877   : > { %v10050_v15 = vcombine.low %v6079_v18, %v6083_v2  ;;  %v6147_v22 = vld [vmem:[%s10941_s1 + $0x9e0] sm:$0xff] }
 0x878   : > { %9003 = vmatpush1.bf16.msra.mxu0 %v9994_v40  ;;  %9167 = vmatpush1.bf16.msra.mxu1 %v9996_v48  ;;  %v10044_v40 = vcombine.low %v6072_v29, %v6076_v30  ;;  %v10051_v48 = vcombine.high %v6079_v18, %v6083_v2  ;;  %v6123_v29 = vld [vmem:[%s10941_s1 + $0x920] sm:$0xff]  ;;  %v6120_v30 = vld [vmem:[%s10941_s1 + $0x908] sm:$0xff] }
 0x879   : > { %9004 = vmatprep.subr.bf16.mxu0 %v10003_v42  ;;  %9168 = vmatprep.subr.bf16.mxu1 %v10005_v11  ;;  %v10053_v42 = vcombine.high %v6080_v39, %v6084_v35  ;;  %v6087_v11 = vld [vmem:[%s10941_s1 + $0x800] sm:$0xff] }
 0x87a   : > { %v6127_v2 = vld [vmem:[%s10941_s1 + $0x940] sm:$0xff] }
 0x87c   : > { %9005 = vmatpush1.bf16.msra.mxu0 %v10002_v57  ;;  %9169 = vmatpush1.bf16.msra.mxu1 %v10004_v27  ;;  %v10052_v57 = vcombine.low %v6080_v39, %v6084_v35  ;;  %v10059_v27 = vcombine.high %v6087_v11, %v6091_v46  ;;  %v6131_v39 = vld [vmem:[%s10941_s1 + $0x960] sm:$0xff]  ;;  %v6128_v35 = vld [vmem:[%s10941_s1 + $0x948] sm:$0xff] }
 0x87d   : > { %9006 = vmatprep.subr.bf16.mxu0 %v10011_v50  ;;  %9170 = vmatprep.subr.bf16.mxu1 %v10013_v53  ;;  %v10061_v50 = vcombine.high %v6088_v0, %v6092_v51  ;;  %v6095_v53 = vld [vmem:[%s10941_s1 + $0x840] sm:$0xff] }
 0x880   : > { %9007 = vmatpush1.bf16.msra.mxu0 %v10010_v5  ;;  %9171 = vmatpush1.bf16.msra.mxu1 %v10012_v7  ;;  %v6100_v5 = vld [vmem:[%s10941_s1 + $0x868] sm:$0xff]  ;;  %v10058_v7 = vcombine.low %v6087_v11, %v6091_v46  ;;  %v6135_v46 = vld [vmem:[%s10941_s1 + $0x980] sm:$0xff] }
 0x881   : > { %9008 = vmatprep.subr.bf16.mxu0 %v10019_v8  ;;  %9172 = vmatprep.subr.bf16.mxu1 %v10021_v38  ;;  %v10060_v8 = vcombine.low %v6088_v0, %v6092_v51  ;;  %v10067_v38 = vcombine.high %v6095_v53, %v6099_v1  ;;  %v10069_v10 = vcombine.high %v6096_v45, %v6100_v5  ;;  %v6139_v0 = vld [vmem:[%s10941_s1 + $0x9a0] sm:$0xff]  ;;  %v6136_v51 = vld [vmem:[%s10941_s1 + $0x988] sm:$0xff] }
 0x884   : > { %9009 = vmatpush1.bf16.msra.mxu0 %v10018_v16  ;;  %9173 = vmatpush1.bf16.msra.mxu1 %v10020_v28  ;;  %v6108_v16 = vld [vmem:[%s10941_s1 + $0x8a8] sm:$0xff]  ;;  %v10066_v28 = vcombine.low %v6095_v53, %v6099_v1  ;;  %v6143_v1 = vld [vmem:[%s10941_s1 + $0x9c0] sm:$0xff] }
 0x885   : > { %9010 = vmatprep.subr.bf16.mxu0 %v10027_v47  ;;  %9174 = vmatprep.subr.bf16.mxu1 %v10029_v33  ;;  %v10068_v47 = vcombine.low %v6096_v45, %v6100_v5  ;;  %v10075_v33 = vcombine.high %v6103_v61, %v6107_v12  ;;  %v10077_v21 = vcombine.high %v6104_v20, %v6108_v16  ;;  %v6144_v45 = vld [vmem:[%s10941_s1 + $0x9c8] sm:$0xff] }
 0x886   : > { %v6148_v5 = vld [vmem:[%s10941_s1 + $0x9e8] sm:$0xff] }
 0x888   : > { %9011 = vmatpush1.bf16.msra.mxu0 %v10026_v26  ;;  %9175 = vmatpush1.bf16.msra.mxu1 %v10028_v44  ;;  %v6116_v26 = vld [vmem:[%s10941_s1 + $0x8e8] sm:$0xff]  ;;  %v10074_v44 = vcombine.low %v6103_v61, %v6107_v12  ;;  %v6151_v61 = vld [vmem:[%s10941_s1 + $0xa00] sm:$0xff] }
 0x889   : > { %9012 = vmatprep.subr.bf16.mxu0 %v10035_v17  ;;  %9176 = vmatprep.subr.bf16.mxu1 %v10037_v49  ;;  %v10076_v17 = vcombine.low %v6104_v20, %v6108_v16  ;;  %v10083_v49 = vcombine.high %v6111_v24, %v6115_v6  ;;  %v10085_v25 = vcombine.high %v6112_v23, %v6116_v26  ;;  %v6155_v12 = vld [vmem:[%s10941_s1 + $0xa20] sm:$0xff]  ;;  %v6152_v20 = vld [vmem:[%s10941_s1 + $0xa08] sm:$0xff] }
 0x88a   : > { %v6156_v16 = vld [vmem:[%s10941_s1 + $0xa28] sm:$0xff] }
 0x88c   : > { %9013 = vmatpush1.bf16.msra.mxu0 %v10034_v43  ;;  %9177 = vmatpush1.bf16.msra.mxu1 %v10036_v32  ;;  %v6124_v43 = vld [vmem:[%s10941_s1 + $0x928] sm:$0xff]  ;;  %v10082_v32 = vcombine.low %v6111_v24, %v6115_v6  ;;  %v6159_v24 = vld [vmem:[%s10941_s1 + $0xa40] sm:$0xff] }
 0x88d   : > { %9014 = vmatprep.subr.bf16.mxu0 %v10043_v34  ;;  %9178 = vmatprep.subr.bf16.mxu1 %v10045_v36  ;;  %v10084_v34 = vcombine.low %v6112_v23, %v6116_v26  ;;  %v10091_v36 = vcombine.high %v6119_v31, %v6123_v29  ;;  %v10093_v18 = vcombine.high %v6120_v30, %v6124_v43  ;;  %v6163_v6 = vld [vmem:[%s10941_s1 + $0xa60] sm:$0xff]  ;;  %v6160_v23 = vld [vmem:[%s10941_s1 + $0xa48] sm:$0xff] }
 0x88e   : > { %v6164_v26 = vld [vmem:[%s10941_s1 + $0xa68] sm:$0xff] }
 0x890   : > { %9015 = vmatpush1.bf16.msra.mxu0 %v10042_v37  ;;  %9179 = vmatpush1.bf16.msra.mxu1 %v10044_v40  ;;  %v6132_v37 = vld [vmem:[%s10941_s1 + $0x968] sm:$0xff]  ;;  %v10090_v40 = vcombine.low %v6119_v31, %v6123_v29  ;;  %v6167_v31 = vld [vmem:[%s10941_s1 + $0xa80] sm:$0xff] }
 0x891   : > { %9016 = vmatprep.subr.bf16.mxu0 %v10051_v48  ;;  %9180 = vmatprep.subr.bf16.mxu1 %v10053_v42  ;;  %v10092_v48 = vcombine.low %v6120_v30, %v6124_v43  ;;  %v10099_v42 = vcombine.high %v6127_v2, %v6131_v39  ;;  %v10101_v11 = vcombine.high %v6128_v35, %v6132_v37  ;;  %v6171_v29 = vld [vmem:[%s10941_s1 + $0xaa0] sm:$0xff]  ;;  %v6168_v30 = vld [vmem:[%s10941_s1 + $0xa88] sm:$0xff] }
 0x892   : > { %v6172_v43 = vld [vmem:[%s10941_s1 + $0xaa8] sm:$0xff] }
 0x894   : > { %9017 = vmatpush1.bf16.msra.mxu0 %v10050_v15  ;;  %9181 = vmatpush1.bf16.msra.mxu1 %v10052_v57  ;;  %v6140_v15 = vld [vmem:[%s10941_s1 + $0x9a8] sm:$0xff]  ;;  %v10098_v57 = vcombine.low %v6127_v2, %v6131_v39  ;;  %v6175_v2 = vld [vmem:[%s10941_s1 + $0xac0] sm:$0xff] }
 0x895   : > { %9027 = vmatprep.subr.bf16.mxu0 %v10059_v27  ;;  %9191 = vmatprep.subr.bf16.mxu1 %v10061_v50  ;;  %v10100_v27 = vcombine.low %v6128_v35, %v6132_v37  ;;  %v10107_v50 = vcombine.high %v6135_v46, %v6139_v0  ;;  %v10109_v53 = vcombine.high %v6136_v51, %v6140_v15  ;;  %v6179_v39 = vld [vmem:[%s10941_s1 + $0xae0] sm:$0xff]  ;;  %v6176_v35 = vld [vmem:[%s10941_s1 + $0xac8] sm:$0xff] }
 0x896   : > { %v6180_v37 = vld [vmem:[%s10941_s1 + $0xae8] sm:$0xff] }
 0x897   : > { %9019 = vmatmul.mubr.bf16.vlgmr.msra.gmra.mrb[0].mxu0 %v12386_v63  ;;  %9183 = vmatmul.mubr.bf16.vlgmr.msra.gmra.mrb[0].mxu1 %v12386_v63 }
 0x898   : > { %9028 = vmatpush1.bf16.msra.mxu0 %v10058_v7  ;;  %9192 = vmatpush1.bf16.msra.mxu1 %v10060_v8  ;;  %v10106_v7 = vcombine.low %v6135_v46, %v6139_v0  ;;  %v10108_v8 = vcombine.low %v6136_v51, %v6140_v15  ;;  %v6183_v46 = vld [vmem:[%s10941_s1 + $0xb00] sm:$0xff]  ;;  %v6184_v51 = vld [vmem:[%s10941_s1 + $0xb08] sm:$0xff] }
 0x899   : > { %9029 = vmatprep.subr.bf16.mxu0 %v10067_v38  ;;  %9193 = vmatprep.subr.bf16.mxu1 %v10069_v10  ;;  %v10115_v38 = vcombine.high %v6143_v1, %v6147_v22  ;;  %v10117_v10 = vcombine.high %v6144_v45, %v6148_v5  ;;  %v6187_v0 = vld [vmem:[%s10941_s1 + $0xb20] sm:$0xff]  ;;  %v6188_v15 = vld [vmem:[%s10941_s1 + $0xb28] sm:$0xff] }
 0x89a   : > { %9059 = vmatprep.mubr.bf16.mxu0 %v12392_v13  ;;  %9223 = vmatprep.mubr.bf16.mxu1 %v12392_v13 }
 0x89c   : > { %9030 = vmatpush1.bf16.msra.mxu0 %v10066_v28  ;;  %9194 = vmatpush1.bf16.msra.mxu1 %v10068_v47  ;;  %v10114_v28 = vcombine.low %v6143_v1, %v6147_v22  ;;  %v10116_v47 = vcombine.low %v6144_v45, %v6148_v5  ;;  %v6191_v1 = vld [vmem:[%s10941_s1 + $0xb40] sm:$0xff]  ;;  %v6192_v45 = vld [vmem:[%s10941_s1 + $0xb48] sm:$0xff] }
 0x89d   : > { %9031 = vmatprep.subr.bf16.mxu0 %v10075_v33  ;;  %9195 = vmatprep.subr.bf16.mxu1 %v10077_v21  ;;  %v10123_v33 = vcombine.high %v6151_v61, %v6155_v12  ;;  %v10125_v21 = vcombine.high %v6152_v20, %v6156_v16  ;;  %v6195_v22 = vld [vmem:[%s10941_s1 + $0xb60] sm:$0xff]  ;;  %v6196_v5 = vld [vmem:[%s10941_s1 + $0xb68] sm:$0xff] }
 0x8a0   : > { %9032 = vmatpush1.bf16.msra.mxu0 %v10074_v44  ;;  %9196 = vmatpush1.bf16.msra.mxu1 %v10076_v17  ;;  %v10122_v44 = vcombine.low %v6151_v61, %v6155_v12  ;;  %v10124_v17 = vcombine.low %v6152_v20, %v6156_v16  ;;  %v6199_v61 = vld [vmem:[%s10941_s1 + $0xb80] sm:$0xff]  ;;  %v6200_v20 = vld [vmem:[%s10941_s1 + $0xb88] sm:$0xff] }
 0x8a1   : > { %9033 = vmatprep.subr.bf16.mxu0 %v10083_v49  ;;  %9197 = vmatprep.subr.bf16.mxu1 %v10085_v25  ;;  %v10131_v49 = vcombine.high %v6159_v24, %v6163_v6  ;;  %v10133_v25 = vcombine.high %v6160_v23, %v6164_v26  ;;  %v6203_v12 = vld [vmem:[%s10941_s1 + $0xba0] sm:$0xff]  ;;  %v6204_v16 = vld [vmem:[%s10941_s1 + $0xba8] sm:$0xff] }
 0x8a4   : > { %9034 = vmatpush1.bf16.msra.mxu0 %v10082_v32  ;;  %9198 = vmatpush1.bf16.msra.mxu1 %v10084_v34  ;;  %v10130_v32 = vcombine.low %v6159_v24, %v6163_v6  ;;  %v10132_v34 = vcombine.low %v6160_v23, %v6164_v26  ;;  %v6207_v24 = vld [vmem:[%s10941_s1 + $0xbc0] sm:$0xff]  ;;  %v5798_v23 = vcombine.high %v12368_v4, %v12368_v4  ;;  %v6208_v26 = vld [vmem:[%s10941_s1 + $0xbc8] sm:$0xff] }
 0x8a5   : > { %9035 = vmatprep.subr.bf16.mxu0 %v10091_v36  ;;  %9199 = vmatprep.subr.bf16.mxu1 %v10093_v18  ;;  %v10139_v36 = vcombine.high %v6167_v31, %v6171_v29  ;;  %v10141_v18 = vcombine.high %v6168_v30, %v6172_v43  ;;  %v6211_v6 = vld [vmem:[%s10941_s1 + $0xbe0] sm:$0xff]  ;;  %v6216_v4 = vld [vmem:[%s10941_s1 + $0xc08] sm:$0xff] }
 0x8a8   : > { %9036 = vmatpush1.bf16.msra.mxu0 %v10090_v40  ;;  %9200 = vmatpush1.bf16.msra.mxu1 %v10092_v48  ;;  %v10138_v40 = vcombine.low %v6167_v31, %v6171_v29  ;;  %v10140_v48 = vcombine.low %v6168_v30, %v6172_v43  ;;  %v6215_v29 = vld [vmem:[%s10941_s1 + $0xc00] sm:$0xff]  ;;  %v12457_v43 = vrot.slane %v5798_v23, %v11747_v58 }
 0x8a9   : > { %9037 = vmatprep.subr.bf16.mxu0 %v10099_v42  ;;  %9201 = vmatprep.subr.bf16.mxu1 %v10101_v11  ;;  %v10147_v42 = vcombine.high %v6175_v2, %v6179_v39  ;;  %v10149_v11 = vcombine.high %v6176_v35, %v6180_v37  ;;  %v6219_v30 = vld [vmem:[%s10941_s1 + $0xc20] sm:$0xff] }
 0x8ac   : > { %9038 = vmatpush1.bf16.msra.mxu0 %v10098_v57  ;;  %9202 = vmatpush1.bf16.msra.mxu1 %v10100_v27  ;;  %v10146_v57 = vcombine.low %v6175_v2, %v6179_v39  ;;  %v10148_v27 = vcombine.low %v6176_v35, %v6180_v37  ;;  %v6223_v39 = vld [vmem:[%s10941_s1 + $0xc40] sm:$0xff]  ;;  %v5814_v37 = vcombine.high %v12457_v43, %v12457_v43 }
 0x8ad   : > { %9039 = vmatprep.subr.bf16.mxu0 %v10107_v50  ;;  %9203 = vmatprep.subr.bf16.mxu1 %v10109_v53  ;;  %v10155_v50 = vcombine.high %v6183_v46, %v6187_v0  ;;  %v10157_v53 = vcombine.high %v6184_v51, %v6188_v15  ;;  %v6227_v35 = vld [vmem:[%s10941_s1 + $0xc60] sm:$0xff] }
 0x8b0   : > { %9040 = vmatpush1.bf16.msra.mxu0 %v10106_v7  ;;  %9204 = vmatpush1.bf16.msra.mxu1 %v10108_v8  ;;  %v10154_v7 = vcombine.low %v6183_v46, %v6187_v0  ;;  %v10156_v8 = vcombine.low %v6184_v51, %v6188_v15  ;;  %v10195_v0 = vcombine.high %v6223_v39, %v6227_v35  ;;  %v6231_v15 = vld [vmem:[%s10941_s1 + $0xc80] sm:$0xff] }
 0x8b1   : > { %9041 = vmatprep.subr.bf16.mxu0 %v10115_v38  ;;  %9205 = vmatprep.subr.bf16.mxu1 %v10117_v10  ;;  %v10163_v38 = vcombine.high %v6191_v1, %v6195_v22  ;;  %v10165_v10 = vcombine.high %v6192_v45, %v6196_v5 }
 0x8b4   : > { %9042 = vmatpush1.bf16.msra.mxu0 %v10114_v28  ;;  %9206 = vmatpush1.bf16.msra.mxu1 %v10116_v47  ;;  %v10162_v28 = vcombine.low %v6191_v1, %v6195_v22  ;;  %v10164_v47 = vcombine.low %v6192_v45, %v6196_v5  ;;  %v6239_v5 = vld [vmem:[%s10941_s1 + $0xcc0] sm:$0xff] }
 0x8b5   : > { %9043 = vmatprep.subr.bf16.mxu0 %v10123_v33  ;;  %9207 = vmatprep.subr.bf16.mxu1 %v10125_v21  ;;  %v10171_v33 = vcombine.high %v6199_v61, %v6203_v12  ;;  %v10173_v21 = vcombine.high %v6200_v20, %v6204_v16 }
 0x8b8   : > { %9044 = vmatpush1.bf16.msra.mxu0 %v10122_v44  ;;  %9208 = vmatpush1.bf16.msra.mxu1 %v10124_v17  ;;  %v6212_v44 = vld [vmem:[%s10941_s1 + $0xbe8] sm:$0xff]  ;;  %v10170_v17 = vcombine.low %v6199_v61, %v6203_v12 }
 0x8b9   : > { %9045 = vmatprep.subr.bf16.mxu0 %v10131_v49  ;;  %9209 = vmatprep.subr.bf16.mxu1 %v10133_v25  ;;  %v10172_v49 = vcombine.low %v6200_v20, %v6204_v16  ;;  %v10179_v25 = vcombine.high %v6207_v24, %v6211_v6  ;;  %v10181_v31 = vcombine.high %v6208_v26, %v6212_v44  ;;  %v6247_v16 = vld [vmem:[%s10941_s1 + $0xd00] sm:$0xff] }
 0x8bc   : > { %9046 = vmatpush1.bf16.msra.mxu0 %v10130_v32  ;;  %9210 = vmatpush1.bf16.msra.mxu1 %v10132_v34  ;;  %v6220_v32 = vld [vmem:[%s10941_s1 + $0xc28] sm:$0xff]  ;;  %v10178_v34 = vcombine.low %v6207_v24, %v6211_v6 }
 0x8bd   : > { %9047 = vmatprep.subr.bf16.mxu0 %v10139_v36  ;;  %9211 = vmatprep.subr.bf16.mxu1 %v10141_v18  ;;  %v10180_v36 = vcombine.low %v6208_v26, %v6212_v44  ;;  %v10187_v18 = vcombine.high %v6215_v29, %v6219_v30  ;;  %v10189_v2 = vcombine.high %v6216_v4, %v6220_v32  ;;  %v6255_v26 = vld [vmem:[%s10941_s1 + $0xd40] sm:$0xff] }
 0x8be   : > { %v10188_v46 = vcombine.low %v6216_v4, %v6220_v32  ;;  %v6259_v44 = vld [vmem:[%s10941_s1 + $0xd60] sm:$0xff] }
 0x8bf   : > { %v6263_v4 = vld [vmem:[%s10941_s1 + $0xd80] sm:$0xff] }
 0x8c0   : > { %9048 = vmatpush1.bf16.msra.mxu0 %v10138_v40  ;;  %9212 = vmatpush1.bf16.msra.mxu1 %v10140_v48  ;;  %v12467_v40 = vpack.c.bf16 %v12376_v52, %v12376_v52  ;;  %v6224_v48 = vld [vmem:[%s10941_s1 + $0xc48] sm:$0xff]  ;;  %v6267_v32 = vld [vmem:[%s10941_s1 + $0xda0] sm:$0xff] }
 0x8c1   : > { %9049 = vmatprep.subr.bf16.mxu0 %v10147_v42  ;;  %9213 = vmatprep.subr.bf16.mxu1 %v10149_v11  ;;  %v6228_v42 = vld [vmem:[%s10941_s1 + $0xc68] sm:$0xff]  ;;  %v10186_v11 = vcombine.low %v6215_v29, %v6219_v30  ;;  %v10227_v29 = vcombine.high %v6255_v26, %v6259_v44 }
 0x8c2   : > { %v10197_v51 = vcombine.high %v6224_v48, %v6228_v42  ;;  %v6232_v52 = vld [vmem:[%s10941_s1 + $0xc88] sm:$0xff]  ;;  %v10196_v1 = vcombine.low %v6224_v48, %v6228_v42  ;;  %v6275_v48 = vld [vmem:[%s10941_s1 + $0xde0] sm:$0xff] }
 0x8c3   : > { %v6272_v42 = vld [vmem:[%s10941_s1 + $0xdc8] sm:$0xff] }
 0x8c4   : > { %9050 = vmatpush1.bf16.msra.mxu0 %v10146_v57  ;;  %9214 = vmatpush1.bf16.msra.mxu1 %v10148_v27  ;;  %v6235_v57 = vld [vmem:[%s10941_s1 + $0xca0] sm:$0xff]  ;;  %v12473_v27 = vpack.c.bf16 %v5814_v37, %v5814_v37 }
 0x8c5   : > { %9051 = vmatprep.subr.bf16.mxu0 %v10155_v50  ;;  %9215 = vmatprep.subr.bf16.mxu1 %v10157_v53  ;;  %v6236_v50 = vld [vmem:[%s10941_s1 + $0xca8] sm:$0xff]  ;;  %v10194_v53 = vcombine.low %v6223_v39, %v6227_v35  ;;  %v10203_v22 = vcombine.high %v6231_v15, %v6235_v57  ;;  %v10235_v39 = vcombine.high %v6263_v4, %v6267_v32  ;;  %v6271_v37 = vld [vmem:[%s10941_s1 + $0xdc0] sm:$0xff] }
 0x8c6   : > { %v10205_v45 = vcombine.high %v6232_v52, %v6236_v50  ;;  %v10204_v61 = vcombine.low %v6232_v52, %v6236_v50  ;;  %v6283_v52 = vld [vmem:[%s10941_s1 + $0xe20] sm:$0xff]  ;;  %v6280_v50 = vld [vmem:[%s10941_s1 + $0xe08] sm:$0xff] }
 0x8c8   : > { %9052 = vmatpush1.bf16.msra.mxu0 %v10154_v7  ;;  %9216 = vmatpush1.bf16.msra.mxu1 %v10156_v8  ;;  %v6243_v7 = vld [vmem:[%s10941_s1 + $0xce0] sm:$0xff]  ;;  %v6240_v8 = vld [vmem:[%s10941_s1 + $0xcc8] sm:$0xff] }
 0x8c9   : > { %9053 = vmatprep.subr.bf16.mxu0 %v10163_v38  ;;  %9217 = vmatprep.subr.bf16.mxu1 %v10165_v10  ;;  %v6244_v38 = vld [vmem:[%s10941_s1 + $0xce8] sm:$0xff]  ;;  %v10202_v10 = vcombine.low %v6231_v15, %v6235_v57  ;;  %v10211_v12 = vcombine.high %v6239_v5, %v6243_v7  ;;  %v6279_v57 = vld [vmem:[%s10941_s1 + $0xe00] sm:$0xff] }
 0x8ca   : > { %v10213_v20 = vcombine.high %v6240_v8, %v6244_v38  ;;  %v10212_v24 = vcombine.low %v6240_v8, %v6244_v38  ;;  %v6291_v8 = vld [vmem:[%s10941_s1 + $0xe60] sm:$0xff]  ;;  %v6288_v38 = vld [vmem:[%s10941_s1 + $0xe48] sm:$0xff] }
 0x8cc   : > { %9054 = vmatpush1.bf16.msra.mxu0 %v10162_v28  ;;  %9218 = vmatpush1.bf16.msra.mxu1 %v10164_v47  ;;  %v6251_v28 = vld [vmem:[%s10941_s1 + $0xd20] sm:$0xff]  ;;  %v6248_v47 = vld [vmem:[%s10941_s1 + $0xd08] sm:$0xff] }
 0x8cd   : > { %9055 = vmatprep.subr.bf16.mxu0 %v10171_v33  ;;  %9219 = vmatprep.subr.bf16.mxu1 %v10173_v21  ;;  %v6252_v33 = vld [vmem:[%s10941_s1 + $0xd28] sm:$0xff]  ;;  %v10210_v21 = vcombine.low %v6239_v5, %v6243_v7  ;;  %v10219_v6 = vcombine.high %v6247_v16, %v6251_v28  ;;  %v6287_v7 = vld [vmem:[%s10941_s1 + $0xe40] sm:$0xff] }
 0x8ce   : > { %v10221_v23 = vcombine.high %v6248_v47, %v6252_v33 }
 0x8d0   : > { %9056 = vmatpush1.bf16.msra.mxu0 %v10170_v17  ;;  %9220 = vmatpush1.bf16.msra.mxu1 %v10172_v49  ;;  %v6256_v17 = vld [vmem:[%s10941_s1 + $0xd48] sm:$0xff] }
 0x8d1   : > { %9057 = vmatprep.subr.bf16.mxu0 %v10179_v25  ;;  %9221 = vmatprep.subr.bf16.mxu1 %v10181_v31  ;;  %v6260_v49 = vld [vmem:[%s10941_s1 + $0xd68] sm:$0xff]  ;;  %v10218_v25 = vcombine.low %v6247_v16, %v6251_v28  ;;  %v10220_v31 = vcombine.low %v6248_v47, %v6252_v33  ;;  %v6295_v28 = vld [vmem:[%s10941_s1 + $0xe80] sm:$0xff] }
 0x8d2   : > { %v10229_v30 = vcombine.high %v6256_v17, %v6260_v49  ;;  %v6299_v47 = vld [vmem:[%s10941_s1 + $0xea0] sm:$0xff]  ;;  %v6296_v33 = vld [vmem:[%s10941_s1 + $0xe88] sm:$0xff] }
 0x8d4   : > { %9058 = vmatpush1.bf16.msra.mxu0 %v10178_v34  ;;  %9222 = vmatpush1.bf16.msra.mxu1 %v10180_v36  ;;  %v6264_v34 = vld [vmem:[%s10941_s1 + $0xd88] sm:$0xff] }
 0x8d5   : > { %9068 = vmatprep.subr.bf16.mxu0 %v10187_v18  ;;  %9232 = vmatprep.subr.bf16.mxu1 %v10189_v2  ;;  %v6268_v36 = vld [vmem:[%s10941_s1 + $0xda8] sm:$0xff]  ;;  %v10226_v18 = vcombine.low %v6255_v26, %v6259_v44  ;;  %v10228_v2 = vcombine.low %v6256_v17, %v6260_v49  ;;  %v6303_v44 = vld [vmem:[%s10941_s1 + $0xec0] sm:$0xff] }
 0x8d6   : > { %v10237_v35 = vcombine.high %v6264_v34, %v6268_v36  ;;  %v6307_v17 = vld [vmem:[%s10941_s1 + $0xee0] sm:$0xff]  ;;  %v6304_v49 = vld [vmem:[%s10941_s1 + $0xec8] sm:$0xff] }
 0x8d7   : > { %9060 = vmatmul.mubr.bf16.vlgmr.msra.gmra.mrb[0].mxu0 %v12467_v40  ;;  %9224 = vmatmul.mubr.bf16.vlgmr.msra.gmra.mrb[0].mxu1 %v12467_v40 }
 0x8d8   : > { %9069 = vmatpush1.bf16.msra.mxu0 %v10186_v11  ;;  %9233 = vmatpush1.bf16.msra.mxu1 %v10188_v46  ;;  %v6276_v11 = vld [vmem:[%s10941_s1 + $0xde8] sm:$0xff]  ;;  %v10234_v46 = vcombine.low %v6263_v4, %v6267_v32  ;;  %v6311_v32 = vld [vmem:[%s10941_s1 + $0xf00] sm:$0xff] }
 0x8d9   : > { %9070 = vmatprep.subr.bf16.mxu0 %v10195_v0  ;;  %9234 = vmatprep.subr.bf16.mxu1 %v10197_v51  ;;  %v10236_v0 = vcombine.low %v6264_v34, %v6268_v36  ;;  %v10243_v51 = vcombine.high %v6271_v37, %v6275_v48  ;;  %v10245_v15 = vcombine.high %v6272_v42, %v6276_v11  ;;  %v6315_v34 = vld [vmem:[%s10941_s1 + $0xf20] sm:$0xff]  ;;  %v6312_v36 = vld [vmem:[%s10941_s1 + $0xf08] sm:$0xff] }
 0x8da   : > { %9100 = vmatprep.mubr.bf16.mxu0 %v12473_v27  ;;  %9264 = vmatprep.mubr.bf16.mxu1 %v12473_v27 }
 0x8dc   : > { %9071 = vmatpush1.bf16.msra.mxu0 %v10194_v53  ;;  %9235 = vmatpush1.bf16.msra.mxu1 %v10196_v1  ;;  %v6284_v53 = vld [vmem:[%s10941_s1 + $0xe28] sm:$0xff]  ;;  %v10242_v1 = vcombine.low %v6271_v37, %v6275_v48  ;;  %v6319_v48 = vld [vmem:[%s10941_s1 + $0xf40] sm:$0xff] }
 0x8dd   : > { %9072 = vmatprep.subr.bf16.mxu0 %v10203_v22  ;;  %9236 = vmatprep.subr.bf16.mxu1 %v10205_v45  ;;  %v10244_v22 = vcombine.low %v6272_v42, %v6276_v11  ;;  %v10251_v45 = vcombine.high %v6279_v57, %v6283_v52  ;;  %v10253_v5 = vcombine.high %v6280_v50, %v6284_v53  ;;  %v6323_v42 = vld [vmem:[%s10941_s1 + $0xf60] sm:$0xff]  ;;  %v6320_v11 = vld [vmem:[%s10941_s1 + $0xf48] sm:$0xff] }
 0x8e0   : > { %9073 = vmatpush1.bf16.msra.mxu0 %v10202_v10  ;;  %9237 = vmatpush1.bf16.msra.mxu1 %v10204_v61  ;;  %v6292_v10 = vld [vmem:[%s10941_s1 + $0xe68] sm:$0xff]  ;;  %v10250_v61 = vcombine.low %v6279_v57, %v6283_v52  ;;  %v6327_v52 = vld [vmem:[%s10941_s1 + $0xf80] sm:$0xff] }
 0x8e1   : > { %9074 = vmatprep.subr.bf16.mxu0 %v10211_v12  ;;  %9238 = vmatprep.subr.bf16.mxu1 %v10213_v20  ;;  %v10252_v12 = vcombine.low %v6280_v50, %v6284_v53  ;;  %v10259_v20 = vcombine.high %v6287_v7, %v6291_v8  ;;  %v10261_v16 = vcombine.high %v6288_v38, %v6292_v10  ;;  %v6331_v50 = vld [vmem:[%s10941_s1 + $0xfa0] sm:$0xff]  ;;  %v6328_v53 = vld [vmem:[%s10941_s1 + $0xf88] sm:$0xff] }
 0x8e4   : > { %9075 = vmatpush1.bf16.msra.mxu0 %v10210_v21  ;;  %9239 = vmatpush1.bf16.msra.mxu1 %v10212_v24  ;;  %v6300_v21 = vld [vmem:[%s10941_s1 + $0xea8] sm:$0xff]  ;;  %v10258_v24 = vcombine.low %v6287_v7, %v6291_v8  ;;  %v6335_v8 = vld [vmem:[%s10941_s1 + $0xfc0] sm:$0xff] }
 0x8e5   : > { %9076 = vmatprep.subr.bf16.mxu0 %v10219_v6  ;;  %9240 = vmatprep.subr.bf16.mxu1 %v10221_v23  ;;  %v10260_v6 = vcombine.low %v6288_v38, %v6292_v10  ;;  %v10267_v23 = vcombine.high %v6295_v28, %v6299_v47  ;;  %v10269_v26 = vcombine.high %v6296_v33, %v6300_v21  ;;  %v6339_v38 = vld [vmem:[%s10941_s1 + $0xfe0] sm:$0xff]  ;;  %v6336_v10 = vld [vmem:[%s10941_s1 + $0xfc8] sm:$0xff] }
 0x8e8   : > { %9077 = vmatpush1.bf16.msra.mxu0 %v10218_v25  ;;  %9241 = vmatpush1.bf16.msra.mxu1 %v10220_v31  ;;  %v6308_v25 = vld [vmem:[%s10941_s1 + $0xee8] sm:$0xff]  ;;  %v10266_v31 = vcombine.low %v6295_v28, %v6299_v47  ;;  %v5833_v47 = vld [vmem:[%s10941_s1 + $0x10] sm:$0xff] }
 0x8e9   : > { %9078 = vmatprep.subr.bf16.mxu0 %v10227_v29  ;;  %9242 = vmatprep.subr.bf16.mxu1 %v10229_v30  ;;  %v10268_v29 = vcombine.low %v6296_v33, %v6300_v21  ;;  %v10275_v30 = vcombine.high %v6303_v44, %v6307_v17  ;;  %v10277_v4 = vcombine.high %v6304_v49, %v6308_v25  ;;  %v5837_v33 = vld [vmem:[%s10941_s1 + $0x30] sm:$0xff]  ;;  %v5834_v21 = vld [vmem:[%s10941_s1 + $0x18] sm:$0xff] }
 0x8ec   : > { %9079 = vmatpush1.bf16.msra.mxu0 %v10226_v18  ;;  %9243 = vmatpush1.bf16.msra.mxu1 %v10228_v2  ;;  %v6316_v18 = vld [vmem:[%s10941_s1 + $0xf28] sm:$0xff]  ;;  %v10274_v2 = vcombine.low %v6303_v44, %v6307_v17  ;;  %v5841_v17 = vld [vmem:[%s10941_s1 + $0x50] sm:$0xff] }
 0x8ed   : > { %9080 = vmatprep.subr.bf16.mxu0 %v10235_v39  ;;  %9244 = vmatprep.subr.bf16.mxu1 %v10237_v35  ;;  %v10276_v39 = vcombine.low %v6304_v49, %v6308_v25  ;;  %v10283_v35 = vcombine.high %v6311_v32, %v6315_v34  ;;  %v10285_v37 = vcombine.high %v6312_v36, %v6316_v18  ;;  %v5845_v49 = vld [vmem:[%s10941_s1 + $0x70] sm:$0xff] }
 0x8ee   : > { %v12541_v25 = vpack.c.bf16 %v12457_v43, %v12457_v43  ;;  %v5850_v43 = vld [vmem:[%s10941_s1 + $0x98] sm:$0xff] }
 0x8f0   : > { %9081 = vmatpush1.bf16.msra.mxu0 %v10234_v46  ;;  %9245 = vmatpush1.bf16.msra.mxu1 %v10236_v0  ;;  %v6324_v46 = vld [vmem:[%s10941_s1 + $0xf68] sm:$0xff]  ;;  %v10282_v0 = vcombine.low %v6311_v32, %v6315_v34  ;;  %v9815_v32 = vcombine.high %v5841_v17, %v5845_v49 }
 0x8f1   : > { %9082 = vmatprep.subr.bf16.mxu0 %v10243_v51  ;;  %9246 = vmatprep.subr.bf16.mxu1 %v10245_v15  ;;  %v10284_v51 = vcombine.low %v6312_v36, %v6316_v18  ;;  %v10291_v15 = vcombine.high %v6319_v48, %v6323_v42  ;;  %v10293_v57 = vcombine.high %v6320_v11, %v6324_v46  ;;  %v5849_v36 = vld [vmem:[%s10941_s1 + $0x90] sm:$0xff] }
 0x8f2   : > { %v5853_v18 = vld [vmem:[%s10941_s1 + $0xb0] sm:$0xff] }
 0x8f4   : > { %9083 = vmatpush1.bf16.msra.mxu0 %v10242_v1  ;;  %9247 = vmatpush1.bf16.msra.mxu1 %v10244_v22  ;;  %v6332_v1 = vld [vmem:[%s10941_s1 + $0xfa8] sm:$0xff]  ;;  %v10290_v22 = vcombine.low %v6319_v48, %v6323_v42  ;;  %v5857_v42 = vld [vmem:[%s10941_s1 + $0xd0] sm:$0xff] }
 0x8f5   : > { %9084 = vmatprep.subr.bf16.mxu0 %v10251_v45  ;;  %9248 = vmatprep.subr.bf16.mxu1 %v10253_v5  ;;  %v10292_v45 = vcombine.low %v6320_v11, %v6324_v46  ;;  %v10299_v5 = vcombine.high %v6327_v52, %v6331_v50  ;;  %v10301_v7 = vcombine.high %v6328_v53, %v6332_v1  ;;  %v5861_v11 = vld [vmem:[%s10941_s1 + $0xf0] sm:$0xff]  ;;  %v5858_v46 = vld [vmem:[%s10941_s1 + $0xd8] sm:$0xff] }
 0x8f8   : > { %9085 = vmatpush1.bf16.msra.mxu0 %v10250_v61  ;;  %9249 = vmatpush1.bf16.msra.mxu1 %v10252_v12  ;;  %v6340_v61 = vld [vmem:[%s10941_s1 + $0xfe8] sm:$0xff]  ;;  %v10298_v12 = vcombine.low %v6327_v52, %v6331_v50  ;;  %v5865_v50 = vld [vmem:[%s10941_s1 + $0x110] sm:$0xff] }
 0x8f9   : > { %9086 = vmatprep.subr.bf16.mxu0 %v10259_v20  ;;  %9250 = vmatprep.subr.bf16.mxu1 %v10261_v16  ;;  %v10300_v20 = vcombine.low %v6328_v53, %v6332_v1  ;;  %v10307_v16 = vcombine.high %v6335_v8, %v6339_v38  ;;  %v10309_v28 = vcombine.high %v6336_v10, %v6340_v61  ;;  %v5869_v53 = vld [vmem:[%s10941_s1 + $0x130] sm:$0xff]  ;;  %v5866_v1 = vld [vmem:[%s10941_s1 + $0x118] sm:$0xff] }
 0x8fc   : > { %9087 = vmatpush1.bf16.msra.mxu0 %v10258_v24  ;;  %9251 = vmatpush1.bf16.msra.mxu1 %v10260_v6  ;;  %v5838_v24 = vld [vmem:[%s10941_s1 + $0x38] sm:$0xff]  ;;  %v10306_v6 = vcombine.low %v6335_v8, %v6339_v38  ;;  %v5873_v8 = vld [vmem:[%s10941_s1 + $0x150] sm:$0xff] }
 0x8fd   : > { %9088 = vmatprep.subr.bf16.mxu0 %v10267_v23  ;;  %9252 = vmatprep.subr.bf16.mxu1 %v10269_v26  ;;  %v10308_v23 = vcombine.low %v6336_v10, %v6340_v61  ;;  %v9807_v26 = vcombine.high %v5833_v47, %v5837_v33  ;;  %v9809_v44 = vcombine.high %v5834_v21, %v5838_v24  ;;  %v5877_v38 = vld [vmem:[%s10941_s1 + $0x170] sm:$0xff]  ;;  %v5874_v10 = vld [vmem:[%s10941_s1 + $0x158] sm:$0xff] }
 0x8fe   : > { %v5878_v61 = vld [vmem:[%s10941_s1 + $0x178] sm:$0xff] }
 0x900   : > { %9089 = vmatpush1.bf16.msra.mxu0 %v10266_v31  ;;  %9253 = vmatpush1.bf16.msra.mxu1 %v10268_v29  ;;  %v5842_v31 = vld [vmem:[%s10941_s1 + $0x58] sm:$0xff] }
 0x901   : > { %9090 = vmatprep.subr.bf16.mxu0 %v10275_v30  ;;  %9254 = vmatprep.subr.bf16.mxu1 %v10277_v4  ;;  %v5846_v29 = vld [vmem:[%s10941_s1 + $0x78] sm:$0xff]  ;;  %v9806_v30 = vcombine.low %v5833_v47, %v5837_v33  ;;  %v9808_v4 = vcombine.low %v5834_v21, %v5838_v24  ;;  %v5881_v47 = vld [vmem:[%s10941_s1 + $0x190] sm:$0xff] }
 0x902   : > { %v9817_v34 = vcombine.high %v5842_v31, %v5846_v29  ;;  %v5885_v33 = vld [vmem:[%s10941_s1 + $0x1b0] sm:$0xff]  ;;  %v5882_v21 = vld [vmem:[%s10941_s1 + $0x198] sm:$0xff] }
 0x903   : > { %v5886_v24 = vld [vmem:[%s10941_s1 + $0x1b8] sm:$0xff] }
 0x904   : > { %9091 = vmatpush1.bf16.msra.mxu0 %v10274_v2  ;;  %9255 = vmatpush1.bf16.msra.mxu1 %v10276_v39  ;;  %v5854_v2 = vld [vmem:[%s10941_s1 + $0xb8] sm:$0xff]  ;;  %v9814_v39 = vcombine.low %v5841_v17, %v5845_v49  ;;  %v5889_v17 = vld [vmem:[%s10941_s1 + $0x1d0] sm:$0xff] }
 0x905   : > { %9092 = vmatprep.subr.bf16.mxu0 %v10283_v35  ;;  %9256 = vmatprep.subr.bf16.mxu1 %v10285_v37  ;;  %v9816_v35 = vcombine.low %v5842_v31, %v5846_v29  ;;  %v9823_v37 = vcombine.high %v5849_v36, %v5853_v18  ;;  %v9825_v48 = vcombine.high %v5850_v43, %v5854_v2  ;;  %v5893_v49 = vld [vmem:[%s10941_s1 + $0x1f0] sm:$0xff]  ;;  %v5890_v31 = vld [vmem:[%s10941_s1 + $0x1d8] sm:$0xff] }
 0x906   : > { %v5894_v29 = vld [vmem:[%s10941_s1 + $0x1f8] sm:$0xff] }
 0x908   : > { %9093 = vmatpush1.bf16.msra.mxu0 %v10282_v0  ;;  %9257 = vmatpush1.bf16.msra.mxu1 %v10284_v51  ;;  %v5862_v0 = vld [vmem:[%s10941_s1 + $0xf8] sm:$0xff]  ;;  %v9822_v51 = vcombine.low %v5849_v36, %v5853_v18  ;;  %v5897_v36 = vld [vmem:[%s10941_s1 + $0x210] sm:$0xff] }
 0x909   : > { %9094 = vmatprep.subr.bf16.mxu0 %v10291_v15  ;;  %9258 = vmatprep.subr.bf16.mxu1 %v10293_v57  ;;  %v9824_v15 = vcombine.low %v5850_v43, %v5854_v2  ;;  %v9831_v57 = vcombine.high %v5857_v42, %v5861_v11  ;;  %v9833_v52 = vcombine.high %v5858_v46, %v5862_v0  ;;  %v5901_v18 = vld [vmem:[%s10941_s1 + $0x230] sm:$0xff]  ;;  %v5898_v43 = vld [vmem:[%s10941_s1 + $0x218] sm:$0xff] }
 0x90a   : > { %v5902_v2 = vld [vmem:[%s10941_s1 + $0x238] sm:$0xff] }
 0x90c   : > { %9095 = vmatpush1.bf16.msra.mxu0 %v10290_v22  ;;  %9259 = vmatpush1.bf16.msra.mxu1 %v10292_v45  ;;  %v5870_v22 = vld [vmem:[%s10941_s1 + $0x138] sm:$0xff]  ;;  %v9830_v45 = vcombine.low %v5857_v42, %v5861_v11  ;;  %v5905_v42 = vld [vmem:[%s10941_s1 + $0x250] sm:$0xff] }
 0x90d   : > { %9096 = vmatprep.subr.bf16.mxu0 %v10299_v5  ;;  %9260 = vmatprep.subr.bf16.mxu1 %v10301_v7  ;;  %v9839_v5 = vcombine.high %v5865_v50, %v5869_v53  ;;  %v9841_v7 = vcombine.high %v5866_v1, %v5870_v22  ;;  %v5909_v11 = vld [vmem:[%s10941_s1 + $0x270] sm:$0xff] }
 0x910   : > { %9097 = vmatpush1.bf16.msra.mxu0 %v10298_v12  ;;  %9261 = vmatpush1.bf16.msra.mxu1 %v10300_v20  ;;  %v9838_v12 = vcombine.low %v5865_v50, %v5869_v53  ;;  %v9840_v20 = vcombine.low %v5866_v1, %v5870_v22  ;;  %v5913_v50 = vld [vmem:[%s10941_s1 + $0x290] sm:$0xff]  ;;  %v5914_v1 = vld [vmem:[%s10941_s1 + $0x298] sm:$0xff] }
 0x911   : > { %9098 = vmatprep.subr.bf16.mxu0 %v10307_v16  ;;  %9262 = vmatprep.subr.bf16.mxu1 %v10309_v28  ;;  %v9847_v16 = vcombine.high %v5873_v8, %v5877_v38  ;;  %v9849_v28 = vcombine.high %v5874_v10, %v5878_v61  ;;  %v5917_v53 = vld [vmem:[%s10941_s1 + $0x2b0] sm:$0xff]  ;;  %v5918_v22 = vld [vmem:[%s10941_s1 + $0x2b8] sm:$0xff] }
 0x914   : > { %9099 = vmatpush1.bf16.msra.mxu0 %v10306_v6  ;;  %9263 = vmatpush1.bf16.msra.mxu1 %v10308_v23  ;;  %v9846_v6 = vcombine.low %v5873_v8, %v5877_v38  ;;  %v9848_v23 = vcombine.low %v5874_v10, %v5878_v61  ;;  %v5921_v8 = vld [vmem:[%s10941_s1 + $0x2d0] sm:$0xff]  ;;  %v5922_v10 = vld [vmem:[%s10941_s1 + $0x2d8] sm:$0xff] }
 0x915   : > { %9273 = vmatprep.subr.bf16.mxu0 %v9807_v26  ;;  %9437 = vmatprep.subr.bf16.mxu1 %v9809_v44  ;;  %v9855_v26 = vcombine.high %v5881_v47, %v5885_v33  ;;  %v9857_v44 = vcombine.high %v5882_v21, %v5886_v24  ;;  %v5925_v38 = vld [vmem:[%s10941_s1 + $0x2f0] sm:$0xff]  ;;  %v5926_v61 = vld [vmem:[%s10941_s1 + $0x2f8] sm:$0xff] }
 0x917   : > { %9101 = vmatmul.mubr.bf16.vlgmr.msra.gmra.mrb[0].mxu0 %v12541_v25  ;;  %9265 = vmatmul.mubr.bf16.vlgmr.msra.gmra.mrb[0].mxu1 %v12541_v25 }
 0x918   : > { %9274 = vmatpush1.bf16.msra.mxu0 %v9806_v30  ;;  %9438 = vmatpush1.bf16.msra.mxu1 %v9808_v4  ;;  %v9854_v30 = vcombine.low %v5881_v47, %v5885_v33  ;;  %v9856_v4 = vcombine.low %v5882_v21, %v5886_v24  ;;  %v5929_v47 = vld [vmem:[%s10941_s1 + $0x310] sm:$0xff]  ;;  %v5930_v21 = vld [vmem:[%s10941_s1 + $0x318] sm:$0xff] }
 0x919   : > { %9275 = vmatprep.subr.bf16.mxu0 %v9815_v32  ;;  %9439 = vmatprep.subr.bf16.mxu1 %v9817_v34  ;;  %v9863_v32 = vcombine.high %v5889_v17, %v5893_v49  ;;  %v9865_v34 = vcombine.high %v5890_v31, %v5894_v29  ;;  %v5933_v33 = vld [vmem:[%s10941_s1 + $0x330] sm:$0xff]  ;;  %v5934_v24 = vld [vmem:[%s10941_s1 + $0x338] sm:$0xff] }
 0x91a   : > { %9305 = vmatprep.mubr.bf16.mxu0 %v12234_v3  ;;  %9469 = vmatprep.mubr.bf16.mxu1 %v12234_v3  ;;  %v9832_v3 = vcombine.low %v5858_v46, %v5862_v0  ;;  %v5906_v46 = vld [vmem:[%s10941_s1 + $0x258] sm:$0xff] }
 0x91b   : > { %v5910_v0 = vld [vmem:[%s10941_s1 + $0x278] sm:$0xff] }
 0x91c   : > { %9276 = vmatpush1.bf16.msra.mxu0 %v9814_v39  ;;  %9440 = vmatpush1.bf16.msra.mxu1 %v9816_v35  ;;  %v9862_v39 = vcombine.low %v5889_v17, %v5893_v49  ;;  %v9864_v35 = vcombine.low %v5890_v31, %v5894_v29  ;;  %v5937_v17 = vld [vmem:[%s10941_s1 + $0x350] sm:$0xff]  ;;  %v5938_v31 = vld [vmem:[%s10941_s1 + $0x358] sm:$0xff] }
 0x91d   : > { %9277 = vmatprep.subr.bf16.mxu0 %v9823_v37  ;;  %9441 = vmatprep.subr.bf16.mxu1 %v9825_v48  ;;  %v9871_v37 = vcombine.high %v5897_v36, %v5901_v18  ;;  %v9873_v48 = vcombine.high %v5898_v43, %v5902_v2  ;;  %v5941_v49 = vld [vmem:[%s10941_s1 + $0x370] sm:$0xff]  ;;  %v5942_v29 = vld [vmem:[%s10941_s1 + $0x378] sm:$0xff] }
 0x920   : > { %9278 = vmatpush1.bf16.msra.mxu0 %v9822_v51  ;;  %9442 = vmatpush1.bf16.msra.mxu1 %v9824_v15  ;;  %v9870_v51 = vcombine.low %v5897_v36, %v5901_v18  ;;  %v9872_v15 = vcombine.low %v5898_v43, %v5902_v2  ;;  %v5945_v36 = vld [vmem:[%s10941_s1 + $0x390] sm:$0xff]  ;;  %v5946_v43 = vld [vmem:[%s10941_s1 + $0x398] sm:$0xff] }
 0x921   : > { %9279 = vmatprep.subr.bf16.mxu0 %v9831_v57  ;;  %9443 = vmatprep.subr.bf16.mxu1 %v9833_v52  ;;  %v9879_v57 = vcombine.high %v5905_v42, %v5909_v11  ;;  %v9881_v52 = vcombine.high %v5906_v46, %v5910_v0  ;;  %v5949_v18 = vld [vmem:[%s10941_s1 + $0x3b0] sm:$0xff]  ;;  %v5950_v2 = vld [vmem:[%s10941_s1 + $0x3b8] sm:$0xff] }
 0x924   : > { %9280 = vmatpush1.bf16.msra.mxu0 %v9830_v45  ;;  %9444 = vmatpush1.bf16.msra.mxu1 %v9832_v3  ;;  %v9878_v45 = vcombine.low %v5905_v42, %v5909_v11  ;;  %v9880_v3 = vcombine.low %v5906_v46, %v5910_v0  ;;  %v5953_v42 = vld [vmem:[%s10941_s1 + $0x3d0] sm:$0xff]  ;;  %v5954_v46 = vld [vmem:[%s10941_s1 + $0x3d8] sm:$0xff] }
 0x925   : > { %9281 = vmatprep.subr.bf16.mxu0 %v9839_v5  ;;  %9445 = vmatprep.subr.bf16.mxu1 %v9841_v7  ;;  %v9887_v5 = vcombine.high %v5913_v50, %v5917_v53  ;;  %v9889_v7 = vcombine.high %v5914_v1, %v5918_v22  ;;  %v5957_v11 = vld [vmem:[%s10941_s1 + $0x3f0] sm:$0xff]  ;;  %v5958_v0 = vld [vmem:[%s10941_s1 + $0x3f8] sm:$0xff] }
 0x928   : > { %9282 = vmatpush1.bf16.msra.mxu0 %v9838_v12  ;;  %9446 = vmatpush1.bf16.msra.mxu1 %v9840_v20  ;;  %v9886_v12 = vcombine.low %v5913_v50, %v5917_v53  ;;  %v9888_v20 = vcombine.low %v5914_v1, %v5918_v22  ;;  %v5961_v50 = vld [vmem:[%s10941_s1 + $0x410] sm:$0xff]  ;;  %v5962_v1 = vld [vmem:[%s10941_s1 + $0x418] sm:$0xff] }
 0x929   : > { %9283 = vmatprep.subr.bf16.mxu0 %v9847_v16  ;;  %9447 = vmatprep.subr.bf16.mxu1 %v9849_v28  ;;  %v9895_v16 = vcombine.high %v5921_v8, %v5925_v38  ;;  %v9897_v28 = vcombine.high %v5922_v10, %v5926_v61  ;;  %v5965_v53 = vld [vmem:[%s10941_s1 + $0x430] sm:$0xff]  ;;  %v5966_v22 = vld [vmem:[%s10941_s1 + $0x438] sm:$0xff] }
 0x92c   : > { %9284 = vmatpush1.bf16.msra.mxu0 %v9846_v6  ;;  %9448 = vmatpush1.bf16.msra.mxu1 %v9848_v23  ;;  %v9894_v6 = vcombine.low %v5921_v8, %v5925_v38  ;;  %v9896_v23 = vcombine.low %v5922_v10, %v5926_v61  ;;  %v5969_v8 = vld [vmem:[%s10941_s1 + $0x450] sm:$0xff]  ;;  %v5970_v10 = vld [vmem:[%s10941_s1 + $0x458] sm:$0xff] }
 0x92d   : > { %9285 = vmatprep.subr.bf16.mxu0 %v9855_v26  ;;  %9449 = vmatprep.subr.bf16.mxu1 %v9857_v44  ;;  %v9903_v26 = vcombine.high %v5929_v47, %v5933_v33  ;;  %v9905_v44 = vcombine.high %v5930_v21, %v5934_v24  ;;  %v5973_v38 = vld [vmem:[%s10941_s1 + $0x470] sm:$0xff]  ;;  %v5974_v61 = vld [vmem:[%s10941_s1 + $0x478] sm:$0xff] }
 0x930   : > { %9286 = vmatpush1.bf16.msra.mxu0 %v9854_v30  ;;  %9450 = vmatpush1.bf16.msra.mxu1 %v9856_v4  ;;  %v9902_v30 = vcombine.low %v5929_v47, %v5933_v33  ;;  %v9904_v4 = vcombine.low %v5930_v21, %v5934_v24  ;;  %v5977_v47 = vld [vmem:[%s10941_s1 + $0x490] sm:$0xff]  ;;  %v5978_v21 = vld [vmem:[%s10941_s1 + $0x498] sm:$0xff] }
 0x931   : > { %9287 = vmatprep.subr.bf16.mxu0 %v9863_v32  ;;  %9451 = vmatprep.subr.bf16.mxu1 %v9865_v34  ;;  %v9911_v32 = vcombine.high %v5937_v17, %v5941_v49  ;;  %v9913_v34 = vcombine.high %v5938_v31, %v5942_v29  ;;  %v5981_v33 = vld [vmem:[%s10941_s1 + $0x4b0] sm:$0xff]  ;;  %v5982_v24 = vld [vmem:[%s10941_s1 + $0x4b8] sm:$0xff] }
 0x934   : > { %9288 = vmatpush1.bf16.msra.mxu0 %v9862_v39  ;;  %9452 = vmatpush1.bf16.msra.mxu1 %v9864_v35  ;;  %v9910_v39 = vcombine.low %v5937_v17, %v5941_v49  ;;  %v9912_v35 = vcombine.low %v5938_v31, %v5942_v29  ;;  %v5985_v17 = vld [vmem:[%s10941_s1 + $0x4d0] sm:$0xff]  ;;  %v5986_v31 = vld [vmem:[%s10941_s1 + $0x4d8] sm:$0xff] }
 0x935   : > { %9289 = vmatprep.subr.bf16.mxu0 %v9871_v37  ;;  %9453 = vmatprep.subr.bf16.mxu1 %v9873_v48  ;;  %v9919_v37 = vcombine.high %v5945_v36, %v5949_v18  ;;  %v9921_v48 = vcombine.high %v5946_v43, %v5950_v2  ;;  %v5989_v49 = vld [vmem:[%s10941_s1 + $0x4f0] sm:$0xff]  ;;  %v5990_v29 = vld [vmem:[%s10941_s1 + $0x4f8] sm:$0xff] }
 0x938   : > { %9290 = vmatpush1.bf16.msra.mxu0 %v9870_v51  ;;  %9454 = vmatpush1.bf16.msra.mxu1 %v9872_v15  ;;  %v9918_v51 = vcombine.low %v5945_v36, %v5949_v18  ;;  %v9920_v15 = vcombine.low %v5946_v43, %v5950_v2  ;;  %v5997_v36 = vld [vmem:[%s10941_s1 + $0x530] sm:$0xff]  ;;  %v5994_v18 = vld [vmem:[%s10941_s1 + $0x518] sm:$0xff]  ;;  %v9958_v2 = vcombine.low %v5985_v17, %v5989_v49 }
 0x939   : > { %9291 = vmatprep.subr.bf16.mxu0 %v9879_v57  ;;  %9455 = vmatprep.subr.bf16.mxu1 %v9881_v52  ;;  %v9927_v57 = vcombine.high %v5953_v42, %v5957_v11  ;;  %v9929_v52 = vcombine.high %v5954_v46, %v5958_v0  ;;  %v5998_v43 = vld [vmem:[%s10941_s1 + $0x538] sm:$0xff] }
 0x93c   : > { %9292 = vmatpush1.bf16.msra.mxu0 %v9878_v45  ;;  %9456 = vmatpush1.bf16.msra.mxu1 %v9880_v3  ;;  %v9926_v45 = vcombine.low %v5953_v42, %v5957_v11  ;;  %v9928_v3 = vcombine.low %v5954_v46, %v5958_v0  ;;  %v6002_v42 = vld [vmem:[%s10941_s1 + $0x558] sm:$0xff]  ;;  %v9968_v0 = vcombine.low %v5994_v18, %v5998_v43 }
 0x93d   : > { %9293 = vmatprep.subr.bf16.mxu0 %v9887_v5  ;;  %9457 = vmatprep.subr.bf16.mxu1 %v9889_v7  ;;  %v9935_v5 = vcombine.high %v5961_v50, %v5965_v53  ;;  %v9937_v7 = vcombine.high %v5962_v1, %v5966_v22  ;;  %v6006_v11 = vld [vmem:[%s10941_s1 + $0x578] sm:$0xff] }
 0x940   : > { %9294 = vmatpush1.bf16.msra.mxu0 %v9886_v12  ;;  %9458 = vmatpush1.bf16.msra.mxu1 %v9888_v20  ;;  %v9934_v12 = vcombine.low %v5961_v50, %v5965_v53  ;;  %v9936_v20 = vcombine.low %v5962_v1, %v5966_v22  ;;  %v6010_v50 = vld [vmem:[%s10941_s1 + $0x598] sm:$0xff]  ;;  %v9976_v22 = vcombine.low %v6002_v42, %v6006_v11 }
 0x941   : > { %9295 = vmatprep.subr.bf16.mxu0 %v9895_v16  ;;  %9459 = vmatprep.subr.bf16.mxu1 %v9897_v28  ;;  %v9943_v16 = vcombine.high %v5969_v8, %v5973_v38  ;;  %v9945_v28 = vcombine.high %v5970_v10, %v5974_v61  ;;  %v6014_v53 = vld [vmem:[%s10941_s1 + $0x5b8] sm:$0xff] }
 0x944   : > { %9296 = vmatpush1.bf16.msra.mxu0 %v9894_v6  ;;  %9460 = vmatpush1.bf16.msra.mxu1 %v9896_v23  ;;  %v9942_v6 = vcombine.low %v5969_v8, %v5973_v38  ;;  %v9944_v23 = vcombine.low %v5970_v10, %v5974_v61  ;;  %v6018_v8 = vld [vmem:[%s10941_s1 + $0x5d8] sm:$0xff]  ;;  %v9984_v61 = vcombine.low %v6010_v50, %v6014_v53 }
 0x945   : > { %9297 = vmatprep.subr.bf16.mxu0 %v9903_v26  ;;  %9461 = vmatprep.subr.bf16.mxu1 %v9905_v44  ;;  %v9951_v26 = vcombine.high %v5977_v47, %v5981_v33  ;;  %v9953_v44 = vcombine.high %v5978_v21, %v5982_v24  ;;  %v6022_v38 = vld [vmem:[%s10941_s1 + $0x5f8] sm:$0xff] }
 0x948   : > { %9298 = vmatpush1.bf16.msra.mxu0 %v9902_v30  ;;  %9462 = vmatpush1.bf16.msra.mxu1 %v9904_v4  ;;  %v9952_v30 = vcombine.low %v5978_v21, %v5982_v24  ;;  %v9959_v4 = vcombine.high %v5985_v17, %v5989_v49  ;;  %v9992_v24 = vcombine.low %v6018_v8, %v6022_v38  ;;  %v6034_v17 = vld [vmem:[%s10941_s1 + $0x658] sm:$0xff] }
 0x949   : > { %9299 = vmatprep.subr.bf16.mxu0 %v9911_v32  ;;  %9463 = vmatprep.subr.bf16.mxu1 %v9913_v34  ;;  %v9961_v32 = vcombine.high %v5986_v31, %v5990_v29  ;;  %v5993_v34 = vld [vmem:[%s10941_s1 + $0x510] sm:$0xff]  ;;  %v6038_v49 = vld [vmem:[%s10941_s1 + $0x678] sm:$0xff] }
 0x94a   : > { %v9966_v46 = vcombine.low %v5993_v34, %v5997_v36 }
 0x94c   : > { %9300 = vmatpush1.bf16.msra.mxu0 %v9910_v39  ;;  %9464 = vmatpush1.bf16.msra.mxu1 %v9912_v35  ;;  %v9967_v39 = vcombine.high %v5993_v34, %v5997_v36  ;;  %v9969_v35 = vcombine.high %v5994_v18, %v5998_v43  ;;  %v6042_v34 = vld [vmem:[%s10941_s1 + $0x698] sm:$0xff]  ;;  %v10008_v43 = vcombine.low %v6034_v17, %v6038_v49 }
 0x94d   : > { %9301 = vmatprep.subr.bf16.mxu0 %v9919_v37  ;;  %9465 = vmatprep.subr.bf16.mxu1 %v9921_v48  ;;  %v6001_v37 = vld [vmem:[%s10941_s1 + $0x550] sm:$0xff]  ;;  %v6046_v36 = vld [vmem:[%s10941_s1 + $0x6b8] sm:$0xff] }
 0x94e   : > { %v6005_v48 = vld [vmem:[%s10941_s1 + $0x570] sm:$0xff] }
 0x94f   : > { %v9974_v1 = vcombine.low %v6001_v37, %v6005_v48 }
 0x950   : > { %9302 = vmatpush1.bf16.msra.mxu0 %v9918_v51  ;;  %9466 = vmatpush1.bf16.msra.mxu1 %v9920_v15  ;;  %v9975_v51 = vcombine.high %v6001_v37, %v6005_v48  ;;  %v9977_v15 = vcombine.high %v6002_v42, %v6006_v11  ;;  %v6050_v37 = vld [vmem:[%s10941_s1 + $0x6d8] sm:$0xff]  ;;  %v10016_v11 = vcombine.low %v6042_v34, %v6046_v36 }
 0x951   : > { %9303 = vmatprep.subr.bf16.mxu0 %v9927_v57  ;;  %9467 = vmatprep.subr.bf16.mxu1 %v9929_v52  ;;  %v6009_v57 = vld [vmem:[%s10941_s1 + $0x590] sm:$0xff]  ;;  %v6054_v48 = vld [vmem:[%s10941_s1 + $0x6f8] sm:$0xff] }
 0x952   : > { %v6013_v52 = vld [vmem:[%s10941_s1 + $0x5b0] sm:$0xff] }
 0x953   : > { %v9982_v10 = vcombine.low %v6009_v57, %v6013_v52 }
 0x954   : > { %9304 = vmatpush1.bf16.msra.mxu0 %v9926_v45  ;;  %9468 = vmatpush1.bf16.msra.mxu1 %v9928_v3  ;;  %v9983_v45 = vcombine.high %v6009_v57, %v6013_v52  ;;  %v9985_v3 = vcombine.high %v6010_v50, %v6014_v53  ;;  %v6058_v57 = vld [vmem:[%s10941_s1 + $0x718] sm:$0xff]  ;;  %v10024_v53 = vcombine.low %v6050_v37, %v6054_v48 }
 0x955   : > { %9314 = vmatprep.subr.bf16.mxu0 %v9935_v5  ;;  %9478 = vmatprep.subr.bf16.mxu1 %v9937_v7  ;;  %v6017_v5 = vld [vmem:[%s10941_s1 + $0x5d0] sm:$0xff]  ;;  %v6062_v52 = vld [vmem:[%s10941_s1 + $0x738] sm:$0xff] }
 0x956   : > { %v6021_v7 = vld [vmem:[%s10941_s1 + $0x5f0] sm:$0xff] }
 0x957   : > { %9306 = vmatmul.mubr.bf16.vlgmr.msra.gmra.mrb[4].mxu0 %v12289_v9  ;;  %9470 = vmatmul.mubr.bf16.vlgmr.msra.gmra.mrb[4].mxu1 %v12289_v9  ;;  %v9950_v9 = vcombine.low %v5977_v47, %v5981_v33  ;;  %v6026_v47 = vld [vmem:[%s10941_s1 + $0x618] sm:$0xff]  ;;  %v9990_v21 = vcombine.low %v6017_v5, %v6021_v7 }
 0x958   : > { %9315 = vmatpush1.bf16.msra.mxu0 %v9934_v12  ;;  %9479 = vmatpush1.bf16.msra.mxu1 %v9936_v20  ;;  %v9991_v12 = vcombine.high %v6017_v5, %v6021_v7  ;;  %v9993_v20 = vcombine.high %v6018_v8, %v6022_v38  ;;  %v6030_v33 = vld [vmem:[%s10941_s1 + $0x638] sm:$0xff]  ;;  %v10032_v38 = vcombine.low %v6058_v57, %v6062_v52 }
 0x959   : > { %9316 = vmatprep.subr.bf16.mxu0 %v9943_v16  ;;  %9480 = vmatprep.subr.bf16.mxu1 %v9945_v28  ;;  %v6025_v16 = vld [vmem:[%s10941_s1 + $0x610] sm:$0xff]  ;;  %v6066_v5 = vld [vmem:[%s10941_s1 + $0x758] sm:$0xff] }
 0x95a   : > { %9346 = vmatprep.mubr.bf16.mxu0 %v12295_v19  ;;  %9510 = vmatprep.mubr.bf16.mxu1 %v12295_v19  ;;  %v9960_v19 = vcombine.low %v5986_v31, %v5990_v29  ;;  %v6029_v28 = vld [vmem:[%s10941_s1 + $0x630] sm:$0xff]  ;;  %v10000_v29 = vcombine.low %v6026_v47, %v6030_v33  ;;  %v6070_v7 = vld [vmem:[%s10941_s1 + $0x778] sm:$0xff] }
 0x95b   : > { %v9998_v31 = vcombine.low %v6025_v16, %v6029_v28 }
 0x95c   : > { %9317 = vmatpush1.bf16.msra.mxu0 %v9942_v6  ;;  %9481 = vmatpush1.bf16.msra.mxu1 %v9944_v23  ;;  %v9999_v6 = vcombine.high %v6025_v16, %v6029_v28  ;;  %v10001_v23 = vcombine.high %v6026_v47, %v6030_v33  ;;  %v6074_v16 = vld [vmem:[%s10941_s1 + $0x798] sm:$0xff]  ;;  %v10040_v33 = vcombine.low %v6066_v5, %v6070_v7 }
 0x95d   : > { %9318 = vmatprep.subr.bf16.mxu0 %v9951_v26  ;;  %9482 = vmatprep.subr.bf16.mxu1 %v9953_v44  ;;  %v6033_v26 = vld [vmem:[%s10941_s1 + $0x650] sm:$0xff]  ;;  %v6078_v28 = vld [vmem:[%s10941_s1 + $0x7b8] sm:$0xff] }
 0x95e   : > { %v6037_v44 = vld [vmem:[%s10941_s1 + $0x670] sm:$0xff] }
 0x95f   : > { %v10006_v18 = vcombine.low %v6033_v26, %v6037_v44 }
 0x960   : > { %9319 = vmatpush1.bf16.msra.mxu0 %v9950_v9  ;;  %9483 = vmatpush1.bf16.msra.mxu1 %v9952_v30  ;;  %v10007_v9 = vcombine.high %v6033_v26, %v6037_v44  ;;  %v10009_v30 = vcombine.high %v6034_v17, %v6038_v49  ;;  %v6082_v26 = vld [vmem:[%s10941_s1 + $0x7d8] sm:$0xff]  ;;  %v10048_v49 = vcombine.low %v6074_v16, %v6078_v28 }
 0x961   : > { %9320 = vmatprep.subr.bf16.mxu0 %v9959_v4  ;;  %9484 = vmatprep.subr.bf16.mxu1 %v9961_v32  ;;  %v6041_v4 = vld [vmem:[%s10941_s1 + $0x690] sm:$0xff]  ;;  %v6086_v44 = vld [vmem:[%s10941_s1 + $0x7f8] sm:$0xff] }
 0x962   : > { %v6045_v32 = vld [vmem:[%s10941_s1 + $0x6b0] sm:$0xff] }
 0x963   : > { %v10014_v42 = vcombine.low %v6041_v4, %v6045_v32 }
 0x964   : > { %9321 = vmatpush1.bf16.msra.mxu0 %v9958_v2  ;;  %9485 = vmatpush1.bf16.msra.mxu1 %v9960_v19  ;;  %v10015_v2 = vcombine.high %v6041_v4, %v6045_v32  ;;  %v10017_v19 = vcombine.high %v6042_v34, %v6046_v36  ;;  %v6090_v4 = vld [vmem:[%s10941_s1 + $0x818] sm:$0xff]  ;;  %v10056_v36 = vcombine.low %v6082_v26, %v6086_v44 }
 0x965   : > { %9322 = vmatprep.subr.bf16.mxu0 %v9967_v39  ;;  %9486 = vmatprep.subr.bf16.mxu1 %v9969_v35  ;;  %v6049_v39 = vld [vmem:[%s10941_s1 + $0x6d0] sm:$0xff]  ;;  %v6094_v32 = vld [vmem:[%s10941_s1 + $0x838] sm:$0xff] }
 0x966   : > { %v6053_v35 = vld [vmem:[%s10941_s1 + $0x6f0] sm:$0xff] }
 0x967   : > { %v10022_v50 = vcombine.low %v6049_v39, %v6053_v35 }
 0x968   : > { %9323 = vmatpush1.bf16.msra.mxu0 %v9966_v46  ;;  %9487 = vmatpush1.bf16.msra.mxu1 %v9968_v0  ;;  %v10023_v46 = vcombine.high %v6049_v39, %v6053_v35  ;;  %v10025_v0 = vcombine.high %v6050_v37, %v6054_v48  ;;  %v6098_v39 = vld [vmem:[%s10941_s1 + $0x858] sm:$0xff]  ;;  %v10064_v48 = vcombine.low %v6090_v4, %v6094_v32 }
 0x969   : > { %9324 = vmatprep.subr.bf16.mxu0 %v9975_v51  ;;  %9488 = vmatprep.subr.bf16.mxu1 %v9977_v15  ;;  %v6057_v51 = vld [vmem:[%s10941_s1 + $0x710] sm:$0xff]  ;;  %v6102_v35 = vld [vmem:[%s10941_s1 + $0x878] sm:$0xff] }
 0x96a   : > { %v6061_v15 = vld [vmem:[%s10941_s1 + $0x730] sm:$0xff] }
 0x96b   : > { %v10030_v8 = vcombine.low %v6057_v51, %v6061_v15 }
 0x96c   : > { %9325 = vmatpush1.bf16.msra.mxu0 %v9974_v1  ;;  %9489 = vmatpush1.bf16.msra.mxu1 %v9976_v22  ;;  %v10031_v1 = vcombine.high %v6057_v51, %v6061_v15  ;;  %v10033_v22 = vcombine.high %v6058_v57, %v6062_v52  ;;  %v6106_v51 = vld [vmem:[%s10941_s1 + $0x898] sm:$0xff]  ;;  %v10072_v52 = vcombine.low %v6098_v39, %v6102_v35 }
 0x96d   : > { %9326 = vmatprep.subr.bf16.mxu0 %v9983_v45  ;;  %9490 = vmatprep.subr.bf16.mxu1 %v9985_v3  ;;  %v6065_v45 = vld [vmem:[%s10941_s1 + $0x750] sm:$0xff]  ;;  %v6110_v15 = vld [vmem:[%s10941_s1 + $0x8b8] sm:$0xff] }
 0x96e   : > { %v6069_v3 = vld [vmem:[%s10941_s1 + $0x770] sm:$0xff] }
 0x96f   : > { %v10038_v47 = vcombine.low %v6065_v45, %v6069_v3 }
 0x970   : > { %9327 = vmatpush1.bf16.msra.mxu0 %v9982_v10  ;;  %9491 = vmatpush1.bf16.msra.mxu1 %v9984_v61  ;;  %v10039_v10 = vcombine.high %v6065_v45, %v6069_v3  ;;  %v10041_v61 = vcombine.high %v6066_v5, %v6070_v7  ;;  %v6114_v45 = vld [vmem:[%s10941_s1 + $0x8d8] sm:$0xff]  ;;  %v10080_v5 = vcombine.low %v6106_v51, %v6110_v15 }
 0x971   : > { %9328 = vmatprep.subr.bf16.mxu0 %v9991_v12  ;;  %9492 = vmatprep.subr.bf16.mxu1 %v9993_v20  ;;  %v6073_v12 = vld [vmem:[%s10941_s1 + $0x790] sm:$0xff]  ;;  %v6118_v3 = vld [vmem:[%s10941_s1 + $0x8f8] sm:$0xff] }
 0x972   : > { %v6077_v20 = vld [vmem:[%s10941_s1 + $0x7b0] sm:$0xff] }
 0x973   : > { %v10046_v17 = vcombine.low %v6073_v12, %v6077_v20 }
 0x974   : > { %9329 = vmatpush1.bf16.msra.mxu0 %v9990_v21  ;;  %9493 = vmatpush1.bf16.msra.mxu1 %v9992_v24  ;;  %v10047_v21 = vcombine.high %v6073_v12, %v6077_v20  ;;  %v10049_v24 = vcombine.high %v6074_v16, %v6078_v28  ;;  %v6126_v12 = vld [vmem:[%s10941_s1 + $0x938] sm:$0xff] }
 0x975   : > { %9330 = vmatprep.subr.bf16.mxu0 %v9999_v6  ;;  %9494 = vmatprep.subr.bf16.mxu1 %v10001_v23  ;;  %v6081_v6 = vld [vmem:[%s10941_s1 + $0x7d0] sm:$0xff] }
 0x976   : > { %v6085_v23 = vld [vmem:[%s10941_s1 + $0x7f0] sm:$0xff] }
 0x977   : > { %v10054_v34 = vcombine.low %v6081_v6, %v6085_v23 }
 0x978   : > { %9331 = vmatpush1.bf16.msra.mxu0 %v9998_v31  ;;  %9495 = vmatpush1.bf16.msra.mxu1 %v10000_v29  ;;  %v10055_v31 = vcombine.high %v6081_v6, %v6085_v23  ;;  %v10057_v29 = vcombine.high %v6082_v26, %v6086_v44 }
 0x979   : > { %9332 = vmatprep.subr.bf16.mxu0 %v10007_v9  ;;  %9496 = vmatprep.subr.bf16.mxu1 %v10009_v30  ;;  %v6089_v9 = vld [vmem:[%s10941_s1 + $0x810] sm:$0xff] }
 0x97a   : > { %v6093_v30 = vld [vmem:[%s10941_s1 + $0x830] sm:$0xff] }
 0x97b   : > { %v10062_v37 = vcombine.low %v6089_v9, %v6093_v30 }
 0x97c   : > { %9333 = vmatpush1.bf16.msra.mxu0 %v10006_v18  ;;  %9497 = vmatpush1.bf16.msra.mxu1 %v10008_v43  ;;  %v10063_v18 = vcombine.high %v6089_v9, %v6093_v30  ;;  %v10065_v43 = vcombine.high %v6090_v4, %v6094_v32 }
 0x97d   : > { %9334 = vmatprep.subr.bf16.mxu0 %v10015_v2  ;;  %9498 = vmatprep.subr.bf16.mxu1 %v10017_v19  ;;  %v6097_v2 = vld [vmem:[%s10941_s1 + $0x850] sm:$0xff] }
 0x97e   : > { %v6101_v19 = vld [vmem:[%s10941_s1 + $0x870] sm:$0xff] }
 0x97f   : > { %v10070_v57 = vcombine.low %v6097_v2, %v6101_v19 }
 0x980   : > { %9335 = vmatpush1.bf16.msra.mxu0 %v10014_v42  ;;  %9499 = vmatpush1.bf16.msra.mxu1 %v10016_v11  ;;  %v10071_v42 = vcombine.high %v6097_v2, %v6101_v19  ;;  %v10073_v11 = vcombine.high %v6098_v39, %v6102_v35 }
 0x981   : > { %9336 = vmatprep.subr.bf16.mxu0 %v10023_v46  ;;  %9500 = vmatprep.subr.bf16.mxu1 %v10025_v0  ;;  %v6105_v46 = vld [vmem:[%s10941_s1 + $0x890] sm:$0xff] }
 0x982   : > { %v6109_v0 = vld [vmem:[%s10941_s1 + $0x8b0] sm:$0xff] }
 0x984   : > { %9337 = vmatpush1.bf16.msra.mxu0 %v10022_v50  ;;  %9501 = vmatpush1.bf16.msra.mxu1 %v10024_v53  ;;  %v10079_v50 = vcombine.high %v6105_v46, %v6109_v0  ;;  %v10081_v53 = vcombine.high %v6106_v51, %v6110_v15 }
 0x985   : > { %9338 = vmatprep.subr.bf16.mxu0 %v10031_v1  ;;  %9502 = vmatprep.subr.bf16.mxu1 %v10033_v22  ;;  %v6113_v1 = vld [vmem:[%s10941_s1 + $0x8d0] sm:$0xff] }
 0x986   : > { %v6117_v22 = vld [vmem:[%s10941_s1 + $0x8f0] sm:$0xff] }
 0x987   : > { %v10087_v7 = vcombine.high %v6113_v1, %v6117_v22  ;;  %v10086_v20 = vcombine.low %v6113_v1, %v6117_v22 }
 0x988   : > { %9339 = vmatpush1.bf16.msra.mxu0 %v10030_v8  ;;  %9503 = vmatpush1.bf16.msra.mxu1 %v10032_v38  ;;  %v10089_v8 = vcombine.high %v6114_v45, %v6118_v3  ;;  %v6121_v38 = vld [vmem:[%s10941_s1 + $0x910] sm:$0xff] }
 0x989   : > { %9340 = vmatprep.subr.bf16.mxu0 %v10039_v10  ;;  %9504 = vmatprep.subr.bf16.mxu1 %v10041_v61  ;;  %v6125_v10 = vld [vmem:[%s10941_s1 + $0x930] sm:$0xff]  ;;  %v6122_v61 = vld [vmem:[%s10941_s1 + $0x918] sm:$0xff] }
 0x98a   : > { %v10095_v16 = vcombine.high %v6121_v38, %v6125_v10  ;;  %v10097_v28 = vcombine.high %v6122_v61, %v6126_v12  ;;  %v10094_v6 = vcombine.low %v6121_v38, %v6125_v10  ;;  %v10096_v23 = vcombine.low %v6122_v61, %v6126_v12 }
 0x98c   : > { %9341 = vmatpush1.bf16.msra.mxu0 %v10038_v47  ;;  %9505 = vmatpush1.bf16.msra.mxu1 %v10040_v33  ;;  %v6129_v47 = vld [vmem:[%s10941_s1 + $0x950] sm:$0xff] }
 0x98d   : > { %9342 = vmatprep.subr.bf16.mxu0 %v10047_v21  ;;  %9506 = vmatprep.subr.bf16.mxu1 %v10049_v24  ;;  %v6133_v33 = vld [vmem:[%s10941_s1 + $0x970] sm:$0xff]  ;;  %v6130_v21 = vld [vmem:[%s10941_s1 + $0x958] sm:$0xff] }
 0x98e   : > { %v6134_v24 = vld [vmem:[%s10941_s1 + $0x978] sm:$0xff]  ;;  %v10103_v26 = vcombine.high %v6129_v47, %v6133_v33  ;;  %v10102_v9 = vcombine.low %v6129_v47, %v6133_v33 }
 0x98f   : > { %v10105_v44 = vcombine.high %v6130_v21, %v6134_v24  ;;  %v10104_v30 = vcombine.low %v6130_v21, %v6134_v24 }
 0x990   : > { %9343 = vmatpush1.bf16.msra.mxu0 %v10046_v17  ;;  %9507 = vmatpush1.bf16.msra.mxu1 %v10048_v49  ;;  %v6137_v17 = vld [vmem:[%s10941_s1 + $0x990] sm:$0xff] }
 0x991   : > { %9344 = vmatprep.subr.bf16.mxu0 %v10055_v31  ;;  %9508 = vmatprep.subr.bf16.mxu1 %v10057_v29  ;;  %v6141_v49 = vld [vmem:[%s10941_s1 + $0x9b0] sm:$0xff]  ;;  %v6138_v31 = vld [vmem:[%s10941_s1 + $0x998] sm:$0xff] }
 0x992   : > { %v6142_v29 = vld [vmem:[%s10941_s1 + $0x9b8] sm:$0xff]  ;;  %v10111_v4 = vcombine.high %v6137_v17, %v6141_v49  ;;  %v10110_v2 = vcombine.low %v6137_v17, %v6141_v49 }
 0x993   : > { %v10113_v32 = vcombine.high %v6138_v31, %v6142_v29  ;;  %v10112_v19 = vcombine.low %v6138_v31, %v6142_v29 }
 0x994   : > { %9345 = vmatpush1.bf16.msra.mxu0 %v10054_v34  ;;  %9509 = vmatpush1.bf16.msra.mxu1 %v10056_v36  ;;  %v6145_v34 = vld [vmem:[%s10941_s1 + $0x9d0] sm:$0xff] }
 0x995   : > { %9355 = vmatprep.subr.bf16.mxu0 %v10063_v18  ;;  %9519 = vmatprep.subr.bf16.mxu1 %v10065_v43  ;;  %v6149_v36 = vld [vmem:[%s10941_s1 + $0x9f0] sm:$0xff]  ;;  %v6146_v18 = vld [vmem:[%s10941_s1 + $0x9d8] sm:$0xff] }
 0x996   : > { %v6150_v43 = vld [vmem:[%s10941_s1 + $0x9f8] sm:$0xff]  ;;  %v10119_v39 = vcombine.high %v6145_v34, %v6149_v36 }
 0x997   : > { %9347 = vmatmul.mubr.bf16.vlgmr.msra.gmra.mrb[4].mxu0 %v12386_v63  ;;  %9511 = vmatmul.mubr.bf16.vlgmr.msra.gmra.mrb[4].mxu1 %v12386_v63  ;;  %v10078_v63 = vcombine.low %v6105_v46, %v6109_v0  ;;  %v10121_v35 = vcombine.high %v6146_v18, %v6150_v43  ;;  %v10118_v46 = vcombine.low %v6145_v34, %v6149_v36 }
 0x998   : > { %9356 = vmatpush1.bf16.msra.mxu0 %v10062_v37  ;;  %9520 = vmatpush1.bf16.msra.mxu1 %v10064_v48  ;;  %v6153_v37 = vld [vmem:[%s10941_s1 + $0xa10] sm:$0xff]  ;;  %v10120_v0 = vcombine.low %v6146_v18, %v6150_v43 }
 0x999   : > { %9357 = vmatprep.subr.bf16.mxu0 %v10071_v42  ;;  %9521 = vmatprep.subr.bf16.mxu1 %v10073_v11  ;;  %v6157_v48 = vld [vmem:[%s10941_s1 + $0xa30] sm:$0xff]  ;;  %v6154_v42 = vld [vmem:[%s10941_s1 + $0xa18] sm:$0xff] }
 0x99a   : > { %9387 = vmatprep.mubr.bf16.mxu0 %v12392_v13  ;;  %9551 = vmatprep.mubr.bf16.mxu1 %v12392_v13  ;;  %v10088_v13 = vcombine.low %v6114_v45, %v6118_v3  ;;  %v6158_v11 = vld [vmem:[%s10941_s1 + $0xa38] sm:$0xff]  ;;  %v10127_v51 = vcombine.high %v6153_v37, %v6157_v48  ;;  %v10126_v1 = vcombine.low %v6153_v37, %v6157_v48 }
 0x99b   : > { %v10129_v15 = vcombine.high %v6154_v42, %v6158_v11  ;;  %v10128_v22 = vcombine.low %v6154_v42, %v6158_v11 }
 0x99c   : > { %9358 = vmatpush1.bf16.msra.mxu0 %v10070_v57  ;;  %9522 = vmatpush1.bf16.msra.mxu1 %v10072_v52  ;;  %v6161_v57 = vld [vmem:[%s10941_s1 + $0xa50] sm:$0xff] }
 0x99d   : > { %9359 = vmatprep.subr.bf16.mxu0 %v10079_v50  ;;  %9523 = vmatprep.subr.bf16.mxu1 %v10081_v53  ;;  %v6165_v52 = vld [vmem:[%s10941_s1 + $0xa70] sm:$0xff]  ;;  %v6162_v50 = vld [vmem:[%s10941_s1 + $0xa58] sm:$0xff] }
 0x99e   : > { %v6166_v53 = vld [vmem:[%s10941_s1 + $0xa78] sm:$0xff]  ;;  %v10135_v45 = vcombine.high %v6161_v57, %v6165_v52  ;;  %v10134_v38 = vcombine.low %v6161_v57, %v6165_v52 }
 0x99f   : > { %v10137_v3 = vcombine.high %v6162_v50, %v6166_v53  ;;  %v10136_v10 = vcombine.low %v6162_v50, %v6166_v53 }
 0x9a0   : > { %9360 = vmatpush1.bf16.msra.mxu0 %v10078_v63  ;;  %9524 = vmatpush1.bf16.msra.mxu1 %v10080_v5  ;;  %v6169_v63 = vld [vmem:[%s10941_s1 + $0xa90] sm:$0xff] }
 0x9a1   : > { %9361 = vmatprep.subr.bf16.mxu0 %v10087_v7  ;;  %9525 = vmatprep.subr.bf16.mxu1 %v10089_v8  ;;  %v6173_v5 = vld [vmem:[%s10941_s1 + $0xab0] sm:$0xff]  ;;  %v6170_v7 = vld [vmem:[%s10941_s1 + $0xa98] sm:$0xff] }
 0x9a2   : > { %v6174_v8 = vld [vmem:[%s10941_s1 + $0xab8] sm:$0xff]  ;;  %v10143_v61 = vcombine.high %v6169_v63, %v6173_v5  ;;  %v10142_v47 = vcombine.low %v6169_v63, %v6173_v5 }
 0x9a3   : > { %v10145_v12 = vcombine.high %v6170_v7, %v6174_v8  ;;  %v10144_v33 = vcombine.low %v6170_v7, %v6174_v8 }
 0x9a4   : > { %9362 = vmatpush1.bf16.msra.mxu0 %v10086_v20  ;;  %9526 = vmatpush1.bf16.msra.mxu1 %v10088_v13  ;;  %v6177_v20 = vld [vmem:[%s10941_s1 + $0xad0] sm:$0xff] }
 0x9a5   : > { %9363 = vmatprep.subr.bf16.mxu0 %v10095_v16  ;;  %9527 = vmatprep.subr.bf16.mxu1 %v10097_v28  ;;  %v6181_v13 = vld [vmem:[%s10941_s1 + $0xaf0] sm:$0xff]  ;;  %v6178_v16 = vld [vmem:[%s10941_s1 + $0xad8] sm:$0xff] }
 0x9a6   : > { %v6182_v28 = vld [vmem:[%s10941_s1 + $0xaf8] sm:$0xff]  ;;  %v10151_v21 = vcombine.high %v6177_v20, %v6181_v13  ;;  %v10150_v17 = vcombine.low %v6177_v20, %v6181_v13 }
 0x9a7   : > { %v10153_v24 = vcombine.high %v6178_v16, %v6182_v28  ;;  %v10152_v49 = vcombine.low %v6178_v16, %v6182_v28 }
 0x9a8   : > { %9364 = vmatpush1.bf16.msra.mxu0 %v10094_v6  ;;  %9528 = vmatpush1.bf16.msra.mxu1 %v10096_v23  ;;  %v6185_v6 = vld [vmem:[%s10941_s1 + $0xb10] sm:$0xff] }
 0x9a9   : > { %9365 = vmatprep.subr.bf16.mxu0 %v10103_v26  ;;  %9529 = vmatprep.subr.bf16.mxu1 %v10105_v44  ;;  %v6189_v23 = vld [vmem:[%s10941_s1 + $0xb30] sm:$0xff]  ;;  %v6186_v26 = vld [vmem:[%s10941_s1 + $0xb18] sm:$0xff] }
 0x9aa   : > { %v6190_v44 = vld [vmem:[%s10941_s1 + $0xb38] sm:$0xff]  ;;  %v10159_v31 = vcombine.high %v6185_v6, %v6189_v23  ;;  %v10158_v34 = vcombine.low %v6185_v6, %v6189_v23 }
 0x9ab   : > { %v10161_v29 = vcombine.high %v6186_v26, %v6190_v44  ;;  %v10160_v36 = vcombine.low %v6186_v26, %v6190_v44 }
 0x9ac   : > { %9366 = vmatpush1.bf16.msra.mxu0 %v10102_v9  ;;  %9530 = vmatpush1.bf16.msra.mxu1 %v10104_v30  ;;  %v6193_v9 = vld [vmem:[%s10941_s1 + $0xb50] sm:$0xff] }
 0x9ad   : > { %9367 = vmatprep.subr.bf16.mxu0 %v10111_v4  ;;  %9531 = vmatprep.subr.bf16.mxu1 %v10113_v32  ;;  %v6197_v30 = vld [vmem:[%s10941_s1 + $0xb70] sm:$0xff]  ;;  %v6194_v4 = vld [vmem:[%s10941_s1 + $0xb58] sm:$0xff] }
 0x9ae   : > { %v6198_v32 = vld [vmem:[%s10941_s1 + $0xb78] sm:$0xff]  ;;  %v10167_v18 = vcombine.high %v6193_v9, %v6197_v30  ;;  %v10166_v37 = vcombine.low %v6193_v9, %v6197_v30 }
 0x9af   : > { %v10169_v43 = vcombine.high %v6194_v4, %v6198_v32  ;;  %v10168_v48 = vcombine.low %v6194_v4, %v6198_v32  ;;  %v6249_v32 = vld [vmem:[%s10941_s1 + $0xd10] sm:$0xff] }
 0x9b0   : > { %9368 = vmatpush1.bf16.msra.mxu0 %v10110_v2  ;;  %9532 = vmatpush1.bf16.msra.mxu1 %v10112_v19  ;;  %v6201_v2 = vld [vmem:[%s10941_s1 + $0xb90] sm:$0xff] }
 0x9b1   : > { %9369 = vmatprep.subr.bf16.mxu0 %v10119_v39  ;;  %9533 = vmatprep.subr.bf16.mxu1 %v10121_v35  ;;  %v6205_v19 = vld [vmem:[%s10941_s1 + $0xbb0] sm:$0xff]  ;;  %v6202_v39 = vld [vmem:[%s10941_s1 + $0xb98] sm:$0xff] }
 0x9b2   : > { %v6206_v35 = vld [vmem:[%s10941_s1 + $0xbb8] sm:$0xff]  ;;  %v10175_v42 = vcombine.high %v6201_v2, %v6205_v19  ;;  %v10174_v57 = vcombine.low %v6201_v2, %v6205_v19 }
 0x9b3   : > { %v10177_v11 = vcombine.high %v6202_v39, %v6206_v35  ;;  %v10176_v52 = vcombine.low %v6202_v39, %v6206_v35  ;;  %v6257_v39 = vld [vmem:[%s10941_s1 + $0xd50] sm:$0xff] }
 0x9b4   : > { %9370 = vmatpush1.bf16.msra.mxu0 %v10118_v46  ;;  %9534 = vmatpush1.bf16.msra.mxu1 %v10120_v0  ;;  %v6209_v46 = vld [vmem:[%s10941_s1 + $0xbd0] sm:$0xff] }
 0x9b5   : > { %9371 = vmatprep.subr.bf16.mxu0 %v10127_v51  ;;  %9535 = vmatprep.subr.bf16.mxu1 %v10129_v15  ;;  %v6213_v0 = vld [vmem:[%s10941_s1 + $0xbf0] sm:$0xff]  ;;  %v6210_v51 = vld [vmem:[%s10941_s1 + $0xbd8] sm:$0xff] }
 0x9b6   : > { %v6214_v15 = vld [vmem:[%s10941_s1 + $0xbf8] sm:$0xff]  ;;  %v10183_v50 = vcombine.high %v6209_v46, %v6213_v0  ;;  %v10182_v63 = vcombine.low %v6209_v46, %v6213_v0  ;;  %v6261_v35 = vld [vmem:[%s10941_s1 + $0xd70] sm:$0xff] }
 0x9b7   : > { %v10185_v53 = vcombine.high %v6210_v51, %v6214_v15  ;;  %v10184_v5 = vcombine.low %v6210_v51, %v6214_v15  ;;  %v10231_v0 = vcombine.high %v6257_v39, %v6261_v35  ;;  %v6265_v15 = vld [vmem:[%s10941_s1 + $0xd90] sm:$0xff] }
 0x9b8   : > { %9372 = vmatpush1.bf16.msra.mxu0 %v10126_v1  ;;  %9536 = vmatpush1.bf16.msra.mxu1 %v10128_v22  ;;  %v6217_v1 = vld [vmem:[%s10941_s1 + $0xc10] sm:$0xff] }
 0x9b9   : > { %9373 = vmatprep.subr.bf16.mxu0 %v10135_v45  ;;  %9537 = vmatprep.subr.bf16.mxu1 %v10137_v3  ;;  %v6221_v22 = vld [vmem:[%s10941_s1 + $0xc30] sm:$0xff]  ;;  %v6218_v45 = vld [vmem:[%s10941_s1 + $0xc18] sm:$0xff] }
 0x9ba   : > { %v6222_v3 = vld [vmem:[%s10941_s1 + $0xc38] sm:$0xff]  ;;  %v10191_v7 = vcombine.high %v6217_v1, %v6221_v22  ;;  %v10190_v20 = vcombine.low %v6217_v1, %v6221_v22 }
 0x9bb   : > { %v10193_v8 = vcombine.high %v6218_v45, %v6222_v3  ;;  %v10192_v13 = vcombine.low %v6218_v45, %v6222_v3  ;;  %v10230_v45 = vcombine.low %v6257_v39, %v6261_v35 }
 0x9bc   : > { %9374 = vmatpush1.bf16.msra.mxu0 %v10134_v38  ;;  %9538 = vmatpush1.bf16.msra.mxu1 %v10136_v10  ;;  %v6225_v38 = vld [vmem:[%s10941_s1 + $0xc50] sm:$0xff] }
 0x9bd   : > { %9375 = vmatprep.subr.bf16.mxu0 %v10143_v61  ;;  %9539 = vmatprep.subr.bf16.mxu1 %v10145_v12  ;;  %v6229_v10 = vld [vmem:[%s10941_s1 + $0xc70] sm:$0xff]  ;;  %v6226_v61 = vld [vmem:[%s10941_s1 + $0xc58] sm:$0xff] }
 0x9be   : > { %v6230_v12 = vld [vmem:[%s10941_s1 + $0xc78] sm:$0xff]  ;;  %v10199_v16 = vcombine.high %v6225_v38, %v6229_v10  ;;  %v10198_v6 = vcombine.low %v6225_v38, %v6229_v10  ;;  %v6277_v38 = vld [vmem:[%s10941_s1 + $0xdf0] sm:$0xff] }
 0x9bf   : > { %v10201_v28 = vcombine.high %v6226_v61, %v6230_v12  ;;  %v10200_v23 = vcombine.low %v6226_v61, %v6230_v12  ;;  %v6274_v12 = vld [vmem:[%s10941_s1 + $0xdd8] sm:$0xff] }
 0x9c0   : > { %9376 = vmatpush1.bf16.msra.mxu0 %v10142_v47  ;;  %9540 = vmatpush1.bf16.msra.mxu1 %v10144_v33  ;;  %v6233_v47 = vld [vmem:[%s10941_s1 + $0xc90] sm:$0xff] }
 0x9c1   : > { %9377 = vmatprep.subr.bf16.mxu0 %v10151_v21  ;;  %9541 = vmatprep.subr.bf16.mxu1 %v10153_v24  ;;  %v6237_v33 = vld [vmem:[%s10941_s1 + $0xcb0] sm:$0xff]  ;;  %v6234_v21 = vld [vmem:[%s10941_s1 + $0xc98] sm:$0xff] }
 0x9c2   : > { %v6238_v24 = vld [vmem:[%s10941_s1 + $0xcb8] sm:$0xff]  ;;  %v10207_v26 = vcombine.high %v6233_v47, %v6237_v33 }
 0x9c3   : > { %v10209_v44 = vcombine.high %v6234_v21, %v6238_v24  ;;  %v10208_v9 = vcombine.low %v6234_v21, %v6238_v24 }
 0x9c4   : > { %9378 = vmatpush1.bf16.msra.mxu0 %v10150_v17  ;;  %9542 = vmatpush1.bf16.msra.mxu1 %v10152_v49  ;;  %v6241_v17 = vld [vmem:[%s10941_s1 + $0xcd0] sm:$0xff] }
 0x9c5   : > { %9379 = vmatprep.subr.bf16.mxu0 %v10159_v31  ;;  %9543 = vmatprep.subr.bf16.mxu1 %v10161_v29  ;;  %v6245_v49 = vld [vmem:[%s10941_s1 + $0xcf0] sm:$0xff]  ;;  %v6242_v31 = vld [vmem:[%s10941_s1 + $0xcd8] sm:$0xff] }
 0x9c6   : > { %v6246_v29 = vld [vmem:[%s10941_s1 + $0xcf8] sm:$0xff]  ;;  %v10215_v30 = vcombine.high %v6241_v17, %v6245_v49 }
 0x9c7   : > { %v10217_v4 = vcombine.high %v6242_v31, %v6246_v29 }
 0x9c8   : > { %9380 = vmatpush1.bf16.msra.mxu0 %v10158_v34  ;;  %9544 = vmatpush1.bf16.msra.mxu1 %v10160_v36  ;;  %v6253_v34 = vld [vmem:[%s10941_s1 + $0xd30] sm:$0xff]  ;;  %v6250_v36 = vld [vmem:[%s10941_s1 + $0xd18] sm:$0xff] }
 0x9c9   : > { %9381 = vmatprep.subr.bf16.mxu0 %v10167_v18  ;;  %9545 = vmatprep.subr.bf16.mxu1 %v10169_v43  ;;  %v6254_v18 = vld [vmem:[%s10941_s1 + $0xd38] sm:$0xff]  ;;  %v10214_v43 = vcombine.low %v6241_v17, %v6245_v49  ;;  %v10223_v2 = vcombine.high %v6249_v32, %v6253_v34  ;;  %v6281_v17 = vld [vmem:[%s10941_s1 + $0xe10] sm:$0xff] }
 0x9ca   : > { %v10225_v19 = vcombine.high %v6250_v36, %v6254_v18  ;;  %v10224_v46 = vcombine.low %v6250_v36, %v6254_v18  ;;  %v6285_v49 = vld [vmem:[%s10941_s1 + $0xe30] sm:$0xff] }
 0x9cb   : > { %v6289_v18 = vld [vmem:[%s10941_s1 + $0xe50] sm:$0xff]  ;;  %v10254_v39 = vcombine.low %v6281_v17, %v6285_v49 }
 0x9cc   : > { %9382 = vmatpush1.bf16.msra.mxu0 %v10166_v37  ;;  %9546 = vmatpush1.bf16.msra.mxu1 %v10168_v48  ;;  %v6258_v37 = vld [vmem:[%s10941_s1 + $0xd58] sm:$0xff] }
 0x9cd   : > { %9383 = vmatprep.subr.bf16.mxu0 %v10175_v42  ;;  %9547 = vmatprep.subr.bf16.mxu1 %v10177_v11  ;;  %v6262_v48 = vld [vmem:[%s10941_s1 + $0xd78] sm:$0xff]  ;;  %v10222_v42 = vcombine.low %v6249_v32, %v6253_v34  ;;  %v12774_v11 = vld [vmem:[%s374_s26] sm:$0xff]  ;;  %v10255_v34 = vcombine.high %v6281_v17, %v6285_v49 }
 0x9ce   : > { %v10233_v51 = vcombine.high %v6258_v37, %v6262_v48  ;;  %v6356_v1 = vrot.slane %v12774_v11, %v12167_v60  ;;  %v6352_v22 = vrot.slane %v12774_v11, %v12162_v56  ;;  %v6360_v3 = vrot.slane %v12774_v11, %v12170_v59 }
 0x9d0   : > { %9384 = vmatpush1.bf16.msra.mxu0 %v10174_v57  ;;  %9548 = vmatpush1.bf16.msra.mxu1 %v10176_v52  ;;  %v6269_v57 = vld [vmem:[%s10941_s1 + $0xdb0] sm:$0xff]  ;;  %v6348_v52 = vrot.slane %v12774_v11, %v12159_v54 }
 0x9d1   : > { %9385 = vmatprep.subr.bf16.mxu0 %v10183_v50  ;;  %9549 = vmatprep.subr.bf16.mxu1 %v10185_v53  ;;  %v6266_v50 = vld [vmem:[%s10941_s1 + $0xd98] sm:$0xff]  ;;  %v10239_v54 = vcombine.high %v6265_v15, %v6269_v57  ;;  %v10238_v59 = vcombine.low %v6265_v15, %v6269_v57 }
 0x9d2   : > { %v6270_v53 = vld [vmem:[%s10941_s1 + $0xdb8] sm:$0xff] }
 0x9d3   : > { %v10240_v24 = vcombine.low %v6266_v50, %v6270_v53 }
 0x9d4   : > { %9386 = vmatpush1.bf16.msra.mxu0 %v10182_v63  ;;  %9550 = vmatpush1.bf16.msra.mxu1 %v10184_v5  ;;  %v10232_v63 = vcombine.low %v6258_v37, %v6262_v48 }
 0x9d5   : > { %9396 = vmatprep.subr.bf16.mxu0 %v10191_v7  ;;  %9560 = vmatprep.subr.bf16.mxu1 %v10193_v8  ;;  %v10241_v7 = vcombine.high %v6266_v50, %v6270_v53  ;;  %v6273_v8 = vld [vmem:[%s10941_s1 + $0xdd0] sm:$0xff] }
 0x9d6   : > { %v6305_v53 = vld [vmem:[%s10941_s1 + $0xed0] sm:$0xff] }
 0x9d7   : > { %9388 = vmatmul.mubr.bf16.vlgmr.msra.gmra.mrb[4].mxu0 %v12467_v40  ;;  %9552 = vmatmul.mubr.bf16.vlgmr.msra.gmra.mrb[4].mxu1 %v12467_v40  ;;  %v10206_v40 = vcombine.low %v6233_v47, %v6237_v33 }
 0x9d8   : > { %9397 = vmatpush1.bf16.msra.mxu0 %v10190_v20  ;;  %9561 = vmatpush1.bf16.msra.mxu1 %v10192_v13  ;;  %v6278_v20 = vld [vmem:[%s10941_s1 + $0xdf8] sm:$0xff] }
 0x9d9   : > { %9398 = vmatprep.subr.bf16.mxu0 %v10199_v16  ;;  %9562 = vmatprep.subr.bf16.mxu1 %v10201_v28  ;;  %v10248_v32 = vcombine.low %v6274_v12, %v6278_v20 }
 0x9da   : > { %9428 = vmatprep.mubr.bf16.mxu0 %v12473_v27  ;;  %9592 = vmatprep.mubr.bf16.mxu1 %v12473_v27  ;;  %v10216_v27 = vcombine.low %v6242_v31, %v6246_v29  ;;  %v6282_v29 = vld [vmem:[%s10941_s1 + $0xe18] sm:$0xff] }
 0x9dc   : > { %9399 = vmatpush1.bf16.msra.mxu0 %v10198_v6  ;;  %9563 = vmatpush1.bf16.msra.mxu1 %v10200_v23  ;;  %v10247_v6 = vcombine.high %v6273_v8, %v6277_v38 }
 0x9dd   : > { %9400 = vmatprep.subr.bf16.mxu0 %v10207_v26  ;;  %9564 = vmatprep.subr.bf16.mxu1 %v10209_v44  ;;  %v10249_v44 = vcombine.high %v6274_v12, %v6278_v20 }
 0x9e0   : > { %9401 = vmatpush1.bf16.msra.mxu0 %v10206_v40  ;;  %9565 = vmatpush1.bf16.msra.mxu1 %v10208_v9  ;;  %v6286_v40 = vld [vmem:[%s10941_s1 + $0xe38] sm:$0xff] }
 0x9e1   : > { %9402 = vmatprep.subr.bf16.mxu0 %v10215_v30  ;;  %9566 = vmatprep.subr.bf16.mxu1 %v10217_v4  ;;  %v10246_v30 = vcombine.low %v6273_v8, %v6277_v38  ;;  %v10257_v36 = vcombine.high %v6282_v29, %v6286_v40  ;;  %v10256_v35 = vcombine.low %v6282_v29, %v6286_v40  ;;  %v6317_v8 = vld [vmem:[%s10941_s1 + $0xf30] sm:$0xff]  ;;  %v6314_v38 = vld [vmem:[%s10941_s1 + $0xf18] sm:$0xff] }
 0x9e2   : > { %v6337_v29 = vld [vmem:[%s10941_s1 + $0xfd0] sm:$0xff] }
 0x9e3   : > { %v6341_v40 = vld [vmem:[%s10941_s1 + $0xff0] sm:$0xff] }
 0x9e4   : > { %9403 = vmatpush1.bf16.msra.mxu0 %v10214_v43  ;;  %9567 = vmatpush1.bf16.msra.mxu1 %v10216_v27  ;;  %v6293_v43 = vld [vmem:[%s10941_s1 + $0xe70] sm:$0xff] }
 0x9e5   : > { %9404 = vmatprep.subr.bf16.mxu0 %v10223_v2  ;;  %9568 = vmatprep.subr.bf16.mxu1 %v10225_v19  ;;  %v6290_v2 = vld [vmem:[%s10941_s1 + $0xe58] sm:$0xff]  ;;  %v10263_v37 = vcombine.high %v6289_v18, %v6293_v43  ;;  %v10262_v15 = vcombine.low %v6289_v18, %v6293_v43  ;;  %v10310_v18 = vcombine.low %v6337_v29, %v6341_v40 }
 0x9e6   : > { %v6294_v19 = vld [vmem:[%s10941_s1 + $0xe78] sm:$0xff] }
 0x9e7   : > { %v10265_v48 = vcombine.high %v6290_v2, %v6294_v19  ;;  %v10264_v57 = vcombine.low %v6290_v2, %v6294_v19  ;;  %v6372_v2 = vrot.slane %v12774_v11, %v12268_v62  ;;  %v6368_v19 = vrot.slane %v12774_v11, %v12260_v55 }
 0x9e8   : > { %9405 = vmatpush1.bf16.msra.mxu0 %v10222_v42  ;;  %9569 = vmatpush1.bf16.msra.mxu1 %v10224_v46  ;;  %v6297_v42 = vld [vmem:[%s10941_s1 + $0xe90] sm:$0xff] }
 0x9e9   : > { %9406 = vmatprep.subr.bf16.mxu0 %v10231_v0  ;;  %9570 = vmatprep.subr.bf16.mxu1 %v10233_v51  ;;  %v6301_v46 = vld [vmem:[%s10941_s1 + $0xeb0] sm:$0xff]  ;;  %v6298_v0 = vld [vmem:[%s10941_s1 + $0xe98] sm:$0xff] }
 0x9ea   : > { %v9102_v5 = vpop.f32.mrb[0].mxu0  ;;  %v9266_v60 = vpop.f32.mrb[0].mxu1  ;;  %v6302_v51 = vld [vmem:[%s10941_s1 + $0xeb8] sm:$0xff] }
 0x9eb   : > { %v10527_v10 = vadd.f32 %v9102_v5, %v6348_v52  ;;  %v9104_v61 = vpop.f32.mrb[1].mxu0  ;;  %v10529_v56 = vadd.f32 %v9266_v60, %v6356_v1  ;;  %v9268_v16 = vpop.f32.mrb[1].mxu1  ;;  %v10271_v52 = vcombine.high %v6297_v42, %v6301_v46  ;;  %v10273_v50 = vcombine.high %v6298_v0, %v6302_v51  ;;  %v6309_v1 = vld [vmem:[%s10941_s1 + $0xef0] sm:$0xff] }
 0x9ec   : > { %v10528_v13 = vadd.f32 %v9104_v61, %v6352_v22  ;;  %v9106_v28 = vpop.f32.mrb[2].mxu0  ;;  %9407 = vmatpush1.bf16.msra.mxu0 %v10230_v45  ;;  %v10530_v47 = vadd.f32 %v9268_v16, %v6360_v3  ;;  %v9270_v33 = vpop.f32.mrb[2].mxu1  ;;  %9571 = vmatpush1.bf16.msra.mxu1 %v10232_v63  ;;  %v6306_v22 = vld [vmem:[%s10941_s1 + $0xed8] sm:$0xff]  ;;  %v10270_v3 = vcombine.low %v6297_v42, %v6301_v46 }
 0x9ed   : > { %v9107_v21 = vpop.f32.mrb[3].mxu0  ;;  %9408 = vmatprep.subr.bf16.mxu0 %v10239_v54  ;;  %v9271_v26 = vpop.f32.mrb[3].mxu1  ;;  %9572 = vmatprep.subr.bf16.mxu1 %v10241_v7  ;;  %v6310_v45 = vld [vmem:[%s10941_s1 + $0xef8] sm:$0xff]  ;;  %v10272_v63 = vcombine.low %v6298_v0, %v6302_v51  ;;  %v10279_v54 = vcombine.high %v6305_v53, %v6309_v1  ;;  %v6313_v7 = vld [vmem:[%s10941_s1 + $0xf10] sm:$0xff]  ;;  %v10278_v60 = vcombine.low %v6305_v53, %v6309_v1 }
 0x9ee   : > { %v9609_v23 = vcombine.low %v10527_v10, %v10528_v13  ;;  %v9610_v31 = vcombine.low %v10529_v56, %v10530_v47  ;;  %v10281_v5 = vcombine.high %v6306_v22, %v6310_v45  ;;  %v6318_v10 = vld [vmem:[%s10941_s1 + $0xf38] sm:$0xff]  ;;  %v10280_v61 = vcombine.low %v6306_v22, %v6310_v45  ;;  %v6321_v56 = vld [vmem:[%s10941_s1 + $0xf50] sm:$0xff] }
 0x9ef   : > { %v10287_v12 = vcombine.high %v6313_v7, %v6317_v8  ;;  %v10289_v20 = vcombine.high %v6314_v38, %v6318_v10  ;;  %v6325_v13 = vld [vmem:[%s10941_s1 + $0xf70] sm:$0xff]  ;;  %v6322_v16 = vld [vmem:[%s10941_s1 + $0xf58] sm:$0xff]  ;;  %v10288_v47 = vcombine.low %v6314_v38, %v6318_v10 }
 0x9f0   : > { %v9617_v9 = vrot.slane %v9609_v23, %v11747_v58  ;;  %9409 = vmatpush1.bf16.msra.mxu0 %v10238_v59  ;;  %v9624_v4 = vrot.slane %v9610_v31, %v11747_v58  ;;  %9573 = vmatpush1.bf16.msra.mxu1 %v10240_v24  ;;  %v6326_v28 = vld [vmem:[%s10941_s1 + $0xf78] sm:$0xff]  ;;  %v10286_v59 = vcombine.low %v6313_v7, %v6317_v8  ;;  %v6329_v24 = vld [vmem:[%s10941_s1 + $0xf90] sm:$0xff] }
 0x9f1   : > { %9410 = vmatprep.subr.bf16.mxu0 %v10247_v6  ;;  %9574 = vmatprep.subr.bf16.mxu1 %v10249_v44  ;;  %v10295_v33 = vcombine.high %v6321_v56, %v6325_v13  ;;  %v10297_v21 = vcombine.high %v6322_v16, %v6326_v28  ;;  %v6333_v6 = vld [vmem:[%s10941_s1 + $0xfb0] sm:$0xff]  ;;  %v6330_v23 = vld [vmem:[%s10941_s1 + $0xf98] sm:$0xff]  ;;  %v10294_v44 = vcombine.low %v6321_v56, %v6325_v13 }
 0x9f2   : > { %v9625_v27 = vcombine.low %v9617_v9, %v9624_v4  ;;  %v6334_v26 = vld [vmem:[%s10941_s1 + $0xfb8] sm:$0xff]  ;;  %v10296_v17 = vcombine.low %v6322_v16, %v6326_v28  ;;  %v10303_v49 = vcombine.high %v6329_v24, %v6333_v6  ;;  %v10302_v4 = vcombine.low %v6329_v24, %v6333_v6 }
 0x9f3   : > { %v10305_v31 = vcombine.high %v6330_v23, %v6334_v26  ;;  %v6338_v9 = vld [vmem:[%s10941_s1 + $0xfd8] sm:$0xff] }
 0x9f4   : > { %9411 = vmatpush1.bf16.msra.mxu0 %v10246_v30  ;;  %9645 = vst [vmem:[%s10950_s0] sm:$0xff] %v9625_v27  ;;  %9575 = vmatpush1.bf16.msra.mxu1 %v10248_v32  ;;  %v6342_v30 = vld [vmem:[%s10941_s1 + $0xff8] sm:$0xff]  ;;  %v10304_v32 = vcombine.low %v6330_v23, %v6334_v26  ;;  %v6364_v27 = vrot.slane %v12774_v11, %v12257_v41 }
 0x9f5   : > { %9412 = vmatprep.subr.bf16.mxu0 %v10255_v34  ;;  %9576 = vmatprep.subr.bf16.mxu1 %v10257_v36  ;;  %v10311_v34 = vcombine.high %v6337_v29, %v6341_v40  ;;  %v10313_v36 = vcombine.high %v6338_v9, %v6342_v30  ;;  %v10312_v43 = vcombine.low %v6338_v9, %v6342_v30 }
 0x9f8   : > { %9413 = vmatpush1.bf16.msra.mxu0 %v10254_v39  ;;  %9577 = vmatpush1.bf16.msra.mxu1 %v10256_v35  ;;  %v6376_v39 = vrot.slane %v12774_v11, %v12278_v14 }
 0x9f9   : > { %9414 = vmatprep.subr.bf16.mxu0 %v10263_v37  ;;  %9578 = vmatprep.subr.bf16.mxu1 %v10265_v48 }
 0x9fc   : > { %9415 = vmatpush1.bf16.msra.mxu0 %v10262_v15  ;;  %9579 = vmatpush1.bf16.msra.mxu1 %v10264_v57 }
 0x9fd   : > { %9416 = vmatprep.subr.bf16.mxu0 %v10271_v52  ;;  %9580 = vmatprep.subr.bf16.mxu1 %v10273_v50 }
 0xa00   : > { %9417 = vmatpush1.bf16.msra.mxu0 %v10270_v3  ;;  %9581 = vmatpush1.bf16.msra.mxu1 %v10272_v63 }
 0xa01   : > { %9418 = vmatprep.subr.bf16.mxu0 %v10279_v54  ;;  %9582 = vmatprep.subr.bf16.mxu1 %v10281_v5 }
 0xa04   : > { %9419 = vmatpush1.bf16.msra.mxu0 %v10278_v60  ;;  %9583 = vmatpush1.bf16.msra.mxu1 %v10280_v61 }
 0xa05   : > { %9420 = vmatprep.subr.bf16.mxu0 %v10287_v12  ;;  %9584 = vmatprep.subr.bf16.mxu1 %v10289_v20 }
 0xa08   : > { %9421 = vmatpush1.bf16.msra.mxu0 %v10286_v59  ;;  %9585 = vmatpush1.bf16.msra.mxu1 %v10288_v47 }
 0xa09   : > { %9422 = vmatprep.subr.bf16.mxu0 %v10295_v33  ;;  %9586 = vmatprep.subr.bf16.mxu1 %v10297_v21 }
 0xa0c   : > { %9423 = vmatpush1.bf16.msra.mxu0 %v10294_v44  ;;  %9587 = vmatpush1.bf16.msra.mxu1 %v10296_v17 }
 0xa0d   : > { %9424 = vmatprep.subr.bf16.mxu0 %v10303_v49  ;;  %9588 = vmatprep.subr.bf16.mxu1 %v10305_v31 }
 0xa10   : > { %9425 = vmatpush1.bf16.msra.mxu0 %v10302_v4  ;;  %9589 = vmatpush1.bf16.msra.mxu1 %v10304_v32 }
 0xa11   : > { %9426 = vmatprep.subr.bf16.mxu0 %v10311_v34  ;;  %9590 = vmatprep.subr.bf16.mxu1 %v10313_v36 }
 0xa14   : > { %9427 = vmatpush1.bf16.msra.mxu0 %v10310_v18  ;;  %9591 = vmatpush1.bf16.msra.mxu1 %v10312_v43 }
 0xa17   : > { %9429 = vmatmul.mubr.bf16.vlgmr.msra.gmra.mrb[4].mxu0 %v12541_v25  ;;  %9593 = vmatmul.mubr.bf16.vlgmr.msra.gmra.mrb[4].mxu1 %v12541_v25 }
 0xaea   : > { %v9430_v35 = vpop.f32.mrb[4].mxu0  ;;  %v9594_v48 = vpop.f32.mrb[4].mxu1 }
 0xaeb   : > { %v10531_v37 = vadd.f32 %v9430_v35, %v6364_v27  ;;  %v9432_v42 = vpop.f32.mrb[5].mxu0  ;;  %v10533_v46 = vadd.f32 %v9594_v48, %v6372_v2  ;;  %v9596_v25 = vpop.f32.mrb[5].mxu1 }
 0xaec   : > { %v10532_v0 = vadd.f32 %v9432_v42, %v6368_v19  ;;  %v9434_v51 = vpop.f32.mrb[6].mxu0  ;;  %v10534_v15 = vadd.f32 %v9596_v25, %v6376_v39  ;;  %v9598_v41 = vpop.f32.mrb[6].mxu1 }
 0xaed   : > { %v9435_v57 = vpop.f32.mrb[7].mxu0  ;;  %v9599_v62 = vpop.f32.mrb[7].mxu1 }
 0xaee   : > { %v9626_v52 = vcombine.low %v10531_v37, %v10532_v0  ;;  %v9627_v50 = vcombine.low %v10533_v46, %v10534_v15 }
 0xaf0   : > { %v9634_v55 = vrot.slane %v9626_v52, %v11747_v58  ;;  %v9641_v53 = vrot.slane %v9627_v50, %v11747_v58 }
 0xaf2   : > { %v9642_v14 = vcombine.low %v9634_v55, %v9641_v53 }
 0xaf4   : > { %9646 = vst [vmem:[%s10950_s0 + $0x8] sm:$0xff] %v9642_v14 }
 0xaf5 PF: > { %s19_s28 = sadd.s32 1, %s10761_s28   ;;  %s12886_s24 = sld [smem:[#allocation6_spill]] }
 0xaf6   : > { %p16_p8 = scmp.ge.s32.totalorder %s19_s28, 58   ;;  %s12887_s25 = sld [smem:[#allocation7_spill]] }
 0xaf7   : > { %s12888_s26 = sld [smem:[#allocation8_spill]]  ;;  %s12889_s27 = sld [smem:[#allocation9_spill]] }
 0xaf8   : > { %s12890_s21 = smov %s10737_s22  ;;  %s12891_s22 = smov %s10741_s23 }
 0xaf9   : > { %s12892_s23 = smov %s10870_s16  ;;  %18 = sbr.rel (!%p16_p8) target bundleno = 8 (0x8), region = 107 }
 0xb00   :  { %9668 = vsyncpa [#allocation4], 1 }
 0xb01   :  { %9670 = vsyncpa [#allocation4 + $0x1], 1 }

</bundles_post_ra>
